<compile_context>
chip_gen: v5e
topology: v5e:2x2
jax: 0.10.0
libtpu: 0.0.40
codegen_flags: <defaults>
</compile_context>

<pallas_src>
import functools
from typing import Optional, Tuple, Union

import jax
import jax.numpy as jnp
from jax.experimental import pallas as pl
from jax.experimental.pallas import tpu as pltpu

IntOrPair = Union[int, Tuple[int, int]]
Pair = Tuple[int, int]

_BLOCK_BUDGET_BYTES = 4 * 1024 * 1024  # per input block (x2 for double-buffer)


def force_pair(v: IntOrPair) -> Pair:
    if isinstance(v, tuple):
        if len(v) != 2:
            raise ValueError(v)
        return (int(v[0]), int(v[1]))
    elif isinstance(v, int):
        return (v, v)
    raise ValueError(v)


def _pad_value(dtype):
    if jnp.issubdtype(dtype, jnp.floating):
        return float("-inf")
    return jnp.iinfo(dtype).min


def _pool_axis(x, axis, K, S, O, pad_val):
    """Max-pool one axis of a VMEM value: window K, stride S, O outputs.

    Uses only contiguous slices + reshape + max/index (no strided slicing),
    which lowers cleanly both on Mosaic and in interpret mode.
    """
    if K == 1 and S == 1:
        return x
    if K == S:  # non-overlapping windows: single reshape + reduce
        xc = jax.lax.slice_in_dim(x, 0, O * S, axis=axis)
        shp = xc.shape[:axis] + (O, S) + xc.shape[axis + 1:]
        return jnp.max(xc.reshape(shp), axis=axis + 1)
    # Generic (overlapping or stride != kernel): stride-1 sliding max built
    # from contiguous slices, then stride-S downsample via reshape + index 0.
    L = x.shape[axis]
    Ls = L - K + 1
    m = jax.lax.slice_in_dim(x, 0, Ls, axis=axis)
    for k in range(1, K):
        m = jnp.maximum(m, jax.lax.slice_in_dim(x, k, k + Ls, axis=axis))
    tgt = O * S
    if Ls < tgt:
        pshape = m.shape[:axis] + (tgt - Ls,) + m.shape[axis + 1:]
        m = jnp.concatenate([m, jnp.full(pshape, pad_val, m.dtype)], axis=axis)
    elif Ls > tgt:
        m = jax.lax.slice_in_dim(m, 0, tgt, axis=axis)
    shp = m.shape[:axis] + (O, S) + m.shape[axis + 1:]
    return jax.lax.index_in_dim(m.reshape(shp), 0, axis=axis + 1,
                                keepdims=False)


def _maxpool_kernel(x_ref, o_ref, *, KH, KW, SH, SW, PH, PW, OH, OW):
    # x_ref: (TP, H, W) tile of fused (batch*channel) planes.
    # o_ref: (TP, OH*OW) lane-dense slab, or (TP, OH, OW).
    x = x_ref[...]
    pad_val = _pad_value(x.dtype)

    # Fused edge padding: VMEM concat instead of an extra HBM pass.
    if PH > 0:
        ph = jnp.full((x.shape[0], PH, x.shape[2]), pad_val, x.dtype)
        x = jnp.concatenate([ph, x, ph], axis=1)
    if PW > 0:
        pw = jnp.full((x.shape[0], x.shape[1], PW), pad_val, x.dtype)
        x = jnp.concatenate([pw, x, pw], axis=2)

    # Separable pooling in the input dtype: H (sublanes) then W (lanes).
    y = _pool_axis(x, axis=1, K=KH, S=SH, O=OH, pad_val=pad_val)
    z = _pool_axis(y, axis=2, K=KW, S=SW, O=OW, pad_val=pad_val)
    o_ref[...] = z.reshape(o_ref.shape)


def _pick_plane_tile(N, H, W, itemsize):
    """Choose how many (H, W) planes to process per grid step."""
    per_plane = max(1, H * W * itemsize)
    cap = max(1, _BLOCK_BUDGET_BYTES // per_plane)
    if N <= cap:
        return N
    divs = [d for d in range(1, int(cap) + 1) if N % d == 0]
    divs8 = [d for d in divs if d % 8 == 0]
    return max(divs8) if divs8 else max(divs)


def maxpool2d_pallas(x: jax.Array,
                     kernel_size: IntOrPair,
                     stride: Optional[IntOrPair] = None,
                     padding: IntOrPair = 0) -> jax.Array:
    """PyTorch-semantics maxpool2d. x: (B, C, H, W) -> (B, C, OH, OW)."""
    KH, KW = force_pair(kernel_size)
    SH, SW = force_pair(stride) if stride is not None else (KH, KW)
    PH, PW = force_pair(padding)

    B, C, H, W = x.shape
    OH = (H + 2 * PH - KH) // SH + 1
    OW = (W + 2 * PW - KW) // SW + 1
    if OH <= 0 or OW <= 0:
        raise ValueError("pooling window does not fit the (padded) input")

    N = B * C
    xf = x.reshape(N, H, W)  # free: merges contiguous leading dims

    itemsize = jnp.dtype(x.dtype).itemsize
    TP = _pick_plane_tile(N, H, W, itemsize)
    n_t = N // TP

    # Lane-dense output slab when the block layout allows it (second-to-last
    # block dim must equal the full extent or be a multiple of 8).
    flatten_out = (TP == N) or (TP % 8 == 0)
    if flatten_out:
        out_struct = jax.ShapeDtypeStruct((N, OH * OW), x.dtype)
        out_spec = pl.BlockSpec((TP, OH * OW), lambda i: (i, 0))
    else:
        out_struct = jax.ShapeDtypeStruct((N, OH, OW), x.dtype)
        out_spec = pl.BlockSpec((TP, OH, OW), lambda i: (i, 0, 0))

    kernel = functools.partial(_maxpool_kernel, KH=KH, KW=KW, SH=SH, SW=SW,
                               PH=PH, PW=PW, OH=OH, OW=OW)

    out = pl.pallas_call(
        kernel,
        out_shape=out_struct,
        grid=(n_t,),
        in_specs=[pl.BlockSpec((TP, H, W), lambda i: (i, 0, 0))],
        out_specs=out_spec,
        compiler_params=pltpu.CompilerParams(
            dimension_semantics=("parallel",),
            vmem_limit_bytes=32 * 1024 * 1024),
    )(xf)

    return out.reshape(B, C, OH, OW)  # free: splits contiguous dims


class MaxPool2d:
    """Mirror of the reference module (note: its default padding is 1,
    unlike stock torch.nn.MaxPool2d)."""

    def __init__(self, kernel_size: IntOrPair,
                 stride: Optional[IntOrPair] = None,
                 padding: IntOrPair = 1):
        self.kernel_size = kernel_size
        self.stride = stride
        self.padding = padding

    def __call__(self, x: jax.Array) -> jax.Array:
        return maxpool2d_pallas(x, self.kernel_size, self.stride, self.padding)

    def extra_repr(self) -> str:
        return (f"kernel_size {self.kernel_size}, stride {self.stride}, "
                f"padding {self.padding}")


def _reference_maxpool(x, kernel_size, stride, padding):
    """Pure-JAX reference (reduce_window) for verification."""
    KH, KW = force_pair(kernel_size)
    SH, SW = force_pair(stride) if stride is not None else (KH, KW)
    PH, PW = force_pair(padding)
    return jax.lax.reduce_window(
        x, -jnp.inf, jax.lax.max,
        window_dimensions=(1, 1, KH, KW),
        window_strides=(1, 1, SH, SW),
        padding=((0, 0), (0, 0), (PH, PH), (PW, PW)))


if __name__ == "__main__":
    key = jax.random.PRNGKey(0)
    x = jax.random.normal(key, (2, 4, 16, 16), dtype=jnp.float32)

    # Module defaults: kernel_size=2, stride=None (-> kernel_size), padding=1
    pool = MaxPool2d(kernel_size=2, stride=None, padding=1)
    out = jax.block_until_ready(pool(x))
    assert out.shape == (2, 4, 9, 9), out.shape
    ref = _reference_maxpool(x, 2, None, 1)
    assert jnp.allclose(out, ref), "mismatch vs reference (k=2, s=2, p=1)"

    # Overlapping-window path (kernel 3, stride 2, padding 1).
    out2 = jax.block_until_ready(maxpool2d_pallas(x, 3, 2, 1))
    ref2 = _reference_maxpool(x, 3, 2, 1)
    assert out2.shape == ref2.shape, (out2.shape, ref2.shape)
    assert jnp.allclose(out2, ref2), "mismatch vs reference (k=3, s=2, p=1)"

    # No-padding, non-square stride path (kernel 2, stride (2,1), padding 0).
    out3 = jax.block_until_ready(maxpool2d_pallas(x, 2, (2, 1), 0))
    ref3 = _reference_maxpool(x, 2, (2, 1), 0)
    assert out3.shape == ref3.shape, (out3.shape, ref3.shape)
    assert jnp.allclose(out3, ref3), "mismatch vs reference (k=2, s=(2,1), p=0)"

    print("KERNEL_OK")
</pallas_src>

<mosaic_0001>
module attributes {stable_mosaic.version = 11 : i64} {
  func.func @_maxpool_kernel(%arg0: i32, %arg1: memref<8x16x16xf32, #tpu.memory_space<vmem>>, %arg2: memref<8x81xf32, #tpu.memory_space<vmem>>) attributes {dimension_semantics = [#tpu.dimension_semantics<parallel>], iteration_bounds = array<i64: 1>, scalar_prefetch = 0 : i64, scratch_operands = 0 : i64, tpu.core_type = #tpu.core_type<tc>, window_params = [{transform_indices = @transform_0, window_bounds = array<i64: 8, 16, 16>}, {transform_indices = @transform_1, window_bounds = array<i64: 8, 81>}]} {
    %c0 = arith.constant 0 : index
    %c0_0 = arith.constant 0 : index
    %c0_1 = arith.constant 0 : index
    %0 = vector.load %arg1[%c0, %c0_0, %c0_1] : memref<8x16x16xf32, #tpu.memory_space<vmem>>, vector<8x16x16xf32>
    %cst = arith.constant 0xFF800000 : f32
    %1 = vector.broadcast %cst : f32 to vector<8x1x16xf32>
    %2 = tpu.concatenate %1, %0, %1 in 1 : vector<8x1x16xf32>, vector<8x16x16xf32>, vector<8x1x16xf32> -> vector<8x18x16xf32>
    %cst_2 = arith.constant 0xFF800000 : f32
    %3 = vector.broadcast %cst_2 : f32 to vector<8x18x1xf32>
    %4 = tpu.concatenate %3, %2, %3 in 2 : vector<8x18x1xf32>, vector<8x18x16xf32>, vector<8x18x1xf32> -> vector<8x18x18xf32>
    %5 = vector.extract_strided_slice %4 {offsets = [0, 0, 0], sizes = [8, 18, 18], strides = [1, 1, 1]} : vector<8x18x18xf32> to vector<8x18x18xf32>
    %6 = vector.shape_cast %5 : vector<8x18x18xf32> to vector<8x9x2x18xf32>
    %cst_3 = arith.constant dense<0xFF800000> : vector<8x9x18xf32>
    %7 = vector.multi_reduction <maximumf>, %6, %cst_3 [2] : vector<8x9x2x18xf32> to vector<8x9x18xf32>
    %8 = vector.extract_strided_slice %7 {offsets = [0, 0, 0], sizes = [8, 9, 18], strides = [1, 1, 1]} : vector<8x9x18xf32> to vector<8x9x18xf32>
    %9 = vector.shape_cast %8 : vector<8x9x18xf32> to vector<8x9x9x2xf32>
    %cst_4 = arith.constant dense<0xFF800000> : vector<8x9x9xf32>
    %10 = vector.multi_reduction <maximumf>, %9, %cst_4 [3] : vector<8x9x9x2xf32> to vector<8x9x9xf32>
    %11 = vector.shape_cast %10 : vector<8x9x9xf32> to vector<8x81xf32>
    %c0_5 = arith.constant 0 : index
    %c0_6 = arith.constant 0 : index
    %12 = vector.load %arg2[%c0_5, %c0_6] : memref<8x81xf32, #tpu.memory_space<vmem>>, vector<8x81xf32>
    tpu.vector_store %arg2[%c0_5, %c0_6], %11 {strides = array<i32>} : memref<8x81xf32, #tpu.memory_space<vmem>>, vector<8x81xf32>,
    return
  }
  func.func @transform_0(%arg0: i32) -> (i32, i32, i32) {
    %c0_i32 = arith.constant 0 : i32
    %c0_i32_0 = arith.constant 0 : i32
    %c0_i32_1 = arith.constant 0 : i32
    return %arg0, %c0_i32, %c0_i32_0 : i32, i32, i32
  }
  func.func @transform_1(%arg0: i32) -> (i32, i32) {
    %c0_i32 = arith.constant 0 : i32
    %c0_i32_0 = arith.constant 0 : i32
    return %arg0, %c0_i32 : i32, i32
  }
}

</mosaic_0001>

<bundles_post_ra>
// kernel: tpu_custom_call.1
= control target key start
LH: loop header
LB: loop body
LE: loop exit
PB: predicated region body
PF: predicated region fallthrough
CT: control target
= control target key end

     0   :  { %6 = vsyncpa [#allocation3], 0  ;;  %s12097_s0 = inlined_call_operand.hbm [shape: f32[8,16,16], index: 0, kind: input, shape index: {}]   ;;  %s12098_s1 = inlined_call_operand.hbm [shape: f32[8,81], index: 1, kind: output, shape index: {}]  }
   0x1   :  { %7 = vsyncpa [#allocation4], 0  ;;  %s12_s8 = sshll.u32 %s12097_s0, 4  ;;  %s5919_s9 = smov [#allocation2]   ;;  %s13_s8 = int_to_ptr.hbm [resolvable:$true] %s12_s8 }
   0x2   :  { %s14_s10 = sshll.u32 %s5919_s9, 4  ;;  %s5920_s11 = smov 128   ;;  %s15_s10 = int_to_ptr.vmem [resolvable:$true] %s14_s10 }
   0x3   :  { %s5921_s12 = smov 8  }
   0x4   :  { %20 = dma.hbm_to_vmem [thread:$0]  %s13_s8, 2048, %s15_s10, [#allocation3], %s5920_s11, %s5920_s11, %s5921_s12  }
   0x5   :  { %5915 = dma.done.wait [#allocation3], 2048  }
   0x6   :  { %5916 = vsyncadd [#allocation3], 4294965248  ;;  %v26_v0 = vld [vmem:[#allocation2 + $0x8] sm:$0xff]  ;;  %vm57_vm0 = vcmask 1040384   ;;  %v25_v1 = vld [vmem:[#allocation2] sm:$0xff]  ;;  %s5922_s0 = smov 1  }
   0x7   :  { %v27_v2 = vld [vmem:[#allocation2 + $0x10] sm:$0xff]  ;;  %v59_v3 = vrot.slane %v26_v0, 7  ;;  %v58_v4 = vrot.slane %v25_v1, 7  ;;  %v28_v5 = vld [vmem:[#allocation2 + $0x18] sm:$0xff]  ;;  %v29_v13 = vld [vmem:[#allocation2 + $0x20] sm:$0xff]  ;;  %vm202_vm1 = vcmask 7168  }
   0x8   :  { %v61_v6 = vrot.slane %v27_v2, 7  ;;  %v62_v7 = vrot.slane %v28_v5, 7  ;;  %v30_v14 = vld [vmem:[#allocation2 + $0x28] sm:$0xff]  ;;  %v64_v16 = vrot.slane %v29_v13, 7  ;;  %v31_v20 = vld [vmem:[#allocation2 + $0x30] sm:$0xff]  ;;  %v32_v21 = vld [vmem:[#allocation2 + $0x38] sm:$0xff] }
   0x9   :  { %v106_v8 = vsel %vm57_vm0, %v59_v3, -inf  ;;  %v98_v9 = vsel %vm57_vm0, -inf, %v58_v4  ;;  %v60_v12 = vsel %vm57_vm0, %v58_v4, %v59_v3  ;;  %v65_v17 = vrot.slane %v30_v14, 7  ;;  %v33_v28 = vld [vmem:[#allocation2 + $0x40] sm:$0xff]  ;;  %v34_v29 = vld [vmem:[#allocation2 + $0x48] sm:$0xff]  ;;  %v35_v35 = vld [vmem:[#allocation2 + $0x50] sm:$0xff] }
   0xa   :  { %134 = vrot.lane.b32.xlu1 %v106_v8, %s5922_s0  ;;  %130 = vrot.lane.b32.xlu0 %v98_v9, %s5922_s0  ;;  %v63_v10 = vsel %vm57_vm0, %v61_v6, %v62_v7  ;;  %v99_v11 = vsel %vm57_vm0, -inf, %v61_v6  ;;  %v107_v15 = vsel %vm57_vm0, %v62_v7, -inf  ;;  %v100_v18 = vsel %vm57_vm0, -inf, %v64_v16  ;;  %v36_v36 = vld [vmem:[#allocation2 + $0x58] sm:$0xff]  ;;  %v37_v42 = vld [vmem:[#allocation2 + $0x60] sm:$0xff]  ;;  %v38_v43 = vld [vmem:[#allocation2 + $0x68] sm:$0xff] }
   0xb   :  { %138 = vrot.lane.b32.xlu2 %v63_v10, %s5922_s0  ;;  %v66_v19 = vsel %vm57_vm0, %v64_v16, %v65_v17  ;;  %v108_v22 = vsel %vm57_vm0, %v65_v17, -inf  ;;  %v67_v23 = vrot.slane %v31_v20, 7  ;;  %v68_v24 = vrot.slane %v32_v21, 7  ;;  %v39_v49 = vld [vmem:[#allocation2 + $0x70] sm:$0xff]  ;;  %v40_v52 = vld [vmem:[#allocation2 + $0x78] sm:$0xff]  ;;  %s5923_s13 = smov 126  }
   0xc   :  { %v70_v30 = vrot.slane %v33_v28, 7  ;;  %v71_v31 = vrot.slane %v34_v29, 7  ;;  %v73_v37 = vrot.slane %v35_v35, 7  ;;  %v74_v38 = vrot.slane %v36_v36, 7  ;;  %s5924_s14 = smov 124   ;;  %s5925_s15 = smov 122  }
   0xd   :  { %v101_v25 = vsel %vm57_vm0, -inf, %v67_v23  ;;  %v69_v26 = vsel %vm57_vm0, %v67_v23, %v68_v24  ;;  %v109_v27 = vsel %vm57_vm0, %v68_v24, -inf  ;;  %v76_v44 = vrot.slane %v37_v42, 7  ;;  %s5926_s16 = smov 120   ;;  %s5927_s17 = smov 118  }
   0xe   :  { %v102_v32 = vsel %vm57_vm0, -inf, %v70_v30  ;;  %v72_v33 = vsel %vm57_vm0, %v70_v30, %v71_v31  ;;  %v110_v34 = vsel %vm57_vm0, %v71_v31, -inf  ;;  %v103_v39 = vsel %vm57_vm0, -inf, %v73_v37  ;;  %s5928_s18 = smov 116   ;;  %s5929_s19 = smov 114  }
   0xf   :  { %v75_v40 = vsel %vm57_vm0, %v73_v37, %v74_v38  ;;  %v111_v41 = vsel %vm57_vm0, %v74_v38, -inf  ;;  %v77_v45 = vrot.slane %v38_v43, 7  ;;  %v104_v46 = vsel %vm57_vm0, -inf, %v76_v44  ;;  %s5930_s20 = smov 112   ;;  %s5933_s21 = smov 27  }
  0x10   :  { %v79_v50 = vrot.slane %v39_v49, 7  ;;  %v80_v53 = vrot.slane %v40_v52, 7  ;;  %vm227_vm2 = vcmask 138240   ;;  %vm364_vm3 = vcmask 140288   ;;  %s5934_s22 = smov 18   ;;  %s5935_s23 = smov 9  }
  0x11   :  { %v78_v47 = vsel %vm57_vm0, %v76_v44, %v77_v45  ;;  %v112_v48 = vsel %vm57_vm0, %v77_v45, -inf  ;;  %vm2094_vm4 = vcmask 1041409   ;;  %vm2097_vm5 = vcmask 1042434   ;;  %s5936_s24 = smov 54   ;;  %s5937_s25 = smov 36  }
  0x12   :  { %136 = vrot.lane.b32.xlu1 %v99_v11, %s5922_s0  ;;  %132 = vrot.lane.b32.xlu0 %v60_v12, %s5922_s0  ;;  %v105_v51 = vsel %vm57_vm0, -inf, %v79_v50  ;;  %v81_v54 = vsel %vm57_vm0, %v79_v50, %v80_v53  ;;  %v113_v55 = vsel %vm57_vm0, %v80_v53, -inf  ;;  %vm2100_vm6 = vcmask 1043459   ;;  %s5938_s26 = smov 45   ;;  %s5939_s27 = smov 63  }
  0x13   :  { %140 = vrot.lane.b32.xlu2 %v107_v15, %s5922_s0  ;;  %vm2103_vm7 = vcmask 1044484   ;;  %vm2106_vm8 = vcmask 1045509   ;;  %vm2109_vm9 = vcmask 1046534   ;;  %vm2112_vm10 = vcmask 1047559   ;;  %s5940_s28 = smov 72   ;;  %s5941_s29 = smov [#allocation5]  }
  0x14   :  { %vm3245_vm11 = vcmask 1047556   ;;  %vm4757_vm12 = vcmask 15360   ;;  %vm4761_vm13 = vcmask 8192   ;;  %vm5340_vm14 = vcmask 130112   ;;  %s5832_s30 = sshll.u32 %s5941_s29, 4  ;;  %s5834_s4 = sshll.u32 %s12098_s1, 4  ;;  %s5833_s30 = int_to_ptr.vmem [resolvable:$true] %s5832_s30  ;;  %s5835_s4 = int_to_ptr.hbm [resolvable:$true] %s5834_s4 }
  0x15   :  { %vm5809_vm15 = vcmask 72704   ;;  %vm5811_vm0 = vcmask 146432  }
  0x1a   :  { %142 = vrot.lane.b32.xlu0 %v100_v18, %s5922_s0  ;;  %144 = vrot.lane.b32.xlu1 %v66_v19, %s5922_s0 }
  0x1b   :  { %146 = vrot.lane.b32.xlu2 %v108_v22, %s5922_s0 }
  0x22   :  { %148 = vrot.lane.b32.xlu0 %v101_v25, %s5922_s0  ;;  %150 = vrot.lane.b32.xlu1 %v69_v26, %s5922_s0 }
  0x23   :  { %152 = vrot.lane.b32.xlu2 %v109_v27, %s5922_s0 }
  0x2a   :  { %154 = vrot.lane.b32.xlu0 %v102_v32, %s5922_s0  ;;  %156 = vrot.lane.b32.xlu1 %v72_v33, %s5922_s0 }
  0x2b   :  { %158 = vrot.lane.b32.xlu2 %v110_v34, %s5922_s0 }
  0x32   :  { %160 = vrot.lane.b32.xlu0 %v103_v39, %s5922_s0  ;;  %162 = vrot.lane.b32.xlu1 %v75_v40, %s5922_s0 }
  0x33   :  { %164 = vrot.lane.b32.xlu2 %v111_v41, %s5922_s0 }
  0x3a   :  { %166 = vrot.lane.b32.xlu0 %v104_v46, %s5922_s0  ;;  %168 = vrot.lane.b32.xlu1 %v78_v47, %s5922_s0 }
  0x3b   :  { %170 = vrot.lane.b32.xlu2 %v112_v48, %s5922_s0 }
  0x42   :  { %172 = vrot.lane.b32.xlu0 %v105_v51, %s5922_s0  ;;  %174 = vrot.lane.b32.xlu1 %v81_v54, %s5922_s0 }
  0x43   :  { %176 = vrot.lane.b32.xlu2 %v113_v55, %s5922_s0 }
  0x65   :  { %v139_v56 = vpop.permute.xlu2 %138 }
  0x66   :  { %v207_v15 = vsel %vm202_vm1, -inf, %v139_v56 }
  0x67   :  { %v6021_v24 = vsel %vm227_vm2, %v207_v15, -inf }
  0x68   :  { %v456_v32 = vsel %vm364_vm3, %v6021_v24, -inf }
  0x69   :  { %v457_v40 = vrot.slane %v456_v32, 4 }
  0x6b   :  { %v458_v49 = vmax.f32 %v456_v32, %v457_v40 }
  0x6d   :  { %v141_v57 = vpop.permute.xlu2 %140 }
  0x6e   :  { %v208_v58 = vsel %vm202_vm1, -inf, %v141_v57 }
  0x6f   :  { %v233_v59 = vsel %vm227_vm2, %v208_v58, -inf  ;;  %v459_v58 = vrot.slane %v458_v49, 2 }
  0x70   :  { %v484_v61 = vsel %vm364_vm3, %v233_v59, -inf }
  0x71   :  { %v485_v5 = vrot.slane %v484_v61, 4 }
  0x73   :  { %v486_v12 = vmax.f32 %v484_v61, %v485_v5 }
  0x75   :  { %v147_v60 = vpop.permute.xlu2 %146  ;;  %v487_v22 = vrot.slane %v486_v12, 2 }
  0x76   :  { %v211_v0 = vsel %vm202_vm1, -inf, %v147_v60 }
  0x77   :  { %v236_v7 = vsel %vm227_vm2, %v211_v0, -inf  ;;  %v488_v34 = vmax.f32 %v486_v12, %v487_v22 }
  0x78   :  { %v547_v13 = vsel %vm364_vm3, %v236_v7, -inf  ;;  %v460_v7 = vmax.f32 %v458_v49, %v459_v58 }
  0x79   :  { %v548_v20 = vrot.slane %v547_v13, 4  ;;  %v489_v43 = vrot.slane %v488_v34, 1 }
  0x7b   :  { %v549_v31 = vmax.f32 %v547_v13, %v548_v20  ;;  %v6047_v52 = vmax.f32 %v488_v34, %v489_v43 }
  0x7c   :  { %v135_v62 = vpop.permute.xlu1 %134  ;;  %v131_v63 = vpop.permute.xlu0 %130 }
  0x7d   :  { %v205_v1 = vsel %vm202_vm1, -inf, %v135_v62  ;;  %v203_v2 = vsel %vm202_vm1, -inf, %v131_v63  ;;  %v550_v41 = vrot.slane %v549_v31, 2  ;;  %12306 = vst [vmem:[#allocation9_spill] sm:$0xff] %v6047_v52 }
  0x7e   :  { %v230_v3 = vsel %vm227_vm2, %v205_v1, -inf  ;;  %v6011_v4 = vsel %vm227_vm2, %v203_v2, -inf }
  0x7f   :  { %v421_v6 = vsel %vm364_vm3, %v230_v3, -inf  ;;  %v365_v9 = vsel %vm364_vm3, %v6011_v4, -inf  ;;  %v269_v25 = vrot.slane %v6011_v4, 4  ;;  %v551_v50 = vmax.f32 %v549_v31, %v550_v41 }
  0x80   :  { %v422_v8 = vrot.slane %v421_v6, 4  ;;  %v366_v10 = vrot.slane %v365_v9, 4  ;;  %v268_v59 = vrot.slane %v6011_v4, 2  ;;  %v270_v34 = vrot.slane %v6011_v4, 6 }
  0x81   :  { %v379_v36 = vsel %vm364_vm3, %v269_v25, -inf  ;;  %v552_v60 = vrot.slane %v551_v50, 1 }
  0x82   :  { %v423_v11 = vmax.f32 %v421_v6, %v422_v8  ;;  %v367_v14 = vmax.f32 %v365_v9, %v366_v10  ;;  %v380_v42 = vrot.slane %v379_v36, 4  ;;  %v372_v8 = vsel %vm364_vm3, %v268_v59, -inf }
  0x83   :  { %v6060_v9 = vmax.f32 %v551_v50, %v552_v60  ;;  %v373_v20 = vrot.slane %v372_v8, 4  ;;  %v386_v4 = vsel %vm364_vm3, %v270_v34, -inf }
  0x84   :  { %v424_v16 = vrot.slane %v423_v11, 2  ;;  %v137_v17 = vpop.permute.xlu1 %136  ;;  %v368_v18 = vrot.slane %v367_v14, 2  ;;  %v133_v23 = vpop.permute.xlu0 %132  ;;  %v381_v51 = vmax.f32 %v379_v36, %v380_v42  ;;  %v387_v60 = vrot.slane %v386_v4, 4 }
  0x85   :  { %v206_v19 = vsel %vm202_vm1, -inf, %v137_v17  ;;  %v204_v30 = vsel %vm202_vm1, -inf, %v133_v23  ;;  %12307 = vst [vmem:[#allocation10_spill] sm:$0xff] %v6060_v9  ;;  %v277_v17 = vrot.slane %v6021_v24, 2  ;;  %v374_v36 = vmax.f32 %v372_v8, %v373_v20 }
  0x86   :  { %v425_v21 = vmax.f32 %v423_v11, %v424_v16  ;;  %v369_v26 = vmax.f32 %v367_v14, %v368_v18  ;;  %v6025_v28 = vsel %vm227_vm2, %v206_v19, -inf  ;;  %v6038_v39 = vsel %vm227_vm2, %v204_v30, -inf }
  0x87   :  { %v428_v37 = vsel %vm364_vm3, %v6025_v28, -inf  ;;  %v271_v45 = vrot.slane %v6038_v39, 2  ;;  %v393_v46 = vsel %vm364_vm3, %v6038_v39, -inf  ;;  %v382_v62 = vrot.slane %v381_v51, 2 }
  0x88   :  { %v426_v27 = vrot.slane %v425_v21, 1  ;;  %v370_v29 = vrot.slane %v369_v26, 1  ;;  %v429_v38 = vrot.slane %v428_v37, 4  ;;  %v394_v48 = vrot.slane %v393_v46, 4 }
  0x89   :  { %v400_v55 = vsel %vm364_vm3, %v271_v45, -inf  ;;  %v275_v2 = vrot.slane %v6025_v28, 4  ;;  %v383_v11 = vmax.f32 %v381_v51, %v382_v62  ;;  %v461_v19 = vrot.slane %v460_v7, 1 }
  0x8a   :  { %v6030_v33 = vmax.f32 %v425_v21, %v426_v27  ;;  %v6032_v35 = vmax.f32 %v369_v26, %v370_v29  ;;  %v430_v44 = vmax.f32 %v428_v37, %v429_v38  ;;  %v395_v54 = vmax.f32 %v393_v46, %v394_v48 }
  0x8b   :  { %v401_v1 = vrot.slane %v400_v55, 4  ;;  %v442_v15 = vsel %vm364_vm3, %v275_v2, -inf  ;;  %v384_v22 = vrot.slane %v383_v11, 1  ;;  %v463_v27 = vsel %vm364_vm3, %v277_v17, -inf }
  0x8c   :  { %12305 = vst [vmem:[#allocation8_spill] sm:$0xff] %v6030_v33  ;;  %957 = vrot.lane.b32.xlu2 %v6030_v33, %s5923_s13  ;;  %941 = vrot.lane.b32.xlu0 %v6032_v35, %s5923_s13  ;;  %v431_v47 = vrot.slane %v430_v44, 2  ;;  %v396_v57 = vrot.slane %v395_v54, 2  ;;  %v143_v61 = vpop.permute.xlu0 %142  ;;  %v145_v3 = vpop.permute.xlu1 %144  ;;  %v443_v23 = vrot.slane %v442_v15, 4  ;;  %v273_v29 = vrot.slane %v6038_v39, 6 }
  0x8d   :  { %v209_v6 = vsel %vm202_vm1, -inf, %v143_v61  ;;  %v402_v13 = vmax.f32 %v400_v55, %v401_v1  ;;  %v210_v14 = vsel %vm202_vm1, -inf, %v145_v3  ;;  %v6083_v32 = vmax.f32 %v460_v7, %v461_v19 }
  0x8e   :  { %v432_v53 = vmax.f32 %v430_v44, %v431_v47  ;;  %v397_v0 = vmax.f32 %v395_v54, %v396_v57  ;;  %v6063_v10 = vsel %vm227_vm2, %v209_v6, -inf  ;;  %v6077_v21 = vsel %vm227_vm2, %v210_v14, -inf }
  0x8f   :  { %v491_v16 = vsel %vm364_vm3, %v6063_v10, -inf  ;;  %v403_v25 = vrot.slane %v402_v13, 2  ;;  %v519_v31 = vsel %vm364_vm3, %v6077_v21, -inf  ;;  %12308 = vst [vmem:[#allocation11_spill] sm:$0xff] %v6083_v32  ;;  %v6086_v38 = vmax.f32 %v383_v11, %v384_v22 }
  0x90   :  { %v433_v56 = vrot.slane %v432_v53, 1  ;;  %v398_v5 = vrot.slane %v397_v0, 1  ;;  %v492_v18 = vrot.slane %v491_v16, 4  ;;  %v520_v37 = vrot.slane %v519_v31, 4 }
  0x91   :  { %v444_v40 = vmax.f32 %v442_v15, %v443_v23  ;;  %v404_v41 = vmax.f32 %v402_v13, %v403_v25  ;;  %v414_v44 = vsel %vm364_vm3, %v273_v29, -inf  ;;  %v464_v46 = vrot.slane %v463_v27, 4 }
  0x92   :  { %v6053_v63 = vmax.f32 %v432_v53, %v433_v56  ;;  %v6065_v12 = vmax.f32 %v397_v0, %v398_v5  ;;  %v493_v26 = vmax.f32 %v491_v16, %v492_v18  ;;  %v521_v43 = vmax.f32 %v519_v31, %v520_v37 }
  0x93   :  { %v375_v49 = vrot.slane %v374_v36, 2  ;;  %v445_v50 = vrot.slane %v444_v40, 2  ;;  %v405_v51 = vrot.slane %v404_v41, 1  ;;  %v415_v54 = vrot.slane %v414_v44, 4 }
  0x94   :  { %975 = vrot.lane.b32.xlu2 %v6047_v52, %s5923_s13  ;;  %959 = vrot.lane.b32.xlu0 %v6053_v63, %s5923_s13  ;;  %v494_v30 = vrot.slane %v493_v26, 2  ;;  %v522_v47 = vrot.slane %v521_v43, 2  ;;  %v149_v48 = vpop.permute.xlu0 %148  ;;  %v281_v55 = vrot.slane %v6063_v10, 4  ;;  %v274_v57 = vrot.slane %v6025_v28, 2 }
  0x95   :  { %949 = vrot.lane.b32.xlu1 %v6065_v12, %s5923_s13  ;;  %v212_v58 = vsel %vm202_vm1, -inf, %v149_v48  ;;  %v465_v59 = vmax.f32 %v463_v27, %v464_v46  ;;  %v376_v0 = vmax.f32 %v374_v36, %v375_v49  ;;  %v446_v1 = vmax.f32 %v444_v40, %v445_v50 }
  0x96   :  { %v495_v42 = vmax.f32 %v493_v26, %v494_v30  ;;  %v523_v56 = vmax.f32 %v521_v43, %v522_v47  ;;  %v6102_v62 = vsel %vm227_vm2, %v212_v58, -inf  ;;  %v272_v2 = vrot.slane %v6038_v39, 4 }
  0x97   :  { %v6105_v3 = vmax.f32 %v404_v41, %v405_v51  ;;  %v416_v5 = vmax.f32 %v414_v44, %v415_v54  ;;  %v505_v6 = vsel %vm364_vm3, %v281_v55, -inf  ;;  %v554_v8 = vsel %vm364_vm3, %v6102_v62, -inf  ;;  %v151_v51 = vpop.permute.xlu1 %150  ;;  %v153_v54 = vpop.permute.xlu2 %152 }
  0x98   :  { %v496_v45 = vrot.slane %v495_v42, 1  ;;  %v524_v61 = vrot.slane %v523_v56, 1  ;;  %v435_v11 = vsel %vm364_vm3, %v274_v57, -inf  ;;  %v555_v13 = vrot.slane %v554_v8, 4 }
  0x99   :  { %v466_v14 = vrot.slane %v465_v59, 2  ;;  %v388_v15 = vmax.f32 %v386_v4, %v387_v60  ;;  %v447_v39 = vrot.slane %v446_v1, 1  ;;  %v407_v16 = vsel %vm364_vm3, %v272_v2, -inf }
  0x9a   :  { %v6094_v53 = vmax.f32 %v495_v42, %v496_v45  ;;  %v6108_v7 = vmax.f32 %v523_v56, %v524_v61  ;;  %v506_v17 = vrot.slane %v505_v6, 4  ;;  %v556_v18 = vmax.f32 %v554_v8, %v555_v13 }
  0x9b   :  { %v377_v19 = vrot.slane %v376_v0, 1  ;;  %v436_v20 = vrot.slane %v435_v11, 4  ;;  %v417_v22 = vrot.slane %v416_v5, 2  ;;  %v283_v23 = vrot.slane %v6077_v21, 2 }
  0x9c   :  { %993 = vrot.lane.b32.xlu2 %v6060_v9, %s5923_s13  ;;  %12309 = vst [vmem:[#allocation12_spill] sm:$0xff] %v6094_v53  ;;  %977 = vrot.lane.b32.xlu0 %v6094_v53, %s5923_s13  ;;  %v279_v25 = vrot.slane %v6021_v24, 6  ;;  %v557_v26 = vrot.slane %v556_v18, 2  ;;  %v467_v27 = vmax.f32 %v465_v59, %v466_v14  ;;  %v389_v29 = vrot.slane %v388_v15, 2 }
  0x9d   :  { %967 = vrot.lane.b32.xlu1 %v6083_v32, %s5923_s13  ;;  %12310 = vst [vmem:[#allocation13_spill] sm:$0xff] %v6108_v7  ;;  %v408_v30 = vrot.slane %v407_v16, 4  ;;  %v276_v31 = vrot.slane %v6025_v28, 6  ;;  %v6121_v34 = vmax.f32 %v446_v1, %v447_v39  ;;  %v507_v36 = vmax.f32 %v505_v6, %v506_v17 }
  0x9e   :  { %v558_v37 = vmax.f32 %v556_v18, %v557_v26  ;;  %v6123_v40 = vmax.f32 %v376_v0, %v377_v19  ;;  %v437_v41 = vmax.f32 %v435_v11, %v436_v20  ;;  %v418_v42 = vmax.f32 %v416_v5, %v417_v22 }
  0x9f   :  { %v526_v43 = vsel %vm364_vm3, %v283_v23, -inf  ;;  %v477_v44 = vsel %vm364_vm3, %v279_v25, -inf  ;;  %v468_v46 = vrot.slane %v467_v27, 1  ;;  %v390_v4 = vmax.f32 %v388_v15, %v389_v29 }
  0xa0   :  { %v559_v45 = vrot.slane %v558_v37, 1  ;;  %v409_v47 = vmax.f32 %v407_v16, %v408_v30  ;;  %v449_v28 = vsel %vm364_vm3, %v276_v31, -inf  ;;  %v508_v48 = vrot.slane %v507_v36, 2 }
  0xa1   :  { %v527_v49 = vrot.slane %v526_v43, 4  ;;  %v478_v55 = vrot.slane %v477_v44, 4  ;;  %v438_v56 = vrot.slane %v437_v41, 2  ;;  %v419_v57 = vrot.slane %v418_v42, 1 }
  0xa2   :  { %v6132_v50 = vmax.f32 %v558_v37, %v559_v45  ;;  %v287_v58 = vrot.slane %v6102_v62, 4  ;;  %v280_v59 = vrot.slane %v6063_v10, 2  ;;  %v278_v60 = vrot.slane %v6021_v24, 4 }
  0xa3   :  { %v450_v61 = vrot.slane %v449_v28, 4  ;;  %v410_v0 = vrot.slane %v409_v47, 2  ;;  %v213_v1 = vsel %vm202_vm1, -inf, %v151_v51  ;;  %v6140_v2 = vmax.f32 %v467_v27, %v468_v46 }
  0xa4   :  { %945 = vrot.lane.b32.xlu2 %v6086_v38, %s5923_s13  ;;  %12311 = vst [vmem:[#allocation14_spill] sm:$0xff] %v6132_v50  ;;  %995 = vrot.lane.b32.xlu0 %v6132_v50, %s5923_s13  ;;  %v391_v5 = vrot.slane %v390_v4, 1  ;;  %v509_v6 = vmax.f32 %v507_v36, %v508_v48  ;;  %v528_v8 = vmax.f32 %v526_v43, %v527_v49  ;;  %v568_v15 = vsel %vm364_vm3, %v287_v58, -inf  ;;  %v6160_v36 = vpop.permute.xlu2 %158 }
  0xa5   :  { %985 = vrot.lane.b32.xlu1 %v6108_v7, %s5923_s13  ;;  %v479_v11 = vmax.f32 %v477_v44, %v478_v55  ;;  %v439_v13 = vmax.f32 %v437_v41, %v438_v56  ;;  %v6142_v14 = vmax.f32 %v418_v42, %v419_v57  ;;  %v498_v39 = vsel %vm364_vm3, %v280_v59, -inf }
  0xa6   :  { %v6147_v16 = vsel %vm227_vm2, %v213_v1, -inf  ;;  %v470_v24 = vsel %vm364_vm3, %v278_v60, -inf  ;;  %v451_v17 = vmax.f32 %v449_v28, %v450_v61  ;;  %v411_v18 = vmax.f32 %v409_v47, %v410_v0  ;;  %v155_v60 = vpop.permute.xlu0 %154 }
  0xa7   :  { %v6154_v19 = vmax.f32 %v390_v4, %v391_v5  ;;  %v510_v20 = vrot.slane %v509_v6, 1  ;;  %v529_v22 = vrot.slane %v528_v8, 2  ;;  %v569_v23 = vrot.slane %v568_v15, 4 }
  0xa8   :  { %v480_v25 = vrot.slane %v479_v11, 2  ;;  %v440_v26 = vrot.slane %v439_v13, 1  ;;  %v499_v27 = vrot.slane %v498_v39, 4  ;;  %v289_v29 = vrot.slane %v6147_v16, 2 }
  0xa9   :  { %v471_v30 = vrot.slane %v470_v24, 4  ;;  %v285_v31 = vrot.slane %v6077_v21, 6  ;;  %v452_v37 = vrot.slane %v451_v17, 2  ;;  %v412_v41 = vrot.slane %v411_v18, 1 }
  0xaa   :  { %v282_v42 = vrot.slane %v6063_v10, 6  ;;  %v6163_v43 = vmax.f32 %v509_v6, %v510_v20  ;;  %v530_v44 = vmax.f32 %v528_v8, %v529_v22  ;;  %v570_v45 = vmax.f32 %v568_v15, %v569_v23 }
  0xab   :  { %v481_v46 = vmax.f32 %v479_v11, %v480_v25  ;;  %v6165_v4 = vmax.f32 %v439_v13, %v440_v26  ;;  %v500_v47 = vmax.f32 %v498_v39, %v499_v27  ;;  %v589_v28 = vsel %vm364_vm3, %v289_v29, -inf }
  0xac   :  { %951 = vrot.lane.b32.xlu2 %v6105_v3, %s5923_s13  ;;  %947 = vrot.lane.b32.xlu0 %v6154_v19, %s5923_s13  ;;  %12312 = vst [vmem:[#allocation15_spill] sm:$0xff] %v6163_v43  ;;  %v472_v48 = vmax.f32 %v470_v24, %v471_v30  ;;  %v540_v49 = vsel %vm364_vm3, %v285_v31, -inf  ;;  %v453_v51 = vmax.f32 %v451_v17, %v452_v37  ;;  %v214_v10 = vsel %vm202_vm1, -inf, %v153_v54 }
  0xad   :  { %943 = vrot.lane.b32.xlu1 %v6123_v40, %s5923_s13  ;;  %v6171_v55 = vmax.f32 %v411_v18, %v412_v41  ;;  %v512_v56 = vsel %vm364_vm3, %v282_v42, -inf  ;;  %v531_v57 = vrot.slane %v530_v44, 1  ;;  %v571_v58 = vrot.slane %v570_v45, 2  ;;  %v6185_v18 = vpop.permute.xlu2 %164 }
  0xae   :  { %v590_v59 = vrot.slane %v589_v28, 4  ;;  %v482_v61 = vrot.slane %v481_v46, 1  ;;  %v501_v0 = vrot.slane %v500_v47, 2  ;;  %v541_v1 = vrot.slane %v540_v49, 4 }
  0xaf   :  { %v473_v5 = vrot.slane %v472_v48, 2  ;;  %v286_v6 = vrot.slane %v6102_v62, 2  ;;  %v239_v54 = vsel %vm227_vm2, %v214_v10, -inf  ;;  %v454_v8 = vrot.slane %v453_v51, 1 }
  0xb0   :  { %v513_v11 = vrot.slane %v512_v56, 4  ;;  %v215_v13 = vsel %vm202_vm1, -inf, %v155_v60  ;;  %v284_v15 = vrot.slane %v6077_v21, 4  ;;  %v6183_v39 = vmax.f32 %v530_v44, %v531_v57  ;;  %v157_v44 = vpop.permute.xlu1 %156 }
  0xb1   :  { %v572_v24 = vmax.f32 %v570_v45, %v571_v58  ;;  %v591_v17 = vmax.f32 %v589_v28, %v590_v59  ;;  %v6187_v20 = vmax.f32 %v481_v46, %v482_v61  ;;  %v502_v22 = vmax.f32 %v500_v47, %v501_v0 }
  0xb2   :  { %12313 = vst [vmem:[#allocation16_spill] sm:$0xff] %v6183_v39  ;;  %v542_v23 = vmax.f32 %v540_v49, %v541_v1  ;;  %v610_v25 = vsel %vm364_vm3, %v239_v54, -inf  ;;  %v474_v26 = vmax.f32 %v472_v48, %v473_v5  ;;  %v561_v27 = vsel %vm364_vm3, %v286_v6, -inf }
  0xb3   :  { %12314 = vst [vmem:[#allocation17_spill] sm:$0xff] %v6187_v20  ;;  %v6194_v21 = vsel %vm227_vm2, %v215_v13, -inf  ;;  %v6196_v29 = vmax.f32 %v453_v51, %v454_v8  ;;  %v514_v30 = vmax.f32 %v512_v56, %v513_v11  ;;  %v533_v31 = vsel %vm364_vm3, %v284_v15, -inf }
  0xb4   :  { %963 = vrot.lane.b32.xlu2 %v6121_v34, %s5923_s13  ;;  %953 = vrot.lane.b32.xlu0 %v6171_v55, %s5923_s13  ;;  %v573_v37 = vrot.slane %v572_v24, 1  ;;  %v592_v41 = vrot.slane %v591_v17, 2  ;;  %v611_v42 = vrot.slane %v610_v25, 4  ;;  %v503_v45 = vrot.slane %v502_v22, 1 }
  0xb5   :  { %955 = vrot.lane.b32.xlu1 %v6142_v14, %s5923_s13  ;;  %v543_v46 = vrot.slane %v542_v23, 2  ;;  %v562_v47 = vrot.slane %v561_v27, 4  ;;  %v293_v28 = vrot.slane %v6194_v21, 4  ;;  %v475_v48 = vrot.slane %v474_v26, 1  ;;  %v6213_v6 = vpop.permute.xlu2 %170 }
  0xb6   :  { %v515_v49 = vrot.slane %v514_v30, 2  ;;  %v534_v51 = vrot.slane %v533_v31, 4  ;;  %v288_v10 = vrot.slane %v6102_v62, 6  ;;  %v216_v56 = vsel %vm202_vm1, -inf, %v157_v44 }
  0xb7   :  { %v6206_v57 = vmax.f32 %v572_v24, %v573_v37  ;;  %v582_v58 = vsel %vm364_vm3, %v6147_v16, -inf  ;;  %v593_v59 = vmax.f32 %v591_v17, %v592_v41  ;;  %v612_v60 = vmax.f32 %v610_v25, %v611_v42 }
  0xb8   :  { %v6210_v61 = vmax.f32 %v502_v22, %v503_v45  ;;  %v544_v0 = vmax.f32 %v542_v23, %v543_v46  ;;  %v563_v1 = vmax.f32 %v561_v27, %v562_v47  ;;  %v631_v5 = vsel %vm364_vm3, %v293_v28, -inf }
  0xb9   :  { %12315 = vst [vmem:[#allocation18_spill] sm:$0xff] %v6206_v57  ;;  %v6218_v62 = vsel %vm227_vm2, %v216_v56, -inf  ;;  %v516_v54 = vmax.f32 %v514_v30, %v515_v49  ;;  %v535_v8 = vmax.f32 %v533_v31, %v534_v51  ;;  %v575_v11 = vsel %vm364_vm3, %v288_v10, -inf }
  0xba   :  { %v583_v13 = vrot.slane %v582_v58, 4  ;;  %v6223_v15 = vmax.f32 %v474_v26, %v475_v48  ;;  %v594_v24 = vrot.slane %v593_v59, 1  ;;  %v613_v17 = vrot.slane %v612_v60, 2 }
  0xbb   :  { %v632_v22 = vrot.slane %v631_v5, 4  ;;  %v545_v23 = vrot.slane %v544_v0, 1  ;;  %v564_v25 = vrot.slane %v563_v1, 2  ;;  %v295_v27 = vrot.slane %v6218_v62, 2 }
  0xbc   :  { %969 = vrot.lane.b32.xlu2 %v6140_v2, %s5923_s13  ;;  %965 = vrot.lane.b32.xlu0 %v6196_v29, %s5923_s13  ;;  %12316 = vst [vmem:[#allocation19_spill] sm:$0xff] %v6223_v15  ;;  %v576_v37 = vrot.slane %v575_v11, 4  ;;  %v291_v41 = vrot.slane %v6147_v16, 6  ;;  %v517_v30 = vrot.slane %v516_v54, 1  ;;  %v536_v31 = vrot.slane %v535_v8, 2 }
  0xbd   :  { %961 = vrot.lane.b32.xlu1 %v6165_v4, %s5923_s13  ;;  %v584_v42 = vmax.f32 %v582_v58, %v583_v13  ;;  %v290_v44 = vrot.slane %v6147_v16, 4  ;;  %v6230_v26 = vmax.f32 %v593_v59, %v594_v24  ;;  %v614_v45 = vmax.f32 %v612_v60, %v613_v17 }
  0xbe   :  { %v633_v46 = vmax.f32 %v631_v5, %v632_v22  ;;  %v6232_v47 = vmax.f32 %v544_v0, %v545_v23  ;;  %v565_v28 = vmax.f32 %v563_v1, %v564_v25  ;;  %v652_v48 = vsel %vm364_vm3, %v295_v27, -inf  ;;  %v6245_v5 = vpop.permute.xlu2 %176 }
  0xbf   :  { %12317 = vst [vmem:[#allocation20_spill] sm:$0xff] %v6230_v26  ;;  %v577_v49 = vmax.f32 %v575_v11, %v576_v37  ;;  %v603_v51 = vsel %vm364_vm3, %v291_v41, -inf  ;;  %v217_v10 = vsel %vm202_vm1, -inf, %v6160_v36  ;;  %v6240_v56 = vmax.f32 %v516_v54, %v517_v30  ;;  %v161_v11 = vpop.permute.xlu0 %160 }
  0xc0   :  { %12318 = vst [vmem:[#allocation21_spill] sm:$0xff] %v6232_v47  ;;  %v537_v16 = vmax.f32 %v535_v8, %v536_v31  ;;  %v585_v58 = vrot.slane %v584_v42, 2  ;;  %v596_v59 = vsel %vm364_vm3, %v290_v44, -inf  ;;  %v615_v60 = vrot.slane %v614_v45, 1 }
  0xc1   :  { %12319 = vst [vmem:[#allocation22_spill] sm:$0xff] %v6240_v56  ;;  %v634_v0 = vrot.slane %v633_v46, 2  ;;  %v653_v1 = vrot.slane %v652_v48, 4  ;;  %v566_v13 = vrot.slane %v565_v28, 1  ;;  %v604_v36 = vrot.slane %v603_v51, 4 }
  0xc2   :  { %v242_v24 = vsel %vm227_vm2, %v217_v10, -inf  ;;  %v578_v17 = vrot.slane %v577_v49, 2  ;;  %v292_v54 = vrot.slane %v6194_v21, 2  ;;  %v538_v8 = vrot.slane %v537_v16, 1 }
  0xc3   :  { %v586_v22 = vmax.f32 %v584_v42, %v585_v58  ;;  %v597_v23 = vrot.slane %v596_v59, 4  ;;  %v218_v25 = vsel %vm202_vm1, -inf, %v161_v11  ;;  %v6252_v27 = vmax.f32 %v614_v45, %v615_v60 }
  0xc4   :  { %981 = vrot.lane.b32.xlu2 %v6163_v43, %s5923_s13  ;;  %971 = vrot.lane.b32.xlu0 %v6223_v15, %s5923_s13  ;;  %v673_v37 = vsel %vm364_vm3, %v242_v24, -inf  ;;  %v635_v41 = vmax.f32 %v633_v46, %v634_v0  ;;  %v654_v30 = vmax.f32 %v652_v48, %v653_v1  ;;  %v6255_v31 = vmax.f32 %v565_v28, %v566_v13 }
  0xc5   :  { %973 = vrot.lane.b32.xlu1 %v6187_v20, %s5923_s13  ;;  %12320 = vst [vmem:[#allocation23_spill] sm:$0xff] %v6252_v27  ;;  %v605_v44 = vmax.f32 %v603_v51, %v604_v36  ;;  %v579_v10 = vmax.f32 %v577_v49, %v578_v17  ;;  %v624_v50 = vsel %vm364_vm3, %v292_v54, -inf  ;;  %v6263_v42 = vmax.f32 %v537_v16, %v538_v8  ;;  %v163_v51 = vpop.permute.xlu1 %162 }
  0xc6   :  { %12321 = vst [vmem:[#allocation24_spill] sm:$0xff] %v6255_v31  ;;  %v598_v45 = vmax.f32 %v596_v59, %v597_v23  ;;  %v674_v58 = vrot.slane %v673_v37, 4  ;;  %v587_v46 = vrot.slane %v586_v22, 1  ;;  %v617_v28 = vsel %vm364_vm3, %v6194_v21, -inf }
  0xc7   :  { %12322 = vst [vmem:[#allocation25_spill] sm:$0xff] %v6263_v42  ;;  %v636_v48 = vrot.slane %v635_v41, 1  ;;  %v655_v49 = vrot.slane %v654_v30, 2  ;;  %v606_v0 = vrot.slane %v605_v44, 2  ;;  %v625_v1 = vrot.slane %v624_v50, 4 }
  0xc8   :  { %v580_v16 = vrot.slane %v579_v10, 1  ;;  %v599_v59 = vrot.slane %v598_v45, 2  ;;  %v675_v13 = vmax.f32 %v673_v37, %v674_v58  ;;  %v618_v36 = vrot.slane %v617_v28, 4 }
  0xc9   :  { %v219_v24 = vsel %vm202_vm1, -inf, %v163_v51  ;;  %v6275_v17 = vmax.f32 %v586_v22, %v587_v46  ;;  %v294_v54 = vrot.slane %v6194_v21, 6  ;;  %v6278_v8 = vmax.f32 %v635_v41, %v636_v48 }
  0xca   :  { %v656_v23 = vmax.f32 %v654_v30, %v655_v49  ;;  %v6288_v22 = vmax.f32 %v579_v10, %v580_v16  ;;  %v600_v37 = vmax.f32 %v598_v45, %v599_v59  ;;  %v676_v21 = vrot.slane %v675_v13, 2 }
  0xcb   :  { %12324 = vst [vmem:[#allocation27_spill] sm:$0xff] %v6275_v17  ;;  %v619_v41 = vmax.f32 %v617_v28, %v618_v36  ;;  %v220_v10 = vsel %vm202_vm1, -inf, %v6185_v18  ;;  %v297_v45 = vrot.slane %v6218_v62, 6  ;;  %v296_v16 = vrot.slane %v6218_v62, 4 }
  0xcc   :  { %987 = vrot.lane.b32.xlu2 %v6183_v39, %s5923_s13  ;;  %983 = vrot.lane.b32.xlu0 %v6240_v56, %s5923_s13  ;;  %12325 = vst [vmem:[#allocation28_spill] sm:$0xff] %v6278_v8  ;;  %v601_v28 = vrot.slane %v600_v37, 1 }
  0xcd   :  { %979 = vrot.lane.b32.xlu1 %v6210_v61, %s5923_s13  ;;  %12326 = vst [vmem:[#allocation29_spill] sm:$0xff] %v6288_v22 }
  0xd4   :  { %999 = vrot.lane.b32.xlu2 %v6206_v57, %s5923_s13  ;;  %989 = vrot.lane.b32.xlu0 %v6263_v42, %s5923_s13  ;;  %v6284_v42 = vsel %vm227_vm2, %v219_v24, -inf }
  0xd5   :  { %991 = vrot.lane.b32.xlu1 %v6232_v47, %s5923_s13  ;;  %v6259_v47 = vsel %vm227_vm2, %v218_v25, -inf  ;;  %v607_v25 = vmax.f32 %v605_v44, %v606_v0  ;;  %v657_v44 = vrot.slane %v656_v23, 1  ;;  %v301_v51 = vrot.slane %v6284_v42, 2 }
  0xd6   :  { %v299_v11 = vrot.slane %v6259_v47, 4  ;;  %v677_v0 = vmax.f32 %v675_v13, %v676_v21  ;;  %v6311_v13 = vmax.f32 %v600_v37, %v601_v28  ;;  %v298_v37 = vrot.slane %v6259_v47, 2 }
  0xd7   :  { %v608_v48 = vrot.slane %v607_v25, 1  ;;  %v6302_v36 = vmax.f32 %v656_v23, %v657_v44  ;;  %v715_v18 = vsel %vm364_vm3, %v301_v51, -inf }
  0xd8   :  { %12330 = vst [vmem:[#allocation33_spill] sm:$0xff] %v6311_v13  ;;  %v678_v21 = vrot.slane %v677_v0, 1 }
  0xd9   :  { %12328 = vst [vmem:[#allocation31_spill] sm:$0xff] %v6302_v36 }
  0xdc   :  { %1005 = vrot.lane.b32.xlu2 %v6230_v26, %s5923_s13  ;;  %1001 = vrot.lane.b32.xlu0 %v6288_v22, %s5923_s13 }
  0xdd   :  { %997 = vrot.lane.b32.xlu1 %v6255_v31, %s5923_s13  ;;  %v645_v31 = vsel %vm364_vm3, %v6218_v62, -inf }
  0xde   :  { %v646_v30 = vrot.slane %v645_v31, 4 }
  0xe0   :  { %v647_v59 = vmax.f32 %v645_v31, %v646_v30  ;;  %v167_v30 = vpop.permute.xlu0 %166 }
  0xe4   :  { %1011 = vrot.lane.b32.xlu2 %v6252_v27, %s5923_s13  ;;  %v694_v27 = vsel %vm364_vm3, %v299_v11, -inf  ;;  %1007 = vrot.lane.b32.xlu0 %v6311_v13, %s5923_s13  ;;  %v169_v13 = vpop.permute.xlu1 %168 }
  0xe5   :  { %1003 = vrot.lane.b32.xlu1 %v6275_v17, %s5923_s13  ;;  %v695_v58 = vrot.slane %v694_v27, 4  ;;  %v245_v17 = vsel %vm227_vm2, %v220_v10, -inf  ;;  %v221_v10 = vsel %vm202_vm1, -inf, %v167_v30 }
  0xe6   :  { %v6269_v60 = vpop.permute.xlu2 %957 }
  0xe7   :  { %12323 = vst [vmem:[#allocation26_spill] sm:$0xff] %v6269_v60  ;;  %v626_v60 = vmax.f32 %v624_v50, %v625_v1  ;;  %v638_v50 = vsel %vm364_vm3, %v294_v54, -inf  ;;  %v620_v1 = vrot.slane %v619_v41, 2  ;;  %v696_v24 = vmax.f32 %v694_v27, %v695_v58 }
  0xe8   :  { %v639_v11 = vrot.slane %v638_v50, 4  ;;  %v6304_v54 = vmax.f32 %v607_v25, %v608_v48  ;;  %v648_v27 = vrot.slane %v647_v59, 2  ;;  %v716_v25 = vrot.slane %v715_v18, 4 }
  0xe9   :  { %v627_v49 = vrot.slane %v626_v60, 2  ;;  %v621_v62 = vmax.f32 %v619_v41, %v620_v1  ;;  %v697_v23 = vrot.slane %v696_v24, 2 }
  0xea   :  { %12329 = vst [vmem:[#allocation32_spill] sm:$0xff] %v6304_v54  ;;  %v640_v31 = vmax.f32 %v638_v50, %v639_v11  ;;  %v649_v28 = vmax.f32 %v647_v59, %v648_v27  ;;  %v717_v11 = vmax.f32 %v715_v18, %v716_v25 }
  0xeb   :  { %v622_v41 = vrot.slane %v621_v62, 1  ;;  %v698_v1 = vmax.f32 %v696_v24, %v697_v23 }
  0xec   :  { %1017 = vrot.lane.b32.xlu2 %v6278_v8, %s5923_s13  ;;  %v666_v8 = vsel %vm364_vm3, %v297_v45, -inf  ;;  %v641_v50 = vrot.slane %v640_v31, 2  ;;  %v6323_v45 = vmax.f32 %v677_v0, %v678_v21  ;;  %v718_v24 = vrot.slane %v717_v11, 2 }
  0xed   :  { %1009 = vrot.lane.b32.xlu1 %v6304_v54, %s5923_s13  ;;  %v667_v48 = vrot.slane %v666_v8, 4  ;;  %v6333_v22 = vmax.f32 %v621_v62, %v622_v41  ;;  %v699_v59 = vrot.slane %v698_v1, 1 }
  0xee   :  { %v6293_v46 = vpop.permute.xlu2 %975  ;;  %12332 = vst [vmem:[#allocation35_spill] sm:$0xff] %v6323_v45  ;;  %v642_v0 = vmax.f32 %v640_v31, %v641_v50  ;;  %v719_v50 = vmax.f32 %v717_v11, %v718_v24 }
  0xef   :  { %12327 = vst [vmem:[#allocation30_spill] sm:$0xff] %v6293_v46  ;;  %v628_v46 = vmax.f32 %v626_v60, %v627_v49  ;;  %v659_v60 = vsel %vm364_vm3, %v296_v16, -inf  ;;  %v736_v49 = vsel %vm364_vm3, %v245_v17, -inf  ;;  %v687_v17 = vsel %vm364_vm3, %v298_v37, -inf  ;;  %1013 = vrot.lane.b32.xlu0 %v6333_v22, %s5923_s13 }
  0xf0   :  { %v660_v51 = vrot.slane %v659_v60, 4  ;;  %v737_v54 = vrot.slane %v736_v49, 4  ;;  %12334 = vst [vmem:[#allocation37_spill] sm:$0xff] %v6333_v22  ;;  %v688_v23 = vrot.slane %v687_v17, 4  ;;  %v643_v62 = vrot.slane %v642_v0, 1 }
  0xf1   :  { %v629_v58 = vrot.slane %v628_v46, 1  ;;  %v300_v37 = vrot.slane %v6259_v47, 6  ;;  %v6348_v41 = vmax.f32 %v698_v1, %v699_v59  ;;  %v6363_v59 = vpop.permute.xlu1 %174 }
  0xf2   :  { %v661_v21 = vmax.f32 %v659_v60, %v660_v51  ;;  %v738_v30 = vmax.f32 %v736_v49, %v737_v54  ;;  %v708_v54 = vsel %vm364_vm3, %v6284_v42, -inf }
  0xf3   :  { %v6325_v16 = vmax.f32 %v628_v46, %v629_v58  ;;  %v650_v46 = vrot.slane %v649_v28, 1  ;;  %v222_v58 = vsel %vm202_vm1, -inf, %v169_v13  ;;  %12337 = vst [vmem:[#allocation40_spill] sm:$0xff] %v6348_v41  ;;  %v709_v11 = vrot.slane %v708_v54, 4 }
  0xf4   :  { %1023 = vrot.lane.b32.xlu2 %v6302_v36, %s5923_s13  ;;  %v6329_v36 = vsel %vm227_vm2, %v221_v10, -inf  ;;  %v662_v31 = vrot.slane %v661_v21, 2  ;;  %v689_v10 = vmax.f32 %v687_v17, %v688_v23  ;;  %v6354_v22 = vsel %vm227_vm2, %v222_v58, -inf }
  0xf5   :  { %12333 = vst [vmem:[#allocation36_spill] sm:$0xff] %v6325_v16  ;;  %1015 = vrot.lane.b32.xlu1 %v6325_v16, %s5923_s13  ;;  %v305_v25 = vrot.slane %v6329_v36, 4  ;;  %v739_v13 = vrot.slane %v738_v30, 2  ;;  %v720_v17 = vrot.slane %v719_v50, 1  ;;  %v302_v58 = vrot.slane %v6284_v42, 4 }
  0xf6   :  { %v6316_v44 = vpop.permute.xlu2 %993  ;;  %v690_v23 = vrot.slane %v689_v10, 2 }
  0xf7   :  { %12331 = vst [vmem:[#allocation34_spill] sm:$0xff] %v6316_v44  ;;  %v668_v44 = vmax.f32 %v666_v8, %v667_v48  ;;  %v680_v8 = vsel %vm364_vm3, %v6259_v47, -inf  ;;  %v6345_v48 = vmax.f32 %v649_v28, %v650_v46  ;;  %v757_v49 = vsel %vm364_vm3, %v305_v25, -inf }
  0xf8   :  { %v681_v60 = vrot.slane %v680_v8, 4  ;;  %v6358_v28 = vmax.f32 %v642_v0, %v643_v62  ;;  %v663_v47 = vmax.f32 %v661_v21, %v662_v31  ;;  %v758_v46 = vrot.slane %v757_v49, 4 }
  0xf9   :  { %v669_v27 = vrot.slane %v668_v44, 2  ;;  %12336 = vst [vmem:[#allocation39_spill] sm:$0xff] %v6345_v48  ;;  %v307_v25 = vrot.slane %v6354_v22, 2  ;;  %v223_v0 = vsel %vm202_vm1, -inf, %v6213_v6  ;;  %v303_v21 = vrot.slane %v6284_v42, 6 }
  0xfa   :  { %12338 = vst [vmem:[#allocation41_spill] sm:$0xff] %v6358_v28  ;;  %v682_v1 = vmax.f32 %v680_v8, %v681_v60  ;;  %1019 = vrot.lane.b32.xlu0 %v6358_v28, %s5923_s13  ;;  %v740_v8 = vmax.f32 %v738_v30, %v739_v13  ;;  %v664_v62 = vrot.slane %v663_v47, 1  ;;  %v691_v16 = vmax.f32 %v689_v10, %v690_v23 }
  0xfb   :  { %v670_v51 = vmax.f32 %v668_v44, %v669_v27  ;;  %v701_v44 = vsel %vm364_vm3, %v300_v37, -inf  ;;  %v710_v37 = vmax.f32 %v708_v54, %v709_v11  ;;  %v778_v6 = vsel %vm364_vm3, %v307_v25, -inf }
  0xfc   :  { %1029 = vrot.lane.b32.xlu2 %v6323_v45, %s5923_s13  ;;  %v683_v31 = vrot.slane %v682_v1, 2  ;;  %v702_v60 = vrot.slane %v701_v44, 4  ;;  %v248_v26 = vsel %vm227_vm2, %v223_v0, -inf  ;;  %v729_v30 = vsel %vm364_vm3, %v303_v21, -inf }
  0xfd   :  { %1021 = vrot.lane.b32.xlu1 %v6345_v48, %s5923_s13  ;;  %v671_v27 = vrot.slane %v670_v51, 1  ;;  %v759_v48 = vmax.f32 %v757_v49, %v758_v46  ;;  %v741_v13 = vrot.slane %v740_v8, 1  ;;  %v6385_v42 = vmax.f32 %v663_v47, %v664_v62 }
  0xfe   :  { %v6339_v18 = vpop.permute.xlu2 %945  ;;  %v703_v54 = vmax.f32 %v701_v44, %v702_v60  ;;  %v722_v10 = vsel %vm364_vm3, %v302_v58, -inf  ;;  %v779_v11 = vrot.slane %v778_v6, 4  ;;  %v730_v23 = vrot.slane %v729_v30, 4 }
  0xff   :  { %12335 = vst [vmem:[#allocation38_spill] sm:$0xff] %v6339_v18  ;;  %v173_v18 = vpop.permute.xlu0 %172  ;;  %v760_v49 = vrot.slane %v759_v48, 2  ;;  %v799_v25 = vsel %vm364_vm3, %v248_v26, -inf  ;;  %v304_v47 = vrot.slane %v6329_v36, 2  ;;  %v723_v0 = vrot.slane %v722_v10, 4 }
 0x100   :  { %12343 = vst [vmem:[#allocation46_spill] sm:$0xff] %v6385_v42  ;;  %v704_v44 = vrot.slane %v703_v54, 2  ;;  %v224_v21 = vsel %vm202_vm1, -inf, %v173_v18  ;;  %v780_v58 = vmax.f32 %v778_v6, %v779_v11 }
 0x101   :  { %v761_v60 = vmax.f32 %v759_v48, %v760_v49  ;;  %v750_v26 = vsel %vm364_vm3, %v304_v47, -inf  ;;  %v743_v49 = vsel %vm364_vm3, %v6329_v36, -inf  ;;  %v306_v47 = vrot.slane %v6329_v36, 6 }
 0x102   :  { %1025 = vrot.lane.b32.xlu0 %v6385_v42, %s5923_s13  ;;  %v724_v42 = vmax.f32 %v722_v10, %v723_v0 }
 0x103   :  { %v762_v48 = vrot.slane %v761_v60, 1 }
 0x104   :  { %1035 = vrot.lane.b32.xlu2 %v6348_v41, %s5923_s13  ;;  %v6376_v41 = vmax.f32 %v670_v51, %v671_v27  ;;  %v711_v51 = vrot.slane %v710_v37, 2  ;;  %v692_v27 = vrot.slane %v691_v16, 1 }
 0x105   :  { %v6427_v0 = vmax.f32 %v761_v60, %v762_v48 }
 0x106   :  { %v6365_v24 = vpop.permute.xlu2 %951  ;;  %12341 = vst [vmem:[#allocation44_spill] sm:$0xff] %v6376_v41  ;;  %1027 = vrot.lane.b32.xlu1 %v6376_v41, %s5923_s13 }
 0x107   :  { %12339 = vst [vmem:[#allocation42_spill] sm:$0xff] %v6365_v24  ;;  %v6374_v24 = vmax.f32 %v719_v50, %v720_v17  ;;  %v6379_v45 = vpop.permute.xlu0 %941  ;;  %v684_v50 = vmax.f32 %v682_v1, %v683_v31  ;;  %v6390_v17 = vpop.permute.xlu1 %949  ;;  %v6398_v1 = vmax.f32 %v740_v8, %v741_v13  ;;  %v712_v31 = vmax.f32 %v710_v37, %v711_v51 }
 0x108   :  { %12342 = vst [vmem:[#allocation45_spill] sm:$0xff] %v6379_v45  ;;  %v6405_v45 = vsel %vm227_vm2, %v224_v21, -inf  ;;  %v800_v8 = vrot.slane %v799_v25, 4  ;;  %v705_v13 = vmax.f32 %v703_v54, %v704_v44  ;;  %v781_v37 = vrot.slane %v780_v58, 2 }
 0x109   :  { %12340 = vst [vmem:[#allocation43_spill] sm:$0xff] %v6374_v24  ;;  %v685_v62 = vrot.slane %v684_v50, 1  ;;  %v751_v54 = vrot.slane %v750_v26, 4  ;;  %v311_v10 = vrot.slane %v6405_v45, 4  ;;  %v744_v44 = vrot.slane %v743_v49, 4 }
 0x10a   :  { %12344 = vst [vmem:[#allocation47_spill] sm:$0xff] %v6390_v17  ;;  %v731_v17 = vmax.f32 %v729_v30, %v730_v23  ;;  %v801_v11 = vmax.f32 %v799_v25, %v800_v8  ;;  %v225_v23 = vsel %vm202_vm1, -inf, %v6363_v59  ;;  %v782_v21 = vmax.f32 %v780_v58, %v781_v37 }
 0x10b   :  { %12346 = vst [vmem:[#allocation49_spill] sm:$0xff] %v6398_v1  ;;  %v6413_v18 = vmax.f32 %v684_v50, %v685_v62  ;;  %v706_v50 = vrot.slane %v705_v13, 1  ;;  %v771_v25 = vsel %vm364_vm3, %v6354_v22, -inf  ;;  %v6435_v8 = vsel %vm227_vm2, %v225_v23, -inf }
 0x10c   :  { %1041 = vrot.lane.b32.xlu2 %v6374_v24, %s5923_s13  ;;  %v732_v51 = vrot.slane %v731_v17, 2  ;;  %12352 = vst [vmem:[#allocation55_spill] sm:$0xff] %v6427_v0  ;;  %v802_v36 = vrot.slane %v801_v11, 2  ;;  %v783_v58 = vrot.slane %v782_v21, 1 }
 0x10d   :  { %12349 = vst [vmem:[#allocation52_spill] sm:$0xff] %v6413_v18  ;;  %1031 = vrot.lane.b32.xlu0 %v6413_v18, %s5923_s13  ;;  %v6439_v59 = vmax.f32 %v705_v13, %v706_v50  ;;  %v309_v13 = vrot.slane %v6354_v22, 6  ;;  %v226_v50 = vsel %vm202_vm1, -inf, %v6245_v5  ;;  %vm5813_vm1 = vcmask 220160  }
 0x10e   :  { %v6392_v46 = vpop.permute.xlu2 %963 }
 0x10f   :  { %12345 = vst [vmem:[#allocation48_spill] sm:$0xff] %v6392_v46  ;;  %v6401_v46 = vmax.f32 %v691_v16, %v692_v27  ;;  %v6409_v41 = vpop.permute.xlu0 %959  ;;  %v713_v16 = vrot.slane %v712_v31, 1  ;;  %v6415_v6 = vpop.permute.xlu1 %967  ;;  %v725_v27 = vrot.slane %v724_v42, 2 }
 0x110   :  { %12348 = vst [vmem:[#allocation51_spill] sm:$0xff] %v6409_v41  ;;  %v820_v41 = vsel %vm364_vm3, %v311_v10, -inf }
 0x111   :  { %12347 = vst [vmem:[#allocation50_spill] sm:$0xff] %v6401_v46  ;;  %1033 = vrot.lane.b32.xlu1 %v6401_v46, %s5923_s13  ;;  %v6429_v62 = vmax.f32 %v712_v31, %v713_v16  ;;  %v726_v60 = vmax.f32 %v724_v42, %v725_v27  ;;  %v764_v31 = vsel %vm364_vm3, %v306_v47, -inf }
 0x112   :  { %12350 = vst [vmem:[#allocation53_spill] sm:$0xff] %v6415_v6  ;;  %v752_v6 = vmax.f32 %v750_v26, %v751_v54  ;;  %v821_v26 = vrot.slane %v820_v41, 4  ;;  %v313_v54 = vrot.slane %v6435_v8, 2  ;;  %v765_v23 = vrot.slane %v764_v31, 4 }
 0x113   :  { %12353 = vst [vmem:[#allocation56_spill] sm:$0xff] %v6429_v62  ;;  %v727_v27 = vrot.slane %v726_v60, 1 }
 0x114   :  { %1047 = vrot.lane.b32.xlu2 %v6398_v1, %s5923_s13  ;;  %12354 = vst [vmem:[#allocation57_spill] sm:$0xff] %v6439_v59  ;;  %v753_v37 = vrot.slane %v752_v6, 2 }
 0x115   :  { %1037 = vrot.lane.b32.xlu0 %v6439_v59, %s5923_s13  ;;  %v841_v59 = vsel %vm364_vm3, %v313_v54, -inf }
 0x116   :  { %v6417_v30 = vpop.permute.xlu2 %969 }
 0x117   :  { %12351 = vst [vmem:[#allocation54_spill] sm:$0xff] %v6417_v30  ;;  %v733_v30 = vmax.f32 %v731_v17, %v732_v51  ;;  %v745_v17 = vmax.f32 %v743_v49, %v744_v44  ;;  %v772_v51 = vrot.slane %v771_v25, 4  ;;  %v6447_v10 = vpop.permute.xlu1 %985  ;;  %v6452_v42 = vpop.permute.xlu0 %977  ;;  %v803_v49 = vmax.f32 %v801_v11, %v802_v36 }
 0x118   :  { %12356 = vst [vmem:[#allocation59_spill] sm:$0xff] %v6447_v10  ;;  %v308_v44 = vrot.slane %v6354_v22, 4  ;;  %v251_v11 = vsel %vm227_vm2, %v226_v50, -inf  ;;  %v766_v36 = vmax.f32 %v764_v31, %v765_v23  ;;  %v6468_v22 = vmax.f32 %v726_v60, %v727_v27 }
 0x119   :  { %1039 = vrot.lane.b32.xlu1 %v6429_v62, %s5923_s13  ;;  %v734_v48 = vrot.slane %v733_v30, 1  ;;  %12357 = vst [vmem:[#allocation60_spill] sm:$0xff] %v6452_v42  ;;  %v746_v47 = vrot.slane %v745_v17, 2  ;;  %v822_v62 = vmax.f32 %v820_v41, %v821_v26  ;;  %v773_v18 = vmax.f32 %v771_v25, %v772_v51 }
 0x11a   :  { %v792_v42 = vsel %vm364_vm3, %v309_v13, -inf  ;;  %v804_v5 = vrot.slane %v803_v49, 1  ;;  %v785_v26 = vsel %vm364_vm3, %v308_v44, -inf  ;;  %v310_v51 = vrot.slane %v6405_v45, 2 }
 0x11b   :  { %v6459_v10 = vmax.f32 %v733_v30, %v734_v48  ;;  %v747_v41 = vmax.f32 %v745_v17, %v746_v47  ;;  %v823_v30 = vrot.slane %v822_v62, 2  ;;  %v793_v48 = vrot.slane %v792_v42, 4 }
 0x11c   :  { %1053 = vrot.lane.b32.xlu2 %v6427_v0, %s5923_s13  ;;  %v754_v0 = vmax.f32 %v752_v6, %v753_v37  ;;  %v842_v6 = vrot.slane %v841_v59, 4  ;;  %v6478_v31 = vmax.f32 %v803_v49, %v804_v5  ;;  %v862_v60 = vsel %vm364_vm3, %v251_v11, -inf }
 0x11d   :  { %1043 = vrot.lane.b32.xlu0 %v6468_v22, %s5923_s13  ;;  %v767_v17 = vrot.slane %v766_v36, 2  ;;  %v748_v54 = vrot.slane %v747_v41, 1  ;;  %v786_v13 = vrot.slane %v785_v26, 4  ;;  %v824_v50 = vmax.f32 %v822_v62, %v823_v30 }
 0x11e   :  { %v6444_v16 = vpop.permute.xlu2 %981  ;;  %v755_v25 = vrot.slane %v754_v0, 1  ;;  %12361 = vst [vmem:[#allocation64_spill] sm:$0xff] %v6478_v31  ;;  %v843_v27 = vmax.f32 %v841_v59, %v842_v6  ;;  %v863_v49 = vrot.slane %v862_v60, 4  ;;  %vm5815_vm2 = vcmask 293888  }
 0x11f   :  { %12355 = vst [vmem:[#allocation58_spill] sm:$0xff] %v6444_v16  ;;  %v6457_v16 = vmax.f32 %v782_v21, %v783_v58  ;;  %v774_v58 = vrot.slane %v773_v18, 2  ;;  %v6473_v37 = vpop.permute.xlu1 %943  ;;  %v6481_v23 = vpop.permute.xlu0 %995  ;;  %v768_v5 = vmax.f32 %v766_v36, %v767_v17  ;;  %v6490_v11 = vmax.f32 %v747_v41, %v748_v54 }
 0x120   :  { %12360 = vst [vmem:[#allocation63_spill] sm:$0xff] %v6473_v37  ;;  %v6483_v47 = vmax.f32 %v754_v0, %v755_v25  ;;  %v813_v37 = vsel %vm364_vm3, %v310_v51, -inf  ;;  %v787_v62 = vmax.f32 %v785_v26, %v786_v13  ;;  %v825_v59 = vrot.slane %v824_v50, 1 }
 0x121   :  { %12358 = vst [vmem:[#allocation61_spill] sm:$0xff] %v6457_v16  ;;  %1045 = vrot.lane.b32.xlu1 %v6459_v10, %s5923_s13  ;;  %v775_v44 = vmax.f32 %v773_v18, %v774_v58  ;;  %v844_v30 = vrot.slane %v843_v27, 2  ;;  %v814_v25 = vrot.slane %v813_v37, 4  ;;  %v864_v36 = vmax.f32 %v862_v60, %v863_v49 }
 0x122   :  { %12362 = vst [vmem:[#allocation65_spill] sm:$0xff] %v6481_v23  ;;  %v788_v41 = vrot.slane %v787_v62, 2  ;;  %v6500_v26 = vmax.f32 %v824_v50, %v825_v59 }
 0x123   :  { %12363 = vst [vmem:[#allocation66_spill] sm:$0xff] %v6483_v47  ;;  %v776_v0 = vrot.slane %v775_v44, 1  ;;  %v845_v17 = vmax.f32 %v843_v27, %v844_v30  ;;  %v865_v60 = vrot.slane %v864_v36, 2 }
 0x124   :  { %1059 = vrot.lane.b32.xlu2 %v6457_v16, %s5923_s13  ;;  %12364 = vst [vmem:[#allocation67_spill] sm:$0xff] %v6490_v11  ;;  %v789_v27 = vmax.f32 %v787_v62, %v788_v41 }
 0x125   :  { %1049 = vrot.lane.b32.xlu0 %v6490_v11, %s5923_s13  ;;  %v6504_v13 = vmax.f32 %v775_v44, %v776_v0  ;;  %v846_v44 = vrot.slane %v845_v17, 1 }
 0x126   :  { %v6470_v21 = vpop.permute.xlu2 %987 }
 0x127   :  { %12359 = vst [vmem:[#allocation62_spill] sm:$0xff] %v6470_v21  ;;  %v794_v21 = vmax.f32 %v792_v42, %v793_v48  ;;  %v806_v42 = vsel %vm364_vm3, %v6405_v45, -inf  ;;  %v6496_v58 = vpop.permute.xlu1 %955  ;;  %v769_v48 = vrot.slane %v768_v5, 1  ;;  %v6502_v54 = vpop.permute.xlu0 %947 }
 0x128   :  { %12366 = vst [vmem:[#allocation69_spill] sm:$0xff] %v6496_v58  ;;  %v807_v51 = vrot.slane %v806_v42, 4  ;;  %v834_v58 = vsel %vm364_vm3, %v6435_v8, -inf }
 0x129   :  { %1051 = vrot.lane.b32.xlu1 %v6483_v47, %s5923_s13  ;;  %v795_v18 = vrot.slane %v794_v21, 2  ;;  %12367 = vst [vmem:[#allocation70_spill] sm:$0xff] %v6502_v54  ;;  %v815_v47 = vmax.f32 %v813_v37, %v814_v25  ;;  %v6513_v50 = vmax.f32 %v768_v5, %v769_v48  ;;  %v835_v30 = vrot.slane %v834_v58, 4 }
 0x12a   :  { %12368 = vst [vmem:[#allocation71_spill] sm:$0xff] %v6504_v13  ;;  %v808_v49 = vmax.f32 %v806_v42, %v807_v51  ;;  %v866_v25 = vmax.f32 %v864_v36, %v865_v60  ;;  %v790_v5 = vrot.slane %v789_v27, 1  ;;  %v6523_v42 = vmax.f32 %v845_v17, %v846_v44 }
 0x12b   :  { %v796_v23 = vmax.f32 %v794_v21, %v795_v18  ;;  %v315_v18 = vrot.slane %v6435_v8, 6  ;;  %v836_v54 = vmax.f32 %v834_v58, %v835_v30 }
 0x12c   :  { %1065 = vrot.lane.b32.xlu2 %v6478_v31, %s5923_s13  ;;  %v809_v48 = vrot.slane %v808_v49, 2  ;;  %v867_v36 = vrot.slane %v866_v25, 1  ;;  %v6535_v60 = vmax.f32 %v789_v27, %v790_v5 }
 0x12d   :  { %v797_v21 = vrot.slane %v796_v23, 1  ;;  %1055 = vrot.lane.b32.xlu0 %v6513_v50, %s5923_s13 }
 0x12e   :  { %v6492_v6 = vpop.permute.xlu2 %999  ;;  %12373 = vst [vmem:[#allocation76_spill] sm:$0xff] %v6535_v60  ;;  %v810_v17 = vmax.f32 %v808_v49, %v809_v48 }
 0x12f   :  { %12365 = vst [vmem:[#allocation68_spill] sm:$0xff] %v6492_v6  ;;  %v312_v6 = vrot.slane %v6405_v45, 6  ;;  %v816_v45 = vrot.slane %v815_v47, 2  ;;  %v6518_v0 = vpop.permute.xlu1 %961  ;;  %v6525_v41 = vpop.permute.xlu0 %953  ;;  %v6527_v51 = vmax.f32 %v796_v23, %v797_v21 }
 0x130   :  { %12370 = vst [vmem:[#allocation73_spill] sm:$0xff] %v6518_v0  ;;  %v855_v0 = vsel %vm364_vm3, %v315_v18, -inf  ;;  %v811_v30 = vrot.slane %v810_v17, 1 }
 0x131   :  { %1057 = vrot.lane.b32.xlu1 %v6504_v13, %s5923_s13  ;;  %v827_v37 = vsel %vm364_vm3, %v312_v6, -inf  ;;  %12371 = vst [vmem:[#allocation74_spill] sm:$0xff] %v6525_v41  ;;  %v314_v6 = vrot.slane %v6435_v8, 4  ;;  %v856_v58 = vrot.slane %v855_v0, 4 }
 0x132   :  { %v828_v62 = vrot.slane %v827_v37, 4  ;;  %12372 = vst [vmem:[#allocation75_spill] sm:$0xff] %v6527_v51 }
 0x133   :  { %v848_v8 = vsel %vm364_vm3, %v314_v6, -inf  ;;  %v857_v48 = vmax.f32 %v855_v0, %v856_v58  ;;  %vm5817_vm3 = vcmask 367616  }
 0x134   :  { %1071 = vrot.lane.b32.xlu2 %v6500_v26, %s5923_s13  ;;  %v829_v44 = vmax.f32 %v827_v37, %v828_v62  ;;  %v849_v27 = vrot.slane %v848_v8, 4  ;;  %v6554_v62 = vmax.f32 %v810_v17, %v811_v30 }
 0x135   :  { %1061 = vrot.lane.b32.xlu0 %v6535_v60, %s5923_s13 }
 0x136   :  { %v6515_v59 = vpop.permute.xlu2 %1005  ;;  %v830_v18 = vrot.slane %v829_v44, 2  ;;  %12379 = vst [vmem:[#allocation82_spill] sm:$0xff] %v6554_v62 }
 0x137   :  { %12369 = vst [vmem:[#allocation72_spill] sm:$0xff] %v6515_v59  ;;  %v817_v59 = vmax.f32 %v815_v47, %v816_v45  ;;  %v837_v47 = vrot.slane %v836_v54, 2  ;;  %v6540_v21 = vpop.permute.xlu1 %973  ;;  %v6544_v45 = vmax.f32 %v866_v25, %v867_v36  ;;  %v6546_v5 = vpop.permute.xlu0 %965  ;;  %v850_v25 = vmax.f32 %v848_v8, %v849_v27 }
 0x138   :  { %12375 = vst [vmem:[#allocation78_spill] sm:$0xff] %v6540_v21  ;;  %v831_v6 = vmax.f32 %v829_v44, %v830_v18  ;;  %v858_v21 = vrot.slane %v857_v48, 2 }
 0x139   :  { %1063 = vrot.lane.b32.xlu1 %v6527_v51, %s5923_s13  ;;  %v818_v23 = vrot.slane %v817_v59, 1  ;;  %12376 = vst [vmem:[#allocation79_spill] sm:$0xff] %v6544_v45  ;;  %v838_v37 = vmax.f32 %v836_v54, %v837_v47 }
 0x13a   :  { %12377 = vst [vmem:[#allocation80_spill] sm:$0xff] %v6546_v5  ;;  %v832_v54 = vrot.slane %v831_v6, 1  ;;  %v859_v47 = vmax.f32 %v857_v48, %v858_v21  ;;  %v12439_v5 = vld [vmem:[#allocation33_spill] sm:$0xff] }
 0x13b   :  { %v6548_v49 = vmax.f32 %v817_v59, %v818_v23  ;;  %v851_v59 = vrot.slane %v850_v25, 2 }
 0x13c   :  { %1077 = vrot.lane.b32.xlu2 %v6523_v42, %s5923_s13  ;;  %v6570_v17 = vmax.f32 %v831_v6, %v832_v54  ;;  %v860_v58 = vrot.slane %v859_v47, 1 }
 0x13d   :  { %12378 = vst [vmem:[#allocation81_spill] sm:$0xff] %v6548_v49  ;;  %1067 = vrot.lane.b32.xlu0 %v6554_v62, %s5923_s13  ;;  %v852_v44 = vmax.f32 %v850_v25, %v851_v59 }
 0x13e   :  { %v6537_v41 = vpop.permute.xlu2 %1011  ;;  %12384 = vst [vmem:[#allocation87_spill] sm:$0xff] %v6570_v17  ;;  %v6580_v18 = vmax.f32 %v859_v47, %v860_v58 }
 0x13f   :  { %12374 = vst [vmem:[#allocation77_spill] sm:$0xff] %v6537_v41  ;;  %v839_v41 = vrot.slane %v838_v37, 1  ;;  %v6558_v60 = vpop.permute.xlu1 %979  ;;  %v6562_v0 = vpop.permute.xlu0 %971 }
 0x140   :  { %12381 = vst [vmem:[#allocation84_spill] sm:$0xff] %v6558_v60 }
 0x141   :  { %1069 = vrot.lane.b32.xlu1 %v6548_v49, %s5923_s13  ;;  %12382 = vst [vmem:[#allocation85_spill] sm:$0xff] %v6562_v0  ;;  %v6564_v23 = vmax.f32 %v838_v37, %v839_v41  ;;  %v853_v41 = vrot.slane %v852_v44, 1 }
 0x142   :  { %12388 = vst [vmem:[#allocation91_spill] sm:$0xff] %v6580_v18 }
 0x143   :  { %12383 = vst [vmem:[#allocation86_spill] sm:$0xff] %v6564_v23  ;;  %v6586_v27 = vmax.f32 %v852_v44, %v853_v41 }
 0x144   :  { %1083 = vrot.lane.b32.xlu2 %v6544_v45, %s5923_s13 }
 0x145   :  { %1073 = vrot.lane.b32.xlu0 %v6570_v17, %s5923_s13  ;;  %12389 = vst [vmem:[#allocation92_spill] sm:$0xff] %v6586_v27 }
 0x146   :  { %v6556_v36 = vpop.permute.xlu2 %1017 }
 0x147   :  { %12380 = vst [vmem:[#allocation83_spill] sm:$0xff] %v6556_v36  ;;  %v6574_v30 = vpop.permute.xlu1 %991  ;;  %v6578_v21 = vpop.permute.xlu0 %983 }
 0x148   :  { %12386 = vst [vmem:[#allocation89_spill] sm:$0xff] %v6574_v30 }
 0x149   :  { %1075 = vrot.lane.b32.xlu1 %v6564_v23, %s5923_s13  ;;  %12387 = vst [vmem:[#allocation90_spill] sm:$0xff] %v6578_v21  ;;  %v12433_v21 = vld [vmem:[#allocation29_spill] sm:$0xff] }
 0x14c   :  { %1089 = vrot.lane.b32.xlu2 %v6086_v38, %s5924_s14 }
 0x14d   :  { %1079 = vrot.lane.b32.xlu0 %v6586_v27, %s5923_s13 }
 0x14e   :  { %v6572_v8 = vpop.permute.xlu2 %1023 }
 0x14f   :  { %12385 = vst [vmem:[#allocation88_spill] sm:$0xff] %v6572_v8  ;;  %v6590_v48 = vpop.permute.xlu1 %997  ;;  %v6594_v6 = vpop.permute.xlu0 %989 }
 0x150   :  { %12391 = vst [vmem:[#allocation94_spill] sm:$0xff] %v6590_v48 }
 0x151   :  { %1081 = vrot.lane.b32.xlu1 %v6580_v18, %s5923_s13  ;;  %12392 = vst [vmem:[#allocation95_spill] sm:$0xff] %v6594_v6  ;;  %v12427_v6 = vld [vmem:[#allocation14_spill] sm:$0xff] }
 0x154   :  { %1095 = vrot.lane.b32.xlu2 %v6105_v3, %s5924_s14 }
 0x155   :  { %1085 = vrot.lane.b32.xlu0 %v6032_v35, %s5924_s14 }
 0x156   :  { %v6588_v37 = vpop.permute.xlu2 %1029 }
 0x157   :  { %12390 = vst [vmem:[#allocation93_spill] sm:$0xff] %v6588_v37  ;;  %v6602_v54 = vpop.permute.xlu1 %1003  ;;  %v6606_v59 = vpop.permute.xlu0 %1001 }
 0x158   :  { %12394 = vst [vmem:[#allocation97_spill] sm:$0xff] %v6602_v54 }
 0x159   :  { %1087 = vrot.lane.b32.xlu1 %v6123_v40, %s5924_s14  ;;  %12395 = vst [vmem:[#allocation98_spill] sm:$0xff] %v6606_v59 }
 0x15c   :  { %1101 = vrot.lane.b32.xlu2 %v6030_v33, %s5924_s14 }
 0x15d   :  { %1091 = vrot.lane.b32.xlu0 %v6154_v19, %s5924_s14 }
 0x15e   :  { %v6600_v25 = vpop.permute.xlu2 %1035 }
 0x15f   :  { %12393 = vst [vmem:[#allocation96_spill] sm:$0xff] %v6600_v25  ;;  %v6614_v44 = vpop.permute.xlu1 %1009  ;;  %v6618_v58 = vpop.permute.xlu0 %1007 }
 0x160   :  { %12397 = vst [vmem:[#allocation100_spill] sm:$0xff] %v6614_v44 }
 0x161   :  { %1093 = vrot.lane.b32.xlu1 %v6065_v12, %s5924_s14  ;;  %12398 = vst [vmem:[#allocation101_spill] sm:$0xff] %v6618_v58 }
 0x164   :  { %1107 = vrot.lane.b32.xlu2 %v6121_v34, %s5924_s14 }
 0x165   :  { %1097 = vrot.lane.b32.xlu0 %v6171_v55, %s5924_s14 }
 0x166   :  { %v6612_v47 = vpop.permute.xlu2 %1041 }
 0x167   :  { %12396 = vst [vmem:[#allocation99_spill] sm:$0xff] %v6612_v47  ;;  %v6626_v37 = vpop.permute.xlu1 %1015  ;;  %v6630_v47 = vpop.permute.xlu0 %1013 }
 0x168   :  { %12400 = vst [vmem:[#allocation103_spill] sm:$0xff] %v6626_v37 }
 0x169   :  { %1099 = vrot.lane.b32.xlu1 %v6142_v14, %s5924_s14  ;;  %12401 = vst [vmem:[#allocation104_spill] sm:$0xff] %v6630_v47 }
 0x16c   :  { %1113 = vrot.lane.b32.xlu2 %v6140_v2, %s5924_s14 }
 0x16d   :  { %1103 = vrot.lane.b32.xlu0 %v6053_v63, %s5924_s14 }
 0x16e   :  { %v6624_v41 = vpop.permute.xlu2 %1047 }
 0x16f   :  { %12399 = vst [vmem:[#allocation102_spill] sm:$0xff] %v6624_v41  ;;  %v6638_v44 = vpop.permute.xlu1 %1021  ;;  %v6642_v41 = vpop.permute.xlu0 %1019 }
 0x170   :  { %12403 = vst [vmem:[#allocation106_spill] sm:$0xff] %v6638_v44 }
 0x171   :  { %1105 = vrot.lane.b32.xlu1 %v6165_v4, %s5924_s14  ;;  %12404 = vst [vmem:[#allocation107_spill] sm:$0xff] %v6642_v41 }
 0x174   :  { %1119 = vrot.lane.b32.xlu2 %v6047_v52, %s5924_s14 }
 0x175   :  { %1109 = vrot.lane.b32.xlu0 %v6196_v29, %s5924_s14 }
 0x176   :  { %v6636_v58 = vpop.permute.xlu2 %1053 }
 0x177   :  { %12402 = vst [vmem:[#allocation105_spill] sm:$0xff] %v6636_v58  ;;  %v6654_v58 = vpop.permute.xlu0 %1025 }
 0x178   :  { %v6650_v59 = vpop.permute.xlu1 %1027  ;;  %12407 = vst [vmem:[#allocation110_spill] sm:$0xff] %v6654_v58 }
 0x179   :  { %1111 = vrot.lane.b32.xlu1 %v6083_v32, %s5924_s14  ;;  %12406 = vst [vmem:[#allocation109_spill] sm:$0xff] %v6650_v59 }
 0x17c   :  { %1125 = vrot.lane.b32.xlu2 %v6163_v43, %s5924_s14 }
 0x17d   :  { %1115 = vrot.lane.b32.xlu0 %v6223_v15, %s5924_s14 }
 0x17e   :  { %v6648_v25 = vpop.permute.xlu2 %1059 }
 0x17f   :  { %12405 = vst [vmem:[#allocation108_spill] sm:$0xff] %v6648_v25  ;;  %v6666_v25 = vpop.permute.xlu0 %1031 }
 0x180   :  { %12410 = vst [vmem:[#allocation113_spill] sm:$0xff] %v6666_v25 }
 0x181   :  { %1117 = vrot.lane.b32.xlu1 %v6187_v20, %s5924_s14 }
 0x183   :  { %v6662_v44 = vpop.permute.xlu1 %1033 }
 0x184   :  { %1131 = vrot.lane.b32.xlu2 %v6183_v39, %s5924_s14  ;;  %12409 = vst [vmem:[#allocation112_spill] sm:$0xff] %v6662_v44  ;;  %v12421_v44 = vld [vmem:[#allocation25_spill] sm:$0xff] }
 0x185   :  { %1121 = vrot.lane.b32.xlu0 %v6094_v53, %s5924_s14 }
 0x186   :  { %v6660_v41 = vpop.permute.xlu2 %1065 }
 0x187   :  { %12408 = vst [vmem:[#allocation111_spill] sm:$0xff] %v6660_v41  ;;  %v6678_v41 = vpop.permute.xlu0 %1037 }
 0x188   :  { %12413 = vst [vmem:[#allocation116_spill] sm:$0xff] %v6678_v41  ;;  %v12418_v41 = vld [vmem:[#allocation21_spill] sm:$0xff] }
 0x189   :  { %1123 = vrot.lane.b32.xlu1 %v6210_v61, %s5924_s14 }
 0x18b   :  { %v6674_v59 = vpop.permute.xlu1 %1039 }
 0x18c   :  { %1137 = vrot.lane.b32.xlu2 %v6060_v9, %s5924_s14  ;;  %12412 = vst [vmem:[#allocation115_spill] sm:$0xff] %v6674_v59  ;;  %v12417_v59 = vld [vmem:[#allocation20_spill] sm:$0xff] }
 0x18d   :  { %1127 = vrot.lane.b32.xlu0 %v6240_v56, %s5924_s14 }
 0x18e   :  { %v6672_v58 = vpop.permute.xlu2 %1071 }
 0x18f   :  { %12411 = vst [vmem:[#allocation114_spill] sm:$0xff] %v6672_v58  ;;  %v6690_v58 = vpop.permute.xlu0 %1043 }
 0x190   :  { %12416 = vst [vmem:[#allocation119_spill] sm:$0xff] %v6690_v58  ;;  %v12424_v58 = vld [vmem:[#allocation24_spill] sm:$0xff] }
 0x191   :  { %1129 = vrot.lane.b32.xlu1 %v6108_v7, %s5924_s14 }
 0x193   :  { %v6686_v47 = vpop.permute.xlu1 %1045 }
 0x194   :  { %1143 = vrot.lane.b32.xlu2 %v6206_v57, %s5924_s14  ;;  %12415 = vst [vmem:[#allocation118_spill] sm:$0xff] %v6686_v47  ;;  %v12423_v47 = vld [vmem:[#allocation23_spill] sm:$0xff] }
 0x195   :  { %1133 = vrot.lane.b32.xlu0 %v12421_v44, %s5924_s14 }
 0x196   :  { %v6684_v25 = vpop.permute.xlu2 %1077 }
 0x197   :  { %12414 = vst [vmem:[#allocation117_spill] sm:$0xff] %v6684_v25  ;;  %v6702_v25 = vpop.permute.xlu0 %1049 }
 0x198   :  { %12422 = vst [vmem:[#allocation122_spill] sm:$0xff] %v6702_v25  ;;  %v12430_v25 = vld [vmem:[#allocation27_spill] sm:$0xff] }
 0x199   :  { %1135 = vrot.lane.b32.xlu1 %v12418_v41, %s5924_s14 }
 0x19b   :  { %v6698_v8 = vpop.permute.xlu1 %1051 }
 0x19c   :  { %1149 = vrot.lane.b32.xlu2 %v12417_v59, %s5924_s14  ;;  %12420 = vst [vmem:[#allocation121_spill] sm:$0xff] %v6698_v8  ;;  %v12429_v8 = vld [vmem:[#allocation28_spill] sm:$0xff] }
 0x19d   :  { %1139 = vrot.lane.b32.xlu0 %v12427_v6, %s5924_s14 }
 0x19e   :  { %v6696_v54 = vpop.permute.xlu2 %1083 }
 0x19f   :  { %12419 = vst [vmem:[#allocation120_spill] sm:$0xff] %v6696_v54  ;;  %v6714_v54 = vpop.permute.xlu0 %1055 }
 0x1a0   :  { %12428 = vst [vmem:[#allocation125_spill] sm:$0xff] %v6714_v54  ;;  %v12436_v54 = vld [vmem:[#allocation32_spill] sm:$0xff] }
 0x1a1   :  { %1141 = vrot.lane.b32.xlu1 %v12424_v58, %s5924_s14 }
 0x1a3   :  { %v6710_v30 = vpop.permute.xlu1 %1057 }
 0x1a4   :  { %1155 = vrot.lane.b32.xlu2 %v12423_v47, %s5924_s14  ;;  %12426 = vst [vmem:[#allocation124_spill] sm:$0xff] %v6710_v30  ;;  %v12435_v30 = vld [vmem:[#allocation31_spill] sm:$0xff] }
 0x1a5   :  { %1145 = vrot.lane.b32.xlu0 %v12433_v21, %s5924_s14 }
 0x1a6   :  { %v6708_v37 = vpop.permute.xlu2 %1089 }
 0x1a7   :  { %12425 = vst [vmem:[#allocation123_spill] sm:$0xff] %v6708_v37  ;;  %v6726_v37 = vpop.permute.xlu0 %1061 }
 0x1a8   :  { %12434 = vst [vmem:[#allocation128_spill] sm:$0xff] %v6726_v37  ;;  %v12442_v37 = vld [vmem:[#allocation36_spill] sm:$0xff] }
 0x1a9   :  { %1147 = vrot.lane.b32.xlu1 %v12430_v25, %s5924_s14 }
 0x1ab   :  { %v6722_v36 = vpop.permute.xlu1 %1063 }
 0x1ac   :  { %1161 = vrot.lane.b32.xlu2 %v12429_v8, %s5924_s14  ;;  %12432 = vst [vmem:[#allocation127_spill] sm:$0xff] %v6722_v36  ;;  %v12441_v36 = vld [vmem:[#allocation35_spill] sm:$0xff] }
 0x1ad   :  { %1151 = vrot.lane.b32.xlu0 %v12439_v5, %s5924_s14 }
 0x1ae   :  { %v6720_v48 = vpop.permute.xlu2 %1095 }
 0x1af   :  { %12431 = vst [vmem:[#allocation126_spill] sm:$0xff] %v6720_v48  ;;  %v6738_v48 = vpop.permute.xlu0 %1067 }
 0x1b0   :  { %12440 = vst [vmem:[#allocation131_spill] sm:$0xff] %v6738_v48  ;;  %v12448_v48 = vld [vmem:[#allocation39_spill] sm:$0xff] }
 0x1b1   :  { %1153 = vrot.lane.b32.xlu1 %v12436_v54, %s5924_s14  ;;  %v12445_v54 = vld [vmem:[#allocation37_spill] sm:$0xff] }
 0x1b3   :  { %v6734_v60 = vpop.permute.xlu1 %1069 }
 0x1b4   :  { %1167 = vrot.lane.b32.xlu2 %v12435_v30, %s5924_s14  ;;  %12438 = vst [vmem:[#allocation130_spill] sm:$0xff] %v6734_v60  ;;  %v12447_v60 = vld [vmem:[#allocation40_spill] sm:$0xff] }
 0x1b5   :  { %1157 = vrot.lane.b32.xlu0 %v12445_v54, %s5924_s14 }
 0x1b6   :  { %v6732_v0 = vpop.permute.xlu2 %1101 }
 0x1b7   :  { %12437 = vst [vmem:[#allocation129_spill] sm:$0xff] %v6732_v0  ;;  %v6750_v0 = vpop.permute.xlu0 %1073 }
 0x1b8   :  { %12446 = vst [vmem:[#allocation37_spill] sm:$0xff] %v6750_v0  ;;  %v12452_v0 = vld [vmem:[#allocation44_spill] sm:$0xff] }
 0x1b9   :  { %1159 = vrot.lane.b32.xlu1 %v12442_v37, %s5924_s14 }
 0x1bb   :  { %v6746_v30 = vpop.permute.xlu1 %1075 }
 0x1bc   :  { %1173 = vrot.lane.b32.xlu2 %v12441_v36, %s5924_s14  ;;  %12444 = vst [vmem:[#allocation133_spill] sm:$0xff] %v6746_v30 }
 0x1bd   :  { %1163 = vrot.lane.b32.xlu0 %v6358_v28, %s5924_s14 }
 0x1be   :  { %v6744_v21 = vpop.permute.xlu2 %1107 }
 0x1bf   :  { %12443 = vst [vmem:[#allocation132_spill] sm:$0xff] %v6744_v21  ;;  %v6762_v21 = vpop.permute.xlu0 %1079 }
 0x1c0   :  { %12451 = vst [vmem:[#allocation136_spill] sm:$0xff] %v6762_v21 }
 0x1c1   :  { %1165 = vrot.lane.b32.xlu1 %v12448_v48, %s5924_s14  ;;  %v12455_v48 = vld [vmem:[#allocation46_spill] sm:$0xff] }
 0x1c3   :  { %v6758_v36 = vpop.permute.xlu1 %1081 }
 0x1c4   :  { %1179 = vrot.lane.b32.xlu2 %v12447_v60, %s5924_s14  ;;  %12450 = vst [vmem:[#allocation135_spill] sm:$0xff] %v6758_v36 }
 0x1c5   :  { %1169 = vrot.lane.b32.xlu0 %v12455_v48, %s5924_s14 }
 0x1c6   :  { %v6756_v5 = vpop.permute.xlu2 %1113 }
 0x1c7   :  { %12449 = vst [vmem:[#allocation134_spill] sm:$0xff] %v6756_v5  ;;  %v6774_v5 = vpop.permute.xlu0 %1085 }
 0x1c8   :  { %12456 = vst [vmem:[#allocation139_spill] sm:$0xff] %v6774_v5  ;;  %v12462_v5 = vld [vmem:[#allocation56_spill] sm:$0xff] }
 0x1c9   :  { %1171 = vrot.lane.b32.xlu1 %v12452_v0, %s5924_s14  ;;  %v12459_v0 = vld [vmem:[#allocation52_spill] sm:$0xff] }
 0x1cb   :  { %v6770_v60 = vpop.permute.xlu1 %1087 }
 0x1cc   :  { %1185 = vrot.lane.b32.xlu2 %v6374_v24, %s5924_s14  ;;  %12454 = vst [vmem:[#allocation138_spill] sm:$0xff] %v6770_v60  ;;  %v12461_v60 = vld [vmem:[#allocation55_spill] sm:$0xff] }
 0x1cd   :  { %1175 = vrot.lane.b32.xlu0 %v12459_v0, %s5924_s14 }
 0x1ce   :  { %v6768_v30 = vpop.permute.xlu2 %1119 }
 0x1cf   :  { %12453 = vst [vmem:[#allocation137_spill] sm:$0xff] %v6768_v30  ;;  %v6786_v30 = vpop.permute.xlu0 %1091 }
 0x1d0   :  { %12460 = vst [vmem:[#allocation52_spill] sm:$0xff] %v6786_v30 }
 0x1d1   :  { %1177 = vrot.lane.b32.xlu1 %v6401_v46, %s5924_s14  ;;  %v12465_v46 = vld [vmem:[#allocation57_spill] sm:$0xff] }
 0x1d3   :  { %v6782_v21 = vpop.permute.xlu1 %1093 }
 0x1d4   :  { %1191 = vrot.lane.b32.xlu2 %v6398_v1, %s5924_s14  ;;  %12458 = vst [vmem:[#allocation141_spill] sm:$0xff] %v6782_v21 }
 0x1d5   :  { %1181 = vrot.lane.b32.xlu0 %v12465_v46, %s5924_s14 }
 0x1d6   :  { %v6780_v36 = vpop.permute.xlu2 %1125 }
 0x1d7   :  { %12457 = vst [vmem:[#allocation140_spill] sm:$0xff] %v6780_v36  ;;  %v6798_v36 = vpop.permute.xlu0 %1097 }
 0x1d8   :  { %12466 = vst [vmem:[#allocation143_spill] sm:$0xff] %v6798_v36  ;;  %v12470_v36 = vld [vmem:[#allocation66_spill] sm:$0xff] }
 0x1d9   :  { %1183 = vrot.lane.b32.xlu1 %v12462_v5, %s5924_s14 }
 0x1db   :  { %v6794_v1 = vpop.permute.xlu1 %1099 }
 0x1dc   :  { %1197 = vrot.lane.b32.xlu2 %v12461_v60, %s5924_s14  ;;  %12464 = vst [vmem:[#allocation142_spill] sm:$0xff] %v6794_v1 }
 0x1dd   :  { %1187 = vrot.lane.b32.xlu0 %v6468_v22, %s5924_s14 }
 0x1de   :  { %v6792_v48 = vpop.permute.xlu2 %1131 }
 0x1df   :  { %12463 = vst [vmem:[#allocation56_spill] sm:$0xff] %v6792_v48  ;;  %v6810_v48 = vpop.permute.xlu0 %1103 }
 0x1e0   :  { %12469 = vst [vmem:[#allocation146_spill] sm:$0xff] %v6810_v48 }
 0x1e1   :  { %1189 = vrot.lane.b32.xlu1 %v6459_v10, %s5924_s14 }
 0x1e3   :  { %v6806_v21 = vpop.permute.xlu1 %1105 }
 0x1e4   :  { %1203 = vrot.lane.b32.xlu2 %v6457_v16, %s5924_s14  ;;  %12468 = vst [vmem:[#allocation145_spill] sm:$0xff] %v6806_v21 }
 0x1e5   :  { %1193 = vrot.lane.b32.xlu0 %v6490_v11, %s5924_s14 }
 0x1e6   :  { %v6804_v30 = vpop.permute.xlu2 %1137 }
 0x1e7   :  { %12467 = vst [vmem:[#allocation144_spill] sm:$0xff] %v6804_v30  ;;  %v6822_v30 = vpop.permute.xlu0 %1109 }
 0x1e8   :  { %12473 = vst [vmem:[#allocation149_spill] sm:$0xff] %v6822_v30 }
 0x1e9   :  { %1195 = vrot.lane.b32.xlu1 %v12470_v36, %s5924_s14 }
 0x1eb   :  { %v6818_v16 = vpop.permute.xlu1 %1111 }
 0x1ec   :  { %1209 = vrot.lane.b32.xlu2 %v6478_v31, %s5924_s14  ;;  %12472 = vst [vmem:[#allocation148_spill] sm:$0xff] %v6818_v16 }
 0x1ed   :  { %1199 = vrot.lane.b32.xlu0 %v6513_v50, %s5924_s14 }
 0x1ee   :  { %v6816_v1 = vpop.permute.xlu2 %1143 }
 0x1ef   :  { %12471 = vst [vmem:[#allocation147_spill] sm:$0xff] %v6816_v1  ;;  %v6834_v1 = vpop.permute.xlu0 %1115 }
 0x1f0   :  { %12476 = vst [vmem:[#allocation152_spill] sm:$0xff] %v6834_v1 }
 0x1f1   :  { %1201 = vrot.lane.b32.xlu1 %v6504_v13, %s5924_s14  ;;  %v12479_v13 = vld [vmem:[#allocation76_spill] sm:$0xff] }
 0x1f3   :  { %v6830_v21 = vpop.permute.xlu1 %1117 }
 0x1f4   :  { %1215 = vrot.lane.b32.xlu2 %v6500_v26, %s5924_s14  ;;  %12475 = vst [vmem:[#allocation151_spill] sm:$0xff] %v6830_v21 }
 0x1f5   :  { %1205 = vrot.lane.b32.xlu0 %v12479_v13, %s5924_s14 }
 0x1f6   :  { %v6828_v48 = vpop.permute.xlu2 %1149 }
 0x1f7   :  { %12474 = vst [vmem:[#allocation150_spill] sm:$0xff] %v6828_v48  ;;  %v6846_v48 = vpop.permute.xlu0 %1121 }
 0x1f8   :  { %12480 = vst [vmem:[#allocation76_spill] sm:$0xff] %v6846_v48 }
 0x1f9   :  { %1207 = vrot.lane.b32.xlu1 %v6527_v51, %s5924_s14 }
 0x1fb   :  { %v6842_v16 = vpop.permute.xlu1 %1123 }
 0x1fc   :  { %1221 = vrot.lane.b32.xlu2 %v6523_v42, %s5924_s14  ;;  %12478 = vst [vmem:[#allocation154_spill] sm:$0xff] %v6842_v16 }
 0x1fd   :  { %1211 = vrot.lane.b32.xlu0 %v6554_v62, %s5924_s14 }
 0x1fe   :  { %v6840_v30 = vpop.permute.xlu2 %1155 }
 0x1ff   :  { %12477 = vst [vmem:[#allocation153_spill] sm:$0xff] %v6840_v30  ;;  %v6858_v30 = vpop.permute.xlu0 %1127 }
 0x200   :  { %12483 = vst [vmem:[#allocation157_spill] sm:$0xff] %v6858_v30 }
 0x201   :  { %1213 = vrot.lane.b32.xlu1 %v6548_v49, %s5924_s14 }
 0x203   :  { %v6854_v21 = vpop.permute.xlu1 %1129 }
 0x204   :  { %1227 = vrot.lane.b32.xlu2 %v6544_v45, %s5924_s14  ;;  %12482 = vst [vmem:[#allocation156_spill] sm:$0xff] %v6854_v21 }
 0x205   :  { %1217 = vrot.lane.b32.xlu0 %v6570_v17, %s5924_s14 }
 0x206   :  { %v6852_v1 = vpop.permute.xlu2 %1161 }
 0x207   :  { %12481 = vst [vmem:[#allocation155_spill] sm:$0xff] %v6852_v1  ;;  %v6870_v1 = vpop.permute.xlu0 %1133 }
 0x208   :  { %12486 = vst [vmem:[#allocation160_spill] sm:$0xff] %v6870_v1 }
 0x209   :  { %1219 = vrot.lane.b32.xlu1 %v6564_v23, %s5924_s14 }
 0x20b   :  { %v6866_v16 = vpop.permute.xlu1 %1135 }
 0x20c   :  { %1233 = vrot.lane.b32.xlu2 %v6086_v38, %s5925_s15  ;;  %12485 = vst [vmem:[#allocation159_spill] sm:$0xff] %v6866_v16 }
 0x20d   :  { %1223 = vrot.lane.b32.xlu0 %v6586_v27, %s5924_s14 }
 0x20e   :  { %v6864_v48 = vpop.permute.xlu2 %1167 }
 0x20f   :  { %12484 = vst [vmem:[#allocation158_spill] sm:$0xff] %v6864_v48  ;;  %v6882_v48 = vpop.permute.xlu0 %1139 }
 0x210   :  { %12489 = vst [vmem:[#allocation163_spill] sm:$0xff] %v6882_v48 }
 0x211   :  { %1225 = vrot.lane.b32.xlu1 %v6580_v18, %s5924_s14 }
 0x213   :  { %v6878_v21 = vpop.permute.xlu1 %1141 }
 0x214   :  { %1239 = vrot.lane.b32.xlu2 %v6105_v3, %s5925_s15  ;;  %12488 = vst [vmem:[#allocation162_spill] sm:$0xff] %v6878_v21 }
 0x215   :  { %1229 = vrot.lane.b32.xlu0 %v6032_v35, %s5925_s15 }
 0x216   :  { %v6876_v30 = vpop.permute.xlu2 %1173 }
 0x217   :  { %12487 = vst [vmem:[#allocation161_spill] sm:$0xff] %v6876_v30  ;;  %v6894_v30 = vpop.permute.xlu0 %1145 }
 0x218   :  { %12492 = vst [vmem:[#allocation166_spill] sm:$0xff] %v6894_v30 }
 0x219   :  { %1231 = vrot.lane.b32.xlu1 %v6123_v40, %s5925_s15 }
 0x21b   :  { %v6890_v16 = vpop.permute.xlu1 %1147 }
 0x21c   :  { %1245 = vrot.lane.b32.xlu2 %v6030_v33, %s5925_s15  ;;  %12491 = vst [vmem:[#allocation165_spill] sm:$0xff] %v6890_v16 }
 0x21d   :  { %1235 = vrot.lane.b32.xlu0 %v6154_v19, %s5925_s15 }
 0x21e   :  { %v6888_v1 = vpop.permute.xlu2 %1179 }
 0x21f   :  { %12490 = vst [vmem:[#allocation164_spill] sm:$0xff] %v6888_v1  ;;  %v6906_v1 = vpop.permute.xlu0 %1151 }
 0x220   :  { %12495 = vst [vmem:[#allocation169_spill] sm:$0xff] %v6906_v1 }
 0x221   :  { %1237 = vrot.lane.b32.xlu1 %v6065_v12, %s5925_s15 }
 0x223   :  { %v6902_v21 = vpop.permute.xlu1 %1153 }
 0x224   :  { %1251 = vrot.lane.b32.xlu2 %v6121_v34, %s5925_s15  ;;  %12494 = vst [vmem:[#allocation168_spill] sm:$0xff] %v6902_v21 }
 0x225   :  { %1241 = vrot.lane.b32.xlu0 %v6171_v55, %s5925_s15 }
 0x226   :  { %v6900_v48 = vpop.permute.xlu2 %1185 }
 0x227   :  { %12493 = vst [vmem:[#allocation167_spill] sm:$0xff] %v6900_v48  ;;  %v6918_v48 = vpop.permute.xlu0 %1157 }
 0x228   :  { %12498 = vst [vmem:[#allocation172_spill] sm:$0xff] %v6918_v48 }
 0x229   :  { %1243 = vrot.lane.b32.xlu1 %v6142_v14, %s5925_s15 }
 0x22b   :  { %v6914_v16 = vpop.permute.xlu1 %1159 }
 0x22c   :  { %1257 = vrot.lane.b32.xlu2 %v6140_v2, %s5925_s15  ;;  %12497 = vst [vmem:[#allocation171_spill] sm:$0xff] %v6914_v16 }
 0x22d   :  { %1247 = vrot.lane.b32.xlu0 %v6053_v63, %s5925_s15 }
 0x22e   :  { %v6912_v30 = vpop.permute.xlu2 %1191 }
 0x22f   :  { %12496 = vst [vmem:[#allocation170_spill] sm:$0xff] %v6912_v30  ;;  %v6930_v30 = vpop.permute.xlu0 %1163 }
 0x230   :  { %12501 = vst [vmem:[#allocation175_spill] sm:$0xff] %v6930_v30 }
 0x231   :  { %1249 = vrot.lane.b32.xlu1 %v6165_v4, %s5925_s15 }
 0x233   :  { %v6926_v21 = vpop.permute.xlu1 %1165 }
 0x234   :  { %1263 = vrot.lane.b32.xlu2 %v6047_v52, %s5925_s15  ;;  %12500 = vst [vmem:[#allocation174_spill] sm:$0xff] %v6926_v21 }
 0x235   :  { %1253 = vrot.lane.b32.xlu0 %v6196_v29, %s5925_s15 }
 0x236   :  { %v6924_v1 = vpop.permute.xlu2 %1197 }
 0x237   :  { %12499 = vst [vmem:[#allocation173_spill] sm:$0xff] %v6924_v1  ;;  %v6942_v1 = vpop.permute.xlu0 %1169 }
 0x238   :  { %12504 = vst [vmem:[#allocation178_spill] sm:$0xff] %v6942_v1 }
 0x239   :  { %1255 = vrot.lane.b32.xlu1 %v6083_v32, %s5925_s15 }
 0x23b   :  { %v6938_v16 = vpop.permute.xlu1 %1171 }
 0x23c   :  { %1269 = vrot.lane.b32.xlu2 %v6163_v43, %s5925_s15  ;;  %12503 = vst [vmem:[#allocation177_spill] sm:$0xff] %v6938_v16 }
 0x23d   :  { %1259 = vrot.lane.b32.xlu0 %v6223_v15, %s5925_s15 }
 0x23e   :  { %v6936_v48 = vpop.permute.xlu2 %1203 }
 0x23f   :  { %12502 = vst [vmem:[#allocation176_spill] sm:$0xff] %v6936_v48  ;;  %v6954_v48 = vpop.permute.xlu0 %1175 }
 0x240   :  { %12507 = vst [vmem:[#allocation181_spill] sm:$0xff] %v6954_v48 }
 0x241   :  { %1261 = vrot.lane.b32.xlu1 %v6187_v20, %s5925_s15 }
 0x243   :  { %v6950_v21 = vpop.permute.xlu1 %1177 }
 0x244   :  { %1275 = vrot.lane.b32.xlu2 %v6183_v39, %s5925_s15  ;;  %12506 = vst [vmem:[#allocation180_spill] sm:$0xff] %v6950_v21 }
 0x245   :  { %1265 = vrot.lane.b32.xlu0 %v6094_v53, %s5925_s15 }
 0x246   :  { %v6948_v30 = vpop.permute.xlu2 %1209 }
 0x247   :  { %12505 = vst [vmem:[#allocation179_spill] sm:$0xff] %v6948_v30  ;;  %v6966_v30 = vpop.permute.xlu0 %1181 }
 0x248   :  { %12510 = vst [vmem:[#allocation184_spill] sm:$0xff] %v6966_v30 }
 0x249   :  { %1267 = vrot.lane.b32.xlu1 %v6210_v61, %s5925_s15 }
 0x24b   :  { %v6962_v16 = vpop.permute.xlu1 %1183 }
 0x24c   :  { %1281 = vrot.lane.b32.xlu2 %v6060_v9, %s5925_s15  ;;  %12509 = vst [vmem:[#allocation183_spill] sm:$0xff] %v6962_v16 }
 0x24d   :  { %1271 = vrot.lane.b32.xlu0 %v6240_v56, %s5925_s15 }
 0x24e   :  { %v6960_v1 = vpop.permute.xlu2 %1215 }
 0x24f   :  { %12508 = vst [vmem:[#allocation182_spill] sm:$0xff] %v6960_v1  ;;  %v6978_v1 = vpop.permute.xlu0 %1187 }
 0x250   :  { %12513 = vst [vmem:[#allocation187_spill] sm:$0xff] %v6978_v1 }
 0x251   :  { %1273 = vrot.lane.b32.xlu1 %v6108_v7, %s5925_s15 }
 0x253   :  { %v6974_v21 = vpop.permute.xlu1 %1189 }
 0x254   :  { %1287 = vrot.lane.b32.xlu2 %v6206_v57, %s5925_s15  ;;  %12512 = vst [vmem:[#allocation186_spill] sm:$0xff] %v6974_v21 }
 0x255   :  { %1277 = vrot.lane.b32.xlu0 %v12421_v44, %s5925_s15 }
 0x256   :  { %v6972_v48 = vpop.permute.xlu2 %1221 }
 0x257   :  { %12511 = vst [vmem:[#allocation185_spill] sm:$0xff] %v6972_v48  ;;  %v6990_v48 = vpop.permute.xlu0 %1193 }
 0x258   :  { %12516 = vst [vmem:[#allocation190_spill] sm:$0xff] %v6990_v48 }
 0x259   :  { %1279 = vrot.lane.b32.xlu1 %v12418_v41, %s5925_s15 }
 0x25b   :  { %v6986_v16 = vpop.permute.xlu1 %1195 }
 0x25c   :  { %1293 = vrot.lane.b32.xlu2 %v12417_v59, %s5925_s15  ;;  %12515 = vst [vmem:[#allocation189_spill] sm:$0xff] %v6986_v16 }
 0x25d   :  { %1283 = vrot.lane.b32.xlu0 %v12427_v6, %s5925_s15 }
 0x25e   :  { %v6984_v30 = vpop.permute.xlu2 %1227 }
 0x25f   :  { %12514 = vst [vmem:[#allocation188_spill] sm:$0xff] %v6984_v30  ;;  %v7002_v30 = vpop.permute.xlu0 %1199 }
 0x260   :  { %12519 = vst [vmem:[#allocation193_spill] sm:$0xff] %v7002_v30  ;;  %v12525_v30 = vld [vmem:[#allocation32_spill] sm:$0xff] }
 0x261   :  { %1285 = vrot.lane.b32.xlu1 %v12424_v58, %s5925_s15  ;;  %v12522_v58 = vld [vmem:[#allocation29_spill] sm:$0xff] }
 0x263   :  { %v6998_v21 = vpop.permute.xlu1 %1201 }
 0x264   :  { %1299 = vrot.lane.b32.xlu2 %v12423_v47, %s5925_s15  ;;  %12518 = vst [vmem:[#allocation192_spill] sm:$0xff] %v6998_v21  ;;  %v12524_v21 = vld [vmem:[#allocation31_spill] sm:$0xff] }
 0x265   :  { %1289 = vrot.lane.b32.xlu0 %v12522_v58, %s5925_s15 }
 0x266   :  { %v6996_v1 = vpop.permute.xlu2 %1233 }
 0x267   :  { %12517 = vst [vmem:[#allocation191_spill] sm:$0xff] %v6996_v1  ;;  %v7014_v1 = vpop.permute.xlu0 %1205 }
 0x268   :  { %12523 = vst [vmem:[#allocation196_spill] sm:$0xff] %v7014_v1 }
 0x269   :  { %1291 = vrot.lane.b32.xlu1 %v12430_v25, %s5925_s15  ;;  %v12528_v25 = vld [vmem:[#allocation33_spill] sm:$0xff] }
 0x26b   :  { %v7010_v16 = vpop.permute.xlu1 %1207 }
 0x26c   :  { %1305 = vrot.lane.b32.xlu2 %v12429_v8, %s5925_s15  ;;  %12521 = vst [vmem:[#allocation195_spill] sm:$0xff] %v7010_v16  ;;  %v12530_v16 = vld [vmem:[#allocation35_spill] sm:$0xff] }
 0x26d   :  { %1295 = vrot.lane.b32.xlu0 %v12528_v25, %s5925_s15 }
 0x26e   :  { %v7008_v48 = vpop.permute.xlu2 %1239 }
 0x26f   :  { %12520 = vst [vmem:[#allocation194_spill] sm:$0xff] %v7008_v48  ;;  %v7026_v48 = vpop.permute.xlu0 %1211 }
 0x270   :  { %12529 = vst [vmem:[#allocation198_spill] sm:$0xff] %v7026_v48  ;;  %v12535_v48 = vld [vmem:[#allocation39_spill] sm:$0xff] }
 0x271   :  { %1297 = vrot.lane.b32.xlu1 %v12525_v30, %s5925_s15 }
 0x273   :  { %v7022_v8 = vpop.permute.xlu1 %1213 }
 0x274   :  { %1311 = vrot.lane.b32.xlu2 %v12524_v21, %s5925_s15  ;;  %12527 = vst [vmem:[#allocation197_spill] sm:$0xff] %v7022_v8  ;;  %v12534_v8 = vld [vmem:[#allocation40_spill] sm:$0xff] }
 0x275   :  { %1301 = vrot.lane.b32.xlu0 %v12445_v54, %s5925_s15 }
 0x276   :  { %v7020_v6 = vpop.permute.xlu2 %1245 }
 0x277   :  { %12526 = vst [vmem:[#allocation32_spill] sm:$0xff] %v7020_v6  ;;  %v7038_v6 = vpop.permute.xlu0 %1217 }
 0x278   :  { %12533 = vst [vmem:[#allocation201_spill] sm:$0xff] %v7038_v6  ;;  %v12539_v6 = vld [vmem:[#allocation44_spill] sm:$0xff] }
 0x279   :  { %1303 = vrot.lane.b32.xlu1 %v12442_v37, %s5925_s15 }
 0x27b   :  { %v7034_v21 = vpop.permute.xlu1 %1219 }
 0x27c   :  { %1317 = vrot.lane.b32.xlu2 %v12530_v16, %s5925_s15  ;;  %12532 = vst [vmem:[#allocation200_spill] sm:$0xff] %v7034_v21 }
 0x27d   :  { %1307 = vrot.lane.b32.xlu0 %v6358_v28, %s5925_s15 }
 0x27e   :  { %v7032_v1 = vpop.permute.xlu2 %1251 }
 0x27f   :  { %12531 = vst [vmem:[#allocation199_spill] sm:$0xff] %v7032_v1  ;;  %v7050_v1 = vpop.permute.xlu0 %1223 }
 0x280   :  { %12538 = vst [vmem:[#allocation204_spill] sm:$0xff] %v7050_v1  ;;  %v12545_v1 = vld [vmem:[#allocation50_spill] sm:$0xff] }
 0x281   :  { %1309 = vrot.lane.b32.xlu1 %v12535_v48, %s5925_s15  ;;  %v12542_v48 = vld [vmem:[#allocation46_spill] sm:$0xff] }
 0x283   :  { %v7046_v16 = vpop.permute.xlu1 %1225 }
 0x284   :  { %1323 = vrot.lane.b32.xlu2 %v12534_v8, %s5925_s15  ;;  %12537 = vst [vmem:[#allocation203_spill] sm:$0xff] %v7046_v16  ;;  %v12544_v16 = vld [vmem:[#allocation49_spill] sm:$0xff] }
 0x285   :  { %1313 = vrot.lane.b32.xlu0 %v12542_v48, %s5925_s15 }
 0x286   :  { %v7044_v25 = vpop.permute.xlu2 %1257 }
 0x287   :  { %12536 = vst [vmem:[#allocation202_spill] sm:$0xff] %v7044_v25  ;;  %v7062_v25 = vpop.permute.xlu0 %1229 }
 0x288   :  { %12543 = vst [vmem:[#allocation46_spill] sm:$0xff] %v7062_v25 }
 0x289   :  { %1315 = vrot.lane.b32.xlu1 %v12539_v6, %s5925_s15 }
 0x28b   :  { %v7058_v8 = vpop.permute.xlu1 %1231 }
 0x28c   :  { %1329 = vrot.lane.b32.xlu2 %v6374_v24, %s5925_s15  ;;  %12541 = vst [vmem:[#allocation205_spill] sm:$0xff] %v7058_v8 }
 0x28d   :  { %1319 = vrot.lane.b32.xlu0 %v12459_v0, %s5925_s15 }
 0x28e   :  { %v7056_v21 = vpop.permute.xlu2 %1263 }
 0x28f   :  { %12540 = vst [vmem:[#allocation44_spill] sm:$0xff] %v7056_v21  ;;  %v7074_v21 = vpop.permute.xlu0 %1235 }
 0x290   :  { %12548 = vst [vmem:[#allocation208_spill] sm:$0xff] %v7074_v21 }
 0x291   :  { %1321 = vrot.lane.b32.xlu1 %v12545_v1, %s5925_s15 }
 0x293   :  { %v7070_v24 = vpop.permute.xlu1 %1237 }
 0x294   :  { %1335 = vrot.lane.b32.xlu2 %v12544_v16, %s5925_s15  ;;  %12547 = vst [vmem:[#allocation207_spill] sm:$0xff] %v7070_v24  ;;  %v12552_v24 = vld [vmem:[#allocation61_spill] sm:$0xff] }
 0x295   :  { %1325 = vrot.lane.b32.xlu0 %v12465_v46, %s5925_s15 }
 0x296   :  { %v7068_v28 = vpop.permute.xlu2 %1269 }
 0x297   :  { %12546 = vst [vmem:[#allocation206_spill] sm:$0xff] %v7068_v28  ;;  %v7086_v28 = vpop.permute.xlu0 %1241 }
 0x298   :  { %12551 = vst [vmem:[#allocation211_spill] sm:$0xff] %v7086_v28 }
 0x299   :  { %1327 = vrot.lane.b32.xlu1 %v12462_v5, %s5925_s15 }
 0x29b   :  { %v7082_v8 = vpop.permute.xlu1 %1243 }
 0x29c   :  { %1341 = vrot.lane.b32.xlu2 %v12461_v60, %s5925_s15  ;;  %12550 = vst [vmem:[#allocation210_spill] sm:$0xff] %v7082_v8 }
 0x29d   :  { %1331 = vrot.lane.b32.xlu0 %v6468_v22, %s5925_s15 }
 0x29e   :  { %v7080_v25 = vpop.permute.xlu2 %1275 }
 0x29f   :  { %12549 = vst [vmem:[#allocation209_spill] sm:$0xff] %v7080_v25  ;;  %v7098_v25 = vpop.permute.xlu0 %1247 }
 0x2a0   :  { %12555 = vst [vmem:[#allocation214_spill] sm:$0xff] %v7098_v25  ;;  %v12559_v25 = vld [vmem:[#allocation71_spill] sm:$0xff] }
 0x2a1   :  { %1333 = vrot.lane.b32.xlu1 %v6459_v10, %s5925_s15 }
 0x2a3   :  { %v7094_v60 = vpop.permute.xlu1 %1249 }
 0x2a4   :  { %1347 = vrot.lane.b32.xlu2 %v12552_v24, %s5925_s15  ;;  %12554 = vst [vmem:[#allocation213_spill] sm:$0xff] %v7094_v60 }
 0x2a5   :  { %1337 = vrot.lane.b32.xlu0 %v6490_v11, %s5925_s15 }
 0x2a6   :  { %v7092_v21 = vpop.permute.xlu2 %1281 }
 0x2a7   :  { %12553 = vst [vmem:[#allocation212_spill] sm:$0xff] %v7092_v21  ;;  %v7110_v21 = vpop.permute.xlu0 %1253 }
 0x2a8   :  { %12558 = vst [vmem:[#allocation217_spill] sm:$0xff] %v7110_v21 }
 0x2a9   :  { %1339 = vrot.lane.b32.xlu1 %v12470_v36, %s5925_s15 }
 0x2ab   :  { %v7106_v8 = vpop.permute.xlu1 %1255 }
 0x2ac   :  { %1353 = vrot.lane.b32.xlu2 %v6478_v31, %s5925_s15  ;;  %12557 = vst [vmem:[#allocation216_spill] sm:$0xff] %v7106_v8 }
 0x2ad   :  { %1343 = vrot.lane.b32.xlu0 %v6513_v50, %s5925_s15 }
 0x2ae   :  { %v7104_v28 = vpop.permute.xlu2 %1287 }
 0x2af   :  { %12556 = vst [vmem:[#allocation215_spill] sm:$0xff] %v7104_v28  ;;  %v7122_v28 = vpop.permute.xlu0 %1259 }
 0x2b0   :  { %12562 = vst [vmem:[#allocation219_spill] sm:$0xff] %v7122_v28 }
 0x2b1   :  { %1345 = vrot.lane.b32.xlu1 %v12559_v25, %s5925_s15 }
 0x2b3   :  { %v7118_v31 = vpop.permute.xlu1 %1261 }
 0x2b4   :  { %1359 = vrot.lane.b32.xlu2 %v6500_v26, %s5925_s15  ;;  %12561 = vst [vmem:[#allocation218_spill] sm:$0xff] %v7118_v31 }
 0x2b5   :  { %1349 = vrot.lane.b32.xlu0 %v12479_v13, %s5925_s15 }
 0x2b6   :  { %v7116_v60 = vpop.permute.xlu2 %1293 }
 0x2b7   :  { %12560 = vst [vmem:[#allocation71_spill] sm:$0xff] %v7116_v60  ;;  %v7134_v60 = vpop.permute.xlu0 %1265 }
 0x2b8   :  { %12565 = vst [vmem:[#allocation222_spill] sm:$0xff] %v7134_v60 }
 0x2b9   :  { %1351 = vrot.lane.b32.xlu1 %v6527_v51, %s5925_s15 }
 0x2bb   :  { %v7130_v8 = vpop.permute.xlu1 %1267 }
 0x2bc   :  { %1365 = vrot.lane.b32.xlu2 %v6523_v42, %s5925_s15  ;;  %12564 = vst [vmem:[#allocation221_spill] sm:$0xff] %v7130_v8 }
 0x2bd   :  { %1355 = vrot.lane.b32.xlu0 %v6554_v62, %s5925_s15 }
 0x2be   :  { %v7128_v21 = vpop.permute.xlu2 %1299 }
 0x2bf   :  { %12563 = vst [vmem:[#allocation220_spill] sm:$0xff] %v7128_v21  ;;  %v7146_v21 = vpop.permute.xlu0 %1271 }
 0x2c0   :  { %12568 = vst [vmem:[#allocation225_spill] sm:$0xff] %v7146_v21 }
 0x2c1   :  { %1357 = vrot.lane.b32.xlu1 %v6548_v49, %s5925_s15 }
 0x2c3   :  { %v7142_v31 = vpop.permute.xlu1 %1273 }
 0x2c4   :  { %1371 = vrot.lane.b32.xlu2 %v6544_v45, %s5925_s15  ;;  %12567 = vst [vmem:[#allocation224_spill] sm:$0xff] %v7142_v31 }
 0x2c5   :  { %1361 = vrot.lane.b32.xlu0 %v6570_v17, %s5925_s15 }
 0x2c6   :  { %v7140_v28 = vpop.permute.xlu2 %1305 }
 0x2c7   :  { %12566 = vst [vmem:[#allocation223_spill] sm:$0xff] %v7140_v28  ;;  %v7158_v28 = vpop.permute.xlu0 %1277 }
 0x2c8   :  { %12571 = vst [vmem:[#allocation228_spill] sm:$0xff] %v7158_v28 }
 0x2c9   :  { %1363 = vrot.lane.b32.xlu1 %v6564_v23, %s5925_s15 }
 0x2cb   :  { %v7154_v8 = vpop.permute.xlu1 %1279 }
 0x2cc   :  { %1377 = vrot.lane.b32.xlu2 %v6086_v38, %s5926_s16  ;;  %12570 = vst [vmem:[#allocation227_spill] sm:$0xff] %v7154_v8 }
 0x2cd   :  { %1367 = vrot.lane.b32.xlu0 %v6586_v27, %s5925_s15 }
 0x2ce   :  { %v7152_v60 = vpop.permute.xlu2 %1311 }
 0x2cf   :  { %12569 = vst [vmem:[#allocation226_spill] sm:$0xff] %v7152_v60  ;;  %v7170_v60 = vpop.permute.xlu0 %1283 }
 0x2d0   :  { %12574 = vst [vmem:[#allocation231_spill] sm:$0xff] %v7170_v60 }
 0x2d1   :  { %1369 = vrot.lane.b32.xlu1 %v6580_v18, %s5925_s15 }
 0x2d3   :  { %v7166_v31 = vpop.permute.xlu1 %1285 }
 0x2d4   :  { %1383 = vrot.lane.b32.xlu2 %v6105_v3, %s5926_s16  ;;  %12573 = vst [vmem:[#allocation230_spill] sm:$0xff] %v7166_v31 }
 0x2d5   :  { %1373 = vrot.lane.b32.xlu0 %v6032_v35, %s5926_s16 }
 0x2d6   :  { %v7164_v21 = vpop.permute.xlu2 %1317 }
 0x2d7   :  { %12572 = vst [vmem:[#allocation229_spill] sm:$0xff] %v7164_v21  ;;  %v7182_v21 = vpop.permute.xlu0 %1289 }
 0x2d8   :  { %12577 = vst [vmem:[#allocation234_spill] sm:$0xff] %v7182_v21 }
 0x2d9   :  { %1375 = vrot.lane.b32.xlu1 %v6123_v40, %s5926_s16 }
 0x2db   :  { %v7178_v8 = vpop.permute.xlu1 %1291 }
 0x2dc   :  { %1389 = vrot.lane.b32.xlu2 %v6030_v33, %s5926_s16  ;;  %12576 = vst [vmem:[#allocation233_spill] sm:$0xff] %v7178_v8 }
 0x2dd   :  { %1379 = vrot.lane.b32.xlu0 %v6154_v19, %s5926_s16 }
 0x2de   :  { %v7176_v28 = vpop.permute.xlu2 %1323 }
 0x2df   :  { %12575 = vst [vmem:[#allocation232_spill] sm:$0xff] %v7176_v28  ;;  %v7194_v28 = vpop.permute.xlu0 %1295 }
 0x2e0   :  { %12580 = vst [vmem:[#allocation237_spill] sm:$0xff] %v7194_v28 }
 0x2e1   :  { %1381 = vrot.lane.b32.xlu1 %v6065_v12, %s5926_s16 }
 0x2e3   :  { %v7190_v31 = vpop.permute.xlu1 %1297 }
 0x2e4   :  { %1395 = vrot.lane.b32.xlu2 %v6121_v34, %s5926_s16  ;;  %12579 = vst [vmem:[#allocation236_spill] sm:$0xff] %v7190_v31 }
 0x2e5   :  { %1385 = vrot.lane.b32.xlu0 %v6171_v55, %s5926_s16 }
 0x2e6   :  { %v7188_v60 = vpop.permute.xlu2 %1329 }
 0x2e7   :  { %12578 = vst [vmem:[#allocation235_spill] sm:$0xff] %v7188_v60  ;;  %v7206_v60 = vpop.permute.xlu0 %1301 }
 0x2e8   :  { %12583 = vst [vmem:[#allocation240_spill] sm:$0xff] %v7206_v60 }
 0x2e9   :  { %1387 = vrot.lane.b32.xlu1 %v6142_v14, %s5926_s16 }
 0x2eb   :  { %v7202_v8 = vpop.permute.xlu1 %1303 }
 0x2ec   :  { %1401 = vrot.lane.b32.xlu2 %v6140_v2, %s5926_s16  ;;  %12582 = vst [vmem:[#allocation239_spill] sm:$0xff] %v7202_v8 }
 0x2ed   :  { %1391 = vrot.lane.b32.xlu0 %v6053_v63, %s5926_s16 }
 0x2ee   :  { %v7200_v21 = vpop.permute.xlu2 %1335 }
 0x2ef   :  { %12581 = vst [vmem:[#allocation238_spill] sm:$0xff] %v7200_v21  ;;  %v7218_v21 = vpop.permute.xlu0 %1307 }
 0x2f0   :  { %12586 = vst [vmem:[#allocation243_spill] sm:$0xff] %v7218_v21 }
 0x2f1   :  { %1393 = vrot.lane.b32.xlu1 %v6165_v4, %s5926_s16 }
 0x2f3   :  { %v7214_v31 = vpop.permute.xlu1 %1309 }
 0x2f4   :  { %1407 = vrot.lane.b32.xlu2 %v6047_v52, %s5926_s16  ;;  %12585 = vst [vmem:[#allocation242_spill] sm:$0xff] %v7214_v31 }
 0x2f5   :  { %1397 = vrot.lane.b32.xlu0 %v6196_v29, %s5926_s16 }
 0x2f6   :  { %v7212_v28 = vpop.permute.xlu2 %1341 }
 0x2f7   :  { %12584 = vst [vmem:[#allocation241_spill] sm:$0xff] %v7212_v28  ;;  %v7230_v28 = vpop.permute.xlu0 %1313 }
 0x2f8   :  { %12589 = vst [vmem:[#allocation246_spill] sm:$0xff] %v7230_v28 }
 0x2f9   :  { %1399 = vrot.lane.b32.xlu1 %v6083_v32, %s5926_s16 }
 0x2fb   :  { %v7226_v8 = vpop.permute.xlu1 %1315 }
 0x2fc   :  { %1413 = vrot.lane.b32.xlu2 %v6163_v43, %s5926_s16  ;;  %12588 = vst [vmem:[#allocation245_spill] sm:$0xff] %v7226_v8 }
 0x2fd   :  { %1403 = vrot.lane.b32.xlu0 %v6223_v15, %s5926_s16 }
 0x2fe   :  { %v7224_v60 = vpop.permute.xlu2 %1347 }
 0x2ff   :  { %12587 = vst [vmem:[#allocation244_spill] sm:$0xff] %v7224_v60  ;;  %v7242_v60 = vpop.permute.xlu0 %1319 }
 0x300   :  { %12592 = vst [vmem:[#allocation249_spill] sm:$0xff] %v7242_v60 }
 0x301   :  { %1405 = vrot.lane.b32.xlu1 %v6187_v20, %s5926_s16 }
 0x303   :  { %v7238_v31 = vpop.permute.xlu1 %1321 }
 0x304   :  { %1419 = vrot.lane.b32.xlu2 %v6183_v39, %s5926_s16  ;;  %12591 = vst [vmem:[#allocation248_spill] sm:$0xff] %v7238_v31 }
 0x305   :  { %1409 = vrot.lane.b32.xlu0 %v6094_v53, %s5926_s16 }
 0x306   :  { %v7236_v21 = vpop.permute.xlu2 %1353 }
 0x307   :  { %12590 = vst [vmem:[#allocation247_spill] sm:$0xff] %v7236_v21  ;;  %v7254_v21 = vpop.permute.xlu0 %1325 }
 0x308   :  { %12595 = vst [vmem:[#allocation252_spill] sm:$0xff] %v7254_v21 }
 0x309   :  { %1411 = vrot.lane.b32.xlu1 %v6210_v61, %s5926_s16 }
 0x30b   :  { %v7250_v8 = vpop.permute.xlu1 %1327 }
 0x30c   :  { %1425 = vrot.lane.b32.xlu2 %v6060_v9, %s5926_s16  ;;  %12594 = vst [vmem:[#allocation251_spill] sm:$0xff] %v7250_v8 }
 0x30d   :  { %1415 = vrot.lane.b32.xlu0 %v6240_v56, %s5926_s16 }
 0x30e   :  { %v7248_v28 = vpop.permute.xlu2 %1359 }
 0x30f   :  { %12593 = vst [vmem:[#allocation250_spill] sm:$0xff] %v7248_v28  ;;  %v7266_v28 = vpop.permute.xlu0 %1331 }
 0x310   :  { %12598 = vst [vmem:[#allocation255_spill] sm:$0xff] %v7266_v28  ;;  %v12602_v28 = vld [vmem:[#allocation24_spill] sm:$0xff] }
 0x311   :  { %1417 = vrot.lane.b32.xlu1 %v6108_v7, %s5926_s16 }
 0x313   :  { %v7262_v31 = vpop.permute.xlu1 %1333 }
 0x314   :  { %1431 = vrot.lane.b32.xlu2 %v6206_v57, %s5926_s16  ;;  %12597 = vst [vmem:[#allocation254_spill] sm:$0xff] %v7262_v31 }
 0x315   :  { %1421 = vrot.lane.b32.xlu0 %v12421_v44, %s5926_s16 }
 0x316   :  { %v7260_v60 = vpop.permute.xlu2 %1365 }
 0x317   :  { %12596 = vst [vmem:[#allocation253_spill] sm:$0xff] %v7260_v60  ;;  %v7278_v60 = vpop.permute.xlu0 %1337 }
 0x318   :  { %12601 = vst [vmem:[#allocation258_spill] sm:$0xff] %v7278_v60  ;;  %v12608_v60 = vld [vmem:[#allocation27_spill] sm:$0xff] }
 0x319   :  { %1423 = vrot.lane.b32.xlu1 %v12418_v41, %s5926_s16  ;;  %v12605_v41 = vld [vmem:[#allocation14_spill] sm:$0xff] }
 0x31b   :  { %v7274_v8 = vpop.permute.xlu1 %1339 }
 0x31c   :  { %1437 = vrot.lane.b32.xlu2 %v12417_v59, %s5926_s16  ;;  %12600 = vst [vmem:[#allocation257_spill] sm:$0xff] %v7274_v8  ;;  %v12607_v8 = vld [vmem:[#allocation28_spill] sm:$0xff] }
 0x31d   :  { %1427 = vrot.lane.b32.xlu0 %v12605_v41, %s5926_s16 }
 0x31e   :  { %v7272_v21 = vpop.permute.xlu2 %1371 }
 0x31f   :  { %12599 = vst [vmem:[#allocation256_spill] sm:$0xff] %v7272_v21  ;;  %v7290_v21 = vpop.permute.xlu0 %1343 }
 0x320   :  { %12606 = vst [vmem:[#allocation261_spill] sm:$0xff] %v7290_v21 }
 0x321   :  { %1429 = vrot.lane.b32.xlu1 %v12602_v28, %s5926_s16 }
 0x323   :  { %v7286_v59 = vpop.permute.xlu1 %1345 }
 0x324   :  { %1443 = vrot.lane.b32.xlu2 %v12423_v47, %s5926_s16  ;;  %12604 = vst [vmem:[#allocation260_spill] sm:$0xff] %v7286_v59  ;;  %v12612_v59 = vld [vmem:[#allocation31_spill] sm:$0xff] }
 0x325   :  { %1433 = vrot.lane.b32.xlu0 %v12522_v58, %s5926_s16 }
 0x326   :  { %v7284_v31 = vpop.permute.xlu2 %1377 }
 0x327   :  { %12603 = vst [vmem:[#allocation259_spill] sm:$0xff] %v7284_v31  ;;  %v7302_v31 = vpop.permute.xlu0 %1349 }
 0x328   :  { %12611 = vst [vmem:[#allocation264_spill] sm:$0xff] %v7302_v31 }
 0x329   :  { %1435 = vrot.lane.b32.xlu1 %v12608_v60, %s5926_s16  ;;  %v12615_v60 = vld [vmem:[#allocation33_spill] sm:$0xff] }
 0x32b   :  { %v7298_v47 = vpop.permute.xlu1 %1351 }
 0x32c   :  { %1449 = vrot.lane.b32.xlu2 %v12607_v8, %s5926_s16  ;;  %12610 = vst [vmem:[#allocation263_spill] sm:$0xff] %v7298_v47  ;;  %v12617_v47 = vld [vmem:[#allocation35_spill] sm:$0xff] }
 0x32d   :  { %1439 = vrot.lane.b32.xlu0 %v12615_v60, %s5926_s16 }
 0x32e   :  { %v7296_v44 = vpop.permute.xlu2 %1383 }
 0x32f   :  { %12609 = vst [vmem:[#allocation262_spill] sm:$0xff] %v7296_v44  ;;  %v7314_v44 = vpop.permute.xlu0 %1355 }
 0x330   :  { %12616 = vst [vmem:[#allocation267_spill] sm:$0xff] %v7314_v44  ;;  %v12622_v44 = vld [vmem:[#allocation39_spill] sm:$0xff] }
 0x331   :  { %1441 = vrot.lane.b32.xlu1 %v12525_v30, %s5926_s16 }
 0x333   :  { %v7310_v8 = vpop.permute.xlu1 %1357 }
 0x334   :  { %1455 = vrot.lane.b32.xlu2 %v12612_v59, %s5926_s16  ;;  %12614 = vst [vmem:[#allocation266_spill] sm:$0xff] %v7310_v8  ;;  %v12621_v8 = vld [vmem:[#allocation40_spill] sm:$0xff] }
 0x335   :  { %1445 = vrot.lane.b32.xlu0 %v12445_v54, %s5926_s16 }
 0x336   :  { %v7308_v21 = vpop.permute.xlu2 %1389 }
 0x337   :  { %12613 = vst [vmem:[#allocation265_spill] sm:$0xff] %v7308_v21  ;;  %v7326_v21 = vpop.permute.xlu0 %1361 }
 0x338   :  { %12620 = vst [vmem:[#allocation270_spill] sm:$0xff] %v7326_v21 }
 0x339   :  { %1447 = vrot.lane.b32.xlu1 %v12442_v37, %s5926_s16  ;;  %v12625_v37 = vld [vmem:[#allocation41_spill] sm:$0xff] }
 0x33b   :  { %v7322_v59 = vpop.permute.xlu1 %1363 }
 0x33c   :  { %1461 = vrot.lane.b32.xlu2 %v12617_v47, %s5926_s16  ;;  %12619 = vst [vmem:[#allocation269_spill] sm:$0xff] %v7322_v59  ;;  %v12627_v59 = vld [vmem:[#allocation43_spill] sm:$0xff] }
 0x33d   :  { %1451 = vrot.lane.b32.xlu0 %v12625_v37, %s5926_s16 }
 0x33e   :  { %v7320_v31 = vpop.permute.xlu2 %1395 }
 0x33f   :  { %12618 = vst [vmem:[#allocation268_spill] sm:$0xff] %v7320_v31  ;;  %v7338_v31 = vpop.permute.xlu0 %1367 }
 0x340   :  { %12626 = vst [vmem:[#allocation272_spill] sm:$0xff] %v7338_v31 }
 0x341   :  { %1453 = vrot.lane.b32.xlu1 %v12622_v44, %s5926_s16 }
 0x343   :  { %v7334_v47 = vpop.permute.xlu1 %1369 }
 0x344   :  { %1467 = vrot.lane.b32.xlu2 %v12621_v8, %s5926_s16  ;;  %12624 = vst [vmem:[#allocation271_spill] sm:$0xff] %v7334_v47 }
 0x345   :  { %1457 = vrot.lane.b32.xlu0 %v12542_v48, %s5926_s16 }
 0x346   :  { %v7332_v60 = vpop.permute.xlu2 %1401 }
 0x347   :  { %12623 = vst [vmem:[#allocation39_spill] sm:$0xff] %v7332_v60  ;;  %v7350_v60 = vpop.permute.xlu0 %1373 }
 0x348   :  { %12630 = vst [vmem:[#allocation275_spill] sm:$0xff] %v7350_v60 }
 0x349   :  { %1459 = vrot.lane.b32.xlu1 %v12539_v6, %s5926_s16 }
 0x34b   :  { %v7346_v8 = vpop.permute.xlu1 %1375 }
 0x34c   :  { %1473 = vrot.lane.b32.xlu2 %v12627_v59, %s5926_s16  ;;  %12629 = vst [vmem:[#allocation274_spill] sm:$0xff] %v7346_v8  ;;  %v12634_v8 = vld [vmem:[#allocation55_spill] sm:$0xff] }
 0x34d   :  { %1463 = vrot.lane.b32.xlu0 %v12459_v0, %s5926_s16 }
 0x34e   :  { %v7344_v21 = vpop.permute.xlu2 %1407 }
 0x34f   :  { %12628 = vst [vmem:[#allocation273_spill] sm:$0xff] %v7344_v21  ;;  %v7362_v21 = vpop.permute.xlu0 %1379 }
 0x350   :  { %12633 = vst [vmem:[#allocation278_spill] sm:$0xff] %v7362_v21 }
 0x351   :  { %1465 = vrot.lane.b32.xlu1 %v12545_v1, %s5926_s16 }
 0x353   :  { %v7358_v31 = vpop.permute.xlu1 %1381 }
 0x354   :  { %1479 = vrot.lane.b32.xlu2 %v12544_v16, %s5926_s16  ;;  %12632 = vst [vmem:[#allocation277_spill] sm:$0xff] %v7358_v31 }
 0x355   :  { %1469 = vrot.lane.b32.xlu0 %v12465_v46, %s5926_s16 }
 0x356   :  { %v7356_v47 = vpop.permute.xlu2 %1413 }
 0x357   :  { %12631 = vst [vmem:[#allocation276_spill] sm:$0xff] %v7356_v47  ;;  %v7374_v47 = vpop.permute.xlu0 %1385 }
 0x358   :  { %12637 = vst [vmem:[#allocation281_spill] sm:$0xff] %v7374_v47 }
 0x359   :  { %1471 = vrot.lane.b32.xlu1 %v12462_v5, %s5926_s16 }
 0x35b   :  { %v7370_v16 = vpop.permute.xlu1 %1387 }
 0x35c   :  { %1485 = vrot.lane.b32.xlu2 %v12634_v8, %s5926_s16  ;;  %12636 = vst [vmem:[#allocation280_spill] sm:$0xff] %v7370_v16  ;;  %v12641_v16 = vld [vmem:[#allocation64_spill] sm:$0xff] }
 0x35d   :  { %1475 = vrot.lane.b32.xlu0 %v6468_v22, %s5926_s16 }
 0x35e   :  { %v7368_v60 = vpop.permute.xlu2 %1419 }
 0x35f   :  { %12635 = vst [vmem:[#allocation279_spill] sm:$0xff] %v7368_v60  ;;  %v7386_v60 = vpop.permute.xlu0 %1391 }
 0x360   :  { %12640 = vst [vmem:[#allocation284_spill] sm:$0xff] %v7386_v60 }
 0x361   :  { %1477 = vrot.lane.b32.xlu1 %v6459_v10, %s5926_s16 }
 0x363   :  { %v7382_v21 = vpop.permute.xlu1 %1393 }
 0x364   :  { %1491 = vrot.lane.b32.xlu2 %v12552_v24, %s5926_s16  ;;  %12639 = vst [vmem:[#allocation283_spill] sm:$0xff] %v7382_v21 }
 0x365   :  { %1481 = vrot.lane.b32.xlu0 %v6490_v11, %s5926_s16 }
 0x366   :  { %v7380_v31 = vpop.permute.xlu2 %1425 }
 0x367   :  { %12638 = vst [vmem:[#allocation282_spill] sm:$0xff] %v7380_v31  ;;  %v7398_v31 = vpop.permute.xlu0 %1397 }
 0x368   :  { %12644 = vst [vmem:[#allocation287_spill] sm:$0xff] %v7398_v31 }
 0x369   :  { %1483 = vrot.lane.b32.xlu1 %v12470_v36, %s5926_s16 }
 0x36b   :  { %v7394_v24 = vpop.permute.xlu1 %1399 }
 0x36c   :  { %1497 = vrot.lane.b32.xlu2 %v12641_v16, %s5926_s16  ;;  %12643 = vst [vmem:[#allocation286_spill] sm:$0xff] %v7394_v24 }
 0x36d   :  { %1487 = vrot.lane.b32.xlu0 %v6513_v50, %s5926_s16 }
 0x36e   :  { %v7392_v47 = vpop.permute.xlu2 %1431 }
 0x36f   :  { %12642 = vst [vmem:[#allocation285_spill] sm:$0xff] %v7392_v47  ;;  %v7410_v47 = vpop.permute.xlu0 %1403 }
 0x370   :  { %12647 = vst [vmem:[#allocation290_spill] sm:$0xff] %v7410_v47 }
 0x371   :  { %1489 = vrot.lane.b32.xlu1 %v12559_v25, %s5926_s16 }
 0x373   :  { %v7406_v21 = vpop.permute.xlu1 %1405 }
 0x374   :  { %1503 = vrot.lane.b32.xlu2 %v6500_v26, %s5926_s16  ;;  %12646 = vst [vmem:[#allocation289_spill] sm:$0xff] %v7406_v21 }
 0x375   :  { %1493 = vrot.lane.b32.xlu0 %v12479_v13, %s5926_s16 }
 0x376   :  { %v7404_v60 = vpop.permute.xlu2 %1437 }
 0x377   :  { %12645 = vst [vmem:[#allocation288_spill] sm:$0xff] %v7404_v60  ;;  %v7422_v60 = vpop.permute.xlu0 %1409 }
 0x378   :  { %12650 = vst [vmem:[#allocation293_spill] sm:$0xff] %v7422_v60 }
 0x379   :  { %1495 = vrot.lane.b32.xlu1 %v6527_v51, %s5926_s16 }
 0x37b   :  { %v7418_v24 = vpop.permute.xlu1 %1411 }
 0x37c   :  { %1509 = vrot.lane.b32.xlu2 %v6523_v42, %s5926_s16  ;;  %12649 = vst [vmem:[#allocation292_spill] sm:$0xff] %v7418_v24 }
 0x37d   :  { %1499 = vrot.lane.b32.xlu0 %v6554_v62, %s5926_s16 }
 0x37e   :  { %v7416_v31 = vpop.permute.xlu2 %1443 }
 0x37f   :  { %12648 = vst [vmem:[#allocation291_spill] sm:$0xff] %v7416_v31  ;;  %v7434_v31 = vpop.permute.xlu0 %1415 }
 0x380   :  { %12653 = vst [vmem:[#allocation296_spill] sm:$0xff] %v7434_v31 }
 0x381   :  { %1501 = vrot.lane.b32.xlu1 %v6548_v49, %s5926_s16 }
 0x383   :  { %v7430_v47 = vpop.permute.xlu1 %1417 }
 0x384   :  { %1515 = vrot.lane.b32.xlu2 %v6544_v45, %s5926_s16  ;;  %12652 = vst [vmem:[#allocation295_spill] sm:$0xff] %v7430_v47 }
 0x385   :  { %1505 = vrot.lane.b32.xlu0 %v6570_v17, %s5926_s16 }
 0x386   :  { %v7428_v21 = vpop.permute.xlu2 %1449 }
 0x387   :  { %12651 = vst [vmem:[#allocation294_spill] sm:$0xff] %v7428_v21  ;;  %v7446_v21 = vpop.permute.xlu0 %1421 }
 0x388   :  { %12656 = vst [vmem:[#allocation299_spill] sm:$0xff] %v7446_v21 }
 0x389   :  { %1507 = vrot.lane.b32.xlu1 %v6564_v23, %s5926_s16 }
 0x38b   :  { %v7442_v24 = vpop.permute.xlu1 %1423 }
 0x38c   :  { %1521 = vrot.lane.b32.xlu2 %v6086_v38, %s5927_s17  ;;  %12655 = vst [vmem:[#allocation298_spill] sm:$0xff] %v7442_v24 }
 0x38d   :  { %1511 = vrot.lane.b32.xlu0 %v6586_v27, %s5926_s16 }
 0x38e   :  { %v7440_v60 = vpop.permute.xlu2 %1455 }
 0x38f   :  { %12654 = vst [vmem:[#allocation297_spill] sm:$0xff] %v7440_v60  ;;  %v7458_v60 = vpop.permute.xlu0 %1427 }
 0x390   :  { %12659 = vst [vmem:[#allocation302_spill] sm:$0xff] %v7458_v60 }
 0x391   :  { %1513 = vrot.lane.b32.xlu1 %v6580_v18, %s5926_s16 }
 0x393   :  { %v7454_v47 = vpop.permute.xlu1 %1429 }
 0x394   :  { %1527 = vrot.lane.b32.xlu2 %v6105_v3, %s5927_s17  ;;  %12658 = vst [vmem:[#allocation301_spill] sm:$0xff] %v7454_v47 }
 0x395   :  { %1517 = vrot.lane.b32.xlu0 %v6032_v35, %s5927_s17 }
 0x396   :  { %v7452_v31 = vpop.permute.xlu2 %1461 }
 0x397   :  { %12657 = vst [vmem:[#allocation300_spill] sm:$0xff] %v7452_v31  ;;  %v7470_v31 = vpop.permute.xlu0 %1433 }
 0x398   :  { %12662 = vst [vmem:[#allocation305_spill] sm:$0xff] %v7470_v31 }
 0x399   :  { %1519 = vrot.lane.b32.xlu1 %v6123_v40, %s5927_s17 }
 0x39b   :  { %v7466_v24 = vpop.permute.xlu1 %1435 }
 0x39c   :  { %1533 = vrot.lane.b32.xlu2 %v6030_v33, %s5927_s17  ;;  %12661 = vst [vmem:[#allocation304_spill] sm:$0xff] %v7466_v24 }
 0x39d   :  { %1523 = vrot.lane.b32.xlu0 %v6154_v19, %s5927_s17 }
 0x39e   :  { %v7464_v21 = vpop.permute.xlu2 %1467 }
 0x39f   :  { %12660 = vst [vmem:[#allocation303_spill] sm:$0xff] %v7464_v21  ;;  %v7482_v21 = vpop.permute.xlu0 %1439 }
 0x3a0   :  { %12665 = vst [vmem:[#allocation308_spill] sm:$0xff] %v7482_v21 }
 0x3a1   :  { %1525 = vrot.lane.b32.xlu1 %v6065_v12, %s5927_s17 }
 0x3a3   :  { %v7478_v47 = vpop.permute.xlu1 %1441 }
 0x3a4   :  { %1539 = vrot.lane.b32.xlu2 %v6121_v34, %s5927_s17  ;;  %12664 = vst [vmem:[#allocation307_spill] sm:$0xff] %v7478_v47 }
 0x3a5   :  { %1529 = vrot.lane.b32.xlu0 %v6171_v55, %s5927_s17 }
 0x3a6   :  { %v7476_v60 = vpop.permute.xlu2 %1473 }
 0x3a7   :  { %12663 = vst [vmem:[#allocation306_spill] sm:$0xff] %v7476_v60  ;;  %v7494_v60 = vpop.permute.xlu0 %1445 }
 0x3a8   :  { %12668 = vst [vmem:[#allocation311_spill] sm:$0xff] %v7494_v60 }
 0x3a9   :  { %1531 = vrot.lane.b32.xlu1 %v6142_v14, %s5927_s17 }
 0x3ab   :  { %v7490_v24 = vpop.permute.xlu1 %1447 }
 0x3ac   :  { %1545 = vrot.lane.b32.xlu2 %v6140_v2, %s5927_s17  ;;  %12667 = vst [vmem:[#allocation310_spill] sm:$0xff] %v7490_v24 }
 0x3ad   :  { %1535 = vrot.lane.b32.xlu0 %v6053_v63, %s5927_s17 }
 0x3ae   :  { %v7488_v31 = vpop.permute.xlu2 %1479 }
 0x3af   :  { %12666 = vst [vmem:[#allocation309_spill] sm:$0xff] %v7488_v31  ;;  %v7506_v31 = vpop.permute.xlu0 %1451 }
 0x3b0   :  { %12671 = vst [vmem:[#allocation314_spill] sm:$0xff] %v7506_v31 }
 0x3b1   :  { %1537 = vrot.lane.b32.xlu1 %v6165_v4, %s5927_s17 }
 0x3b3   :  { %v7502_v47 = vpop.permute.xlu1 %1453 }
 0x3b4   :  { %1551 = vrot.lane.b32.xlu2 %v6047_v52, %s5927_s17  ;;  %12670 = vst [vmem:[#allocation313_spill] sm:$0xff] %v7502_v47 }
 0x3b5   :  { %1541 = vrot.lane.b32.xlu0 %v6196_v29, %s5927_s17 }
 0x3b6   :  { %v7500_v21 = vpop.permute.xlu2 %1485 }
 0x3b7   :  { %12669 = vst [vmem:[#allocation312_spill] sm:$0xff] %v7500_v21  ;;  %v7518_v21 = vpop.permute.xlu0 %1457 }
 0x3b8   :  { %12674 = vst [vmem:[#allocation317_spill] sm:$0xff] %v7518_v21 }
 0x3b9   :  { %1543 = vrot.lane.b32.xlu1 %v6083_v32, %s5927_s17 }
 0x3bb   :  { %v7514_v24 = vpop.permute.xlu1 %1459 }
 0x3bc   :  { %1557 = vrot.lane.b32.xlu2 %v6163_v43, %s5927_s17  ;;  %12673 = vst [vmem:[#allocation316_spill] sm:$0xff] %v7514_v24 }
 0x3bd   :  { %1547 = vrot.lane.b32.xlu0 %v6223_v15, %s5927_s17 }
 0x3be   :  { %v7512_v60 = vpop.permute.xlu2 %1491 }
 0x3bf   :  { %12672 = vst [vmem:[#allocation315_spill] sm:$0xff] %v7512_v60  ;;  %v7530_v60 = vpop.permute.xlu0 %1463 }
 0x3c0   :  { %12677 = vst [vmem:[#allocation320_spill] sm:$0xff] %v7530_v60 }
 0x3c1   :  { %1549 = vrot.lane.b32.xlu1 %v6187_v20, %s5927_s17 }
 0x3c3   :  { %v7526_v47 = vpop.permute.xlu1 %1465 }
 0x3c4   :  { %1563 = vrot.lane.b32.xlu2 %v6183_v39, %s5927_s17  ;;  %12676 = vst [vmem:[#allocation319_spill] sm:$0xff] %v7526_v47 }
 0x3c5   :  { %1553 = vrot.lane.b32.xlu0 %v6094_v53, %s5927_s17 }
 0x3c6   :  { %v7524_v31 = vpop.permute.xlu2 %1497 }
 0x3c7   :  { %12675 = vst [vmem:[#allocation318_spill] sm:$0xff] %v7524_v31  ;;  %v7542_v31 = vpop.permute.xlu0 %1469 }
 0x3c8   :  { %12680 = vst [vmem:[#allocation323_spill] sm:$0xff] %v7542_v31  ;;  %v12685_v31 = vld [vmem:[#allocation21_spill] sm:$0xff] }
 0x3c9   :  { %1555 = vrot.lane.b32.xlu1 %v6210_v61, %s5927_s17 }
 0x3cb   :  { %v7538_v24 = vpop.permute.xlu1 %1471 }
 0x3cc   :  { %1569 = vrot.lane.b32.xlu2 %v6060_v9, %s5927_s17  ;;  %12679 = vst [vmem:[#allocation322_spill] sm:$0xff] %v7538_v24  ;;  %v12684_v24 = vld [vmem:[#allocation20_spill] sm:$0xff] }
 0x3cd   :  { %1559 = vrot.lane.b32.xlu0 %v6240_v56, %s5927_s17 }
 0x3ce   :  { %v7536_v21 = vpop.permute.xlu2 %1503 }
 0x3cf   :  { %12678 = vst [vmem:[#allocation321_spill] sm:$0xff] %v7536_v21  ;;  %v7554_v21 = vpop.permute.xlu0 %1475 }
 0x3d0   :  { %12683 = vst [vmem:[#allocation326_spill] sm:$0xff] %v7554_v21 }
 0x3d1   :  { %1561 = vrot.lane.b32.xlu1 %v6108_v7, %s5927_s17  ;;  %v12688_v7 = vld [vmem:[#allocation25_spill] sm:$0xff] }
 0x3d3   :  { %v7550_v47 = vpop.permute.xlu1 %1477 }
 0x3d4   :  { %1575 = vrot.lane.b32.xlu2 %v6206_v57, %s5927_s17  ;;  %12682 = vst [vmem:[#allocation325_spill] sm:$0xff] %v7550_v47  ;;  %v12690_v47 = vld [vmem:[#allocation23_spill] sm:$0xff] }
 0x3d5   :  { %1565 = vrot.lane.b32.xlu0 %v12688_v7, %s5927_s17 }
 0x3d6   :  { %v7548_v60 = vpop.permute.xlu2 %1509 }
 0x3d7   :  { %12681 = vst [vmem:[#allocation324_spill] sm:$0xff] %v7548_v60  ;;  %v7566_v60 = vpop.permute.xlu0 %1481 }
 0x3d8   :  { %12689 = vst [vmem:[#allocation329_spill] sm:$0xff] %v7566_v60  ;;  %v12695_v60 = vld [vmem:[#allocation27_spill] sm:$0xff] }
 0x3d9   :  { %1567 = vrot.lane.b32.xlu1 %v12685_v31, %s5927_s17 }
 0x3db   :  { %v7562_v57 = vpop.permute.xlu1 %1483 }
 0x3dc   :  { %1581 = vrot.lane.b32.xlu2 %v12684_v24, %s5927_s17  ;;  %12687 = vst [vmem:[#allocation328_spill] sm:$0xff] %v7562_v57  ;;  %v12694_v57 = vld [vmem:[#allocation28_spill] sm:$0xff] }
 0x3dd   :  { %1571 = vrot.lane.b32.xlu0 %v12605_v41, %s5927_s17 }
 0x3de   :  { %v7560_v53 = vpop.permute.xlu2 %1515 }
 0x3df   :  { %12686 = vst [vmem:[#allocation327_spill] sm:$0xff] %v7560_v53  ;;  %v7578_v53 = vpop.permute.xlu0 %1487 }
 0x3e0   :  { %12693 = vst [vmem:[#allocation332_spill] sm:$0xff] %v7578_v53 }
 0x3e1   :  { %1573 = vrot.lane.b32.xlu1 %v12602_v28, %s5927_s17 }
 0x3e3   :  { %v7574_v24 = vpop.permute.xlu1 %1489 }
 0x3e4   :  { %1587 = vrot.lane.b32.xlu2 %v12690_v47, %s5927_s17  ;;  %12692 = vst [vmem:[#allocation331_spill] sm:$0xff] %v7574_v24  ;;  %v12699_v24 = vld [vmem:[#allocation31_spill] sm:$0xff] }
 0x3e5   :  { %1577 = vrot.lane.b32.xlu0 %v12522_v58, %s5927_s17 }
 0x3e6   :  { %v7572_v21 = vpop.permute.xlu2 %1521 }
 0x3e7   :  { %12691 = vst [vmem:[#allocation330_spill] sm:$0xff] %v7572_v21  ;;  %v7590_v21 = vpop.permute.xlu0 %1493 }
 0x3e8   :  { %12698 = vst [vmem:[#allocation335_spill] sm:$0xff] %v7590_v21  ;;  %v12705_v21 = vld [vmem:[#allocation36_spill] sm:$0xff] }
 0x3e9   :  { %1579 = vrot.lane.b32.xlu1 %v12695_v60, %s5927_s17  ;;  %v12702_v60 = vld [vmem:[#allocation33_spill] sm:$0xff] }
 0x3eb   :  { %v7586_v47 = vpop.permute.xlu1 %1495 }
 0x3ec   :  { %1593 = vrot.lane.b32.xlu2 %v12694_v57, %s5927_s17  ;;  %12697 = vst [vmem:[#allocation334_spill] sm:$0xff] %v7586_v47  ;;  %v12704_v47 = vld [vmem:[#allocation35_spill] sm:$0xff] }
 0x3ed   :  { %1583 = vrot.lane.b32.xlu0 %v12702_v60, %s5927_s17 }
 0x3ee   :  { %v7584_v7 = vpop.permute.xlu2 %1527 }
 0x3ef   :  { %12696 = vst [vmem:[#allocation333_spill] sm:$0xff] %v7584_v7  ;;  %v7602_v7 = vpop.permute.xlu0 %1499 }
 0x3f0   :  { %12703 = vst [vmem:[#allocation33_spill] sm:$0xff] %v7602_v7 }
 0x3f1   :  { %1585 = vrot.lane.b32.xlu1 %v12525_v30, %s5927_s17 }
 0x3f3   :  { %v7598_v57 = vpop.permute.xlu1 %1501 }
 0x3f4   :  { %1599 = vrot.lane.b32.xlu2 %v12699_v24, %s5927_s17  ;;  %12701 = vst [vmem:[#allocation337_spill] sm:$0xff] %v7598_v57  ;;  %v12709_v57 = vld [vmem:[#allocation40_spill] sm:$0xff] }
 0x3f5   :  { %1589 = vrot.lane.b32.xlu0 %v12445_v54, %s5927_s17 }
 0x3f6   :  { %v7596_v53 = vpop.permute.xlu2 %1533 }
 0x3f7   :  { %12700 = vst [vmem:[#allocation336_spill] sm:$0xff] %v7596_v53  ;;  %v7614_v53 = vpop.permute.xlu0 %1505 }
 0x3f8   :  { %12708 = vst [vmem:[#allocation339_spill] sm:$0xff] %v7614_v53 }
 0x3f9   :  { %1591 = vrot.lane.b32.xlu1 %v12705_v21, %s5927_s17 }
 0x3fb   :  { %v7610_v24 = vpop.permute.xlu1 %1507 }
 0x3fc   :  { %1605 = vrot.lane.b32.xlu2 %v12704_v47, %s5927_s17  ;;  %12707 = vst [vmem:[#allocation338_spill] sm:$0xff] %v7610_v24 }
 0x3fd   :  { %1595 = vrot.lane.b32.xlu0 %v12625_v37, %s5927_s17 }
 0x3fe   :  { %v7608_v58 = vpop.permute.xlu2 %1539 }
 0x3ff   :  { %12706 = vst [vmem:[#allocation36_spill] sm:$0xff] %v7608_v58  ;;  %v7626_v58 = vpop.permute.xlu0 %1511 }
 0x400   :  { %12712 = vst [vmem:[#allocation342_spill] sm:$0xff] %v7626_v58 }
 0x401   :  { %1597 = vrot.lane.b32.xlu1 %v12622_v44, %s5927_s17 }
 0x403   :  { %v7622_v47 = vpop.permute.xlu1 %1513 }
 0x404   :  { %1611 = vrot.lane.b32.xlu2 %v12709_v57, %s5927_s17  ;;  %12711 = vst [vmem:[#allocation341_spill] sm:$0xff] %v7622_v47  ;;  %v12716_v47 = vld [vmem:[#allocation49_spill] sm:$0xff] }
 0x405   :  { %1601 = vrot.lane.b32.xlu0 %v12542_v48, %s5927_s17 }
 0x406   :  { %v7620_v7 = vpop.permute.xlu2 %1545 }
 0x407   :  { %12710 = vst [vmem:[#allocation340_spill] sm:$0xff] %v7620_v7  ;;  %v7638_v7 = vpop.permute.xlu0 %1517 }
 0x408   :  { %12715 = vst [vmem:[#allocation345_spill] sm:$0xff] %v7638_v7 }
 0x409   :  { %1603 = vrot.lane.b32.xlu1 %v12539_v6, %s5927_s17 }
 0x40b   :  { %v7634_v24 = vpop.permute.xlu1 %1519 }
 0x40c   :  { %1617 = vrot.lane.b32.xlu2 %v12627_v59, %s5927_s17  ;;  %12714 = vst [vmem:[#allocation344_spill] sm:$0xff] %v7634_v24 }
 0x40d   :  { %1607 = vrot.lane.b32.xlu0 %v12459_v0, %s5927_s17 }
 0x40e   :  { %v7632_v53 = vpop.permute.xlu2 %1551 }
 0x40f   :  { %12713 = vst [vmem:[#allocation343_spill] sm:$0xff] %v7632_v53  ;;  %v7650_v53 = vpop.permute.xlu0 %1523 }
 0x410   :  { %12719 = vst [vmem:[#allocation348_spill] sm:$0xff] %v7650_v53 }
 0x411   :  { %1609 = vrot.lane.b32.xlu1 %v12545_v1, %s5927_s17 }
 0x413   :  { %v7646_v59 = vpop.permute.xlu1 %1525 }
 0x414   :  { %1623 = vrot.lane.b32.xlu2 %v12716_v47, %s5927_s17  ;;  %12718 = vst [vmem:[#allocation347_spill] sm:$0xff] %v7646_v59  ;;  %v12723_v59 = vld [vmem:[#allocation61_spill] sm:$0xff] }
 0x415   :  { %1613 = vrot.lane.b32.xlu0 %v12465_v46, %s5927_s17 }
 0x416   :  { %v7644_v58 = vpop.permute.xlu2 %1557 }
 0x417   :  { %12717 = vst [vmem:[#allocation346_spill] sm:$0xff] %v7644_v58  ;;  %v7662_v58 = vpop.permute.xlu0 %1529 }
 0x418   :  { %12722 = vst [vmem:[#allocation351_spill] sm:$0xff] %v7662_v58 }
 0x419   :  { %1615 = vrot.lane.b32.xlu1 %v12462_v5, %s5927_s17 }
 0x41b   :  { %v7658_v24 = vpop.permute.xlu1 %1531 }
 0x41c   :  { %1629 = vrot.lane.b32.xlu2 %v12634_v8, %s5927_s17  ;;  %12721 = vst [vmem:[#allocation350_spill] sm:$0xff] %v7658_v24 }
 0x41d   :  { %1619 = vrot.lane.b32.xlu0 %v6468_v22, %s5927_s17 }
 0x41e   :  { %v7656_v7 = vpop.permute.xlu2 %1563 }
 0x41f   :  { %12720 = vst [vmem:[#allocation349_spill] sm:$0xff] %v7656_v7  ;;  %v7674_v7 = vpop.permute.xlu0 %1535 }
 0x420   :  { %12726 = vst [vmem:[#allocation353_spill] sm:$0xff] %v7674_v7 }
 0x421   :  { %1621 = vrot.lane.b32.xlu1 %v6459_v10, %s5927_s17 }
 0x423   :  { %v7670_v8 = vpop.permute.xlu1 %1537 }
 0x424   :  { %1635 = vrot.lane.b32.xlu2 %v12723_v59, %s5927_s17  ;;  %12725 = vst [vmem:[#allocation352_spill] sm:$0xff] %v7670_v8 }
 0x425   :  { %1625 = vrot.lane.b32.xlu0 %v6490_v11, %s5927_s17 }
 0x426   :  { %v7668_v53 = vpop.permute.xlu2 %1569 }
 0x427   :  { %12724 = vst [vmem:[#allocation61_spill] sm:$0xff] %v7668_v53  ;;  %v7686_v53 = vpop.permute.xlu0 %1541 }
 0x428   :  { %12729 = vst [vmem:[#allocation356_spill] sm:$0xff] %v7686_v53 }
 0x429   :  { %1627 = vrot.lane.b32.xlu1 %v12470_v36, %s5927_s17 }
 0x42b   :  { %v7682_v24 = vpop.permute.xlu1 %1543 }
 0x42c   :  { %1641 = vrot.lane.b32.xlu2 %v12641_v16, %s5927_s17  ;;  %12728 = vst [vmem:[#allocation355_spill] sm:$0xff] %v7682_v24 }
 0x42d   :  { %1631 = vrot.lane.b32.xlu0 %v6513_v50, %s5927_s17 }
 0x42e   :  { %v7680_v58 = vpop.permute.xlu2 %1575 }
 0x42f   :  { %12727 = vst [vmem:[#allocation354_spill] sm:$0xff] %v7680_v58  ;;  %v7698_v58 = vpop.permute.xlu0 %1547 }
 0x430   :  { %12732 = vst [vmem:[#allocation359_spill] sm:$0xff] %v7698_v58 }
 0x431   :  { %1633 = vrot.lane.b32.xlu1 %v12559_v25, %s5927_s17 }
 0x433   :  { %v7694_v8 = vpop.permute.xlu1 %1549 }
 0x434   :  { %1647 = vrot.lane.b32.xlu2 %v6500_v26, %s5927_s17  ;;  %12731 = vst [vmem:[#allocation358_spill] sm:$0xff] %v7694_v8 }
 0x435   :  { %1637 = vrot.lane.b32.xlu0 %v12479_v13, %s5927_s17 }
 0x436   :  { %v7692_v7 = vpop.permute.xlu2 %1581 }
 0x437   :  { %12730 = vst [vmem:[#allocation357_spill] sm:$0xff] %v7692_v7  ;;  %v7710_v7 = vpop.permute.xlu0 %1553 }
 0x438   :  { %12735 = vst [vmem:[#allocation362_spill] sm:$0xff] %v7710_v7 }
 0x439   :  { %1639 = vrot.lane.b32.xlu1 %v6527_v51, %s5927_s17 }
 0x43b   :  { %v7706_v24 = vpop.permute.xlu1 %1555 }
 0x43c   :  { %1653 = vrot.lane.b32.xlu2 %v6523_v42, %s5927_s17  ;;  %12734 = vst [vmem:[#allocation361_spill] sm:$0xff] %v7706_v24 }
 0x43d   :  { %1643 = vrot.lane.b32.xlu0 %v6554_v62, %s5927_s17 }
 0x43e   :  { %v7704_v53 = vpop.permute.xlu2 %1587 }
 0x43f   :  { %12733 = vst [vmem:[#allocation360_spill] sm:$0xff] %v7704_v53  ;;  %v7722_v53 = vpop.permute.xlu0 %1559 }
 0x440   :  { %12738 = vst [vmem:[#allocation365_spill] sm:$0xff] %v7722_v53 }
 0x441   :  { %1645 = vrot.lane.b32.xlu1 %v6548_v49, %s5927_s17 }
 0x443   :  { %v7718_v8 = vpop.permute.xlu1 %1561 }
 0x444   :  { %1659 = vrot.lane.b32.xlu2 %v6544_v45, %s5927_s17  ;;  %12737 = vst [vmem:[#allocation364_spill] sm:$0xff] %v7718_v8 }
 0x445   :  { %1649 = vrot.lane.b32.xlu0 %v6570_v17, %s5927_s17 }
 0x446   :  { %v7716_v58 = vpop.permute.xlu2 %1593 }
 0x447   :  { %12736 = vst [vmem:[#allocation363_spill] sm:$0xff] %v7716_v58  ;;  %v7734_v58 = vpop.permute.xlu0 %1565 }
 0x448   :  { %12741 = vst [vmem:[#allocation368_spill] sm:$0xff] %v7734_v58 }
 0x449   :  { %1651 = vrot.lane.b32.xlu1 %v6564_v23, %s5927_s17 }
 0x44b   :  { %v7730_v24 = vpop.permute.xlu1 %1567 }
 0x44c   :  { %1665 = vrot.lane.b32.xlu2 %v6086_v38, %s5928_s18  ;;  %12740 = vst [vmem:[#allocation367_spill] sm:$0xff] %v7730_v24 }
 0x44d   :  { %1655 = vrot.lane.b32.xlu0 %v6586_v27, %s5927_s17 }
 0x44e   :  { %v7728_v7 = vpop.permute.xlu2 %1599 }
 0x44f   :  { %12739 = vst [vmem:[#allocation366_spill] sm:$0xff] %v7728_v7  ;;  %v7746_v7 = vpop.permute.xlu0 %1571 }
 0x450   :  { %12744 = vst [vmem:[#allocation371_spill] sm:$0xff] %v7746_v7 }
 0x451   :  { %1657 = vrot.lane.b32.xlu1 %v6580_v18, %s5927_s17 }
 0x453   :  { %v7742_v53 = vpop.permute.xlu1 %1573 }
 0x454   :  { %1671 = vrot.lane.b32.xlu2 %v6105_v3, %s5928_s18  ;;  %12743 = vst [vmem:[#allocation370_spill] sm:$0xff] %v7742_v53 }
 0x455   :  { %1661 = vrot.lane.b32.xlu0 %v6032_v35, %s5928_s18 }
 0x456   :  { %v7740_v8 = vpop.permute.xlu2 %1605 }
 0x457   :  { %12742 = vst [vmem:[#allocation369_spill] sm:$0xff] %v7740_v8  ;;  %v7758_v8 = vpop.permute.xlu0 %1577 }
 0x458   :  { %12747 = vst [vmem:[#allocation374_spill] sm:$0xff] %v7758_v8 }
 0x459   :  { %1663 = vrot.lane.b32.xlu1 %v6123_v40, %s5928_s18 }
 0x45b   :  { %v7754_v24 = vpop.permute.xlu1 %1579 }
 0x45c   :  { %1677 = vrot.lane.b32.xlu2 %v6030_v33, %s5928_s18  ;;  %12746 = vst [vmem:[#allocation373_spill] sm:$0xff] %v7754_v24 }
 0x45d   :  { %1667 = vrot.lane.b32.xlu0 %v6154_v19, %s5928_s18 }
 0x45e   :  { %v7752_v58 = vpop.permute.xlu2 %1611 }
 0x45f   :  { %12745 = vst [vmem:[#allocation372_spill] sm:$0xff] %v7752_v58  ;;  %v7770_v58 = vpop.permute.xlu0 %1583 }
 0x460   :  { %12750 = vst [vmem:[#allocation377_spill] sm:$0xff] %v7770_v58 }
 0x461   :  { %1669 = vrot.lane.b32.xlu1 %v6065_v12, %s5928_s18 }
 0x463   :  { %v7766_v53 = vpop.permute.xlu1 %1585 }
 0x464   :  { %1683 = vrot.lane.b32.xlu2 %v6121_v34, %s5928_s18  ;;  %12749 = vst [vmem:[#allocation376_spill] sm:$0xff] %v7766_v53 }
 0x465   :  { %1673 = vrot.lane.b32.xlu0 %v6171_v55, %s5928_s18 }
 0x466   :  { %v7764_v7 = vpop.permute.xlu2 %1617 }
 0x467   :  { %12748 = vst [vmem:[#allocation375_spill] sm:$0xff] %v7764_v7  ;;  %v7782_v7 = vpop.permute.xlu0 %1589 }
 0x468   :  { %12753 = vst [vmem:[#allocation380_spill] sm:$0xff] %v7782_v7 }
 0x469   :  { %1675 = vrot.lane.b32.xlu1 %v6142_v14, %s5928_s18 }
 0x46b   :  { %v7778_v8 = vpop.permute.xlu1 %1591 }
 0x46c   :  { %1689 = vrot.lane.b32.xlu2 %v6140_v2, %s5928_s18  ;;  %12752 = vst [vmem:[#allocation379_spill] sm:$0xff] %v7778_v8 }
 0x46d   :  { %1679 = vrot.lane.b32.xlu0 %v6053_v63, %s5928_s18 }
 0x46e   :  { %v7776_v24 = vpop.permute.xlu2 %1623 }
 0x46f   :  { %12751 = vst [vmem:[#allocation378_spill] sm:$0xff] %v7776_v24  ;;  %v7794_v24 = vpop.permute.xlu0 %1595 }
 0x470   :  { %12756 = vst [vmem:[#allocation383_spill] sm:$0xff] %v7794_v24 }
 0x471   :  { %1681 = vrot.lane.b32.xlu1 %v6165_v4, %s5928_s18 }
 0x473   :  { %v7790_v53 = vpop.permute.xlu1 %1597 }
 0x474   :  { %1695 = vrot.lane.b32.xlu2 %v6047_v52, %s5928_s18  ;;  %12755 = vst [vmem:[#allocation382_spill] sm:$0xff] %v7790_v53 }
 0x475   :  { %1685 = vrot.lane.b32.xlu0 %v6196_v29, %s5928_s18 }
 0x476   :  { %v7788_v58 = vpop.permute.xlu2 %1629 }
 0x477   :  { %12754 = vst [vmem:[#allocation381_spill] sm:$0xff] %v7788_v58  ;;  %v7806_v58 = vpop.permute.xlu0 %1601 }
 0x478   :  { %12759 = vst [vmem:[#allocation386_spill] sm:$0xff] %v7806_v58 }
 0x479   :  { %1687 = vrot.lane.b32.xlu1 %v6083_v32, %s5928_s18 }
 0x47b   :  { %v7802_v8 = vpop.permute.xlu1 %1603 }
 0x47c   :  { %1701 = vrot.lane.b32.xlu2 %v6163_v43, %s5928_s18  ;;  %12758 = vst [vmem:[#allocation385_spill] sm:$0xff] %v7802_v8 }
 0x47d   :  { %1691 = vrot.lane.b32.xlu0 %v6223_v15, %s5928_s18 }
 0x47e   :  { %v7800_v7 = vpop.permute.xlu2 %1635 }
 0x47f   :  { %12757 = vst [vmem:[#allocation384_spill] sm:$0xff] %v7800_v7  ;;  %v7818_v7 = vpop.permute.xlu0 %1607 }
 0x480   :  { %12762 = vst [vmem:[#allocation389_spill] sm:$0xff] %v7818_v7  ;;  %v12768_v7 = vld [vmem:[#allocation13_spill] sm:$0xff] }
 0x481   :  { %1693 = vrot.lane.b32.xlu1 %v6187_v20, %s5928_s18  ;;  %v12765_v20 = vld [vmem:[#allocation12_spill] sm:$0xff] }
 0x483   :  { %v7814_v53 = vpop.permute.xlu1 %1609 }
 0x484   :  { %1707 = vrot.lane.b32.xlu2 %v6183_v39, %s5928_s18  ;;  %12761 = vst [vmem:[#allocation388_spill] sm:$0xff] %v7814_v53  ;;  %v12767_v53 = vld [vmem:[#allocation18_spill] sm:$0xff] }
 0x485   :  { %1697 = vrot.lane.b32.xlu0 %v12765_v20, %s5928_s18 }
 0x486   :  { %v7812_v24 = vpop.permute.xlu2 %1641 }
 0x487   :  { %12760 = vst [vmem:[#allocation387_spill] sm:$0xff] %v7812_v24  ;;  %v7830_v24 = vpop.permute.xlu0 %1613 }
 0x488   :  { %12766 = vst [vmem:[#allocation12_spill] sm:$0xff] %v7830_v24 }
 0x489   :  { %1699 = vrot.lane.b32.xlu1 %v6210_v61, %s5928_s18 }
 0x48b   :  { %v7826_v8 = vpop.permute.xlu1 %1615 }
 0x48c   :  { %1713 = vrot.lane.b32.xlu2 %v6060_v9, %s5928_s18  ;;  %12764 = vst [vmem:[#allocation391_spill] sm:$0xff] %v7826_v8  ;;  %v12772_v8 = vld [vmem:[#allocation20_spill] sm:$0xff] }
 0x48d   :  { %1703 = vrot.lane.b32.xlu0 %v6240_v56, %s5928_s18 }
 0x48e   :  { %v7824_v58 = vpop.permute.xlu2 %1647 }
 0x48f   :  { %12763 = vst [vmem:[#allocation390_spill] sm:$0xff] %v7824_v58  ;;  %v7842_v58 = vpop.permute.xlu0 %1619 }
 0x490   :  { %12771 = vst [vmem:[#allocation394_spill] sm:$0xff] %v7842_v58 }
 0x491   :  { %1705 = vrot.lane.b32.xlu1 %v12768_v7, %s5928_s18  ;;  %v12775_v7 = vld [vmem:[#allocation25_spill] sm:$0xff] }
 0x493   :  { %v7838_v9 = vpop.permute.xlu1 %1621 }
 0x494   :  { %1719 = vrot.lane.b32.xlu2 %v12767_v53, %s5928_s18  ;;  %12770 = vst [vmem:[#allocation393_spill] sm:$0xff] %v7838_v9  ;;  %v12777_v9 = vld [vmem:[#allocation23_spill] sm:$0xff] }
 0x495   :  { %1709 = vrot.lane.b32.xlu0 %v12775_v7, %s5928_s18 }
 0x496   :  { %v7836_v15 = vpop.permute.xlu2 %1653 }
 0x497   :  { %12769 = vst [vmem:[#allocation392_spill] sm:$0xff] %v7836_v15  ;;  %v7854_v15 = vpop.permute.xlu0 %1625 }
 0x498   :  { %12776 = vst [vmem:[#allocation397_spill] sm:$0xff] %v7854_v15  ;;  %v12782_v15 = vld [vmem:[#allocation27_spill] sm:$0xff] }
 0x499   :  { %1711 = vrot.lane.b32.xlu1 %v12685_v31, %s5928_s18 }
 0x49b   :  { %v7850_v53 = vpop.permute.xlu1 %1627 }
 0x49c   :  { %1725 = vrot.lane.b32.xlu2 %v12772_v8, %s5928_s18  ;;  %12774 = vst [vmem:[#allocation396_spill] sm:$0xff] %v7850_v53  ;;  %v12781_v53 = vld [vmem:[#allocation28_spill] sm:$0xff] }
 0x49d   :  { %1715 = vrot.lane.b32.xlu0 %v12605_v41, %s5928_s18 }
 0x49e   :  { %v7848_v24 = vpop.permute.xlu2 %1659 }
 0x49f   :  { %12773 = vst [vmem:[#allocation395_spill] sm:$0xff] %v7848_v24  ;;  %v7866_v24 = vpop.permute.xlu0 %1631 }
 0x4a0   :  { %12780 = vst [vmem:[#allocation400_spill] sm:$0xff] %v7866_v24 }
 0x4a1   :  { %1717 = vrot.lane.b32.xlu1 %v12602_v28, %s5928_s18  ;;  %v12785_v28 = vld [vmem:[#allocation29_spill] sm:$0xff] }
 0x4a3   :  { %v7862_v8 = vpop.permute.xlu1 %1633 }
 0x4a4   :  { %1731 = vrot.lane.b32.xlu2 %v12777_v9, %s5928_s18  ;;  %12779 = vst [vmem:[#allocation399_spill] sm:$0xff] %v7862_v8  ;;  %v12787_v8 = vld [vmem:[#allocation31_spill] sm:$0xff] }
 0x4a5   :  { %1721 = vrot.lane.b32.xlu0 %v12785_v28, %s5928_s18 }
 0x4a6   :  { %v7860_v58 = vpop.permute.xlu2 %1665 }
 0x4a7   :  { %12778 = vst [vmem:[#allocation398_spill] sm:$0xff] %v7860_v58  ;;  %v7878_v58 = vpop.permute.xlu0 %1637 }
 0x4a8   :  { %12786 = vst [vmem:[#allocation403_spill] sm:$0xff] %v7878_v58 }
 0x4a9   :  { %1723 = vrot.lane.b32.xlu1 %v12782_v15, %s5928_s18 }
 0x4ab   :  { %v7874_v9 = vpop.permute.xlu1 %1639 }
 0x4ac   :  { %1737 = vrot.lane.b32.xlu2 %v12781_v53, %s5928_s18  ;;  %12784 = vst [vmem:[#allocation402_spill] sm:$0xff] %v7874_v9  ;;  %v12791_v9 = vld [vmem:[#allocation35_spill] sm:$0xff] }
 0x4ad   :  { %1727 = vrot.lane.b32.xlu0 %v12702_v60, %s5928_s18 }
 0x4ae   :  { %v7872_v7 = vpop.permute.xlu2 %1671 }
 0x4af   :  { %12783 = vst [vmem:[#allocation401_spill] sm:$0xff] %v7872_v7  ;;  %v7890_v7 = vpop.permute.xlu0 %1643 }
 0x4b0   :  { %12790 = vst [vmem:[#allocation406_spill] sm:$0xff] %v7890_v7 }
 0x4b1   :  { %1729 = vrot.lane.b32.xlu1 %v12525_v30, %s5928_s18 }
 0x4b3   :  { %v7886_v53 = vpop.permute.xlu1 %1645 }
 0x4b4   :  { %1743 = vrot.lane.b32.xlu2 %v12787_v8, %s5928_s18  ;;  %12789 = vst [vmem:[#allocation405_spill] sm:$0xff] %v7886_v53 }
 0x4b5   :  { %1733 = vrot.lane.b32.xlu0 %v12445_v54, %s5928_s18 }
 0x4b6   :  { %v7884_v24 = vpop.permute.xlu2 %1677 }
 0x4b7   :  { %12788 = vst [vmem:[#allocation404_spill] sm:$0xff] %v7884_v24  ;;  %v7902_v24 = vpop.permute.xlu0 %1649 }
 0x4b8   :  { %12794 = vst [vmem:[#allocation409_spill] sm:$0xff] %v7902_v24 }
 0x4b9   :  { %1735 = vrot.lane.b32.xlu1 %v12705_v21, %s5928_s18 }
 0x4bb   :  { %v7898_v8 = vpop.permute.xlu1 %1651 }
 0x4bc   :  { %1749 = vrot.lane.b32.xlu2 %v12791_v9, %s5928_s18  ;;  %12793 = vst [vmem:[#allocation408_spill] sm:$0xff] %v7898_v8  ;;  %v12798_v8 = vld [vmem:[#allocation43_spill] sm:$0xff] }
 0x4bd   :  { %1739 = vrot.lane.b32.xlu0 %v12625_v37, %s5928_s18 }
 0x4be   :  { %v7896_v58 = vpop.permute.xlu2 %1683 }
 0x4bf   :  { %12792 = vst [vmem:[#allocation407_spill] sm:$0xff] %v7896_v58  ;;  %v7914_v58 = vpop.permute.xlu0 %1655 }
 0x4c0   :  { %12797 = vst [vmem:[#allocation412_spill] sm:$0xff] %v7914_v58 }
 0x4c1   :  { %1741 = vrot.lane.b32.xlu1 %v12622_v44, %s5928_s18 }
 0x4c3   :  { %v7910_v53 = vpop.permute.xlu1 %1657 }
 0x4c4   :  { %1755 = vrot.lane.b32.xlu2 %v12709_v57, %s5928_s18  ;;  %12796 = vst [vmem:[#allocation411_spill] sm:$0xff] %v7910_v53 }
 0x4c5   :  { %1745 = vrot.lane.b32.xlu0 %v12542_v48, %s5928_s18 }
 0x4c6   :  { %v7908_v7 = vpop.permute.xlu2 %1689 }
 0x4c7   :  { %12795 = vst [vmem:[#allocation410_spill] sm:$0xff] %v7908_v7  ;;  %v7926_v7 = vpop.permute.xlu0 %1661 }
 0x4c8   :  { %12801 = vst [vmem:[#allocation415_spill] sm:$0xff] %v7926_v7 }
 0x4c9   :  { %1747 = vrot.lane.b32.xlu1 %v12539_v6, %s5928_s18 }
 0x4cb   :  { %v7922_v57 = vpop.permute.xlu1 %1663 }
 0x4cc   :  { %1761 = vrot.lane.b32.xlu2 %v12798_v8, %s5928_s18  ;;  %12800 = vst [vmem:[#allocation414_spill] sm:$0xff] %v7922_v57  ;;  %v12805_v57 = vld [vmem:[#allocation55_spill] sm:$0xff] }
 0x4cd   :  { %1751 = vrot.lane.b32.xlu0 %v12459_v0, %s5928_s18 }
 0x4ce   :  { %v7920_v24 = vpop.permute.xlu2 %1695 }
 0x4cf   :  { %12799 = vst [vmem:[#allocation413_spill] sm:$0xff] %v7920_v24  ;;  %v7938_v24 = vpop.permute.xlu0 %1667 }
 0x4d0   :  { %12804 = vst [vmem:[#allocation418_spill] sm:$0xff] %v7938_v24 }
 0x4d1   :  { %1753 = vrot.lane.b32.xlu1 %v12545_v1, %s5928_s18 }
 0x4d3   :  { %v7934_v58 = vpop.permute.xlu1 %1669 }
 0x4d4   :  { %1767 = vrot.lane.b32.xlu2 %v12716_v47, %s5928_s18  ;;  %12803 = vst [vmem:[#allocation417_spill] sm:$0xff] %v7934_v58 }
 0x4d5   :  { %1757 = vrot.lane.b32.xlu0 %v12465_v46, %s5928_s18 }
 0x4d6   :  { %v7932_v53 = vpop.permute.xlu2 %1701 }
 0x4d7   :  { %12802 = vst [vmem:[#allocation416_spill] sm:$0xff] %v7932_v53  ;;  %v7950_v53 = vpop.permute.xlu0 %1673 }
 0x4d8   :  { %12808 = vst [vmem:[#allocation420_spill] sm:$0xff] %v7950_v53 }
 0x4d9   :  { %1759 = vrot.lane.b32.xlu1 %v12462_v5, %s5928_s18 }
 0x4db   :  { %v7946_v47 = vpop.permute.xlu1 %1675 }
 0x4dc   :  { %1773 = vrot.lane.b32.xlu2 %v12805_v57, %s5928_s18  ;;  %12807 = vst [vmem:[#allocation419_spill] sm:$0xff] %v7946_v47 }
 0x4dd   :  { %1763 = vrot.lane.b32.xlu0 %v6468_v22, %s5928_s18 }
 0x4de   :  { %v7944_v7 = vpop.permute.xlu2 %1707 }
 0x4df   :  { %12806 = vst [vmem:[#allocation55_spill] sm:$0xff] %v7944_v7  ;;  %v7962_v7 = vpop.permute.xlu0 %1679 }
 0x4e0   :  { %12811 = vst [vmem:[#allocation423_spill] sm:$0xff] %v7962_v7 }
 0x4e1   :  { %1765 = vrot.lane.b32.xlu1 %v6459_v10, %s5928_s18 }
 0x4e3   :  { %v7958_v58 = vpop.permute.xlu1 %1681 }
 0x4e4   :  { %1779 = vrot.lane.b32.xlu2 %v12723_v59, %s5928_s18  ;;  %12810 = vst [vmem:[#allocation422_spill] sm:$0xff] %v7958_v58 }
 0x4e5   :  { %1769 = vrot.lane.b32.xlu0 %v6490_v11, %s5928_s18 }
 0x4e6   :  { %v7956_v24 = vpop.permute.xlu2 %1713 }
 0x4e7   :  { %12809 = vst [vmem:[#allocation421_spill] sm:$0xff] %v7956_v24  ;;  %v7974_v24 = vpop.permute.xlu0 %1685 }
 0x4e8   :  { %12814 = vst [vmem:[#allocation426_spill] sm:$0xff] %v7974_v24 }
 0x4e9   :  { %1771 = vrot.lane.b32.xlu1 %v12470_v36, %s5928_s18 }
 0x4eb   :  { %v7970_v47 = vpop.permute.xlu1 %1687 }
 0x4ec   :  { %1785 = vrot.lane.b32.xlu2 %v12641_v16, %s5928_s18  ;;  %12813 = vst [vmem:[#allocation425_spill] sm:$0xff] %v7970_v47 }
 0x4ed   :  { %1775 = vrot.lane.b32.xlu0 %v6513_v50, %s5928_s18 }
 0x4ee   :  { %v7968_v53 = vpop.permute.xlu2 %1719 }
 0x4ef   :  { %12812 = vst [vmem:[#allocation424_spill] sm:$0xff] %v7968_v53  ;;  %v7986_v53 = vpop.permute.xlu0 %1691 }
 0x4f0   :  { %12817 = vst [vmem:[#allocation429_spill] sm:$0xff] %v7986_v53 }
 0x4f1   :  { %1777 = vrot.lane.b32.xlu1 %v12559_v25, %s5928_s18 }
 0x4f3   :  { %v7982_v58 = vpop.permute.xlu1 %1693 }
 0x4f4   :  { %1791 = vrot.lane.b32.xlu2 %v6500_v26, %s5928_s18  ;;  %12816 = vst [vmem:[#allocation428_spill] sm:$0xff] %v7982_v58 }
 0x4f5   :  { %1781 = vrot.lane.b32.xlu0 %v12479_v13, %s5928_s18 }
 0x4f6   :  { %v7980_v7 = vpop.permute.xlu2 %1725 }
 0x4f7   :  { %12815 = vst [vmem:[#allocation427_spill] sm:$0xff] %v7980_v7  ;;  %v7998_v7 = vpop.permute.xlu0 %1697 }
 0x4f8   :  { %12820 = vst [vmem:[#allocation432_spill] sm:$0xff] %v7998_v7 }
 0x4f9   :  { %1783 = vrot.lane.b32.xlu1 %v6527_v51, %s5928_s18 }
 0x4fb   :  { %v7994_v47 = vpop.permute.xlu1 %1699 }
 0x4fc   :  { %1797 = vrot.lane.b32.xlu2 %v6523_v42, %s5928_s18  ;;  %12819 = vst [vmem:[#allocation431_spill] sm:$0xff] %v7994_v47 }
 0x4fd   :  { %1787 = vrot.lane.b32.xlu0 %v6554_v62, %s5928_s18 }
 0x4fe   :  { %v7992_v24 = vpop.permute.xlu2 %1731 }
 0x4ff   :  { %12818 = vst [vmem:[#allocation430_spill] sm:$0xff] %v7992_v24  ;;  %v8010_v24 = vpop.permute.xlu0 %1703 }
 0x500   :  { %12823 = vst [vmem:[#allocation435_spill] sm:$0xff] %v8010_v24 }
 0x501   :  { %1789 = vrot.lane.b32.xlu1 %v6548_v49, %s5928_s18 }
 0x503   :  { %v8006_v58 = vpop.permute.xlu1 %1705 }
 0x504   :  { %1803 = vrot.lane.b32.xlu2 %v6544_v45, %s5928_s18  ;;  %12822 = vst [vmem:[#allocation434_spill] sm:$0xff] %v8006_v58 }
 0x505   :  { %1793 = vrot.lane.b32.xlu0 %v6570_v17, %s5928_s18 }
 0x506   :  { %v8004_v53 = vpop.permute.xlu2 %1737 }
 0x507   :  { %12821 = vst [vmem:[#allocation433_spill] sm:$0xff] %v8004_v53  ;;  %v8022_v53 = vpop.permute.xlu0 %1709 }
 0x508   :  { %12826 = vst [vmem:[#allocation438_spill] sm:$0xff] %v8022_v53 }
 0x509   :  { %1795 = vrot.lane.b32.xlu1 %v6564_v23, %s5928_s18 }
 0x50b   :  { %v8018_v47 = vpop.permute.xlu1 %1711 }
 0x50c   :  { %1809 = vrot.lane.b32.xlu2 %v6086_v38, %s5929_s19  ;;  %12825 = vst [vmem:[#allocation437_spill] sm:$0xff] %v8018_v47 }
 0x50d   :  { %1799 = vrot.lane.b32.xlu0 %v6586_v27, %s5928_s18 }
 0x50e   :  { %v8016_v7 = vpop.permute.xlu2 %1743 }
 0x50f   :  { %12824 = vst [vmem:[#allocation436_spill] sm:$0xff] %v8016_v7  ;;  %v8034_v7 = vpop.permute.xlu0 %1715 }
 0x510   :  { %12829 = vst [vmem:[#allocation441_spill] sm:$0xff] %v8034_v7 }
 0x511   :  { %1801 = vrot.lane.b32.xlu1 %v6580_v18, %s5928_s18 }
 0x513   :  { %v8030_v24 = vpop.permute.xlu1 %1717 }
 0x514   :  { %1815 = vrot.lane.b32.xlu2 %v6105_v3, %s5929_s19  ;;  %12828 = vst [vmem:[#allocation440_spill] sm:$0xff] %v8030_v24 }
 0x515   :  { %1805 = vrot.lane.b32.xlu0 %v6032_v35, %s5929_s19 }
 0x516   :  { %v8028_v58 = vpop.permute.xlu2 %1749 }
 0x517   :  { %12827 = vst [vmem:[#allocation439_spill] sm:$0xff] %v8028_v58  ;;  %v8046_v58 = vpop.permute.xlu0 %1721 }
 0x518   :  { %12832 = vst [vmem:[#allocation444_spill] sm:$0xff] %v8046_v58 }
 0x519   :  { %1807 = vrot.lane.b32.xlu1 %v6123_v40, %s5929_s19 }
 0x51b   :  { %v8042_v47 = vpop.permute.xlu1 %1723 }
 0x51c   :  { %1821 = vrot.lane.b32.xlu2 %v6030_v33, %s5929_s19  ;;  %12831 = vst [vmem:[#allocation443_spill] sm:$0xff] %v8042_v47 }
 0x51d   :  { %1811 = vrot.lane.b32.xlu0 %v6154_v19, %s5929_s19 }
 0x51e   :  { %v8040_v53 = vpop.permute.xlu2 %1755 }
 0x51f   :  { %12830 = vst [vmem:[#allocation442_spill] sm:$0xff] %v8040_v53  ;;  %v8058_v53 = vpop.permute.xlu0 %1727 }
 0x520   :  { %12835 = vst [vmem:[#allocation447_spill] sm:$0xff] %v8058_v53 }
 0x521   :  { %1813 = vrot.lane.b32.xlu1 %v6065_v12, %s5929_s19 }
 0x523   :  { %v8054_v24 = vpop.permute.xlu1 %1729 }
 0x524   :  { %1827 = vrot.lane.b32.xlu2 %v6121_v34, %s5929_s19  ;;  %12834 = vst [vmem:[#allocation446_spill] sm:$0xff] %v8054_v24 }
 0x525   :  { %1817 = vrot.lane.b32.xlu0 %v6171_v55, %s5929_s19 }
 0x526   :  { %v8052_v7 = vpop.permute.xlu2 %1761 }
 0x527   :  { %12833 = vst [vmem:[#allocation445_spill] sm:$0xff] %v8052_v7  ;;  %v8070_v7 = vpop.permute.xlu0 %1733 }
 0x528   :  { %12838 = vst [vmem:[#allocation450_spill] sm:$0xff] %v8070_v7 }
 0x529   :  { %1819 = vrot.lane.b32.xlu1 %v6142_v14, %s5929_s19 }
 0x52b   :  { %v8066_v58 = vpop.permute.xlu1 %1735 }
 0x52c   :  { %1833 = vrot.lane.b32.xlu2 %v6140_v2, %s5929_s19  ;;  %12837 = vst [vmem:[#allocation449_spill] sm:$0xff] %v8066_v58 }
 0x52d   :  { %1823 = vrot.lane.b32.xlu0 %v6053_v63, %s5929_s19 }
 0x52e   :  { %v8064_v47 = vpop.permute.xlu2 %1767 }
 0x52f   :  { %12836 = vst [vmem:[#allocation448_spill] sm:$0xff] %v8064_v47  ;;  %v8082_v47 = vpop.permute.xlu0 %1739 }
 0x530   :  { %12841 = vst [vmem:[#allocation453_spill] sm:$0xff] %v8082_v47 }
 0x531   :  { %1825 = vrot.lane.b32.xlu1 %v6165_v4, %s5929_s19 }
 0x533   :  { %v8078_v24 = vpop.permute.xlu1 %1741 }
 0x534   :  { %1839 = vrot.lane.b32.xlu2 %v6047_v52, %s5929_s19  ;;  %12840 = vst [vmem:[#allocation452_spill] sm:$0xff] %v8078_v24  ;;  %v12845_v24 = vld [vmem:[#allocation17_spill] sm:$0xff] }
 0x535   :  { %1829 = vrot.lane.b32.xlu0 %v6196_v29, %s5929_s19 }
 0x536   :  { %v8076_v53 = vpop.permute.xlu2 %1773 }
 0x537   :  { %12839 = vst [vmem:[#allocation451_spill] sm:$0xff] %v8076_v53  ;;  %v8094_v53 = vpop.permute.xlu0 %1745 }
 0x538   :  { %12844 = vst [vmem:[#allocation456_spill] sm:$0xff] %v8094_v53 }
 0x539   :  { %1831 = vrot.lane.b32.xlu1 %v6083_v32, %s5929_s19  ;;  %v12848_v32 = vld [vmem:[#allocation19_spill] sm:$0xff] }
 0x53b   :  { %v8090_v58 = vpop.permute.xlu1 %1747 }
 0x53c   :  { %1845 = vrot.lane.b32.xlu2 %v6163_v43, %s5929_s19  ;;  %12843 = vst [vmem:[#allocation455_spill] sm:$0xff] %v8090_v58  ;;  %v12850_v58 = vld [vmem:[#allocation10_spill] sm:$0xff] }
 0x53d   :  { %1835 = vrot.lane.b32.xlu0 %v12848_v32, %s5929_s19 }
 0x53e   :  { %v8088_v7 = vpop.permute.xlu2 %1779 }
 0x53f   :  { %12842 = vst [vmem:[#allocation454_spill] sm:$0xff] %v8088_v7  ;;  %v8106_v7 = vpop.permute.xlu0 %1751 }
 0x540   :  { %12849 = vst [vmem:[#allocation459_spill] sm:$0xff] %v8106_v7  ;;  %v12855_v7 = vld [vmem:[#allocation13_spill] sm:$0xff] }
 0x541   :  { %1837 = vrot.lane.b32.xlu1 %v12845_v24, %s5929_s19 }
 0x543   :  { %v8102_v43 = vpop.permute.xlu1 %1753 }
 0x544   :  { %1851 = vrot.lane.b32.xlu2 %v6183_v39, %s5929_s19  ;;  %12847 = vst [vmem:[#allocation458_spill] sm:$0xff] %v8102_v43  ;;  %v12854_v43 = vld [vmem:[#allocation18_spill] sm:$0xff] }
 0x545   :  { %1841 = vrot.lane.b32.xlu0 %v12765_v20, %s5929_s19 }
 0x546   :  { %v8100_v47 = vpop.permute.xlu2 %1785 }
 0x547   :  { %12846 = vst [vmem:[#allocation457_spill] sm:$0xff] %v8100_v47  ;;  %v8118_v47 = vpop.permute.xlu0 %1757 }
 0x548   :  { %12853 = vst [vmem:[#allocation462_spill] sm:$0xff] %v8118_v47 }
 0x549   :  { %1843 = vrot.lane.b32.xlu1 %v6210_v61, %s5929_s19 }
 0x54b   :  { %v8114_v39 = vpop.permute.xlu1 %1759 }
 0x54c   :  { %1857 = vrot.lane.b32.xlu2 %v12850_v58, %s5929_s19  ;;  %12852 = vst [vmem:[#allocation461_spill] sm:$0xff] %v8114_v39  ;;  %v12859_v39 = vld [vmem:[#allocation20_spill] sm:$0xff] }
 0x54d   :  { %1847 = vrot.lane.b32.xlu0 %v6240_v56, %s5929_s19 }
 0x54e   :  { %v8112_v53 = vpop.permute.xlu2 %1791 }
 0x54f   :  { %12851 = vst [vmem:[#allocation460_spill] sm:$0xff] %v8112_v53  ;;  %v8130_v53 = vpop.permute.xlu0 %1763 }
 0x550   :  { %12858 = vst [vmem:[#allocation464_spill] sm:$0xff] %v8130_v53  ;;  %v12865_v53 = vld [vmem:[#allocation24_spill] sm:$0xff] }
 0x551   :  { %1849 = vrot.lane.b32.xlu1 %v12855_v7, %s5929_s19  ;;  %v12862_v7 = vld [vmem:[#allocation25_spill] sm:$0xff] }
 0x553   :  { %v8126_v58 = vpop.permute.xlu1 %1765 }
 0x554   :  { %1863 = vrot.lane.b32.xlu2 %v12854_v43, %s5929_s19  ;;  %12857 = vst [vmem:[#allocation463_spill] sm:$0xff] %v8126_v58  ;;  %v12864_v58 = vld [vmem:[#allocation23_spill] sm:$0xff] }
 0x555   :  { %1853 = vrot.lane.b32.xlu0 %v12862_v7, %s5929_s19 }
 0x556   :  { %v8124_v24 = vpop.permute.xlu2 %1797 }
 0x557   :  { %12856 = vst [vmem:[#allocation18_spill] sm:$0xff] %v8124_v24  ;;  %v8142_v24 = vpop.permute.xlu0 %1769 }
 0x558   :  { %12863 = vst [vmem:[#allocation25_spill] sm:$0xff] %v8142_v24 }
 0x559   :  { %1855 = vrot.lane.b32.xlu1 %v12685_v31, %s5929_s19 }
 0x55b   :  { %v8138_v32 = vpop.permute.xlu1 %1771 }
 0x55c   :  { %1869 = vrot.lane.b32.xlu2 %v12859_v39, %s5929_s19  ;;  %12861 = vst [vmem:[#allocation466_spill] sm:$0xff] %v8138_v32  ;;  %v12869_v32 = vld [vmem:[#allocation28_spill] sm:$0xff] }
 0x55d   :  { %1859 = vrot.lane.b32.xlu0 %v12605_v41, %s5929_s19 }
 0x55e   :  { %v8136_v47 = vpop.permute.xlu2 %1803 }
 0x55f   :  { %12860 = vst [vmem:[#allocation465_spill] sm:$0xff] %v8136_v47  ;;  %v8154_v47 = vpop.permute.xlu0 %1775 }
 0x560   :  { %12868 = vst [vmem:[#allocation469_spill] sm:$0xff] %v8154_v47 }
 0x561   :  { %1861 = vrot.lane.b32.xlu1 %v12865_v53, %s5929_s19 }
 0x563   :  { %v8150_v39 = vpop.permute.xlu1 %1777 }
 0x564   :  { %1875 = vrot.lane.b32.xlu2 %v12864_v58, %s5929_s19  ;;  %12867 = vst [vmem:[#allocation468_spill] sm:$0xff] %v8150_v39  ;;  %v12873_v39 = vld [vmem:[#allocation31_spill] sm:$0xff] }
 0x565   :  { %1865 = vrot.lane.b32.xlu0 %v12785_v28, %s5929_s19 }
 0x566   :  { %v8148_v56 = vpop.permute.xlu2 %1809 }
 0x567   :  { %12866 = vst [vmem:[#allocation467_spill] sm:$0xff] %v8148_v56  ;;  %v8166_v56 = vpop.permute.xlu0 %1781 }
 0x568   :  { %12872 = vst [vmem:[#allocation471_spill] sm:$0xff] %v8166_v56 }
 0x569   :  { %1867 = vrot.lane.b32.xlu1 %v12782_v15, %s5929_s19 }
 0x56b   :  { %v8162_v58 = vpop.permute.xlu1 %1783 }
 0x56c   :  { %1881 = vrot.lane.b32.xlu2 %v12869_v32, %s5929_s19  ;;  %12871 = vst [vmem:[#allocation470_spill] sm:$0xff] %v8162_v58 }
 0x56d   :  { %1871 = vrot.lane.b32.xlu0 %v12702_v60, %s5929_s19 }
 0x56e   :  { %v8160_v24 = vpop.permute.xlu2 %1815 }
 0x56f   :  { %12870 = vst [vmem:[#allocation28_spill] sm:$0xff] %v8160_v24  ;;  %v8178_v24 = vpop.permute.xlu0 %1787 }
 0x570   :  { %12876 = vst [vmem:[#allocation473_spill] sm:$0xff] %v8178_v24 }
 0x571   :  { %1873 = vrot.lane.b32.xlu1 %v12525_v30, %s5929_s19 }
 0x573   :  { %v8174_v31 = vpop.permute.xlu1 %1789 }
 0x574   :  { %1887 = vrot.lane.b32.xlu2 %v12873_v39, %s5929_s19  ;;  %12875 = vst [vmem:[#allocation472_spill] sm:$0xff] %v8174_v31  ;;  %v12880_v31 = vld [vmem:[#allocation40_spill] sm:$0xff] }
 0x575   :  { %1877 = vrot.lane.b32.xlu0 %v12445_v54, %s5929_s19 }
 0x576   :  { %v8172_v47 = vpop.permute.xlu2 %1821 }
 0x577   :  { %12874 = vst [vmem:[#allocation31_spill] sm:$0xff] %v8172_v47  ;;  %v8190_v47 = vpop.permute.xlu0 %1793 }
 0x578   :  { %12879 = vst [vmem:[#allocation476_spill] sm:$0xff] %v8190_v47 }
 0x579   :  { %1879 = vrot.lane.b32.xlu1 %v12705_v21, %s5929_s19 }
 0x57b   :  { %v8186_v56 = vpop.permute.xlu1 %1795 }
 0x57c   :  { %1893 = vrot.lane.b32.xlu2 %v12791_v9, %s5929_s19  ;;  %12878 = vst [vmem:[#allocation475_spill] sm:$0xff] %v8186_v56 }
 0x57d   :  { %1883 = vrot.lane.b32.xlu0 %v12625_v37, %s5929_s19 }
 0x57e   :  { %v8184_v58 = vpop.permute.xlu2 %1827 }
 0x57f   :  { %12877 = vst [vmem:[#allocation474_spill] sm:$0xff] %v8184_v58  ;;  %v8202_v58 = vpop.permute.xlu0 %1799 }
 0x580   :  { %12883 = vst [vmem:[#allocation478_spill] sm:$0xff] %v8202_v58 }
 0x581   :  { %1885 = vrot.lane.b32.xlu1 %v12622_v44, %s5929_s19 }
 0x583   :  { %v8198_v9 = vpop.permute.xlu1 %1801 }
 0x584   :  { %1899 = vrot.lane.b32.xlu2 %v12880_v31, %s5929_s19  ;;  %12882 = vst [vmem:[#allocation477_spill] sm:$0xff] %v8198_v9  ;;  %v12887_v9 = vld [vmem:[#allocation49_spill] sm:$0xff] }
 0x585   :  { %1889 = vrot.lane.b32.xlu0 %v12542_v48, %s5929_s19 }
 0x586   :  { %v8196_v24 = vpop.permute.xlu2 %1833 }
 0x587   :  { %12881 = vst [vmem:[#allocation40_spill] sm:$0xff] %v8196_v24  ;;  %v8214_v24 = vpop.permute.xlu0 %1805 }
 0x588   :  { %12886 = vst [vmem:[#allocation481_spill] sm:$0xff] %v8214_v24 }
 0x589   :  { %1891 = vrot.lane.b32.xlu1 %v12539_v6, %s5929_s19 }
 0x58b   :  { %v8210_v47 = vpop.permute.xlu1 %1807 }
 0x58c   :  { %1905 = vrot.lane.b32.xlu2 %v12798_v8, %s5929_s19  ;;  %12885 = vst [vmem:[#allocation480_spill] sm:$0xff] %v8210_v47 }
 0x58d   :  { %1895 = vrot.lane.b32.xlu0 %v12459_v0, %s5929_s19 }
 0x58e   :  { %v8208_v56 = vpop.permute.xlu2 %1839 }
 0x58f   :  { %12884 = vst [vmem:[#allocation479_spill] sm:$0xff] %v8208_v56  ;;  %v8226_v56 = vpop.permute.xlu0 %1811 }
 0x590   :  { %12890 = vst [vmem:[#allocation484_spill] sm:$0xff] %v8226_v56 }
 0x591   :  { %1897 = vrot.lane.b32.xlu1 %v12545_v1, %s5929_s19 }
 0x593   :  { %v8222_v8 = vpop.permute.xlu1 %1813 }
 0x594   :  { %1911 = vrot.lane.b32.xlu2 %v12887_v9, %s5929_s19  ;;  %12889 = vst [vmem:[#allocation483_spill] sm:$0xff] %v8222_v8 }
 0x595   :  { %1901 = vrot.lane.b32.xlu0 %v12465_v46, %s5929_s19 }
 0x596   :  { %v8220_v58 = vpop.permute.xlu2 %1845 }
 0x597   :  { %12888 = vst [vmem:[#allocation482_spill] sm:$0xff] %v8220_v58  ;;  %v8238_v58 = vpop.permute.xlu0 %1817 }
 0x598   :  { %12893 = vst [vmem:[#allocation487_spill] sm:$0xff] %v8238_v58 }
 0x599   :  { %1903 = vrot.lane.b32.xlu1 %v12462_v5, %s5929_s19 }
 0x59b   :  { %v8234_v47 = vpop.permute.xlu1 %1819 }
 0x59c   :  { %1917 = vrot.lane.b32.xlu2 %v12805_v57, %s5929_s19  ;;  %12892 = vst [vmem:[#allocation486_spill] sm:$0xff] %v8234_v47 }
 0x59d   :  { %1907 = vrot.lane.b32.xlu0 %v6468_v22, %s5929_s19 }
 0x59e   :  { %v8232_v24 = vpop.permute.xlu2 %1851 }
 0x59f   :  { %12891 = vst [vmem:[#allocation485_spill] sm:$0xff] %v8232_v24  ;;  %v8250_v24 = vpop.permute.xlu0 %1823 }
 0x5a0   :  { %12896 = vst [vmem:[#allocation490_spill] sm:$0xff] %v8250_v24 }
 0x5a1   :  { %1909 = vrot.lane.b32.xlu1 %v6459_v10, %s5929_s19 }
 0x5a3   :  { %v8246_v8 = vpop.permute.xlu1 %1825 }
 0x5a4   :  { %1923 = vrot.lane.b32.xlu2 %v12723_v59, %s5929_s19  ;;  %12895 = vst [vmem:[#allocation489_spill] sm:$0xff] %v8246_v8 }
 0x5a5   :  { %1913 = vrot.lane.b32.xlu0 %v6490_v11, %s5929_s19 }
 0x5a6   :  { %v8244_v56 = vpop.permute.xlu2 %1857 }
 0x5a7   :  { %12894 = vst [vmem:[#allocation488_spill] sm:$0xff] %v8244_v56  ;;  %v8262_v56 = vpop.permute.xlu0 %1829 }
 0x5a8   :  { %12899 = vst [vmem:[#allocation493_spill] sm:$0xff] %v8262_v56 }
 0x5a9   :  { %1915 = vrot.lane.b32.xlu1 %v12470_v36, %s5929_s19 }
 0x5ab   :  { %v8258_v47 = vpop.permute.xlu1 %1831 }
 0x5ac   :  { %1929 = vrot.lane.b32.xlu2 %v12641_v16, %s5929_s19  ;;  %12898 = vst [vmem:[#allocation492_spill] sm:$0xff] %v8258_v47 }
 0x5ad   :  { %1919 = vrot.lane.b32.xlu0 %v6513_v50, %s5929_s19 }
 0x5ae   :  { %v8256_v58 = vpop.permute.xlu2 %1863 }
 0x5af   :  { %12897 = vst [vmem:[#allocation491_spill] sm:$0xff] %v8256_v58  ;;  %v8274_v58 = vpop.permute.xlu0 %1835 }
 0x5b0   :  { %12902 = vst [vmem:[#allocation496_spill] sm:$0xff] %v8274_v58 }
 0x5b1   :  { %1921 = vrot.lane.b32.xlu1 %v12559_v25, %s5929_s19 }
 0x5b3   :  { %v8270_v8 = vpop.permute.xlu1 %1837 }
 0x5b4   :  { %1935 = vrot.lane.b32.xlu2 %v6500_v26, %s5929_s19  ;;  %12901 = vst [vmem:[#allocation495_spill] sm:$0xff] %v8270_v8 }
 0x5b5   :  { %1925 = vrot.lane.b32.xlu0 %v12479_v13, %s5929_s19 }
 0x5b6   :  { %v8268_v24 = vpop.permute.xlu2 %1869 }
 0x5b7   :  { %12900 = vst [vmem:[#allocation494_spill] sm:$0xff] %v8268_v24  ;;  %v8286_v24 = vpop.permute.xlu0 %1841 }
 0x5b8   :  { %12905 = vst [vmem:[#allocation499_spill] sm:$0xff] %v8286_v24 }
 0x5b9   :  { %1927 = vrot.lane.b32.xlu1 %v6527_v51, %s5929_s19 }
 0x5bb   :  { %v8282_v47 = vpop.permute.xlu1 %1843 }
 0x5bc   :  { %1941 = vrot.lane.b32.xlu2 %v6523_v42, %s5929_s19  ;;  %12904 = vst [vmem:[#allocation498_spill] sm:$0xff] %v8282_v47 }
 0x5bd   :  { %1931 = vrot.lane.b32.xlu0 %v6554_v62, %s5929_s19 }
 0x5be   :  { %v8280_v56 = vpop.permute.xlu2 %1875 }
 0x5bf   :  { %12903 = vst [vmem:[#allocation497_spill] sm:$0xff] %v8280_v56  ;;  %v8298_v56 = vpop.permute.xlu0 %1847 }
 0x5c0   :  { %12908 = vst [vmem:[#allocation502_spill] sm:$0xff] %v8298_v56 }
 0x5c1   :  { %1933 = vrot.lane.b32.xlu1 %v6548_v49, %s5929_s19 }
 0x5c3   :  { %v8294_v8 = vpop.permute.xlu1 %1849 }
 0x5c4   :  { %1947 = vrot.lane.b32.xlu2 %v6544_v45, %s5929_s19  ;;  %12907 = vst [vmem:[#allocation501_spill] sm:$0xff] %v8294_v8 }
 0x5c5   :  { %1937 = vrot.lane.b32.xlu0 %v6570_v17, %s5929_s19 }
 0x5c6   :  { %v8292_v58 = vpop.permute.xlu2 %1881 }
 0x5c7   :  { %12906 = vst [vmem:[#allocation500_spill] sm:$0xff] %v8292_v58  ;;  %v8310_v58 = vpop.permute.xlu0 %1853 }
 0x5c8   :  { %12911 = vst [vmem:[#allocation505_spill] sm:$0xff] %v8310_v58 }
 0x5c9   :  { %1939 = vrot.lane.b32.xlu1 %v6564_v23, %s5929_s19 }
 0x5cb   :  { %v8306_v47 = vpop.permute.xlu1 %1855 }
 0x5cc   :  { %1953 = vrot.lane.b32.xlu2 %v6086_v38, %s5930_s20  ;;  %12910 = vst [vmem:[#allocation504_spill] sm:$0xff] %v8306_v47 }
 0x5cd   :  { %1943 = vrot.lane.b32.xlu0 %v6586_v27, %s5929_s19 }
 0x5ce   :  { %v8304_v24 = vpop.permute.xlu2 %1887 }
 0x5cf   :  { %12909 = vst [vmem:[#allocation503_spill] sm:$0xff] %v8304_v24  ;;  %v8322_v24 = vpop.permute.xlu0 %1859 }
 0x5d0   :  { %12914 = vst [vmem:[#allocation508_spill] sm:$0xff] %v8322_v24 }
 0x5d1   :  { %1945 = vrot.lane.b32.xlu1 %v6580_v18, %s5929_s19 }
 0x5d3   :  { %v8318_v8 = vpop.permute.xlu1 %1861 }
 0x5d4   :  { %1959 = vrot.lane.b32.xlu2 %v6105_v3, %s5930_s20  ;;  %12913 = vst [vmem:[#allocation507_spill] sm:$0xff] %v8318_v8 }
 0x5d5   :  { %1949 = vrot.lane.b32.xlu0 %v6032_v35, %s5930_s20 }
 0x5d6   :  { %v8316_v56 = vpop.permute.xlu2 %1893 }
 0x5d7   :  { %12912 = vst [vmem:[#allocation506_spill] sm:$0xff] %v8316_v56  ;;  %v8334_v56 = vpop.permute.xlu0 %1865 }
 0x5d8   :  { %12917 = vst [vmem:[#allocation511_spill] sm:$0xff] %v8334_v56  ;;  %v2093_v56 = vrot.slane %v6123_v40, 7 }
 0x5d9   :  { %1951 = vrot.lane.b32.xlu1 %v6123_v40, %s5930_s20  ;;  %v2228_v40 = vrot.slane %v6121_v34, 6 }
 0x5db   :  { %v8330_v47 = vpop.permute.xlu1 %1867 }
 0x5dc   :  { %1965 = vrot.lane.b32.xlu2 %v6030_v33, %s5930_s20  ;;  %12916 = vst [vmem:[#allocation510_spill] sm:$0xff] %v8330_v47  ;;  %v2478_v33 = vrot.slane %v12865_v53, 7 }
 0x5dd   :  { %1955 = vrot.lane.b32.xlu0 %v6154_v19, %s5930_s20 }
 0x5de   :  { %v8328_v58 = vpop.permute.xlu2 %1899 }
 0x5df   :  { %12915 = vst [vmem:[#allocation509_spill] sm:$0xff] %v8328_v58  ;;  %v8346_v58 = vpop.permute.xlu0 %1871 }
 0x5e0   :  { %12920 = vst [vmem:[#allocation514_spill] sm:$0xff] %v8346_v58  ;;  %v2095_v58 = vsel %vm2094_vm4, %v2093_v56, %v6032_v35  ;;  %v2099_v35 = vrot.slane %v6154_v19, 5 }
 0x5e1   :  { %1957 = vrot.lane.b32.xlu1 %v6065_v12, %s5930_s20 }
 0x5e3   :  { %v8342_v8 = vpop.permute.xlu1 %1873 }
 0x5e4   :  { %1971 = vrot.lane.b32.xlu2 %v6121_v34, %s5930_s20  ;;  %12919 = vst [vmem:[#allocation513_spill] sm:$0xff] %v8342_v8  ;;  %v2096_v8 = vrot.slane %v6086_v38, 6  ;;  %v2352_v38 = vrot.slane %v6210_v61, 7  ;;  %v2105_v34 = vrot.slane %v6105_v3, 3 }
 0x5e5   :  { %1961 = vrot.lane.b32.xlu0 %v6171_v55, %s5930_s20 }
 0x5e6   :  { %v8340_v24 = vpop.permute.xlu2 %1905  ;;  %v2098_v9 = vsel %vm2097_vm5, %v2096_v8, %v2095_v58  ;;  %v2230_v8 = vrot.slane %v6196_v29, 5  ;;  %v12925_v58 = vld [vmem:[#allocation15_spill] sm:$0xff]  ;;  %v2353_v3 = vsel %vm2094_vm4, %v2352_v38, %v12765_v20 }
 0x5e7   :  { %12918 = vst [vmem:[#allocation512_spill] sm:$0xff] %v8340_v24  ;;  %v2226_v24 = vrot.slane %v6165_v4, 7  ;;  %v8364_v16 = vpop.permute.xlu0 %1877 }
 0x5e8   :  { %12923 = vst [vmem:[#allocation517_spill] sm:$0xff] %v8364_v16  ;;  %v2354_v16 = vrot.slane %v12925_v58, 6 }
 0x5e9   :  { %1963 = vrot.lane.b32.xlu1 %v6142_v14, %s5930_s20 }
 0x5ea   :  { %v2355_v38 = vsel %vm2097_vm5, %v2354_v16, %v2353_v3 }
 0x5eb   :  { %v8356_v45 = vpop.permute.xlu1 %1879 }
 0x5ec   :  { %1977 = vrot.lane.b32.xlu2 %v6140_v2, %s5930_s20  ;;  %12922 = vst [vmem:[#allocation516_spill] sm:$0xff] %v8356_v45  ;;  %v2102_v45 = vrot.slane %v6065_v12, 4  ;;  %v2101_v12 = vsel %vm2100_vm6, %v2099_v35, %v2098_v9 }
 0x5ed   :  { %1967 = vrot.lane.b32.xlu0 %v6053_v63, %s5930_s20 }
 0x5ee   :  { %v8353_v47 = vpop.permute.xlu2 %1911  ;;  %v2104_v19 = vsel %vm2103_vm7, %v2102_v45, %v2101_v12 }
 0x5ef   :  { %12921 = vst [vmem:[#allocation515_spill] sm:$0xff] %v8353_v47  ;;  %v2227_v47 = vsel %vm2094_vm4, %v2226_v24, %v6053_v63  ;;  %v2107_v12 = vsel %vm2106_vm8, %v2105_v34, %v2104_v19  ;;  %v12930_v63 = vld [vmem:[#allocation22_spill] sm:$0xff]  ;;  %v12931_v19 = vld [vmem:[#allocation45_spill] sm:$0xff] }
 0x5f0   :  { %v2229_v56 = vsel %vm2097_vm5, %v2228_v40, %v2227_v47  ;;  %v2108_v47 = vrot.slane %v6171_v55, 2  ;;  %v12927_v40 = vld [vmem:[#allocation11_spill] sm:$0xff]  ;;  %v2356_v18 = vrot.slane %v12930_v63, 5  ;;  %v2234_v55 = vrot.slane %v6140_v2, 3 }
 0x5f1   :  { %1969 = vrot.lane.b32.xlu1 %v6165_v4, %s5930_s20  ;;  %v2479_v4 = vsel %vm2094_vm4, %v2478_v33, %v12605_v41  ;;  %v2231_v9 = vsel %vm2100_vm6, %v2230_v8, %v2229_v56  ;;  %v2232_v35 = vrot.slane %v12927_v40, 4  ;;  %v2482_v56 = vrot.slane %v12785_v28, 5 }
 0x5f2   :  { %v2110_v16 = vsel %vm2109_vm9, %v2108_v47, %v2107_v12  ;;  %v2357_v34 = vsel %vm2100_vm6, %v2356_v18, %v2355_v38  ;;  %v12936_v47 = vld [vmem:[#allocation19_spill] sm:$0xff] }
 0x5f3   :  { %v8385_v53 = vpop.permute.xlu1 %1885  ;;  %v2233_v41 = vsel %vm2103_vm7, %v2232_v35, %v2231_v9  ;;  %v12933_v9 = vld [vmem:[#allocation13_spill] sm:$0xff]  ;;  %v2236_v12 = vrot.slane %v12936_v47, 2 }
 0x5f4   :  { %1983 = vrot.lane.b32.xlu2 %v6047_v52, %s5930_s20  ;;  %v2480_v52 = vrot.slane %v12854_v43, 6  ;;  %12926 = vst [vmem:[#allocation15_spill] sm:$0xff] %v8385_v53  ;;  %v12929_v53 = vld [vmem:[#allocation63_spill] sm:$0xff]  ;;  %v2235_v2 = vsel %vm2106_vm8, %v2234_v55, %v2233_v41  ;;  %v2358_v35 = vrot.slane %v12933_v9, 4 }
 0x5f5   :  { %v2114_v45 = vrot.slane %v12929_v53, 7  ;;  %v2484_v53 = vrot.slane %v12782_v15, 4  ;;  %1973 = vrot.lane.b32.xlu0 %v6196_v29, %s5930_s20 }
 0x5f6   :  { %v8379_v24 = vpop.permute.xlu2 %1917  ;;  %v2481_v33 = vsel %vm2097_vm5, %v2480_v52, %v2479_v4  ;;  %v2111_v52 = vrot.slane %v6142_v14, 1  ;;  %v12937_v14 = vld [vmem:[#allocation20_spill] sm:$0xff]  ;;  %v2359_v41 = vsel %vm2103_vm7, %v2358_v35, %v2357_v34  ;;  %v2488_v34 = vrot.slane %v12702_v60, 2 }
 0x5f7   :  { %12924 = vst [vmem:[#allocation518_spill] sm:$0xff] %v8379_v24  ;;  %v8397_v24 = vpop.permute.xlu0 %1883  ;;  %v2483_v8 = vsel %vm2100_vm6, %v2482_v56, %v2481_v33  ;;  %v2115_v3 = vsel %vm2094_vm4, %v2114_v45, %v12931_v19  ;;  %v2486_v15 = vrot.slane %v12937_v14, 3  ;;  %v12939_v45 = vld [vmem:[#allocation42_spill] sm:$0xff]  ;;  %v2237_v19 = vsel %vm2109_vm9, %v2236_v12, %v2235_v2 }
 0x5f8   :  { %12928 = vst [vmem:[#allocation11_spill] sm:$0xff] %v8397_v24  ;;  %v2122_v38 = vrot.slane %v12939_v45, 3  ;;  %v8432_v33 = vsel %vm2112_vm10, %v2111_v52, %v2110_v16  ;;  %v2485_v56 = vsel %vm2103_vm7, %v2484_v53, %v2483_v8  ;;  %v12943_v45 = vld [vmem:[#allocation51_spill] sm:$0xff]  ;;  %v12944_v52 = vld [vmem:[#allocation17_spill] sm:$0xff] }
 0x5f9   :  { %1975 = vrot.lane.b32.xlu1 %v12927_v40, %s5930_s20  ;;  %v12935_v40 = vld [vmem:[#allocation38_spill] sm:$0xff]  ;;  %v2238_v51 = vrot.slane %v12944_v52, 1  ;;  %v12945_v53 = vld [vmem:[#allocation47_spill] sm:$0xff]  ;;  %v2487_v35 = vsel %vm2106_vm8, %v2486_v15, %v2485_v56  ;;  %v2490_v15 = vrot.slane %v12525_v30, 1 }
 0x5fa   :  { %v2116_v28 = vrot.slane %v12935_v40, 6  ;;  %v2120_v8 = vrot.slane %v12945_v53, 4 }
 0x5fb   :  { %v8421_v24 = vpop.permute.xlu1 %1891 }
 0x5fc   :  { %1989 = vrot.lane.b32.xlu2 %v12925_v58, %s5930_s20  ;;  %v12932_v58 = vld [vmem:[#allocation73_spill] sm:$0xff]  ;;  %12934 = vst [vmem:[#allocation63_spill] sm:$0xff] %v8421_v24  ;;  %v2117_v55 = vsel %vm2097_vm5, %v2116_v28, %v2115_v3  ;;  %v2604_v24 = vrot.slane %v12705_v21, 7  ;;  %v12946_v28 = vld [vmem:[#allocation48_spill] sm:$0xff] }
 0x5fd   :  { %v2240_v4 = vrot.slane %v12932_v58, 7  ;;  %v12940_v58 = vld [vmem:[#allocation16_spill] sm:$0xff]  ;;  %v2242_v3 = vrot.slane %v12946_v28, 6  ;;  %1979 = vrot.lane.b32.xlu0 %v12936_v47, %s5930_s20 }
 0x5fe   :  { %v8428_v18 = vpop.permute.xlu2 %1923  ;;  %v2360_v40 = vrot.slane %v12940_v58, 3  ;;  %v2605_v56 = vsel %vm2094_vm4, %v2604_v24, %v12445_v54  ;;  %v12950_v24 = vld [vmem:[#allocation74_spill] sm:$0xff] }
 0x5ff   :  { %12938 = vst [vmem:[#allocation22_spill] sm:$0xff] %v8428_v18  ;;  %v8440_v29 = vpop.permute.xlu0 %1889  ;;  %v12942_v18 = vld [vmem:[#allocation70_spill] sm:$0xff]  ;;  %v2241_v16 = vsel %vm2094_vm4, %v2240_v4, %v12943_v45  ;;  %v2362_v4 = vrot.slane %v12862_v7, 2  ;;  %v2606_v45 = vrot.slane %v12869_v32, 6 }
 0x600   :  { %12941 = vst [vmem:[#allocation45_spill] sm:$0xff] %v8440_v29  ;;  %v2118_v27 = vrot.slane %v12942_v18, 5  ;;  %v2361_v2 = vsel %vm2106_vm8, %v2360_v40, %v2359_v41  ;;  %v8455_v18 = vsel %vm2112_vm10, %v2238_v51, %v2237_v19  ;;  %v2243_v53 = vsel %vm2097_vm5, %v2242_v3, %v2241_v16  ;;  %v12948_v19 = vld [vmem:[#allocation21_spill] sm:$0xff] }
 0x601   :  { %1981 = vrot.lane.b32.xlu1 %v12944_v52, %s5930_s20  ;;  %v2363_v51 = vsel %vm2109_vm9, %v2362_v4, %v2361_v2  ;;  %v2489_v40 = vsel %vm2109_vm9, %v2488_v34, %v2487_v35  ;;  %v2608_v3 = vrot.slane %v12625_v37, 5  ;;  %v2730_v41 = vrot.slane %v12545_v1, 7  ;;  %v12951_v4 = vld [vmem:[#allocation84_spill] sm:$0xff]  ;;  %v12952_v35 = vld [vmem:[#allocation53_spill] sm:$0xff] }
 0x602   :  { %v2119_v12 = vsel %vm2100_vm6, %v2118_v27, %v2117_v55  ;;  %v12947_v27 = vld [vmem:[#allocation80_spill] sm:$0xff]  ;;  %v2366_v29 = vrot.slane %v12951_v4, 7  ;;  %v2607_v34 = vsel %vm2097_vm5, %v2606_v45, %v2605_v56  ;;  %v8488_v1 = vsel %vm2112_vm10, %v2490_v15, %v2489_v40  ;;  %v12958_v40 = vld [vmem:[#allocation10_spill] sm:$0xff] }
 0x603   :  { %v2244_v55 = vrot.slane %v12947_v27, 5  ;;  %v8470_v28 = vpop.permute.xlu1 %1897  ;;  %v2121_v52 = vsel %vm2103_vm7, %v2120_v8, %v2119_v12  ;;  %v2124_v27 = vrot.slane %v12950_v24, 2  ;;  %v12953_v8 = vld [vmem:[#allocation54_spill] sm:$0xff]  ;;  %v12956_v24 = vld [vmem:[#allocation69_spill] sm:$0xff]  ;;  %v2610_v45 = vrot.slane %v12622_v44, 4 }
 0x604   :  { %1995 = vrot.lane.b32.xlu2 %v12940_v58, %s5930_s20  ;;  %v2364_v58 = vrot.slane %v12948_v19, 1  ;;  %12949 = vst [vmem:[#allocation73_spill] sm:$0xff] %v8470_v28  ;;  %v2246_v28 = vrot.slane %v12952_v35, 4  ;;  %v2248_v12 = vrot.slane %v12953_v8, 3  ;;  %v2732_v56 = vrot.slane %v12880_v31, 6  ;;  %v12957_v35 = vld [vmem:[#allocation85_spill] sm:$0xff] }
 0x605   :  { %v2245_v2 = vsel %vm2100_vm6, %v2244_v55, %v2243_v53  ;;  %v2126_v53 = vrot.slane %v12956_v24, 1  ;;  %v2123_v55 = vsel %vm2106_vm8, %v2122_v38, %v2121_v52  ;;  %v2731_v15 = vsel %vm2094_vm4, %v2730_v41, %v12459_v0  ;;  %v12959_v24 = vld [vmem:[#allocation60_spill] sm:$0xff]  ;;  %1985 = vrot.lane.b32.xlu0 %v12765_v20, %s5930_s20 }
 0x606   :  { %v8485_v16 = vsel %vm2112_vm10, %v2364_v58, %v2363_v51  ;;  %v8492_v47 = vpop.permute.xlu2 %1929  ;;  %v2247_v4 = vsel %vm2103_vm7, %v2246_v28, %v2245_v2  ;;  %v2250_v51 = vrot.slane %v12957_v35, 2  ;;  %v2609_v58 = vsel %vm2100_vm6, %v2608_v3, %v2607_v34  ;;  %v12960_v28 = vld [vmem:[#allocation59_spill] sm:$0xff]  ;;  %v12961_v2 = vld [vmem:[#allocation58_spill] sm:$0xff] }
 0x607   :  { %v8490_v37 = vpop.permute.xlu0 %1895  ;;  %12955 = vst [vmem:[#allocation38_spill] sm:$0xff] %v8492_v47  ;;  %v2125_v8 = vsel %vm2109_vm9, %v2124_v27, %v2123_v55  ;;  %v2367_v38 = vsel %vm2094_vm4, %v2366_v29, %v12959_v24  ;;  %v2372_v3 = vrot.slane %v12960_v28, 4  ;;  %v2368_v34 = vrot.slane %v12961_v2, 6 }
 0x608   :  { %12954 = vst [vmem:[#allocation13_spill] sm:$0xff] %v8490_v37  ;;  %v2612_v41 = vrot.slane %v12873_v39, 3  ;;  %v2734_v35 = vrot.slane %v12465_v46, 5  ;;  %v12962_v37 = vld [vmem:[#allocation78_spill] sm:$0xff]  ;;  %v2249_v55 = vsel %vm2106_vm8, %v2248_v12, %v2247_v4  ;;  %v2611_v29 = vsel %vm2103_vm7, %v2610_v45, %v2609_v58 }
 0x609   :  { %1987 = vrot.lane.b32.xlu1 %v6210_v61, %s5930_s20  ;;  %v2252_v27 = vrot.slane %v12962_v37, 1  ;;  %v2733_v24 = vsel %vm2097_vm5, %v2732_v56, %v2731_v15  ;;  %v8523_v61 = vsel %vm2112_vm10, %v2126_v53, %v2125_v8  ;;  %v2251_v28 = vsel %vm2109_vm9, %v2250_v51, %v2249_v55  ;;  %v12964_v37 = vld [vmem:[#allocation62_spill] sm:$0xff]  ;;  %v12966_v15 = vld [vmem:[#allocation68_spill] sm:$0xff] }
 0x60a   :  { %v2369_v2 = vsel %vm2097_vm5, %v2368_v34, %v2367_v38  ;;  %v2856_v52 = vrot.slane %v12470_v36, 7  ;;  %v2374_v12 = vrot.slane %v12964_v37, 3  ;;  %v12965_v4 = vld [vmem:[#allocation90_spill] sm:$0xff]  ;;  %v2614_v56 = vrot.slane %v12542_v48, 2  ;;  %v12967_v8 = vld [vmem:[#allocation72_spill] sm:$0xff] }
 0x60b   :  { %v8520_v47 = vpop.permute.xlu1 %1903  ;;  %v2370_v45 = vrot.slane %v12965_v4, 5  ;;  %v2736_v58 = vrot.slane %v12462_v5, 4  ;;  %v2494_v53 = vrot.slane %v12966_v15, 6  ;;  %v2613_v51 = vsel %vm2106_vm8, %v2612_v41, %v2611_v29  ;;  %v12969_v15 = vld [vmem:[#allocation43_spill] sm:$0xff] }
 0x60c   :  { %2001 = vrot.lane.b32.xlu2 %v12958_v40, %s5930_s20  ;;  %12963 = vst [vmem:[#allocation19_spill] sm:$0xff] %v8520_v47  ;;  %v2735_v38 = vsel %vm2100_vm6, %v2734_v35, %v2733_v24  ;;  %v8542_v55 = vsel %vm2112_vm10, %v2252_v27, %v2251_v28  ;;  %v2858_v4 = vrot.slane %v12805_v57, 6  ;;  %v2616_v36 = vrot.slane %v12539_v6, 1  ;;  %v12971_v27 = vld [vmem:[#allocation83_spill] sm:$0xff]  ;;  %v12972_v28 = vld [vmem:[#allocation94_spill] sm:$0xff] }
 0x60d   :  { %v2371_v37 = vsel %vm2100_vm6, %v2370_v45, %v2369_v2  ;;  %v2738_v46 = vrot.slane %v12969_v15, 3  ;;  %v2857_v41 = vsel %vm2094_vm4, %v2856_v52, %v6490_v11  ;;  %v2982_v35 = vrot.slane %v6548_v49, 7  ;;  %1991 = vrot.lane.b32.xlu0 %v12930_v63, %s5930_s20  ;;  %v12980_v63 = vld [vmem:[#allocation88_spill] sm:$0xff] }
 0x60e   :  { %v8551_v29 = vpop.permute.xlu2 %1935  ;;  %v2620_v24 = vrot.slane %v12971_v27, 6  ;;  %v2492_v2 = vrot.slane %v12972_v28, 7  ;;  %v2615_v45 = vsel %vm2109_vm9, %v2614_v56, %v2613_v51  ;;  %v2737_v20 = vsel %vm2103_vm7, %v2736_v58, %v2735_v38  ;;  %v12976_v51 = vld [vmem:[#allocation103_spill] sm:$0xff] }
 0x60f   :  { %v8538_v34 = vpop.permute.xlu0 %1901  ;;  %12970 = vst [vmem:[#allocation42_spill] sm:$0xff] %v8551_v29  ;;  %v2373_v47 = vsel %vm2103_vm7, %v2372_v3, %v2371_v37  ;;  %v2860_v49 = vrot.slane %v6513_v50, 5  ;;  %v2740_v27 = vrot.slane %v6468_v22, 2  ;;  %v2859_v28 = vsel %vm2097_vm5, %v2858_v4, %v2857_v41  ;;  %v12977_v4 = vld [vmem:[#allocation65_spill] sm:$0xff] }
 0x610   :  { %12968 = vst [vmem:[#allocation20_spill] sm:$0xff] %v8538_v34  ;;  %v12973_v34 = vld [vmem:[#allocation95_spill] sm:$0xff]  ;;  %v2984_v56 = vrot.slane %v6500_v26, 6  ;;  %v8573_v38 = vsel %vm2112_vm10, %v2616_v36, %v2615_v45  ;;  %v2739_v3 = vsel %vm2106_vm8, %v2738_v46, %v2737_v20  ;;  %v2375_v37 = vsel %vm2106_vm8, %v2374_v12, %v2373_v47  ;;  %v12978_v45 = vld [vmem:[#allocation112_spill] sm:$0xff] }
 0x611   :  { %1993 = vrot.lane.b32.xlu1 %v12933_v9, %s5930_s20  ;;  %v2376_v29 = vrot.slane %v12973_v34, 2  ;;  %v2618_v9 = vrot.slane %v12976_v51, 7  ;;  %v2983_v34 = vsel %vm2094_vm4, %v2982_v35, %v6554_v62  ;;  %v2493_v41 = vsel %vm2094_vm4, %v2492_v2, %v12977_v4  ;;  %v12981_v62 = vld [vmem:[#allocation97_spill] sm:$0xff] }
 0x612   :  { %v2862_v51 = vrot.slane %v12559_v25, 4  ;;  %v2744_v52 = vrot.slane %v12978_v45, 7  ;;  %v2861_v46 = vsel %vm2100_vm6, %v2860_v49, %v2859_v28  ;;  %v2986_v20 = vrot.slane %v6570_v17, 5 }
 0x613   :  { %v8569_v58 = vpop.permute.xlu1 %1909  ;;  %v2377_v36 = vsel %vm2109_vm9, %v2376_v29, %v2375_v37  ;;  %v2741_v12 = vsel %vm2109_vm9, %v2740_v27, %v2739_v3  ;;  %v2985_v2 = vsel %vm2097_vm5, %v2984_v56, %v2983_v34  ;;  %v2495_v4 = vsel %vm2097_vm5, %v2494_v53, %v2493_v41  ;;  %v12982_v37 = vld [vmem:[#allocation104_spill] sm:$0xff] }
 0x614   :  { %2007 = vrot.lane.b32.xlu2 %v12854_v43, %s5930_s20  ;;  %v12974_v43 = vld [vmem:[#allocation89_spill] sm:$0xff]  ;;  %12975 = vst [vmem:[#allocation16_spill] sm:$0xff] %v8569_v58  ;;  %v2626_v58 = vrot.slane %v12980_v63, 3  ;;  %v2498_v29 = vrot.slane %v12981_v62, 4  ;;  %v2619_v45 = vsel %vm2094_vm4, %v2618_v9, %v12982_v37  ;;  %v2864_v49 = vrot.slane %v12723_v59, 3  ;;  %v12983_v63 = vld [vmem:[#allocation98_spill] sm:$0xff] }
 0x615   :  { %v2378_v11 = vrot.slane %v12974_v43, 1  ;;  %v2742_v43 = vrot.slane %v6459_v10, 1  ;;  %v2496_v47 = vrot.slane %v12983_v63, 5  ;;  %v2863_v27 = vsel %vm2103_vm7, %v2862_v51, %v2861_v46  ;;  %v12984_v62 = vld [vmem:[#allocation96_spill] sm:$0xff]  ;;  %v12985_v9 = vld [vmem:[#allocation113_spill] sm:$0xff]  ;;  %1997 = vrot.lane.b32.xlu0 %v12862_v7, %s5930_s20 }
 0x616   :  { %v2988_v56 = vrot.slane %v6564_v23, 4  ;;  %v2746_v53 = vrot.slane %v12984_v62, 6  ;;  %v2745_v3 = vsel %vm2094_vm4, %v2744_v52, %v12985_v9  ;;  %v2621_v51 = vsel %vm2097_vm5, %v2620_v24, %v2619_v45  ;;  %v12989_v52 = vld [vmem:[#allocation107_spill] sm:$0xff] }
 0x617   :  { %v8589_v35 = vpop.permute.xlu0 %1907  ;;  %v8603_v28 = vsel %vm2112_vm10, %v2378_v11, %v2377_v36  ;;  %v8614_v34 = vsel %vm2112_vm10, %v2742_v43, %v2741_v12  ;;  %v2987_v11 = vsel %vm2100_vm6, %v2986_v20, %v2985_v2  ;;  %v2497_v41 = vsel %vm2100_vm6, %v2496_v47, %v2495_v4  ;;  %v12987_v36 = vld [vmem:[#allocation106_spill] sm:$0xff]  ;;  %v12990_v24 = vld [vmem:[#allocation115_spill] sm:$0xff]  ;;  %v12991_v2 = vld [vmem:[#allocation121_spill] sm:$0xff] }
 0x618   :  { %12979 = vst [vmem:[#allocation70_spill] sm:$0xff] %v8589_v35  ;;  %v2624_v46 = vrot.slane %v12987_v36, 4  ;;  %v2499_v63 = vsel %vm2103_vm7, %v2498_v29, %v2497_v41  ;;  %v2622_v62 = vrot.slane %v12989_v52, 5  ;;  %v2865_v43 = vsel %vm2106_vm8, %v2864_v49, %v2863_v27  ;;  %v12992_v41 = vld [vmem:[#allocation116_spill] sm:$0xff]  ;;  %v12993_v49 = vld [vmem:[#allocation75_spill] sm:$0xff]  ;;  %v13007_v35 = vld [vmem:[#allocation138_spill] sm:$0xff] }
 0x619   :  { %1999 = vrot.lane.b32.xlu1 %v12948_v19, %s5930_s20  ;;  %v2866_v19 = vrot.slane %v12479_v13, 2  ;;  %v2990_v20 = vrot.slane %v6523_v42, 3  ;;  %v2747_v47 = vsel %vm2097_vm5, %v2746_v53, %v2745_v3  ;;  %v2750_v12 = vrot.slane %v12990_v24, 4  ;;  %v12996_v3 = vld [vmem:[#allocation100_spill] sm:$0xff] }
 0x61a   :  { %v2870_v4 = vrot.slane %v12991_v2, 7  ;;  %v2989_v45 = vsel %vm2103_vm7, %v2988_v56, %v2987_v11  ;;  %v2623_v29 = vsel %vm2100_vm6, %v2622_v62, %v2621_v51  ;;  %v2748_v36 = vrot.slane %v12992_v41, 5  ;;  %v12998_v11 = vld [vmem:[#allocation101_spill] sm:$0xff] }
 0x61b   :  { %v8623_v37 = vpop.permute.xlu1 %1915  ;;  %v2868_v27 = vrot.slane %v12993_v49, 1  ;;  %v12995_v7 = vrot.slane %v12967_v8, 3  ;;  %v2504_v24 = vrot.slane %v12996_v3, 1  ;;  %v2625_v2 = vsel %vm2103_vm7, %v2624_v46, %v2623_v29  ;;  %v13000_v8 = vld [vmem:[#allocation99_spill] sm:$0xff] }
 0x61c   :  { %2013 = vrot.lane.b32.xlu2 %v12937_v14, %s5930_s20  ;;  %v8617_v14 = vpop.permute.xlu2 %1941  ;;  %12988 = vst [vmem:[#allocation17_spill] sm:$0xff] %v8623_v37  ;;  %v2502_v9 = vrot.slane %v12998_v11, 2  ;;  %v2749_v51 = vsel %vm2100_vm6, %v2748_v36, %v2747_v47  ;;  %v2867_v62 = vsel %vm2109_vm9, %v2866_v19, %v2865_v43  ;;  %v2991_v41 = vsel %vm2106_vm8, %v2990_v20, %v2989_v45  ;;  %v13002_v29 = vld [vmem:[#allocation91_spill] sm:$0xff]  ;;  %v13003_v11 = vld [vmem:[#allocation24_spill] sm:$0xff]  ;;  %v13004_v43 = vld [vmem:[#allocation109_spill] sm:$0xff] }
 0x61d   :  { %12986 = vst [vmem:[#allocation51_spill] sm:$0xff] %v8617_v14  ;;  %v2501_v53 = vsel %vm2106_vm8, %v12995_v7, %v2499_v63  ;;  %v12997_v14 = vld [vmem:[#allocation92_spill] sm:$0xff]  ;;  %v2752_v37 = vrot.slane %v13000_v8, 3  ;;  %v2751_v63 = vsel %vm2103_vm7, %v2750_v12, %v2749_v51  ;;  %v13001_v7 = vld [vmem:[#allocation122_spill] sm:$0xff]  ;;  %v2994_v3 = vrot.slane %v13002_v29, 1  ;;  %v13005_v45 = vld [vmem:[#allocation105_spill] sm:$0xff] }
 0x61e   :  { %v2992_v56 = vrot.slane %v12997_v14, 2  ;;  %v2871_v46 = vsel %vm2094_vm4, %v2870_v4, %v13001_v7  ;;  %v2503_v47 = vsel %vm2109_vm9, %v2502_v9, %v2501_v53  ;;  %v2627_v19 = vsel %vm2106_vm8, %v2626_v58, %v2625_v2  ;;  %v13006_v12 = vld [vmem:[#allocation110_spill] sm:$0xff]  ;;  %v13010_v2 = vld [vmem:[#allocation124_spill] sm:$0xff] }
 0x61f   :  { %v8639_v52 = vpop.permute.xlu0 %1913  ;;  %v2630_v20 = vrot.slane %v13004_v43, 1  ;;  %v2872_v36 = vrot.slane %v13005_v45, 6  ;;  %v8665_v8 = vsel %vm2112_vm10, %v2504_v24, %v2503_v47  ;;  %v2628_v51 = vrot.slane %v13006_v12, 2  ;;  %v13009_v9 = vld [vmem:[#allocation118_spill] sm:$0xff] }
 0x620   :  { %12994 = vst [vmem:[#allocation47_spill] sm:$0xff] %v8639_v52  ;;  %v12999_v52 = vld [vmem:[#allocation23_spill] sm:$0xff]  ;;  %v2128_v4 = vrot.slane %v13007_v35, 7  ;;  %v2993_v7 = vsel %vm2109_vm9, %v2992_v56, %v2991_v41  ;;  %v2756_v53 = vrot.slane %v13009_v9, 1  ;;  %v2876_v43 = vrot.slane %v13010_v2, 4  ;;  %v13011_v45 = vld [vmem:[#allocation14_spill] sm:$0xff] }
 0x621   :  { %2005 = vrot.lane.b32.xlu1 %v13003_v11, %s5930_s20  ;;  %v2753_v11 = vsel %vm2106_vm8, %v2752_v37, %v2751_v63  ;;  %v2873_v58 = vsel %vm2097_vm5, %v2872_v36, %v2871_v46  ;;  %2003 = vrot.lane.b32.xlu0 %v13011_v45, %s5930_s20  ;;  %v2629_v47 = vsel %vm2109_vm9, %v2628_v51, %v2627_v19  ;;  %v13013_v35 = vld [vmem:[#allocation119_spill] sm:$0xff]  ;;  %v13014_v56 = vld [vmem:[#allocation125_spill] sm:$0xff]  ;;  %v13015_v63 = vld [vmem:[#allocation130_spill] sm:$0xff]  ;;  %v5931_v17 = vmov 1983009808  }
 0x622   :  { %v2754_v12 = vrot.slane %v13013_v35, 2  ;;  %v2874_v41 = vrot.slane %v13014_v56, 5  ;;  %v8685_v37 = vsel %vm2112_vm10, %v2630_v20, %v2629_v47  ;;  %v2996_v46 = vrot.slane %v13015_v63, 7  ;;  %v13019_v35 = vld [vmem:[#allocation139_spill] sm:$0xff] }
 0x623   :  { %v8670_v14 = vpop.permute.xlu1 %1921  ;;  %v8689_v36 = vsel %vm2112_vm10, %v2868_v27, %v2867_v62  ;;  %v8692_v9 = vsel %vm2112_vm10, %v2994_v3, %v2993_v7  ;;  %v2129_v20 = vsel %vm2094_vm4, %v2128_v4, %v13019_v35  ;;  %v13021_v62 = vld [vmem:[#allocation123_spill] sm:$0xff]  ;;  %v13022_v3 = vld [vmem:[#allocation145_spill] sm:$0xff] }
 0x624   :  { %2019 = vrot.lane.b32.xlu2 %v12999_v52, %s5930_s20  ;;  %13008 = vst [vmem:[#allocation48_spill] sm:$0xff] %v8670_v14  ;;  %v8678_v24 = vpop.permute.xlu2 %1947  ;;  %v2755_v51 = vsel %vm2109_vm9, %v2754_v12, %v2753_v11  ;;  %v2875_v45 = vsel %vm2100_vm6, %v2874_v41, %v2873_v58  ;;  %v2130_v56 = vrot.slane %v13021_v62, 6  ;;  %v2254_v7 = vrot.slane %v13022_v3, 7  ;;  %v13023_v11 = vld [vmem:[#allocation108_spill] sm:$0xff]  ;;  %v13024_v58 = vld [vmem:[#allocation114_spill] sm:$0xff]  ;;  %v13025_v4 = vld [vmem:[#allocation27_spill] sm:$0xff] }
 0x625   :  { %13012 = vst [vmem:[#allocation80_spill] sm:$0xff] %v8678_v24  ;;  %v8702_v47 = vsel %vm2112_vm10, %v2756_v53, %v2755_v51  ;;  %v2877_v27 = vsel %vm2103_vm7, %v2876_v43, %v2875_v45  ;;  %v2878_v12 = vrot.slane %v13023_v11, 3  ;;  %v2998_v41 = vrot.slane %v13024_v58, 6  ;;  %v13026_v53 = vld [vmem:[#allocation117_spill] sm:$0xff]  ;;  %v13027_v35 = vld [vmem:[#allocation131_spill] sm:$0xff]  ;;  %v13030_v14 = vld [vmem:[#allocation52_spill] sm:$0xff] }
 0x626   :  { %13016 = vst [vmem:[#allocation21_spill] sm:$0xff] %v8689_v36  ;;  %v3004_v51 = vrot.slane %v13026_v53, 3  ;;  %v2997_v43 = vsel %vm2094_vm4, %v2996_v46, %v13027_v35  ;;  %v2131_v45 = vsel %vm2097_vm5, %v2130_v56, %v2129_v20  ;;  %v13028_v62 = vld [vmem:[#allocation141_spill] sm:$0xff]  ;;  %v13029_v19 = vld [vmem:[#allocation127_spill] sm:$0xff]  ;;  %v2132_v58 = vrot.slane %v13030_v14, 5  ;;  %v13033_v53 = vld [vmem:[#allocation126_spill] sm:$0xff] }
 0x627   :  { %13017 = vst [vmem:[#allocation74_spill] sm:$0xff] %v8692_v9  ;;  %v8694_v2 = vpop.permute.xlu0 %1919  ;;  %v2134_v3 = vrot.slane %v13028_v62, 4  ;;  %v2879_v63 = vsel %vm2106_vm8, %v2878_v12, %v2877_v27  ;;  %v2882_v11 = vrot.slane %v13029_v19, 1  ;;  %v2136_v29 = vrot.slane %v13033_v53, 3  ;;  %v13034_v35 = vld [vmem:[#allocation146_spill] sm:$0xff]  ;;  %v13035_v56 = vld [vmem:[#allocation29_spill] sm:$0xff] }
 0x628   :  { %13018 = vst [vmem:[#allocation84_spill] sm:$0xff] %v8694_v2  ;;  %v3250_v46 = vunpack.c.l.s4 %v5931_v17  ;;  %v2255_v20 = vsel %vm2094_vm4, %v2254_v7, %v13034_v35  ;;  %v2999_v27 = vsel %vm2097_vm5, %v2998_v41, %v2997_v43  ;;  %v13036_v12 = vld [vmem:[#allocation133_spill] sm:$0xff]  ;;  %v13037_v62 = vld [vmem:[#allocation132_spill] sm:$0xff] }
 0x629   :  { %13020 = vst [vmem:[#allocation53_spill] sm:$0xff] %v8702_v47  ;;  %2011 = vrot.lane.b32.xlu1 %v13025_v4, %s5930_s20  ;;  %v13032_v4 = vld [vmem:[#allocation128_spill] sm:$0xff]  ;;  %2009 = vrot.lane.b32.xlu0 %v13035_v56, %s5930_s20  ;;  %v3002_v19 = vrot.slane %v13036_v12, 4  ;;  %v2256_v14 = vrot.slane %v13037_v62, 6  ;;  %v13039_v47 = vld [vmem:[#allocation154_spill] sm:$0xff]  ;;  %v13042_v43 = vld [vmem:[#allocation129_spill] sm:$0xff] }
 0x62a   :  { %v2880_v2 = vrot.slane %v13032_v4, 2  ;;  %v2380_v23 = vrot.slane %v13039_v47, 7  ;;  %v3395_v56 = vrot.slane %v13042_v43, 4  ;;  %v13048_v43 = vld [vmem:[#allocation76_spill] sm:$0xff] }
 0x62b   :  { %v8723_v24 = vpop.permute.xlu1 %1927  ;;  %v2257_v12 = vsel %vm2097_vm5, %v2256_v14, %v2255_v20 }
 0x62c   :  { %2025 = vrot.lane.b32.xlu2 %v12869_v32, %s5930_s20  ;;  %13031 = vst [vmem:[#allocation54_spill] sm:$0xff] %v8723_v24  ;;  %v2133_v32 = vsel %vm2100_vm6, %v2132_v58, %v2131_v45  ;;  %v2881_v4 = vsel %vm2109_vm9, %v2880_v2, %v2879_v63  ;;  %v13038_v24 = vld [vmem:[#allocation37_spill] sm:$0xff]  ;;  %v8741_v35 = vpop.permute.xlu2 %1953  ;;  %v13043_v45 = vld [vmem:[#allocation148_spill] sm:$0xff] }
 0x62d   :  { %v3000_v53 = vrot.slane %v13038_v24, 5  ;;  %v2135_v17 = vsel %vm2103_vm7, %v2134_v3, %v2133_v32  ;;  %v8744_v41 = vsel %vm2112_vm10, %v2882_v11, %v2881_v4  ;;  %v2260_v58 = vrot.slane %v13043_v45, 4  ;;  %v13044_v63 = vld [vmem:[#allocation149_spill] sm:$0xff]  ;;  %v13045_v11 = vld [vmem:[#allocation142_spill] sm:$0xff]  ;;  %v13049_v45 = vld [vmem:[#allocation8_spill] sm:$0xff] }
 0x62e   :  { %13041 = vst [vmem:[#allocation85_spill] sm:$0xff] %v8744_v41  ;;  %v8750_v24 = vunpack.c.0.s8 %v3250_v46  ;;  %v2258_v47 = vrot.slane %v13044_v63, 5  ;;  %v2137_v32 = vsel %vm2106_vm8, %v2136_v29, %v2135_v17  ;;  %v2140_v62 = vrot.slane %v13045_v11, 1  ;;  %v13046_v4 = vld [vmem:[#allocation162_spill] sm:$0xff]  ;;  %v13047_v46 = vld [vmem:[#allocation143_spill] sm:$0xff]  ;;  %v13050_v29 = vld [vmem:[#allocation137_spill] sm:$0xff] }
 0x62f   :  { %v8739_v7 = vpop.permute.xlu0 %1925  ;;  %v3001_v2 = vsel %vm2100_vm6, %v3000_v53, %v2999_v27  ;;  %v2506_v20 = vrot.slane %v13046_v4, 7  ;;  %v2138_v14 = vrot.slane %v13047_v46, 2  ;;  %v3584_v17 = vrot.slane %v13050_v29, 4  ;;  %v13053_v46 = vld [vmem:[#allocation136_spill] sm:$0xff] }
 0x630   :  { %13040 = vst [vmem:[#allocation69_spill] sm:$0xff] %v8739_v7  ;;  %v3003_v3 = vsel %vm2103_vm7, %v3002_v19, %v3001_v2  ;;  %v2259_v53 = vsel %vm2100_vm6, %v2258_v47, %v2257_v12  ;;  %v8768_v19 = vsel %vm3245_vm11, %v3395_v56, %v13049_v45  ;;  %v13051_v2 = vld [vmem:[#allocation140_spill] sm:$0xff]  ;;  %v3006_v27 = vrot.slane %v13053_v46, 2  ;;  %v13054_v12 = vld [vmem:[#allocation134_spill] sm:$0xff]  ;;  %v13058_v46 = vld [vmem:[#allocation151_spill] sm:$0xff] }
 0x631   :  { %2017 = vrot.lane.b32.xlu1 %v12525_v30, %s5930_s20  ;;  %v2382_v63 = vrot.slane %v13051_v2, 6  ;;  %v2261_v11 = vsel %vm2103_vm7, %v2260_v58, %v2259_v53  ;;  %v3005_v4 = vsel %vm2106_vm8, %v3004_v51, %v3003_v3  ;;  %v2262_v47 = vrot.slane %v13054_v12, 3  ;;  %2015 = vrot.lane.b32.xlu0 %v12702_v60, %s5930_s20  ;;  %v13055_v45 = vld [vmem:[#allocation156_spill] sm:$0xff]  ;;  %v13056_v58 = vld [vmem:[#allocation163_spill] sm:$0xff] }
 0x632   :  { %v2386_v29 = vrot.slane %v13055_v45, 4  ;;  %v2507_v53 = vsel %vm2094_vm4, %v2506_v20, %v13056_v58  ;;  %v13057_v3 = vld [vmem:[#allocation147_spill] sm:$0xff]  ;;  %v2266_v12 = vrot.slane %v13058_v46, 1  ;;  %v3007_v60 = vsel %vm2109_vm9, %v3006_v27, %v3005_v4  ;;  %v13063_v45 = vld [vmem:[#allocation152_spill] sm:$0xff] }
 0x633   :  { %v8773_v30 = vpop.permute.xlu1 %1933  ;;  %v2263_v51 = vsel %vm2106_vm8, %v2262_v47, %v2261_v11  ;;  %v2508_v2 = vrot.slane %v13057_v3, 6  ;;  %v2264_v20 = vrot.slane %v13063_v45, 2  ;;  %v13064_v3 = vld [vmem:[#allocation165_spill] sm:$0xff]  ;;  %v13066_v27 = vrot.slane %v8432_v33, 4  ;;  %v13070_v7 = vld [vmem:[#allocation171_spill] sm:$0xff] }
 0x634   :  { %2031 = vrot.lane.b32.xlu2 %v12873_v39, %s5930_s20  ;;  %v2381_v39 = vsel %vm2094_vm4, %v2380_v23, %v13048_v43  ;;  %13052 = vst [vmem:[#allocation10_spill] sm:$0xff] %v8773_v30  ;;  %v2139_v23 = vsel %vm2109_vm9, %v2138_v14, %v2137_v32  ;;  %v13059_v30 = vld [vmem:[#allocation157_spill] sm:$0xff]  ;;  %v2512_v46 = vrot.slane %v13064_v3, 4  ;;  %v2632_v41 = vrot.slane %v13070_v7, 7 }
 0x635   :  { %v2141_v56 = vsel %vm2112_vm10, %v2140_v62, %v2139_v23  ;;  %v2383_v43 = vsel %vm2097_vm5, %v2382_v63, %v2381_v39  ;;  %v2384_v32 = vrot.slane %v13059_v30, 5  ;;  %v13061_v62 = vld [vmem:[#allocation135_spill] sm:$0xff]  ;;  %v13062_v39 = vld [vmem:[#allocation9_spill] sm:$0xff]  ;;  %v2509_v47 = vsel %vm2097_vm5, %v2508_v2, %v2507_v53  ;;  %v8802_v30 = vpop.permute.xlu2 %1959  ;;  %v13069_v2 = vld [vmem:[#allocation144_spill] sm:$0xff] }
 0x636   :  { %v3008_v23 = vrot.slane %v13061_v62, 1  ;;  %v8796_v63 = vsel %vm3245_vm11, %v3584_v17, %v13062_v39  ;;  %v3244_v58 = vrot.slane %v2141_v56, 4  ;;  %v3248_v4 = vsel %vm3245_vm11, %v2141_v56, %v13066_v27  ;;  %v13067_v39 = vld [vmem:[#allocation166_spill] sm:$0xff]  ;;  %v13073_v27 = vld [vmem:[#allocation159_spill] sm:$0xff] }
 0x637   :  { %v8790_v14 = vpop.permute.xlu0 %1931  ;;  %v2385_v11 = vsel %vm2100_vm6, %v2384_v32, %v2383_v43  ;;  %v2265_v17 = vsel %vm2109_vm9, %v2264_v20, %v2263_v51  ;;  %v2510_v45 = vrot.slane %v13067_v39, 5  ;;  %v13068_v43 = vld [vmem:[#allocation56_spill] sm:$0xff]  ;;  %v3773_v32 = vrot.slane %v13069_v2, 4  ;;  %v13075_v39 = vld [vmem:[#allocation150_spill] sm:$0xff] }
 0x638   :  { %13060 = vst [vmem:[#allocation60_spill] sm:$0xff] %v8790_v14  ;;  %v13065_v14 = vld [vmem:[#allocation35_spill] sm:$0xff]  ;;  %v2387_v62 = vsel %vm2103_vm7, %v2386_v29, %v2385_v11  ;;  %v2388_v53 = vrot.slane %v13068_v43, 3  ;;  %v2267_v3 = vsel %vm2112_vm10, %v2266_v12, %v2265_v17  ;;  %v8821_v51 = vsel %vm2112_vm10, %v3008_v23, %v3007_v60  ;;  %v13081_v29 = vld [vmem:[#allocation168_spill] sm:$0xff] }
 0x639   :  { %2023 = vrot.lane.b32.xlu1 %v12705_v21, %s5930_s20  ;;  %13071 = vst [vmem:[#allocation59_spill] sm:$0xff] %v8821_v51  ;;  %v2511_v20 = vsel %vm2100_vm6, %v2510_v45, %v2509_v47  ;;  %v8829_v11 = vperm.slane %v3248_v4, %v8750_v24  ;;  %v2392_v7 = vrot.slane %v13073_v27, 1  ;;  %2021 = vrot.lane.b32.xlu0 %v12445_v54, %s5930_s20  ;;  %v13074_v23 = vrot.slane %v8455_v18, 4  ;;  %v13076_v4 = vld [vmem:[#allocation160_spill] sm:$0xff] }
 0x63a   :  { %v2389_v12 = vsel %vm2106_vm8, %v2388_v53, %v2387_v62  ;;  %v2513_v17 = vsel %vm2103_vm7, %v2512_v46, %v2511_v20  ;;  %v3246_v60 = vsel %vm3245_vm11, %v3244_v58, %v8432_v33  ;;  %v2514_v45 = vrot.slane %v13075_v39, 3  ;;  %v13077_v46 = vld [vmem:[#allocation153_spill] sm:$0xff]  ;;  %v13078_v20 = vld [vmem:[#allocation172_spill] sm:$0xff]  ;;  %v13080_v58 = vld [vmem:[#allocation155_spill] sm:$0xff] }
 0x63b   :  { %v8826_v21 = vpop.permute.xlu1 %1939  ;;  %v3437_v47 = vsel %vm3245_vm11, %v2267_v3, %v13074_v23  ;;  %v2390_v43 = vrot.slane %v13076_v4, 2  ;;  %v8845_v62 = vsel %vm3245_vm11, %v3773_v32, %v12958_v40  ;;  %v3434_v53 = vrot.slane %v2267_v3, 4  ;;  %v13082_v32 = vld [vmem:[#allocation169_spill] sm:$0xff] }
 0x63c   :  { %2037 = vrot.lane.b32.xlu2 %v13065_v14, %s5930_s20  ;;  %13072 = vst [vmem:[#allocation58_spill] sm:$0xff] %v8826_v21  ;;  %v3962_v2 = vrot.slane %v13077_v46, 4  ;;  %v2633_v54 = vsel %vm2094_vm4, %v2632_v41, %v13078_v20  ;;  %v2634_v23 = vrot.slane %v13080_v58, 6  ;;  %v2515_v39 = vsel %vm2106_vm8, %v2514_v45, %v2513_v17  ;;  %v13083_v46 = vld [vmem:[#allocation180_spill] sm:$0xff]  ;;  %v13086_v20 = vld [vmem:[#allocation175_spill] sm:$0xff] }
 0x63d   :  { %v2391_v33 = vsel %vm2109_vm9, %v2390_v43, %v2389_v12  ;;  %v2518_v4 = vrot.slane %v13081_v29, 1  ;;  %v8857_v56 = vperm.slane %v3437_v47, %v8750_v24  ;;  %v2516_v3 = vrot.slane %v13082_v32, 2  ;;  %v13084_v29 = vld [vmem:[#allocation174_spill] sm:$0xff]  ;;  %v13085_v47 = vld [vmem:[#allocation161_spill] sm:$0xff] }
 0x63e   :  { %v2393_v40 = vsel %vm2112_vm10, %v2392_v7, %v2391_v33  ;;  %v2758_v21 = vrot.slane %v13083_v46, 7  ;;  %v8865_v41 = vperm.slane %v3246_v60, %v8750_v24  ;;  %v2635_v17 = vsel %vm2097_vm5, %v2634_v23, %v2633_v54  ;;  %v8879_v33 = vpop.permute.xlu2 %1965 }
 0x63f   :  { %v8850_v27 = vpop.permute.xlu0 %1937  ;;  %v2638_v45 = vrot.slane %v13084_v29, 4  ;;  %v8874_v7 = vsel %vm3245_vm11, %v3962_v2, %v12999_v52  ;;  %v4151_v43 = vrot.slane %v13085_v47, 4  ;;  %v2636_v60 = vrot.slane %v13086_v20, 5  ;;  %13087 = vst [vmem:[#allocation62_spill] sm:$0xff] %v8879_v33  ;;  %v13091_v29 = vld [vmem:[#allocation189_spill] sm:$0xff]  ;;  %v13093_v20 = vld [vmem:[#allocation158_spill] sm:$0xff] }
 0x640   :  { %13079 = vst [vmem:[#allocation78_spill] sm:$0xff] %v8850_v27  ;;  %v8885_v58 = vsel %vm3245_vm11, %v3434_v53, %v8455_v18  ;;  %v2884_v47 = vrot.slane %v13091_v29, 7  ;;  %v13092_v18 = vld [vmem:[#allocation41_spill] sm:$0xff] }
 0x641   :  { %2029 = vrot.lane.b32.xlu1 %v12622_v44, %s5930_s20  ;;  %v13088_v44 = vrot.slane %v8485_v16, 4  ;;  %v2637_v32 = vsel %vm2100_vm6, %v2636_v60, %v2635_v17  ;;  %2027 = vrot.lane.b32.xlu0 %v13092_v18, %s5930_s20  ;;  %v13095_v60 = vrot.slane %v8488_v1, 4  ;;  %v13108_v33 = vld [vmem:[#allocation205_spill] sm:$0xff] }
 0x642   :  { %v2639_v54 = vsel %vm2103_vm7, %v2638_v45, %v2637_v32  ;;  %v13098_v45 = vld [vmem:[#allocation183_spill] sm:$0xff]  ;;  %v13099_v32 = vld [vmem:[#allocation177_spill] sm:$0xff] }
 0x643   :  { %v3626_v52 = vsel %vm3245_vm11, %v2393_v40, %v13088_v44  ;;  %v8891_v23 = vpop.permute.xlu1 %1945  ;;  %v2640_v44 = vrot.slane %v13093_v20, 3  ;;  %v13097_v20 = vld [vmem:[#allocation170_spill] sm:$0xff]  ;;  %v2644_v12 = vrot.slane %v13099_v32, 1 }
 0x644   :  { %2043 = vrot.lane.b32.xlu2 %v12880_v31, %s5930_s20  ;;  %v2517_v31 = vsel %vm2109_vm9, %v2516_v3, %v2515_v39  ;;  %13089 = vst [vmem:[#allocation90_spill] sm:$0xff] %v8891_v23  ;;  %v13090_v3 = vld [vmem:[#allocation181_spill] sm:$0xff]  ;;  %v3623_v39 = vrot.slane %v2393_v40, 4  ;;  %v8906_v17 = vperm.slane %v3626_v52, %v8750_v24  ;;  %v4340_v53 = vrot.slane %v13097_v20, 4  ;;  %v13100_v23 = vld [vmem:[#allocation184_spill] sm:$0xff] }
 0x645   :  { %v2519_v2 = vsel %vm2112_vm10, %v2518_v4, %v2517_v31  ;;  %v2759_v46 = vsel %vm2094_vm4, %v2758_v21, %v13090_v3  ;;  %v13094_v4 = vld [vmem:[#allocation164_spill] sm:$0xff]  ;;  %v8910_v21 = vsel %vm3245_vm11, %v4151_v43, %v13065_v14  ;;  %v2764_v40 = vrot.slane %v13098_v45, 4  ;;  %v13101_v43 = vld [vmem:[#allocation190_spill] sm:$0xff]  ;;  %v13104_v45 = vld [vmem:[#allocation197_spill] sm:$0xff] }
 0x646   :  { %v2760_v31 = vrot.slane %v13094_v4, 6  ;;  %v3815_v3 = vsel %vm3245_vm11, %v2519_v2, %v13095_v60  ;;  %v3812_v18 = vrot.slane %v2519_v2, 4  ;;  %v2641_v52 = vsel %vm2106_vm8, %v2640_v44, %v2639_v54  ;;  %v13102_v60 = vld [vmem:[#allocation178_spill] sm:$0xff] }
 0x647   :  { %v8915_v29 = vpop.permute.xlu0 %1943  ;;  %v2762_v14 = vrot.slane %v13100_v23, 5  ;;  %v2885_v27 = vsel %vm2094_vm4, %v2884_v47, %v13101_v43  ;;  %v8928_v2 = vperm.slane %v3815_v3, %v8750_v24  ;;  %v2642_v20 = vrot.slane %v13102_v60, 2  ;;  %v13105_v43 = vld [vmem:[#allocation192_spill] sm:$0xff] }
 0x648   :  { %13096 = vst [vmem:[#allocation68_spill] sm:$0xff] %v8915_v29  ;;  %v2761_v4 = vsel %vm2097_vm5, %v2760_v31, %v2759_v46  ;;  %v13103_v46 = vld [vmem:[#allocation173_spill] sm:$0xff]  ;;  %v3010_v29 = vrot.slane %v13104_v45, 7  ;;  %v8937_v54 = vsel %vm3245_vm11, %v3623_v39, %v8485_v16  ;;  %v2890_v60 = vrot.slane %v13105_v43, 4 }
 0x649   :  { %v2886_v31 = vrot.slane %v13103_v46, 6  ;;  %2035 = vrot.lane.b32.xlu1 %v12539_v6, %s5930_s20  ;;  %v2763_v47 = vsel %vm2100_vm6, %v2762_v14, %v2761_v4  ;;  %v2643_v44 = vsel %vm2109_vm9, %v2642_v20, %v2641_v52  ;;  %v13106_v46 = vld [vmem:[#allocation167_spill] sm:$0xff]  ;;  %v13107_v45 = vld [vmem:[#allocation193_spill] sm:$0xff]  ;;  %2033 = vrot.lane.b32.xlu0 %v12542_v48, %s5930_s20  ;;  %v8955_v4 = vpop.permute.xlu2 %1971  ;;  %v13114_v48 = vld [vmem:[#allocation186_spill] sm:$0xff] }
 0x64a   :  { %v2765_v3 = vsel %vm2103_vm7, %v2764_v40, %v2763_v47  ;;  %v2766_v16 = vrot.slane %v13106_v46, 3  ;;  %v2645_v39 = vsel %vm2112_vm10, %v2644_v12, %v2643_v44  ;;  %v2888_v23 = vrot.slane %v13107_v45, 5  ;;  %13109 = vst [vmem:[#allocation72_spill] sm:$0xff] %v8955_v4  ;;  %v13110_v52 = vld [vmem:[#allocation49_spill] sm:$0xff]  ;;  %v13112_v12 = vld [vmem:[#allocation198_spill] sm:$0xff]  ;;  %v13116_v45 = vld [vmem:[#allocation176_spill] sm:$0xff] }
 0x64b   :  { %v2887_v32 = vsel %vm2097_vm5, %v2886_v31, %v2885_v27  ;;  %v8947_v6 = vpop.permute.xlu1 %1951  ;;  %v8959_v27 = vsel %vm3245_vm11, %v3812_v18, %v8488_v1  ;;  %v8964_v14 = vsel %vm3245_vm11, %v4340_v53, %v13110_v52  ;;  %v3011_v20 = vsel %vm2094_vm4, %v3010_v29, %v13112_v12  ;;  %v13113_v31 = vld [vmem:[#allocation182_spill] sm:$0xff]  ;;  %v13117_v40 = vld [vmem:[#allocation187_spill] sm:$0xff]  ;;  %v13121_v4 = vld [vmem:[#allocation201_spill] sm:$0xff] }
 0x64c   :  { %2049 = vrot.lane.b32.xlu2 %v12969_v15, %s5930_s20  ;;  %v2142_v15 = vrot.slane %v13108_v33, 7  ;;  %13111 = vst [vmem:[#allocation43_spill] sm:$0xff] %v8964_v14  ;;  %v2767_v33 = vsel %vm2106_vm8, %v2766_v16, %v2765_v3  ;;  %v3012_v47 = vrot.slane %v13113_v31, 6  ;;  %v2770_v44 = vrot.slane %v13114_v48, 1  ;;  %v13118_v16 = vld [vmem:[#allocation200_spill] sm:$0xff]  ;;  %v13119_v48 = vld [vmem:[#allocation46_spill] sm:$0xff] }
 0x64d   :  { %v2889_v43 = vsel %vm2100_vm6, %v2888_v23, %v2887_v32  ;;  %v13115_v1 = vrot.slane %v8573_v38, 4  ;;  %v2892_v53 = vrot.slane %v13116_v45, 3  ;;  %v2768_v51 = vrot.slane %v13117_v40, 2  ;;  %v13120_v45 = vld [vmem:[#allocation191_spill] sm:$0xff]  ;;  %v13145_v14 = vld [vmem:[#allocation221_spill] sm:$0xff] }
 0x64e   :  { %v2891_v29 = vsel %vm2103_vm7, %v2890_v60, %v2889_v43  ;;  %v4001_v12 = vrot.slane %v2645_v39, 4  ;;  %v3013_v3 = vsel %vm2097_vm5, %v3012_v47, %v3011_v20  ;;  %v3016_v31 = vrot.slane %v13118_v16, 4  ;;  %v13125_v16 = vld [vmem:[#allocation196_spill] sm:$0xff] }
 0x64f   :  { %v8972_v46 = vpop.permute.xlu0 %1949  ;;  %v4004_v18 = vsel %vm3245_vm11, %v2645_v39, %v13115_v1  ;;  %v2143_v23 = vsel %vm2094_vm4, %v2142_v15, %v13119_v48  ;;  %v2769_v1 = vsel %vm2109_vm9, %v2768_v51, %v2767_v33  ;;  %v2144_v40 = vrot.slane %v13120_v45, 6  ;;  %v13122_v39 = vld [vmem:[#allocation50_spill] sm:$0xff]  ;;  %v13126_v45 = vld [vmem:[#allocation207_spill] sm:$0xff] }
 0x650   :  { %v3014_v60 = vrot.slane %v13121_v4, 5  ;;  %v8994_v20 = vperm.slane %v4004_v18, %v8750_v24  ;;  %v2771_v15 = vsel %vm2112_vm10, %v2770_v44, %v2769_v1  ;;  %v2893_v47 = vsel %vm2106_vm8, %v2892_v53, %v2891_v29  ;;  %v13127_v1 = vld [vmem:[#allocation208_spill] sm:$0xff] }
 0x651   :  { %2041 = vrot.lane.b32.xlu1 %v13122_v39, %s5930_s20  ;;  %v2894_v48 = vrot.slane %v13125_v16, 2  ;;  %v2145_v33 = vsel %vm2097_vm5, %v2144_v40, %v2143_v23  ;;  %v2148_v4 = vrot.slane %v13126_v45, 4  ;;  %v9007_v18 = vsel %vm3245_vm11, %v4001_v12, %v8573_v38  ;;  %2039 = vrot.lane.b32.xlu0 %v12459_v0, %s5930_s20  ;;  %v13129_v40 = vld [vmem:[#allocation185_spill] sm:$0xff]  ;;  %v9026_v45 = vpop.permute.xlu2 %1977 }
 0x652   :  { %13123 = vst [vmem:[#allocation83_spill] sm:$0xff] %v8994_v20  ;;  %v3015_v51 = vsel %vm2100_vm6, %v3014_v60, %v3013_v3  ;;  %v2146_v53 = vrot.slane %v13127_v1, 5  ;;  %v13128_v3 = vrot.slane %v8614_v34, 4  ;;  %v3018_v60 = vrot.slane %v13129_v40, 3  ;;  %v13132_v0 = vld [vmem:[#allocation213_spill] sm:$0xff]  ;;  %v13134_v40 = vld [vmem:[#allocation203_spill] sm:$0xff] }
 0x653   :  { %v9003_v32 = vpop.permute.xlu1 %1957  ;;  %v3017_v44 = vsel %vm2103_vm7, %v3016_v31, %v3015_v51  ;;  %v2895_v39 = vsel %vm2109_vm9, %v2894_v48, %v2893_v47  ;;  %v2268_v51 = vrot.slane %v13132_v0, 7  ;;  %13133 = vst [vmem:[#allocation95_spill] sm:$0xff] %v9026_v45  ;;  %v3022_v29 = vrot.slane %v13134_v40, 1 }
 0x654   :  { %2055 = vrot.lane.b32.xlu2 %v13110_v52, %s5930_s20  ;;  %v13124_v52 = vld [vmem:[#allocation195_spill] sm:$0xff]  ;;  %v4193_v23 = vsel %vm3245_vm11, %v2771_v15, %v13128_v3  ;;  %v2147_v16 = vsel %vm2100_vm6, %v2146_v53, %v2145_v33  ;;  %v3019_v3 = vsel %vm2106_vm8, %v3018_v60, %v3017_v44  ;;  %v9035_v48 = vperm.slane %v8885_v58, %v8750_v24  ;;  %v13136_v33 = vld [vmem:[#allocation194_spill] sm:$0xff] }
 0x655   :  { %v2896_v43 = vrot.slane %v13124_v52, 1  ;;  %v13130_v52 = vld [vmem:[#allocation32_spill] sm:$0xff]  ;;  %v2149_v47 = vsel %vm2103_vm7, %v2148_v4, %v2147_v16  ;;  %v2150_v53 = vrot.slane %v13136_v33, 3  ;;  %v13138_v60 = vld [vmem:[#allocation26_spill] sm:$0xff]  ;;  %v13139_v16 = vld [vmem:[#allocation199_spill] sm:$0xff]  ;;  %v9052_v58 = vperm.slane %v8937_v54, %v8750_v24 }
 0x656   :  { %v3401_v38 = vrot.slane %v13130_v52, 4  ;;  %v13137_v52 = vld [vmem:[#allocation204_spill] sm:$0xff]  ;;  %v2270_v40 = vrot.slane %v13139_v16, 6  ;;  %v13140_v33 = vld [vmem:[#allocation210_spill] sm:$0xff]  ;;  %v2394_v20 = vrot.slane %v13145_v14, 7 }
 0x657   :  { %v9022_v31 = vsel %vm2112_vm10, %v2896_v43, %v2895_v39  ;;  %v9028_v1 = vpop.permute.xlu0 %1955  ;;  %v4190_v43 = vrot.slane %v2771_v15, 4  ;;  %v9038_v39 = vperm.slane %v4193_v23, %v8750_v24  ;;  %v3020_v0 = vrot.slane %v13137_v52, 2  ;;  %v13141_v52 = vld [vmem:[#allocation214_spill] sm:$0xff]  ;;  %v13147_v14 = vld [vmem:[#allocation216_spill] sm:$0xff] }
 0x658   :  { %13131 = vst [vmem:[#allocation94_spill] sm:$0xff] %v9022_v31  ;;  %v4379_v44 = vrot.slane %v9022_v31, 4  ;;  %v3402_v4 = vsel %vm3245_vm11, %v3401_v38, %v13138_v60  ;;  %v2151_v23 = vsel %vm2106_vm8, %v2150_v53, %v2149_v47  ;;  %v2269_v12 = vsel %vm2094_vm4, %v2268_v51, %v13141_v52  ;;  %v13143_v60 = vld [vmem:[#allocation44_spill] sm:$0xff]  ;;  %v13144_v31 = vld [vmem:[#allocation211_spill] sm:$0xff]  ;;  %v13146_v51 = vld [vmem:[#allocation57_spill] sm:$0xff] }
 0x659   :  { %13135 = vst [vmem:[#allocation89_spill] sm:$0xff] %v9038_v39  ;;  %2047 = vrot.lane.b32.xlu1 %v12462_v5, %s5930_s20  ;;  %v3021_v15 = vsel %vm2109_vm9, %v3020_v0, %v3019_v3  ;;  %v3590_v16 = vrot.slane %v13143_v60, 4  ;;  %v2152_v5 = vrot.slane %v13144_v31, 2  ;;  %v9069_v3 = vsel %vm3245_vm11, %v4190_v43, %v8614_v34  ;;  %2045 = vrot.lane.b32.xlu0 %v13146_v51, %s5930_s20  ;;  %v9103_v39 = vpop.permute.xlu2 %1983 }
 0x65a   :  { %v9060_v38 = vsel %vm2112_vm10, %v3022_v29, %v3021_v15  ;;  %v3406_v53 = vperm.slane %v3402_v4, %v8750_v24  ;;  %v2271_v31 = vsel %vm2097_vm5, %v2270_v40, %v2269_v12  ;;  %v2274_v15 = vrot.slane %v13147_v14, 4  ;;  %v13149_v4 = vld [vmem:[#allocation217_spill] sm:$0xff]  ;;  %v13150_v12 = vld [vmem:[#allocation30_spill] sm:$0xff]  ;;  %13155 = vst [vmem:[#allocation112_spill] sm:$0xff] %v9103_v39 }
 0x65b   :  { %13142 = vst [vmem:[#allocation103_spill] sm:$0xff] %v9060_v38  ;;  %v9065_v54 = vpop.permute.xlu1 %1963  ;;  %v2153_v0 = vsel %vm2109_vm9, %v2152_v5, %v2151_v23  ;;  %v4568_v34 = vrot.slane %v9060_v38, 4  ;;  %v2272_v52 = vrot.slane %v13149_v4, 5  ;;  %v9091_v23 = vsel %vm3245_vm11, %v4379_v44, %v8689_v36  ;;  %v13151_v5 = vld [vmem:[#allocation222_spill] sm:$0xff]  ;;  %v13154_v38 = vld [vmem:[#allocation212_spill] sm:$0xff] }
 0x65c   :  { %2061 = vrot.lane.b32.xlu2 %v12805_v57, %s5930_s20  ;;  %v2154_v57 = vrot.slane %v13140_v33, 1  ;;  %v9081_v33 = vperm.slane %v8959_v27, %v8750_v24  ;;  %v3591_v40 = vsel %vm3245_vm11, %v3590_v16, %v13150_v12  ;;  %v2395_v27 = vsel %vm2094_vm4, %v2394_v20, %v13151_v5  ;;  %v13152_v14 = vld [vmem:[#allocation230_spill] sm:$0xff]  ;;  %v13157_v5 = vld [vmem:[#allocation224_spill] sm:$0xff] }
 0x65d   :  { %v2520_v47 = vrot.slane %v13152_v14, 7  ;;  %v9098_v29 = vrot.slane %v3406_v53, 4  ;;  %v2273_v4 = vsel %vm2100_vm6, %v2272_v52, %v2271_v31  ;;  %v3779_v51 = vrot.slane %v13154_v38, 4  ;;  %v13156_v44 = vld [vmem:[#allocation202_spill] sm:$0xff] }
 0x65e   :  { %13148 = vst [vmem:[#allocation65_spill] sm:$0xff] %v9081_v33  ;;  %v2155_v43 = vsel %vm2112_vm10, %v2154_v57, %v2153_v0  ;;  %v13153_v57 = vld [vmem:[#allocation206_spill] sm:$0xff]  ;;  %v2276_v16 = vrot.slane %v13156_v44, 3  ;;  %v2275_v20 = vsel %vm2103_vm7, %v2274_v15, %v2273_v4  ;;  %v9114_v31 = vsel %vm3245_vm11, %v4568_v34, %v8692_v9  ;;  %v13159_v15 = vld [vmem:[#allocation225_spill] sm:$0xff]  ;;  %v13160_v44 = vld [vmem:[#allocation231_spill] sm:$0xff] }
 0x65f   :  { %v9086_v60 = vpop.permute.xlu0 %1961  ;;  %v2396_v0 = vrot.slane %v13153_v57, 6  ;;  %v3257_v12 = vrot.slane %v2155_v43, 4  ;;  %v3595_v38 = vperm.slane %v3591_v40, %v8750_v24  ;;  %v13158_v14 = vrot.slane %v8523_v61, 4  ;;  %v13163_v40 = vld [vmem:[#allocation34_spill] sm:$0xff]  ;;  %v13186_v33 = vld [vmem:[#allocation243_spill] sm:$0xff] }
 0x660   :  { %v2398_v4 = vrot.slane %v13159_v15, 5  ;;  %v9129_v34 = vperm.slane %v9007_v18, %v8750_v24  ;;  %v13165_v36 = vld [vmem:[#allocation218_spill] sm:$0xff] }
 0x661   :  { %2053 = vrot.lane.b32.xlu1 %v6459_v10, %s5930_s20  ;;  %v2397_v52 = vsel %vm2097_vm5, %v2396_v0, %v2395_v27  ;;  %v3260_v57 = vsel %vm3245_vm11, %v2155_v43, %v13158_v14  ;;  %v2521_v10 = vsel %vm2094_vm4, %v2520_v47, %v13160_v44  ;;  %v3780_v27 = vsel %vm3245_vm11, %v3779_v51, %v13163_v40  ;;  %v13166_v14 = vld [vmem:[#allocation219_spill] sm:$0xff] }
 0x662   :  { %13162 = vst [vmem:[#allocation97_spill] sm:$0xff] %v9129_v34  ;;  %v2277_v0 = vsel %vm2106_vm8, %v2276_v16, %v2275_v20  ;;  %v2280_v43 = vrot.slane %v13165_v36, 1  ;;  %2051 = vrot.lane.b32.xlu0 %v6468_v22, %s5930_s20  ;;  %v3258_v47 = vsel %vm3245_vm11, %v3257_v12, %v8523_v61  ;;  %v2278_v15 = vrot.slane %v13166_v14, 2  ;;  %v13167_v44 = vld [vmem:[#allocation239_spill] sm:$0xff]  ;;  %v13168_v36 = vld [vmem:[#allocation233_spill] sm:$0xff] }
 0x663   :  { %v9125_v53 = vpop.permute.xlu1 %1969  ;;  %v2399_v18 = vsel %vm2100_vm6, %v2398_v4, %v2397_v52  ;;  %v2646_v39 = vrot.slane %v13167_v44, 7  ;;  %v9144_v51 = vperm.slane %v3260_v57, %v8750_v24  ;;  %v2526_v40 = vrot.slane %v13168_v36, 4  ;;  %v13170_v22 = vld [vmem:[#allocation209_spill] sm:$0xff]  ;;  %v13171_v52 = vld [vmem:[#allocation234_spill] sm:$0xff]  ;;  %v13173_v44 = vld [vmem:[#allocation227_spill] sm:$0xff] }
 0x664   :  { %2067 = vrot.lane.b32.xlu2 %v12723_v59, %s5930_s20  ;;  %v2400_v59 = vrot.slane %v13157_v5, 4  ;;  %13161 = vst [vmem:[#allocation88_spill] sm:$0xff] %v9125_v53  ;;  %v13164_v5 = vld [vmem:[#allocation215_spill] sm:$0xff]  ;;  %v2402_v45 = vrot.slane %v13170_v22, 3  ;;  %v3784_v61 = vperm.slane %v3780_v27, %v8750_v24  ;;  %v2279_v12 = vsel %vm2109_vm9, %v2278_v15, %v2277_v0  ;;  %v13174_v15 = vld [vmem:[#allocation240_spill] sm:$0xff]  ;;  %v13175_v36 = vld [vmem:[#allocation66_spill] sm:$0xff] }
 0x665   :  { %v2522_v9 = vrot.slane %v13164_v5, 6  ;;  %v2524_v4 = vrot.slane %v13171_v52, 5  ;;  %v9155_v14 = vrot.slane %v3595_v38, 4  ;;  %v9158_v57 = vperm.slane %v3258_v47, %v8750_v24 }
 0x666   :  { %v2401_v16 = vsel %vm2103_vm7, %v2400_v59, %v2399_v18  ;;  %v2281_v59 = vsel %vm2112_vm10, %v2280_v43, %v2279_v12  ;;  %v2406_v27 = vrot.slane %v13173_v44, 1  ;;  %v2647_v38 = vsel %vm2094_vm4, %v2646_v39, %v13174_v15  ;;  %v13176_v43 = vld [vmem:[#allocation228_spill] sm:$0xff]  ;;  %v13177_v12 = vld [vmem:[#allocation223_spill] sm:$0xff] }
 0x667   :  { %v2523_v20 = vsel %vm2097_vm5, %v2522_v9, %v2521_v10  ;;  %v9149_v5 = vpop.permute.xlu0 %1967  ;;  %v13172_v9 = vld [vmem:[#allocation64_spill] sm:$0xff]  ;;  %v2403_v18 = vsel %vm2106_vm8, %v2402_v45, %v2401_v16  ;;  %v2404_v22 = vrot.slane %v13176_v43, 2  ;;  %v2648_v52 = vrot.slane %v13177_v12, 6 }
 0x668   :  { %13169 = vst [vmem:[#allocation104_spill] sm:$0xff] %v9149_v5  ;;  %v2525_v0 = vsel %vm2100_vm6, %v2524_v4, %v2523_v20  ;;  %v9177_v45 = vrot.slane %v3784_v61, 4  ;;  %v3446_v16 = vrot.slane %v2281_v59, 4  ;;  %v13179_v20 = vld [vmem:[#allocation71_spill] sm:$0xff]  ;;  %v13180_v44 = vld [vmem:[#allocation220_spill] sm:$0xff]  ;;  %v13187_v5 = vld [vmem:[#allocation229_spill] sm:$0xff] }
 0x669   :  { %2059 = vrot.lane.b32.xlu1 %v13175_v36, %s5930_s20  ;;  %v2527_v10 = vsel %vm2103_vm7, %v2526_v40, %v2525_v0  ;;  %v2528_v4 = vrot.slane %v13179_v20, 3  ;;  %v3968_v39 = vrot.slane %v13180_v44, 4  ;;  %v13182_v36 = vrot.slane %v8542_v55, 4  ;;  %v13183_v40 = vld [vmem:[#allocation242_spill] sm:$0xff]  ;;  %v13184_v61 = vld [vmem:[#allocation67_spill] sm:$0xff]  ;;  %v13185_v44 = vld [vmem:[#allocation236_spill] sm:$0xff] }
 0x66a   :  { %v2405_v43 = vsel %vm2109_vm9, %v2404_v22, %v2403_v18  ;;  %v2649_v12 = vsel %vm2097_vm5, %v2648_v52, %v2647_v38  ;;  %v2652_v0 = vrot.slane %v13183_v40, 4  ;;  %2057 = vrot.lane.b32.xlu0 %v13184_v61, %s5930_s20  ;;  %v2532_v34 = vrot.slane %v13185_v44, 1  ;;  %v13193_v61 = vld [vmem:[#allocation238_spill] sm:$0xff]  ;;  %v13194_v44 = vld [vmem:[#allocation93_spill] sm:$0xff] }
 0x66b   :  { %v9181_v15 = vpop.permute.xlu1 %1975  ;;  %v3449_v47 = vsel %vm3245_vm11, %v2281_v59, %v13182_v36  ;;  %v2529_v20 = vsel %vm2106_vm8, %v2528_v4, %v2527_v10  ;;  %v4157_v53 = vrot.slane %v13187_v5, 4  ;;  %v13188_v59 = vld [vmem:[#allocation237_spill] sm:$0xff]  ;;  %v9201_v38 = vperm.slane %v9069_v3, %v8750_v24 }
 0x66c   :  { %2073 = vrot.lane.b32.xlu2 %v13172_v9, %s5930_s20  ;;  %v9175_v9 = vpop.permute.xlu2 %1989  ;;  %13181 = vst [vmem:[#allocation96_spill] sm:$0xff] %v9181_v15  ;;  %v2650_v15 = vrot.slane %v13186_v33, 5  ;;  %v2530_v36 = vrot.slane %v13188_v59, 2  ;;  %v3447_v22 = vsel %vm3245_vm11, %v3446_v16, %v8542_v55  ;;  %v13190_v10 = vld [vmem:[#allocation77_spill] sm:$0xff]  ;;  %v13191_v4 = vrot.slane %v8603_v28, 4  ;;  %v13192_v55 = vld [vmem:[#allocation226_spill] sm:$0xff] }
 0x66d   :  { %13178 = vst [vmem:[#allocation98_spill] sm:$0xff] %v9175_v9  ;;  %v2407_v9 = vsel %vm2112_vm10, %v2406_v27, %v2405_v43  ;;  %v9206_v27 = vperm.slane %v3449_v47, %v8750_v24  ;;  %v3969_v52 = vsel %vm3245_vm11, %v3968_v39, %v13190_v10  ;;  %v2654_v47 = vrot.slane %v13192_v55, 3 }
 0x66e   :  { %13189 = vst [vmem:[#allocation113_spill] sm:$0xff] %v9201_v38  ;;  %v2651_v33 = vsel %vm2100_vm6, %v2650_v15, %v2649_v12  ;;  %v3635_v5 = vrot.slane %v2407_v9, 4  ;;  %v3638_v43 = vsel %vm3245_vm11, %v2407_v9, %v13191_v4  ;;  %v2531_v40 = vsel %vm2109_vm9, %v2530_v36, %v2529_v20  ;;  %v13196_v36 = vld [vmem:[#allocation245_spill] sm:$0xff] }
 0x66f   :  { %v9197_v18 = vpop.permute.xlu0 %1973  ;;  %v2653_v3 = vsel %vm2103_vm7, %v2652_v0, %v2651_v33  ;;  %v2533_v16 = vsel %vm2112_vm10, %v2532_v34, %v2531_v40  ;;  %v4346_v39 = vrot.slane %v13193_v61, 4  ;;  %v5932_v15 = vmov 1934713408   ;;  %v13198_v40 = vld [vmem:[#allocation246_spill] sm:$0xff]  ;;  %v13259_v38 = vld [vmem:[#allocation333_spill] sm:$0xff] }
 0x670   :  { %v3298_v12 = vunpack.c.l.s4 %v5932_v15  ;;  %v3973_v9 = vperm.slane %v3969_v52, %v8750_v24  ;;  %v4158_v20 = vsel %vm3245_vm11, %v4157_v53, %v13194_v44  ;;  %v9232_v34 = vperm.slane %v3447_v22, %v8750_v24 }
 0x671   :  { %2065 = vrot.lane.b32.xlu1 %v12559_v25, %s5930_s20  ;;  %v9235_v59 = vperm.slane %v3638_v43, %v8750_v24  ;;  %v2655_v25 = vsel %vm2106_vm8, %v2654_v47, %v2653_v3  ;;  %v2658_v10 = vrot.slane %v13196_v36, 1  ;;  %v3636_v53 = vsel %vm3245_vm11, %v3635_v5, %v8603_v28  ;;  %v13200_v47 = vld [vmem:[#allocation102_spill] sm:$0xff]  ;;  %v13226_v43 = vld [vmem:[#allocation344_spill] sm:$0xff] }
 0x672   :  { %v3824_v33 = vrot.slane %v2533_v16, 4  ;;  %v13197_v4 = vrot.slane %v8665_v8, 4  ;;  %v2656_v22 = vrot.slane %v13198_v40, 2  ;;  %2063 = vrot.lane.b32.xlu0 %v6513_v50, %s5930_s20  ;;  %v4162_v3 = vperm.slane %v4158_v20, %v8750_v24 }
 0x673   :  { %v9239_v52 = vpop.permute.xlu1 %1981  ;;  %v4347_v61 = vsel %vm3245_vm11, %v4346_v39, %v13200_v47  ;;  %v9255_v28 = vunpack.c.0.s8 %v3298_v12  ;;  %v9257_v5 = vrot.slane %v3973_v9, 4  ;;  %v13202_v44 = vperm.slane %v8768_v19, %v8750_v24 }
 0x674   :  { %2079 = vrot.lane.b32.xlu2 %v6500_v26, %s5930_s20  ;;  %v9229_v26 = vperm.slane %v9091_v23, %v8750_v24  ;;  %v3827_v23 = vsel %vm3245_vm11, %v2533_v16, %v13197_v4  ;;  %v9247_v55 = vpop.permute.xlu2 %1995  ;;  %v2657_v16 = vsel %vm2109_vm9, %v2656_v22, %v2655_v25  ;;  %v9271_v36 = vperm.slane %v3636_v53, %v8750_v24  ;;  %v13204_v4 = vld [vmem:[#allocation248_spill] sm:$0xff] }
 0x675   :  { %13199 = vst [vmem:[#allocation107_spill] sm:$0xff] %v9247_v55  ;;  %v9267_v50 = vsel %vm3245_vm11, %v9098_v29, %v13202_v44  ;;  %v9275_v12 = vperm.slane %v3827_v23, %v8750_v24  ;;  %v2659_v9 = vsel %vm2112_vm10, %v2658_v10, %v2657_v16  ;;  %v3825_v25 = vsel %vm3245_vm11, %v3824_v33, %v8665_v8  ;;  %v13205_v22 = vld [vmem:[#allocation232_spill] sm:$0xff]  ;;  %v13206_v23 = vld [vmem:[#allocation235_spill] sm:$0xff] }
 0x676   :  { %13195 = vst [vmem:[#allocation106_spill] sm:$0xff] %v9229_v26  ;;  %v4351_v19 = vperm.slane %v4347_v61, %v8750_v24  ;;  %v2772_v29 = vrot.slane %v13204_v4, 7  ;;  %v3293_v53 = vrot.slane %v9158_v57, 4  ;;  %v9285_v40 = vrot.slane %v4162_v3, 4  ;;  %v13207_v33 = vld [vmem:[#allocation480_spill] sm:$0xff] }
 0x677   :  { %v9260_v15 = vpop.permute.xlu0 %1979  ;;  %13203 = vst [vmem:[#allocation121_spill] sm:$0xff] %v9267_v50  ;;  %v2774_v47 = vrot.slane %v13205_v22, 6  ;;  %v2780_v44 = vrot.slane %v13206_v23, 3  ;;  %v4013_v10 = vrot.slane %v2659_v9, 4  ;;  %v2198_v61 = vrot.slane %v13207_v33, 7  ;;  %v13253_v50 = vld [vmem:[#allocation487_spill] sm:$0xff] }
 0x678   :  { %13201 = vst [vmem:[#allocation115_spill] sm:$0xff] %v9260_v15  ;;  %v13208_v16 = vrot.slane %v8865_v41, 4  ;;  %v13209_v3 = vperm.slane %v8796_v63, %v8750_v24  ;;  %v13211_v22 = vrot.slane %v8685_v37, 4  ;;  %v13212_v33 = vrot.slane %v9144_v51, 4  ;;  %v13223_v63 = vld [vmem:[#allocation467_spill] sm:$0xff] }
 0x679   :  { %2071 = vrot.lane.b32.xlu1 %v12993_v49, %s5930_s20  ;;  %v9306_v49 = vperm.slane %v3825_v25, %v8750_v24  ;;  %v13218_v8 = vrot.slane %v8829_v11, 4 }
 0x67a   :  { %v9303_v4 = vsel %vm3245_vm11, %v9155_v14, %v13209_v3  ;;  %v4016_v23 = vsel %vm3245_vm11, %v2659_v9, %v13211_v22  ;;  %v3306_v20 = vsel %vm3245_vm11, %v13212_v33, %v8829_v11  ;;  %v9320_v14 = vrot.slane %v4351_v19, 4  ;;  %2069 = vrot.lane.b32.xlu0 %v12479_v13, %s5930_s20  ;;  %v13217_v22 = vld [vmem:[#allocation241_spill] sm:$0xff] }
 0x67b   :  { %13210 = vst [vmem:[#allocation116_spill] sm:$0xff] %v9303_v4  ;;  %v9326_v9 = vpop.permute.xlu1 %1987  ;;  %v3294_v3 = vsel %vm3245_vm11, %v3293_v53, %v8865_v41  ;;  %v3308_v19 = vsel %vm3245_vm11, %v9144_v51, %v13218_v8  ;;  %v4014_v13 = vsel %vm3245_vm11, %v4013_v10, %v8685_v37  ;;  %v13220_v41 = vld [vmem:[#allocation481_spill] sm:$0xff]  ;;  %v13222_v51 = vld [vmem:[#allocation251_spill] sm:$0xff]  ;;  %v13225_v10 = vld [vmem:[#allocation252_spill] sm:$0xff] }
 0x67c   :  { %2085 = vrot.lane.b32.xlu2 %v6523_v42, %s5930_s20  ;;  %v3296_v42 = vsel %vm3245_vm11, %v9158_v57, %v13208_v16  ;;  %v9317_v57 = vperm.slane %v9114_v31, %v8750_v24  ;;  %13214 = vst [vmem:[#allocation100_spill] sm:$0xff] %v9320_v14  ;;  %v13215_v16 = vld [vmem:[#allocation249_spill] sm:$0xff]  ;;  %v2199_v53 = vsel %vm2094_vm4, %v2198_v61, %v13220_v41  ;;  %v9347_v0 = vpop.permute.xlu2 %2001  ;;  %v2778_v8 = vrot.slane %v13222_v51, 4  ;;  %v13227_v41 = vld [vmem:[#allocation414_spill] sm:$0xff] }
 0x67d   :  { %v2773_v25 = vsel %vm2094_vm4, %v2772_v29, %v13215_v16  ;;  %13216 = vst [vmem:[#allocation101_spill] sm:$0xff] %v9326_v9  ;;  %v9332_v31 = vperm.slane %v3296_v42, %v9255_v28  ;;  %v9343_v16 = vperm.slane %v4016_v23, %v8750_v24  ;;  %v9350_v42 = vperm.slane %v3306_v20, %v9255_v28  ;;  %v13228_v20 = vld [vmem:[#allocation79_spill] sm:$0xff]  ;;  %v13240_v4 = vld [vmem:[#allocation398_spill] sm:$0xff] }
 0x67e   :  { %13213 = vst [vmem:[#allocation75_spill] sm:$0xff] %v9317_v57  ;;  %v2775_v11 = vsel %vm2097_vm5, %v2774_v47, %v2773_v25  ;;  %v2200_v29 = vrot.slane %v13223_v63, 6  ;;  %v9358_v37 = vperm.slane %v3294_v3, %v9255_v28  ;;  %v2776_v23 = vrot.slane %v13225_v10, 5  ;;  %v13229_v25 = vld [vmem:[#allocation244_spill] sm:$0xff]  ;;  %v13230_v57 = vld [vmem:[#allocation483_spill] sm:$0xff]  ;;  %v13231_v3 = vld [vmem:[#allocation81_spill] sm:$0xff] }
 0x67f   :  { %13219 = vst [vmem:[#allocation23_spill] sm:$0xff] %v9343_v16  ;;  %v9355_v39 = vpop.permute.xlu0 %1985  ;;  %v2170_v61 = vrot.slane %v13226_v43, 7  ;;  %v2184_v33 = vrot.slane %v13227_v41, 7  ;;  %v9366_v47 = vperm.slane %v3308_v19, %v9255_v28  ;;  %v2204_v14 = vrot.slane %v13230_v57, 4  ;;  %v13232_v19 = vld [vmem:[#allocation484_spill] sm:$0xff]  ;;  %v13236_v10 = vld [vmem:[#allocation415_spill] sm:$0xff] }
 0x680   :  { %13221 = vst [vmem:[#allocation99_spill] sm:$0xff] %v9347_v0  ;;  %v2201_v63 = vsel %vm2097_vm5, %v2200_v29, %v2199_v53  ;;  %v9375_v43 = vperm.slane %v4014_v13, %v8750_v24  ;;  %v2202_v0 = vrot.slane %v13232_v19, 5  ;;  %v13233_v53 = vperm.slane %v8845_v62, %v8750_v24  ;;  %v13235_v13 = vld [vmem:[#allocation345_spill] sm:$0xff]  ;;  %v13238_v19 = vld [vmem:[#allocation250_spill] sm:$0xff] }
 0x681   :  { %13224 = vst [vmem:[#allocation122_spill] sm:$0xff] %v9355_v39  ;;  %2077 = vrot.lane.b32.xlu1 %v13231_v3, %s5930_s20  ;;  %v2171_v41 = vsel %vm2094_vm4, %v2170_v61, %v13235_v13  ;;  %v13239_v62 = vld [vmem:[#allocation330_spill] sm:$0xff]  ;;  %v2178_v16 = vrot.slane %v13259_v38, 3 }
 0x682   :  { %v9388_v3 = vsel %vm3245_vm11, %v9177_v45, %v13233_v53  ;;  %v2172_v29 = vrot.slane %v13239_v62, 6  ;;  %v2186_v45 = vrot.slane %v13240_v4, 6  ;;  %v13241_v13 = vld [vmem:[#allocation274_spill] sm:$0xff]  ;;  %v13245_v4 = vld [vmem:[#allocation417_spill] sm:$0xff] }
 0x683   :  { %13234 = vst [vmem:[#allocation24_spill] sm:$0xff] %v9388_v3  ;;  %v2156_v26 = vrot.slane %v13241_v13, 7  ;;  %v2190_v55 = vrot.slane %v13245_v4, 4  ;;  %v13250_v9 = vld [vmem:[#allocation254_spill] sm:$0xff]  ;;  %v13251_v3 = vld [vmem:[#allocation253_spill] sm:$0xff] }
 0x684   :  { %2091 = vrot.lane.b32.xlu2 %v13228_v20, %s5930_s20  ;;  %v2777_v20 = vsel %vm2100_vm6, %v2776_v23, %v2775_v11  ;;  %v2185_v11 = vsel %vm2094_vm4, %v2184_v33, %v13236_v10  ;;  %v2203_v23 = vsel %vm2100_vm6, %v2202_v0, %v2201_v63  ;;  %v13242_v33 = vld [vmem:[#allocation28_spill] sm:$0xff]  ;;  %v9405_v0 = vpop.permute.xlu1 %1993  ;;  %v2784_v63 = vrot.slane %v13250_v9, 1  ;;  %v13255_v4 = vld [vmem:[#allocation86_spill] sm:$0xff] }
 0x685   :  { %v2779_v51 = vsel %vm2103_vm7, %v2778_v8, %v2777_v20  ;;  %v13237_v8 = vld [vmem:[#allocation82_spill] sm:$0xff]  ;;  %v2205_v53 = vsel %vm2103_vm7, %v2204_v14, %v2203_v23  ;;  %v2206_v10 = vrot.slane %v13242_v33, 3  ;;  %13243 = vst [vmem:[#allocation109_spill] sm:$0xff] %v9405_v0  ;;  %v13244_v20 = vld [vmem:[#allocation347_spill] sm:$0xff]  ;;  %v2187_v62 = vsel %vm2097_vm5, %v2186_v45, %v2185_v11  ;;  %v13246_v14 = vld [vmem:[#allocation348_spill] sm:$0xff]  ;;  %v9417_v0 = vpop.permute.xlu2 %2007 }
 0x686   :  { %2075 = vrot.lane.b32.xlu0 %v13237_v8, %s5930_s20  ;;  %v2781_v61 = vsel %vm2106_vm8, %v2780_v44, %v2779_v51  ;;  %v2173_v8 = vsel %vm2097_vm5, %v2172_v29, %v2171_v41  ;;  %v2176_v57 = vrot.slane %v13244_v20, 4  ;;  %v2174_v23 = vrot.slane %v13246_v14, 5  ;;  %v13247_v44 = vld [vmem:[#allocation418_spill] sm:$0xff]  ;;  %13249 = vst [vmem:[#allocation105_spill] sm:$0xff] %v9417_v0  ;;  %v13252_v29 = vld [vmem:[#allocation257_spill] sm:$0xff]  ;;  %v13256_v14 = vld [vmem:[#allocation255_spill] sm:$0xff] }
 0x687   :  { %v2188_v51 = vrot.slane %v13247_v44, 5  ;;  %v2207_v13 = vsel %vm2106_vm8, %v2206_v10, %v2205_v53  ;;  %v13248_v33 = vld [vmem:[#allocation486_spill] sm:$0xff]  ;;  %v2898_v20 = vrot.slane %v13252_v29, 7  ;;  %v2208_v11 = vrot.slane %v13253_v50, 2  ;;  %v9423_v45 = vpop.permute.xlu0 %1991  ;;  %v13257_v53 = vld [vmem:[#allocation275_spill] sm:$0xff] }
 0x688   :  { %v2210_v39 = vrot.slane %v13248_v33, 1  ;;  %13254 = vst [vmem:[#allocation110_spill] sm:$0xff] %v9423_v45  ;;  %v2782_v44 = vrot.slane %v13256_v14, 2  ;;  %v2157_v10 = vsel %vm2094_vm4, %v2156_v26, %v13257_v53  ;;  %v2175_v33 = vsel %vm2100_vm6, %v2174_v23, %v2173_v8  ;;  %v13258_v0 = vld [vmem:[#allocation259_spill] sm:$0xff] }
 0x689   :  { %2083 = vrot.lane.b32.xlu1 %v13255_v4, %s5930_s20  ;;  %v2189_v9 = vsel %vm2100_vm6, %v2188_v51, %v2187_v62  ;;  %v2158_v41 = vrot.slane %v13258_v0, 6  ;;  %v2177_v29 = vsel %vm2103_vm7, %v2176_v57, %v2175_v33  ;;  %v2209_v45 = vsel %vm2109_vm9, %v2208_v11, %v2207_v13  ;;  %v13260_v4 = vld [vmem:[#allocation401_spill] sm:$0xff]  ;;  %v13261_v8 = vld [vmem:[#allocation87_spill] sm:$0xff]  ;;  %v13262_v62 = vld [vmem:[#allocation258_spill] sm:$0xff] }
 0x68a   :  { %v2191_v50 = vsel %vm2103_vm7, %v2190_v55, %v2189_v9  ;;  %v2192_v15 = vrot.slane %v13260_v4, 3  ;;  %v9439_v14 = vsel %vm2112_vm10, %v2210_v39, %v2209_v45  ;;  %v2212_v26 = vrot.slane %v8947_v6, 7  ;;  %v13263_v55 = vld [vmem:[#allocation278_spill] sm:$0xff]  ;;  %v13264_v51 = vld [vmem:[#allocation277_spill] sm:$0xff]  ;;  %v13266_v45 = vld [vmem:[#allocation419_spill] sm:$0xff] }
 0x68b   :  { %v2899_v0 = vsel %vm2094_vm4, %v2898_v20, %v13262_v62  ;;  %v2159_v57 = vsel %vm2097_vm5, %v2158_v41, %v2157_v10  ;;  %v2160_v23 = vrot.slane %v13263_v55, 5  ;;  %v2162_v13 = vrot.slane %v13264_v51, 4  ;;  %v13265_v11 = vld [vmem:[#allocation350_spill] sm:$0xff]  ;;  %v13267_v33 = vld [vmem:[#allocation351_spill] sm:$0xff]  ;;  %v13268_v4 = vld [vmem:[#allocation420_spill] sm:$0xff] }
 0x68c   :  { %v2179_v38 = vsel %vm2106_vm8, %v2178_v16, %v2177_v29  ;;  %v2182_v53 = vrot.slane %v13265_v11, 1  ;;  %v2193_v39 = vsel %vm2106_vm8, %v2192_v15, %v2191_v50  ;;  %v2196_v6 = vrot.slane %v13266_v45, 1  ;;  %v9467_v55 = vpop.permute.xlu1 %1999 }
 0x68d   :  { %v2180_v9 = vrot.slane %v13267_v33, 2  ;;  %v3281_v20 = vrot.slane %v9439_v14, 4  ;;  %v13269_v41 = vrot.slane %v8857_v56, 4  ;;  %v2783_v62 = vsel %vm2109_vm9, %v2782_v44, %v2781_v61  ;;  %v13271_v61 = vld [vmem:[#allocation91_spill] sm:$0xff] }
 0x68e   :  { %2081 = vrot.lane.b32.xlu0 %v13261_v8, %s5930_s20  ;;  %v2194_v8 = vrot.slane %v13268_v4, 2  ;;  %v13270_v16 = vrot.slane %v13217_v22, 6  ;;  %v2161_v15 = vsel %vm2100_vm6, %v2160_v23, %v2159_v57  ;;  %v2213_v50 = vsel %vm2094_vm4, %v2212_v26, %v8972_v46  ;;  %v13272_v22 = vld [vmem:[#allocation260_spill] sm:$0xff]  ;;  %v9483_v26 = vpop.permute.xlu2 %2013 }
 0x68f   :  { %v3497_v10 = vsel %vm3245_vm11, %v9206_v27, %v13269_v41  ;;  %v2163_v51 = vsel %vm2103_vm7, %v2162_v13, %v2161_v15  ;;  %v2181_v11 = vsel %vm2109_vm9, %v2180_v9, %v2179_v38  ;;  %v2214_v33 = vrot.slane %v8741_v35, 6  ;;  %13274 = vst [vmem:[#allocation138_spill] sm:$0xff] %v9483_v26  ;;  %v13275_v13 = vld [vmem:[#allocation261_spill] sm:$0xff]  ;;  %v9490_v4 = vpop.permute.xlu0 %1997 }
 0x690   :  { %v2901_v29 = vsel %vm2097_vm5, %v13270_v16, %v2899_v0  ;;  %v2195_v45 = vsel %vm2109_vm9, %v2194_v8, %v2193_v39  ;;  %v2904_v44 = vrot.slane %v13272_v22, 4  ;;  %v13273_v0 = vld [vmem:[#allocation262_spill] sm:$0xff]  ;;  %v9478_v23 = vsel %vm2112_vm10, %v2182_v53, %v2181_v11  ;;  %v13276_v53 = vld [vmem:[#allocation280_spill] sm:$0xff]  ;;  %v13278_v11 = vld [vmem:[#allocation281_spill] sm:$0xff] }
 0x691   :  { %2089 = vrot.lane.b32.xlu1 %v13271_v61, %s5930_s20  ;;  %v2164_v57 = vrot.slane %v13273_v0, 3  ;;  %v9481_v46 = vsel %vm2112_vm10, %v2196_v6, %v2195_v45  ;;  %v2902_v38 = vrot.slane %v13275_v13, 5  ;;  %v3282_v35 = vsel %vm3245_vm11, %v3281_v20, %v9478_v23  ;;  %v13277_v16 = vld [vmem:[#allocation92_spill] sm:$0xff] }
 0x692   :  { %v2215_v39 = vsel %vm2097_vm5, %v2214_v33, %v2213_v50  ;;  %v2218_v9 = vrot.slane %v9003_v32, 4  ;;  %v2168_v41 = vrot.slane %v13276_v53, 1  ;;  %v2216_v6 = vrot.slane %v9028_v1, 5 }
 0x693   :  { %v2165_v8 = vsel %vm2106_vm8, %v2164_v57, %v2163_v51  ;;  %v9498_v15 = vperm.slane %v3497_v10, %v9255_v28  ;;  %v2785_v20 = vsel %vm2112_vm10, %v2784_v63, %v2783_v62  ;;  %v2903_v50 = vsel %vm2100_vm6, %v2902_v38, %v2901_v29  ;;  %v13281_v57 = vld [vmem:[#allocation53_spill] sm:$0xff] }
 0x694   :  { %v2166_v32 = vrot.slane %v13278_v11, 2  ;;  %v3269_v45 = vrot.slane %v9481_v46, 4  ;;  %v2905_v51 = vsel %vm2103_vm7, %v2904_v44, %v2903_v50  ;;  %v9506_v33 = vperm.slane %v3282_v35, %v8750_v24  ;;  %v9539_v50 = vpop.permute.xlu1 %2005  ;;  %v13286_v11 = vld [vmem:[#allocation266_spill] sm:$0xff] }
 0x695   :  { %v2217_v1 = vsel %vm2100_vm6, %v2216_v6, %v2215_v39  ;;  %v13279_v61 = vrot.slane %v9035_v48, 4  ;;  %v3482_v29 = vrot.slane %v9232_v34, 4  ;;  %v13280_v22 = vrot.slane %v9206_v27, 4  ;;  %v13285_v6 = vld [vmem:[#allocation264_spill] sm:$0xff] }
 0x696   :  { %2087 = vrot.lane.b32.xlu0 %v13277_v16, %s5930_s20  ;;  %v2167_v63 = vsel %vm2109_vm9, %v2166_v32, %v2165_v8  ;;  %v2219_v62 = vsel %vm2103_vm7, %v2218_v9, %v2217_v1  ;;  %v4202_v0 = vrot.slane %v2785_v20, 4  ;;  %v13282_v13 = vrot.slane %v13281_v57, 4 }
 0x697   :  { %v3485_v10 = vsel %vm3245_vm11, %v9232_v34, %v13279_v61  ;;  %v3495_v44 = vsel %vm3245_vm11, %v13280_v22, %v8857_v56  ;;  %v9524_v35 = vsel %vm2112_vm10, %v2168_v41, %v2167_v63  ;;  %v2220_v39 = vrot.slane %v8802_v30, 3  ;;  %v13284_v34 = vld [vmem:[#allocation263_spill] sm:$0xff]  ;;  %v9562_v22 = vpop.permute.xlu0 %2003 }
 0x698   :  { %v4205_v38 = vsel %vm3245_vm11, %v2785_v20, %v13282_v13  ;;  %v13283_v8 = vrot.slane %v13229_v25, 3  ;;  %v2910_v53 = vrot.slane %v13284_v34, 1  ;;  %v3270_v27 = vsel %vm3245_vm11, %v3269_v45, %v9524_v35 }
 0x699   :  { %v9534_v56 = vperm.slane %v3485_v10, %v9255_v28  ;;  %v2908_v16 = vrot.slane %v13285_v6, 2  ;;  %v2221_v20 = vsel %vm2106_vm8, %v2220_v39, %v2219_v62  ;;  %v2224_v41 = vrot.slane %v9065_v54, 1  ;;  %v9552_v54 = vpop.permute.xlu2 %2019 }
 0x69a   :  { %v2907_v9 = vsel %vm2106_vm8, %v13283_v8, %v2905_v51  ;;  %v3317_v30 = vrot.slane %v9506_v33, 4  ;;  %v9543_v25 = vperm.slane %v4205_v38, %v8750_v24  ;;  %v3024_v32 = vrot.slane %v13286_v11, 7  ;;  %13287 = vst [vmem:[#allocation118_spill] sm:$0xff] %v9552_v54  ;;  %v13314_v54 = vld [vmem:[#allocation271_spill] sm:$0xff] }
 0x69b   :  { %v2222_v45 = vrot.slane %v9086_v60, 2  ;;  %v3483_v51 = vsel %vm3245_vm11, %v3482_v29, %v9035_v48  ;;  %v4203_v1 = vsel %vm3245_vm11, %v4202_v0, %v13281_v57  ;;  %v2909_v61 = vsel %vm2109_vm9, %v2908_v16, %v2907_v9  ;;  %v13312_v16 = vld [vmem:[#allocation474_spill] sm:$0xff] }
 0x69c   :  { %v9555_v10 = vperm.slane %v3270_v27, %v8750_v24  ;;  %v3671_v63 = vrot.slane %v9271_v36, 4  ;;  %v9559_v62 = vsel %vm2112_vm10, %v2910_v53, %v2909_v61  ;;  %v9565_v48 = vperm.slane %v3495_v44, %v9255_v28  ;;  %v13290_v44 = vld [vmem:[#allocation267_spill] sm:$0xff] }
 0x69d   :  { %13288 = vst [vmem:[#allocation124_spill] sm:$0xff] %v9559_v62  ;;  %v2223_v60 = vsel %vm2109_vm9, %v2222_v45, %v2221_v20  ;;  %v13289_v29 = vrot.slane %v8906_v17, 4  ;;  %v9577_v38 = vperm.slane %v3483_v51, %v9255_v28  ;;  %v9581_v8 = vperm.slane %v4203_v1, %v8750_v24  ;;  %v13296_v51 = vld [vmem:[#allocation269_spill] sm:$0xff] }
 0x69e   :  { %v9572_v57 = vsel %vm2112_vm10, %v2224_v41, %v2223_v60  ;;  %v3318_v13 = vsel %vm3245_vm11, %v3317_v30, %v9555_v10  ;;  %v3025_v9 = vsel %vm2094_vm4, %v3024_v32, %v13290_v44  ;;  %v13291_v34 = vrot.slane %v9052_v58, 4  ;;  %v13298_v60 = vld [vmem:[#allocation270_spill] sm:$0xff]  ;;  %v13300_v44 = vld [vmem:[#allocation489_spill] sm:$0xff] }
 0x69f   :  { %v3686_v0 = vsel %vm3245_vm11, %v9235_v59, %v13289_v29  ;;  %v13292_v27 = vrot.slane %v9235_v59, 4  ;;  %v4391_v20 = vrot.slane %v9559_v62, 4  ;;  %v3672_v41 = vsel %vm3245_vm11, %v3671_v63, %v9052_v58 }
 0x6a0   :  { %v3674_v53 = vsel %vm3245_vm11, %v9271_v36, %v13291_v34  ;;  %v9598_v30 = vperm.slane %v3686_v0, %v9255_v28  ;;  %v9602_v11 = vperm.slane %v9572_v57, %v8750_v24  ;;  %v9605_v36 = vperm.slane %v3318_v13, %v9255_v28  ;;  %v9634_v34 = vpop.permute.xlu1 %2011  ;;  %v13307_v0 = vld [vmem:[#allocation352_spill] sm:$0xff] }
 0x6a1   :  { %v3684_v6 = vsel %vm3245_vm11, %v13292_v27, %v8906_v17  ;;  %v13293_v17 = vperm.slane %v8874_v7, %v8750_v24  ;;  %v13295_v58 = vrot.slane %v13238_v19, 6  ;;  %v3030_v1 = vrot.slane %v13296_v51, 4  ;;  %v13299_v19 = vld [vmem:[#allocation85_spill] sm:$0xff] }
 0x6a2   :  { %v9620_v61 = vperm.slane %v3674_v53, %v9255_v28  ;;  %v9623_v63 = vperm.slane %v3684_v6, %v9255_v28  ;;  %v3028_v29 = vrot.slane %v13298_v60, 5  ;;  %v4392_v13 = vsel %vm3245_vm11, %v4391_v20, %v13299_v19 }
 0x6a3   :  { %v9613_v32 = vsel %vm3245_vm11, %v9257_v5, %v13293_v17  ;;  %v3027_v45 = vsel %vm2097_vm5, %v13295_v58, %v3025_v9  ;;  %v9629_v5 = vperm.slane %v3672_v41, %v9255_v28  ;;  %v2324_v9 = vrot.slane %v13300_v44, 7  ;;  %v13304_v44 = vld [vmem:[#allocation283_spill] sm:$0xff] }
 0x6a4   :  { %13294 = vst [vmem:[#allocation14_spill] sm:$0xff] %v9613_v32  ;;  %v3029_v6 = vsel %vm2100_vm6, %v3028_v29, %v3027_v45  ;;  %v13301_v17 = vrot.slane %v9358_v37, 4  ;;  %v9646_v58 = vperm.slane %v9602_v11, %v9255_v28  ;;  %v13302_v20 = vperm.slane %v8910_v21, %v8750_v24  ;;  %v9657_v29 = vpop.permute.xlu2 %2025  ;;  %v9665_v21 = vpop.permute.xlu0 %2009  ;;  %v13320_v32 = vld [vmem:[#allocation36_spill] sm:$0xff] }
 0x6a5   :  { %13297 = vst [vmem:[#allocation119_spill] sm:$0xff] %v9623_v63  ;;  %v3031_v60 = vsel %vm2103_vm7, %v3030_v1, %v3029_v6  ;;  %v2282_v45 = vrot.slane %v13304_v44, 7  ;;  %v9662_v53 = vperm.slane %v4392_v13, %v8750_v24  ;;  %v2296_v59 = vrot.slane %v13307_v0, 7  ;;  %v13309_v6 = vld [vmem:[#allocation490_spill] sm:$0xff]  ;;  %v13311_v0 = vld [vmem:[#allocation39_spill] sm:$0xff] }
 0x6a6   :  { %v3344_v41 = vsel %vm3245_vm11, %v9605_v36, %v13301_v17  ;;  %v9653_v51 = vsel %vm3245_vm11, %v9285_v40, %v13302_v20  ;;  %13305 = vst [vmem:[#allocation130_spill] sm:$0xff] %v9657_v29  ;;  %v13308_v20 = vld [vmem:[#allocation268_spill] sm:$0xff]  ;;  %v2325_v44 = vsel %vm2094_vm4, %v2324_v9, %v13309_v6  ;;  %v13310_v13 = vrot.slane %v13251_v3, 3 }
 0x6a7   :  { %13303 = vst [vmem:[#allocation125_spill] sm:$0xff] %v9653_v51  ;;  %v2284_v1 = vrot.slane %v13308_v20, 6  ;;  %v4765_v7 = vsel %vm4757_vm12, %v3344_v41, -inf  ;;  %v2326_v62 = vrot.slane %v13312_v16, 6  ;;  %v3387_v40 = vrot.slane %v9646_v58, 4  ;;  %v13313_v20 = vld [vmem:[#allocation272_spill] sm:$0xff] }
 0x6a8   :  { %13306 = vst [vmem:[#allocation139_spill] sm:$0xff] %v9662_v53  ;;  %v3033_v27 = vsel %vm2106_vm8, %v13310_v13, %v3031_v60  ;;  %v3034_v19 = vrot.slane %v13313_v20, 2  ;;  %v13315_v6 = vld [vmem:[#allocation284_spill] sm:$0xff]  ;;  %v13316_v17 = vrot.slane %v8928_v2, 4  ;;  %v13317_v60 = vld [vmem:[#allocation353_spill] sm:$0xff]  ;;  %v13318_v16 = vld [vmem:[#allocation422_spill] sm:$0xff] }
 0x6a9   :  { %v2283_v41 = vsel %vm2094_vm4, %v2282_v45, %v13315_v6  ;;  %v2297_v13 = vsel %vm2094_vm4, %v2296_v59, %v13317_v60  ;;  %v2327_v39 = vsel %vm2097_vm5, %v2326_v62, %v2325_v44  ;;  %v13319_v51 = vld [vmem:[#allocation492_spill] sm:$0xff]  ;;  %v2298_v45 = vrot.slane %v13320_v32, 6  ;;  %v13321_v6 = vld [vmem:[#allocation493_spill] sm:$0xff]  ;;  %v13322_v59 = vld [vmem:[#allocation286_spill] sm:$0xff] }
 0x6aa   :  { %v9688_v3 = vsel %vm3245_vm11, %v9275_v12, %v13316_v17  ;;  %v2330_v20 = vrot.slane %v13319_v51, 4  ;;  %v9696_v9 = vsel %vm2109_vm9, %v3034_v19, %v3033_v27  ;;  %v2328_v29 = vrot.slane %v13321_v6, 5  ;;  %v9708_v27 = vpop.permute.xlu1 %2017 }
 0x6ab   :  { %v3319_v26 = vrot.slane %v9555_v10, 4  ;;  %v3271_v17 = vrot.slane %v9524_v35, 4  ;;  %v2285_v63 = vsel %vm2097_vm5, %v2284_v1, %v2283_v41  ;;  %v2288_v60 = vrot.slane %v13322_v59, 4  ;;  %13323 = vst [vmem:[#allocation123_spill] sm:$0xff] %v9708_v27  ;;  %v13324_v10 = vld [vmem:[#allocation355_spill] sm:$0xff] }
 0x6ac   :  { %v3283_v62 = vrot.slane %v9478_v23, 4  ;;  %v2299_v51 = vsel %vm2097_vm5, %v2298_v45, %v2297_v13  ;;  %v2329_v19 = vsel %vm2100_vm6, %v2328_v29, %v2327_v39  ;;  %v2302_v44 = vrot.slane %v13324_v10, 4  ;;  %v13325_v35 = vld [vmem:[#allocation423_spill] sm:$0xff]  ;;  %v13327_v23 = vld [vmem:[#allocation40_spill] sm:$0xff]  ;;  %v9720_v29 = vpop.permute.xlu2 %2031 }
 0x6ad   :  { %4766 = vmax.xlane.f32.xlu2 %v4765_v7  ;;  %v2310_v7 = vrot.slane %v13318_v16, 7  ;;  %v3388_v16 = vsel %vm3245_vm11, 0.0, %v3387_v40  ;;  %v3320_v32 = vsel %vm3245_vm11, %v9506_v33, %v3319_v26  ;;  %v2331_v41 = vsel %vm2103_vm7, %v2330_v20, %v2329_v19  ;;  %v13326_v40 = vld [vmem:[#allocation407_spill] sm:$0xff]  ;;  %13328 = vst [vmem:[#allocation145_spill] sm:$0xff] %v9720_v29  ;;  %v13329_v26 = vld [vmem:[#allocation356_spill] sm:$0xff]  ;;  %v9727_v20 = vpop.permute.xlu0 %2015 }
 0x6ae   :  { %v2312_v6 = vrot.slane %v13326_v40, 6  ;;  %v2332_v59 = vrot.slane %v13327_v23, 3  ;;  %v3284_v39 = vsel %vm3245_vm11, %v9439_v14, %v3283_v62  ;;  %v4768_v13 = vsel %vm4761_vm13, %v3388_v16, -inf  ;;  %13330 = vst [vmem:[#allocation108_spill] sm:$0xff] %v9727_v20  ;;  %v13331_v14 = vld [vmem:[#allocation425_spill] sm:$0xff]  ;;  %v13332_v16 = vld [vmem:[#allocation495_spill] sm:$0xff] }
 0x6af   :  { %v2311_v1 = vsel %vm2094_vm4, %v2310_v7, %v13325_v35  ;;  %v2300_v33 = vrot.slane %v13329_v26, 5  ;;  %v3272_v45 = vsel %vm3245_vm11, %v9481_v46, %v3271_v17  ;;  %v3357_v7 = vrot.slane %v9572_v57, 4  ;;  %v13333_v26 = vld [vmem:[#allocation426_spill] sm:$0xff]  ;;  %v13334_v17 = vld [vmem:[#allocation496_spill] sm:$0xff] }
 0x6b0   :  { %v9730_v19 = vperm.slane %v3320_v32, %v9255_v28  ;;  %v2313_v10 = vsel %vm2097_vm5, %v2312_v6, %v2311_v1  ;;  %v2316_v62 = vrot.slane %v13331_v14, 4  ;;  %v2333_v35 = vsel %vm2106_vm8, %v2332_v59, %v2331_v41  ;;  %v13336_v32 = vld [vmem:[#allocation340_spill] sm:$0xff] }
 0x6b1   :  { %v2336_v40 = vrot.slane %v13332_v16, 1  ;;  %v2301_v23 = vsel %vm2100_vm6, %v2300_v33, %v2299_v51  ;;  %v2314_v46 = vrot.slane %v13333_v26, 5  ;;  %v3292_v57 = vperm.slane %v3284_v39, %v8750_v24 }
 0x6b2   :  { %v2334_v29 = vrot.slane %v13334_v17, 2  ;;  %v2304_v27 = vrot.slane %v13336_v32, 3  ;;  %v2303_v1 = vsel %vm2103_vm7, %v2302_v44, %v2301_v23  ;;  %v3280_v6 = vperm.slane %v3272_v45, %v8750_v24  ;;  %v13341_v32 = vld [vmem:[#allocation428_spill] sm:$0xff] }
 0x6b3   :  { %v2315_v41 = vsel %vm2100_vm6, %v2314_v46, %v2313_v10  ;;  %v13337_v51 = vrot.slane %v9332_v31, 4  ;;  %v3358_v39 = vsel %vm3245_vm11, 0.0, %v3357_v7  ;;  %v3341_v44 = vrot.slane %v9605_v36, 4  ;;  %v13338_v10 = vld [vmem:[#allocation410_spill] sm:$0xff]  ;;  %v9761_v7 = vpop.permute.xlu1 %2023 }
 0x6b4   :  { %v2335_v59 = vsel %vm2109_vm9, %v2334_v29, %v2333_v35  ;;  %v2317_v16 = vsel %vm2103_vm7, %v2316_v62, %v2315_v41  ;;  %v2305_v45 = vsel %vm2106_vm8, %v2304_v27, %v2303_v1  ;;  %v2318_v29 = vrot.slane %v13338_v10, 3  ;;  %v13339_v46 = vld [vmem:[#allocation358_spill] sm:$0xff]  ;;  %v13340_v62 = vld [vmem:[#allocation359_spill] sm:$0xff]  ;;  %v13342_v41 = vld [vmem:[#allocation429_spill] sm:$0xff] }
 0x6b5   :  { %4769 = vmax.xlane.f32.xlu2 %v4768_v13  ;;  %v13335_v13 = vld [vmem:[#allocation287_spill] sm:$0xff]  ;;  %v3348_v33 = vsel %vm3245_vm11, %v9730_v19, %v13337_v51  ;;  %v9754_v26 = vsel %vm2112_vm10, %v2336_v40, %v2335_v59  ;;  %v3329_v35 = vrot.slane %v3292_v57, 4  ;;  %v3367_v23 = vrot.slane %v9602_v11, 4  ;;  %v9770_v59 = vpop.permute.xlu2 %2037 }
 0x6b6   :  { %v2286_v20 = vrot.slane %v13335_v13, 5  ;;  %v2308_v17 = vrot.slane %v13339_v46, 1  ;;  %v3331_v13 = vrot.slane %v3280_v6, 4  ;;  %v2306_v40 = vrot.slane %v13340_v62, 2  ;;  %13343 = vst [vmem:[#allocation114_spill] sm:$0xff] %v9770_v59  ;;  %v13373_v59 = vld [vmem:[#allocation404_spill] sm:$0xff] }
 0x6b7   :  { %v2319_v36 = vsel %vm2106_vm8, %v2318_v29, %v2317_v16  ;;  %v2322_v27 = vrot.slane %v13341_v32, 1  ;;  %v3470_v1 = vrot.slane %v9754_v26, 4  ;;  %v2320_v11 = vrot.slane %v13342_v41, 2  ;;  %v9779_v29 = vpop.permute.xlu0 %2021  ;;  %v13349_v41 = vld [vmem:[#allocation290_spill] sm:$0xff] }
 0x6b8   :  { %v2287_v14 = vsel %vm2100_vm6, %v2286_v20, %v2285_v63  ;;  %v4777_v63 = vsel %vm4757_vm12, %v3348_v33, -inf  ;;  %v3366_v20 = vperm.slane %v3358_v39, %v8750_v24  ;;  %v3342_v51 = vsel %vm3245_vm11, %v3341_v44, %v9358_v37  ;;  %v13344_v44 = vld [vmem:[#allocation88_spill] sm:$0xff] }
 0x6b9   :  { %v4762_v33 = vsel %vm4761_vm13, %v9646_v58, -inf  ;;  %v3332_v39 = vsel %vm3245_vm11, %v3292_v57, %v3331_v13  ;;  %v2289_v10 = vsel %vm2103_vm7, %v2288_v60, %v2287_v14  ;;  %v2307_v16 = vsel %vm2109_vm9, %v2306_v40, %v2305_v45 }
 0x6ba   :  { %v3368_v46 = vsel %vm3245_vm11, 0.0, %v3367_v23  ;;  %v9784_v62 = vsel %vm2112_vm10, %v2308_v17, %v2307_v16  ;;  %v2321_v37 = vsel %vm2109_vm9, %v2320_v11, %v2319_v36  ;;  %v2338_v58 = vrot.slane %v13344_v44, 7 }
 0x6bb   :  { %4763 = vmax.xlane.f32.xlu1 %v4762_v33  ;;  %v9789_v57 = vperm.slane %v3366_v20, %v9255_v28  ;;  %v9792_v60 = vsel %vm2112_vm10, %v2322_v27, %v2321_v37  ;;  %v3471_v14 = vsel %vm3245_vm11, %v3470_v1, %v9784_v62  ;;  %v4758_v45 = vsel %vm4757_vm12, %v3342_v51, -inf  ;;  %v13350_v51 = vld [vmem:[#allocation289_spill] sm:$0xff]  ;;  %v13351_v33 = vld [vmem:[#allocation104_spill] sm:$0xff] }
 0x6bc   :  { %v3376_v23 = vperm.slane %v3368_v46, %v9255_v28  ;;  %v3377_v13 = vrot.slane %v3366_v20, 4  ;;  %v13345_v40 = vrot.slane %v13314_v54, 1  ;;  %v13347_v32 = vrot.slane %v13311_v0, 3  ;;  %v9831_v46 = vpop.permute.xlu1 %2029 }
 0x6bd   :  { %4778 = vmax.xlane.f32.xlu2 %v4777_v63  ;;  %v3330_v63 = vsel %vm3245_vm11, %v3329_v35, %v3280_v6  ;;  %v9798_v6 = vperm.slane %v3332_v39, %v9255_v28  ;;  %v3345_v35 = vrot.slane %v9730_v19, 4  ;;  %v3860_v1 = vrot.slane %v9306_v49, 4 }
 0x6be   :  { %v9803_v17 = vperm.slane %v3330_v63, %v9255_v28  ;;  %v9809_v36 = vsel %vm2112_vm10, %v13345_v40, %v9696_v9  ;;  %v2291_v27 = vsel %vm2106_vm8, %v13347_v32, %v2289_v10  ;;  %v9817_v19 = vperm.slane %v9688_v3, %v9255_v28  ;;  %v13352_v10 = vld [vmem:[#allocation72_spill] sm:$0xff] }
 0x6bf   :  { %13346 = vst [vmem:[#allocation27_spill] sm:$0xff] %v9809_v36  ;;  %v2292_v11 = vrot.slane %v13349_v41, 2  ;;  %v2294_v20 = vrot.slane %v13350_v51, 1  ;;  %v2339_v54 = vsel %vm2094_vm4, %v2338_v58, %v13351_v33  ;;  %v4786_v9 = vsel %vm4761_vm13, %v9789_v57, -inf  ;;  %v13353_v40 = vld [vmem:[#allocation96_spill] sm:$0xff]  ;;  %v13354_v41 = vld [vmem:[#allocation65_spill] sm:$0xff] }
 0x6c0   :  { %4759 = vmax.xlane.f32.xlu0 %v4758_v45  ;;  %13348 = vst [vmem:[#allocation117_spill] sm:$0xff] %v9817_v19  ;;  %v3458_v0 = vrot.slane %v9792_v60, 4  ;;  %v9827_v39 = vperm.slane %v3471_v14, %v8750_v24  ;;  %v2340_v16 = vrot.slane %v13352_v10, 6  ;;  %v3353_v3 = vrot.slane %v9798_v6, 4  ;;  %v9858_v10 = vpop.permute.xlu0 %2027 }
 0x6c1   :  { %v3346_v63 = vsel %vm3245_vm11, %v3345_v35, %v9332_v31  ;;  %v4774_v37 = vsel %vm4761_vm13, %v3376_v23, -inf  ;;  %v3349_v44 = vrot.slane %v9803_v17, 4  ;;  %v3378_v58 = vsel %vm3245_vm11, 0.0, %v3377_v13  ;;  %v9850_v13 = vpop.permute.xlu2 %2043  ;;  %13358 = vst [vmem:[#allocation141_spill] sm:$0xff] %v9858_v10  ;;  %v13409_v10 = vld [vmem:[#allocation432_spill] sm:$0xff] }
 0x6c2   :  { %v2293_v45 = vsel %vm2109_vm9, %v2292_v11, %v2291_v27  ;;  %v2341_v14 = vsel %vm2097_vm5, %v2340_v16, %v2339_v54  ;;  %v2344_v32 = vrot.slane %v13353_v40, 4  ;;  %v13355_v51 = vrot.slane %v13354_v41, 4  ;;  %13356 = vst [vmem:[#allocation131_spill] sm:$0xff] %v9850_v13  ;;  %v13360_v40 = vld [vmem:[#allocation95_spill] sm:$0xff]  ;;  %v13386_v13 = vld [vmem:[#allocation361_spill] sm:$0xff] }
 0x6c3   :  { %4775 = vmax.xlane.f32.xlu1 %v4774_v37  ;;  %v4580_v31 = vrot.slane %v9809_v36, 4  ;;  %v9847_v35 = vsel %vm2112_vm10, %v2294_v20, %v2293_v45  ;;  %v13357_v27 = vrot.slane %v9275_v12, 4  ;;  %v3354_v20 = vsel %vm3245_vm11, %v3353_v3, %v9366_v47 }
 0x6c4   :  { %v3863_v33 = vsel %vm3245_vm11, %v9306_v49, %v13355_v51  ;;  %v3459_v54 = vsel %vm3245_vm11, %v3458_v0, %v9847_v35  ;;  %v4771_v49 = vsel %vm4757_vm12, %v3346_v63, -inf  ;;  %v9864_v16 = vperm.slane %v3378_v58, %v9255_v28 }
 0x6c5   :  { %4787 = vmax.xlane.f32.xlu2 %v4786_v9  ;;  %v2342_v9 = vrot.slane %v9197_v18, 5  ;;  %v3873_v11 = vsel %vm3245_vm11, %v13357_v27, %v8928_v2  ;;  %v3389_v37 = vrot.slane %v3376_v23, 4  ;;  %v3350_v2 = vsel %vm3245_vm11, %v3349_v44, %v9350_v42 }
 0x6c6   :  { %v3506_v12 = vrot.slane %v9827_v39, 4  ;;  %v3861_v63 = vsel %vm3245_vm11, %v3860_v1, %v13354_v41  ;;  %v9874_v45 = vperm.slane %v3863_v33, %v9255_v28  ;;  %v4049_v3 = vrot.slane %v9375_v43, 4  ;;  %v13368_v41 = vld [vmem:[#allocation97_spill] sm:$0xff] }
 0x6c7   :  { %v2343_v18 = vsel %vm2100_vm6, %v2342_v9, %v2341_v14  ;;  %v9878_v58 = vperm.slane %v3459_v54, %v8750_v24  ;;  %v13359_v14 = vld [vmem:[#allocation31_spill] sm:$0xff]  ;;  %v2346_v51 = vrot.slane %v13360_v40, 3  ;;  %v4795_v44 = vsel %vm4757_vm12, %v3354_v20, -inf }
 0x6c8   :  { %4772 = vmax.xlane.f32.xlu0 %v4771_v49  ;;  %v2345_v0 = vsel %vm2103_vm7, %v2344_v32, %v2343_v18  ;;  %v3413_v23 = vrot.slane %v13359_v14, 4  ;;  %v4783_v9 = vsel %vm4757_vm12, %v3350_v2, -inf  ;;  %v3393_v32 = vrot.slane %v9864_v16, 4  ;;  %v13362_v20 = vld [vmem:[#allocation115_spill] sm:$0xff] }
 0x6c9   :  { %v9886_v1 = vperm.slane %v3873_v11, %v9255_v28  ;;  %v2347_v33 = vsel %vm2106_vm8, %v2346_v51, %v2345_v0  ;;  %v2350_v27 = vrot.slane %v9239_v52, 1  ;;  %v3390_v54 = vsel %vm3245_vm11, 0.0, %v3389_v37  ;;  %v13363_v11 = vld [vmem:[#allocation83_spill] sm:$0xff]  ;;  %v13366_v51 = vld [vmem:[#allocation336_spill] sm:$0xff]  ;;  %v9905_v37 = vpop.permute.xlu1 %2035 }
 0x6ca   :  { %v3507_v49 = vsel %vm3245_vm11, %v3506_v12, %v9878_v58  ;;  %v2348_v18 = vrot.slane %v13362_v20, 2  ;;  %v3391_v2 = vrot.slane %v9789_v57, 4  ;;  %v9897_v14 = vperm.slane %v3861_v63, %v9255_v28  ;;  %13367 = vst [vmem:[#allocation52_spill] sm:$0xff] %v9905_v37 }
 0x6cb   :  { %13361 = vst [vmem:[#allocation127_spill] sm:$0xff] %v9886_v1  ;;  %4784 = vmax.xlane.f32.xlu1 %v4783_v9  ;;  %v13364_v40 = vrot.slane %v13363_v11, 4  ;;  %v3414_v52 = vsel %vm3245_vm11, %v3413_v23, %v13366_v51  ;;  %v4050_v12 = vsel %vm3245_vm11, %v4049_v3, %v13368_v41  ;;  %v13369_v9 = vrot.slane %v13368_v41, 4  ;;  %v13371_v3 = vld [vmem:[#allocation59_spill] sm:$0xff]  ;;  %v13408_v1 = vld [vmem:[#allocation365_spill] sm:$0xff] }
 0x6cc   :  { %v4780_v36 = vsel %vm4761_vm13, %v3390_v54, -inf  ;;  %v3394_v23 = vsel %vm3245_vm11, 0.0, %v3393_v32  ;;  %v9921_v51 = vperm.slane %v3507_v49, %v9255_v28  ;;  %v9925_v41 = vsel %vm3245_vm11, %v4580_v31, %v13371_v3  ;;  %v9935_v32 = vpop.permute.xlu0 %2033 }
 0x6cd   :  { %4796 = vmax.xlane.f32.xlu2 %v4795_v44  ;;  %v13365_v44 = vld [vmem:[#allocation23_spill] sm:$0xff]  ;;  %v4052_v57 = vsel %vm3245_vm11, %v9375_v43, %v13369_v9  ;;  %13372 = vst [vmem:[#allocation128_spill] sm:$0xff] %v9925_v41  ;;  %v3407_v43 = vrot.slane %v13373_v59, 4  ;;  %v3418_v54 = vperm.slane %v3414_v52, %v8750_v24  ;;  %v3392_v49 = vsel %vm3245_vm11, 0.0, %v3391_v2  ;;  %v13380_v52 = vld [vmem:[#allocation276_spill] sm:$0xff]  ;;  %v13394_v41 = vld [vmem:[#allocation113_spill] sm:$0xff] }
 0x6ce   :  { %v4064_v0 = vsel %vm3245_vm11, %v13365_v44, %v13364_v40  ;;  %v13370_v63 = vrot.slane %v13365_v44, 4  ;;  %v2349_v40 = vsel %vm2109_vm9, %v2348_v18, %v2347_v33  ;;  %v9931_v44 = vpop.permute.xlu2 %2049  ;;  %13375 = vst [vmem:[#allocation146_spill] sm:$0xff] %v9935_v32  ;;  %v9939_v18 = vperm.slane %v4052_v57, %v9255_v28 }
 0x6cf   :  { %v9929_v9 = vsel %vm2112_vm10, %v2350_v27, %v2349_v40  ;;  %13374 = vst [vmem:[#allocation126_spill] sm:$0xff] %v9931_v44  ;;  %v9942_v31 = vperm.slane %v4064_v0, %v9255_v28  ;;  %v4804_v59 = vsel %vm4761_vm13, %v3394_v23, -inf  ;;  %v3530_v2 = vrot.slane %v9921_v51, 4  ;;  %v13381_v40 = vld [vmem:[#allocation279_spill] sm:$0xff]  ;;  %v13382_v27 = vld [vmem:[#allocation265_spill] sm:$0xff] }
 0x6d0   :  { %v4062_v20 = vsel %vm3245_vm11, %v13370_v63, %v13363_v11  ;;  %4781 = vmax.xlane.f32.xlu0 %v4780_v36  ;;  %13376 = vst [vmem:[#allocation29_spill] sm:$0xff] %v9939_v18  ;;  %v9947_v36 = vperm.slane %v4050_v12, %v9255_v28  ;;  %v9956_v57 = vperm.slane %v9929_v9, %v8750_v24  ;;  %v13383_v33 = vrot.slane %v9350_v42, 4  ;;  %v13384_v44 = vld [vmem:[#allocation89_spill] sm:$0xff] }
 0x6d1   :  { %13377 = vst [vmem:[#allocation133_spill] sm:$0xff] %v9942_v31  ;;  %v9950_v11 = vperm.slane %v4062_v20, %v9255_v28  ;;  %v3408_v12 = vsel %vm3245_vm11, %v3407_v43, %v13382_v27  ;;  %v3425_v63 = vrot.slane %v3418_v54, 4  ;;  %v13385_v0 = vrot.slane %v13384_v44, 4  ;;  %v13387_v27 = vld [vmem:[#allocation498_spill] sm:$0xff] }
 0x6d2   :  { %13378 = vst [vmem:[#allocation132_spill] sm:$0xff] %v9947_v36  ;;  %v3352_v20 = vsel %vm3245_vm11, %v9803_v17, %v13383_v33  ;;  %v2422_v43 = vrot.slane %v13386_v13, 7  ;;  %v2450_v42 = vrot.slane %v13387_v27, 7  ;;  %v3412_v33 = vperm.slane %v3408_v12, %v8750_v24  ;;  %v13389_v13 = vld [vmem:[#allocation288_spill] sm:$0xff]  ;;  %v9987_v27 = vpop.permute.xlu1 %2041  ;;  %v13396_v17 = vld [vmem:[#allocation499_spill] sm:$0xff] }
 0x6d3   :  { %13379 = vst [vmem:[#allocation37_spill] sm:$0xff] %v9950_v11  ;;  %v4253_v23 = vsel %vm3245_vm11, %v9543_v25, %v13385_v0  ;;  %v4789_v54 = vsel %vm4757_vm12, %v3352_v20, -inf  ;;  %v13388_v0 = vld [vmem:[#allocation285_spill] sm:$0xff]  ;;  %v13392_v20 = vld [vmem:[#allocation292_spill] sm:$0xff]  ;;  %v13395_v18 = vrot.slane %v13394_v41, 4  ;;  %v2426_v19 = vrot.slane %v13408_v1, 5 }
 0x6d4   :  { %13390 = vst [vmem:[#allocation154_spill] sm:$0xff] %v9987_v27  ;;  %v9991_v12 = vperm.slane %v4253_v23, %v9255_v28  ;;  %v2408_v32 = vrot.slane %v13392_v20, 7  ;;  %v3426_v31 = vsel %vm3245_vm11, %v3425_v63, %v3412_v33  ;;  %v2451_v23 = vsel %vm2094_vm4, %v2450_v42, %v13396_v17  ;;  %v13399_v63 = vld [vmem:[#allocation362_spill] sm:$0xff]  ;;  %v13411_v1 = vld [vmem:[#allocation364_spill] sm:$0xff] }
 0x6d5   :  { %4805 = vmax.xlane.f32.xlu2 %v4804_v59  ;;  %v4792_v59 = vsel %vm4761_vm13, %v3392_v49, -inf  ;;  %v3531_v49 = vsel %vm3245_vm11, %v3530_v2, %v9577_v38  ;;  %v13393_v2 = vrot.slane %v9366_v47, 4  ;;  %v4241_v3 = vsel %vm3245_vm11, %v9581_v8, %v13395_v18  ;;  %v13401_v18 = vld [vmem:[#allocation482_spill] sm:$0xff] }
 0x6d6   :  { %4793 = vmax.xlane.f32.xlu1 %v4792_v59  ;;  %v9983_v59 = vperm.slane %v9956_v57, %v9255_v28  ;;  %13391 = vst [vmem:[#allocation129_spill] sm:$0xff] %v9991_v12  ;;  %v10006_v27 = vpop.permute.xlu2 %2055  ;;  %v4813_v20 = vsel %vm4757_vm12, %v3531_v49, -inf  ;;  %v13398_v47 = vrot.slane %v9543_v25, 4  ;;  %v2423_v33 = vsel %vm2094_vm4, %v2422_v43, %v13399_v63  ;;  %v13403_v17 = vld [vmem:[#allocation346_spill] sm:$0xff] }
 0x6d7   :  { %v3356_v11 = vsel %vm3245_vm11, %v9798_v6, %v13393_v2  ;;  %13397 = vst [vmem:[#allocation148_spill] sm:$0xff] %v10006_v27  ;;  %v13400_v2 = vld [vmem:[#allocation431_spill] sm:$0xff]  ;;  %v2452_v37 = vrot.slane %v13401_v18, 6  ;;  %v2424_v27 = vrot.slane %v13403_v17, 6  ;;  %v3430_v25 = vperm.slane %v3426_v31, %v9255_v28 }
 0x6d8   :  { %4790 = vmax.xlane.f32.xlu0 %v4789_v54  ;;  %v3460_v54 = vrot.slane %v9847_v35, 4  ;;  %v4251_v6 = vsel %vm3245_vm11, %v13398_v47, %v13384_v44  ;;  %v2436_v36 = vrot.slane %v13400_v2, 7  ;;  %v10017_v35 = vpop.permute.xlu0 %2039  ;;  %v3576_v42 = vrot.slane %v9983_v59, 4  ;;  %v13404_v47 = vld [vmem:[#allocation293_spill] sm:$0xff] }
 0x6d9   :  { %13402 = vst [vmem:[#allocation149_spill] sm:$0xff] %v10017_v35  ;;  %v4801_v49 = vsel %vm4757_vm12, %v3356_v11, -inf  ;;  %v10024_v44 = vperm.slane %v4241_v3, %v9255_v28  ;;  %v2409_v43 = vsel %vm2094_vm4, %v2408_v32, %v13404_v47  ;;  %v2453_v63 = vsel %vm2097_vm5, %v2452_v37, %v2451_v23  ;;  %v13405_v2 = vld [vmem:[#allocation501_spill] sm:$0xff]  ;;  %v13407_v35 = vld [vmem:[#allocation502_spill] sm:$0xff] }
 0x6da   :  { %v2456_v18 = vrot.slane %v13405_v2, 4  ;;  %v3472_v17 = vrot.slane %v9784_v62, 4  ;;  %v2425_v11 = vsel %vm2097_vm5, %v2424_v27, %v2423_v33  ;;  %v2454_v31 = vrot.slane %v13407_v35, 5  ;;  %v13413_v2 = vld [vmem:[#allocation435_spill] sm:$0xff] }
 0x6db   :  { %v3508_v3 = vrot.slane %v9878_v58, 4  ;;  %v2437_v32 = vsel %vm2094_vm4, %v2436_v36, %v13409_v10  ;;  %v4798_v37 = vsel %vm4761_vm13, %v9864_v16, -inf  ;;  %v3577_v23 = vsel %vm3245_vm11, 0.0, %v3576_v42  ;;  %v13412_v42 = vld [vmem:[#allocation485_spill] sm:$0xff] }
 0x6dc   :  { %v2455_v62 = vsel %vm2100_vm6, %v2454_v31, %v2453_v63  ;;  %v3431_v27 = vrot.slane %v3430_v25, 4  ;;  %v2427_v58 = vsel %vm2100_vm6, %v2426_v19, %v2425_v11  ;;  %v2428_v35 = vrot.slane %v13411_v1, 4  ;;  %v10056_v25 = vpop.permute.xlu1 %2047  ;;  %v13414_v11 = vld [vmem:[#allocation434_spill] sm:$0xff] }
 0x6dd   :  { %4814 = vmax.xlane.f32.xlu2 %v4813_v20  ;;  %v10031_v20 = vperm.slane %v4251_v6, %v9255_v28  ;;  %v13410_v6 = vld [vmem:[#allocation416_spill] sm:$0xff]  ;;  %v3509_v33 = vsel %vm3245_vm11, %v9827_v39, %v3508_v3  ;;  %v3461_v10 = vsel %vm3245_vm11, %v9792_v60, %v3460_v54  ;;  %v2457_v16 = vsel %vm2103_vm7, %v2456_v18, %v2455_v62 }
 0x6de   :  { %4802 = vmax.xlane.f32.xlu1 %v4801_v49  ;;  %v2438_v49 = vrot.slane %v13410_v6, 6  ;;  %v2458_v47 = vrot.slane %v13412_v42, 3  ;;  %v3473_v63 = vsel %vm3245_vm11, %v9754_v26, %v3472_v17  ;;  %v4822_v39 = vsel %vm4761_vm13, %v3577_v23, -inf  ;;  %v13415_v18 = vld [vmem:[#allocation504_spill] sm:$0xff]  ;;  %v13416_v26 = vld [vmem:[#allocation121_spill] sm:$0xff]  ;;  %v13418_v6 = vld [vmem:[#allocation62_spill] sm:$0xff] }
 0x6df   :  { %13406 = vst [vmem:[#allocation142_spill] sm:$0xff] %v10031_v20  ;;  %v2440_v19 = vrot.slane %v13413_v2, 5  ;;  %v2442_v31 = vrot.slane %v13414_v11, 4  ;;  %v3546_v3 = vrot.slane %v9929_v9, 4  ;;  %v10063_v60 = vperm.slane %v3509_v33, %v9255_v28  ;;  %v13422_v11 = vld [vmem:[#allocation349_spill] sm:$0xff]  ;;  %v13468_v20 = vld [vmem:[#allocation507_spill] sm:$0xff] }
 0x6e0   :  { %4799 = vmax.xlane.f32.xlu0 %v4798_v37  ;;  %v2439_v36 = vsel %vm2097_vm5, %v2438_v49, %v2437_v32  ;;  %v2459_v54 = vsel %vm2106_vm8, %v2458_v47, %v2457_v16  ;;  %v2462_v32 = vrot.slane %v13415_v18, 1  ;;  %v10067_v37 = vpop.permute.xlu2 %2061  ;;  %v13417_v17 = vperm.slane %v13416_v26, %v9255_v28  ;;  %v13420_v16 = vld [vmem:[#allocation505_spill] sm:$0xff]  ;;  %v10081_v47 = vpop.permute.xlu0 %2045 }
 0x6e1   :  { %v4810_v49 = vsel %vm4761_vm13, %v13418_v6, -inf  ;;  %v13419_v9 = vrot.slane %v13380_v52, 6  ;;  %v2429_v33 = vsel %vm2103_vm7, %v2428_v35, %v2427_v58  ;;  %v3481_v1 = vperm.slane %v3473_v63, %v8750_v24 }
 0x6e2   :  { %v3432_v23 = vsel %vm3245_vm11, %v3431_v27, %v13417_v17  ;;  %v2460_v42 = vrot.slane %v13420_v16, 2  ;;  %v2430_v27 = vrot.slane %v13422_v11, 3  ;;  %v3469_v18 = vperm.slane %v3461_v10, %v8750_v24  ;;  %v13424_v17 = vld [vmem:[#allocation296_spill] sm:$0xff] }
 0x6e3   :  { %v2411_v62 = vsel %vm2097_vm5, %v13419_v9, %v2409_v43  ;;  %v2441_v26 = vsel %vm2100_vm6, %v2440_v19, %v2439_v36  ;;  %v4807_v43 = vsel %vm4757_vm12, %v3432_v23, -inf  ;;  %v13423_v58 = vrot.slane %v9534_v56, 4  ;;  %v13425_v36 = vld [vmem:[#allocation55_spill] sm:$0xff] }
 0x6e4   :  { %v2461_v52 = vsel %vm2109_vm9, %v2460_v42, %v2459_v54  ;;  %v3547_v63 = vsel %vm3245_vm11, 0.0, %v3546_v3  ;;  %v2412_v6 = vrot.slane %v13424_v17, 5  ;;  %v2443_v9 = vsel %vm2103_vm7, %v2442_v31, %v2441_v26  ;;  %v13427_v42 = vld [vmem:[#allocation367_spill] sm:$0xff]  ;;  %v10115_v17 = vpop.permute.xlu1 %2053 }
 0x6e5   :  { %4823 = vmax.xlane.f32.xlu2 %v4822_v39  ;;  %v13421_v39 = vld [vmem:[#allocation295_spill] sm:$0xff]  ;;  %v3537_v35 = vsel %vm3245_vm11, %v10063_v60, %v13423_v58  ;;  %v10098_v10 = vsel %vm2112_vm10, %v2462_v32, %v2461_v52  ;;  %v2444_v19 = vrot.slane %v13425_v36, 3  ;;  %v3518_v54 = vrot.slane %v3481_v1, 4  ;;  %v13428_v32 = vld [vmem:[#allocation368_spill] sm:$0xff]  ;;  %v13429_v52 = vld [vmem:[#allocation437_spill] sm:$0xff] }
 0x6e6   :  { %4811 = vmax.xlane.f32.xlu1 %v4810_v49  ;;  %v2414_v2 = vrot.slane %v13421_v39, 4  ;;  %v2431_v49 = vsel %vm2106_vm8, %v2430_v27, %v2429_v33  ;;  %v13426_v23 = vrot.slane %v9577_v38, 4  ;;  %v3556_v3 = vrot.slane %v9956_v57, 4  ;;  %v13430_v58 = vld [vmem:[#allocation438_spill] sm:$0xff] }
 0x6e7   :  { %v2434_v39 = vrot.slane %v13427_v42, 1  ;;  %v3520_v11 = vrot.slane %v3469_v18, 4  ;;  %v4831_v33 = vsel %vm4757_vm12, %v3537_v35, -inf  ;;  %v3555_v31 = vperm.slane %v3547_v63, %v8750_v24 }
 0x6e8   :  { %4808 = vmax.xlane.f32.xlu0 %v4807_v43  ;;  %v3533_v16 = vsel %vm3245_vm11, %v9921_v51, %v13426_v23  ;;  %v2432_v27 = vrot.slane %v13428_v32, 2  ;;  %v2445_v26 = vsel %vm2106_vm8, %v2444_v19, %v2443_v9  ;;  %v2448_v43 = vrot.slane %v13429_v52, 1  ;;  %v10128_v32 = vpop.permute.xlu2 %2067 }
 0x6e9   :  { %v3659_v38 = vrot.slane %v10098_v10, 4  ;;  %v2413_v51 = vsel %vm2100_vm6, %v2412_v6, %v2411_v62  ;;  %v2446_v57 = vrot.slane %v13430_v58, 2  ;;  %v4819_v36 = vsel %vm4757_vm12, %v3533_v16, -inf  ;;  %v13431_v6 = vld [vmem:[#allocation101_spill] sm:$0xff]  ;;  %13432 = vst [vmem:[#allocation162_spill] sm:$0xff] %v10128_v32  ;;  %v10138_v16 = vpop.permute.xlu0 %2051 }
 0x6ea   :  { %v3521_v35 = vsel %vm3245_vm11, %v3481_v1, %v3520_v11  ;;  %v2415_v63 = vsel %vm2103_vm7, %v2414_v2, %v2413_v51  ;;  %v2433_v23 = vsel %vm2109_vm9, %v2432_v27, %v2431_v49  ;;  %v3557_v9 = vsel %vm3245_vm11, 0.0, %v3556_v3 }
 0x6eb   :  { %v3519_v19 = vsel %vm3245_vm11, %v3518_v54, %v3469_v18  ;;  %v10124_v42 = vsel %vm2112_vm10, %v2434_v39, %v2433_v23  ;;  %v2447_v62 = vsel %vm2109_vm9, %v2446_v57, %v2445_v26  ;;  %v10131_v1 = vperm.slane %v3555_v31, %v9255_v28  ;;  %v13438_v23 = vld [vmem:[#allocation122_spill] sm:$0xff] }
 0x6ec   :  { %v10134_v2 = vsel %vm2112_vm10, %v2448_v43, %v2447_v62  ;;  %v3660_v49 = vsel %vm3245_vm11, %v3659_v38, %v10124_v42  ;;  %v4816_v18 = vsel %vm4761_vm13, %v9983_v59, -inf  ;;  %v10143_v54 = vperm.slane %v3521_v35, %v9255_v28  ;;  %v13434_v43 = vld [vmem:[#allocation298_spill] sm:$0xff] }
 0x6ed   :  { %4832 = vmax.xlane.f32.xlu2 %v4831_v33  ;;  %v2464_v33 = vrot.slane %v13431_v6, 7  ;;  %v3534_v3 = vrot.slane %v10063_v60, 4  ;;  %v3565_v39 = vperm.slane %v3557_v9, %v9255_v28  ;;  %v10148_v11 = vperm.slane %v3519_v19, %v9255_v28  ;;  %v13436_v60 = vld [vmem:[#allocation299_spill] sm:$0xff] }
 0x6ee   :  { %4820 = vmax.xlane.f32.xlu1 %v4819_v36  ;;  %v3566_v27 = vrot.slane %v3555_v31, 4  ;;  %v13433_v26 = vrot.slane %v13381_v40, 3  ;;  %v2420_v38 = vrot.slane %v13434_v43, 1  ;;  %v13435_v59 = vrot.slane %v9581_v8, 4  ;;  %v13437_v36 = vld [vmem:[#allocation301_spill] sm:$0xff]  ;;  %v13439_v8 = vld [vmem:[#allocation98_spill] sm:$0xff] }
 0x6ef   :  { %v2418_v57 = vrot.slane %v13436_v60, 2  ;;  %v2534_v35 = vrot.slane %v13437_v36, 7  ;;  %v2465_v31 = vsel %vm2094_vm4, %v2464_v33, %v13438_v23  ;;  %v4840_v40 = vsel %vm4761_vm13, %v10131_v1, -inf  ;;  %v13442_v23 = vld [vmem:[#allocation110_spill] sm:$0xff] }
 0x6f0   :  { %4817 = vmax.xlane.f32.xlu0 %v4816_v18  ;;  %v2417_v52 = vsel %vm2106_vm8, %v13433_v26, %v2415_v63  ;;  %v4239_v51 = vsel %vm3245_vm11, %v13435_v59, %v13394_v41  ;;  %v3647_v63 = vrot.slane %v10134_v2, 4  ;;  %v10167_v9 = vperm.slane %v3660_v49, %v8750_v24  ;;  %v13440_v49 = vld [vmem:[#allocation109_spill] sm:$0xff] }
 0x6f1   :  { %v2466_v19 = vrot.slane %v13439_v8, 6  ;;  %v3542_v41 = vrot.slane %v10143_v54, 4  ;;  %v3535_v62 = vsel %vm3245_vm11, %v3534_v3, %v9534_v56  ;;  %v4828_v6 = vsel %vm4761_vm13, %v3565_v39, -inf  ;;  %v13441_v56 = vld [vmem:[#allocation302_spill] sm:$0xff]  ;;  %v10188_v8 = vpop.permute.xlu1 %2059 }
 0x6f2   :  { %v3538_v33 = vrot.slane %v10148_v11, 4  ;;  %v3567_v18 = vsel %vm3245_vm11, 0.0, %v3566_v27  ;;  %v2419_v26 = vsel %vm2109_vm9, %v2418_v57, %v2417_v52  ;;  %v2470_v59 = vrot.slane %v13440_v49, 4  ;;  %v13445_v49 = vld [vmem:[#allocation304_spill] sm:$0xff] }
 0x6f3   :  { %v2467_v43 = vsel %vm2097_vm5, %v2466_v19, %v2465_v31  ;;  %v10180_v60 = vperm.slane %v4239_v51, %v9255_v28  ;;  %v10183_v36 = vsel %vm2112_vm10, %v2420_v38, %v2419_v26  ;;  %v2535_v3 = vsel %vm2094_vm4, %v2534_v35, %v13441_v56  ;;  %v10200_v35 = vpop.permute.xlu2 %2073  ;;  %v13446_v56 = vld [vmem:[#allocation310_spill] sm:$0xff] }
 0x6f4   :  { %v3648_v52 = vsel %vm3245_vm11, %v3647_v63, %v10183_v36  ;;  %v4825_v57 = vsel %vm4757_vm12, %v3535_v62, -inf  ;;  %v3543_v51 = vsel %vm3245_vm11, %v3542_v41, %v9498_v15  ;;  %v10197_v38 = vperm.slane %v3567_v18, %v9255_v28  ;;  %13443 = vst [vmem:[#allocation143_spill] sm:$0xff] %v10200_v35 }
 0x6f5   :  { %4841 = vmax.xlane.f32.xlu2 %v4840_v40  ;;  %v2468_v40 = vrot.slane %v13442_v23, 5  ;;  %v3578_v19 = vrot.slane %v3565_v39, 4  ;;  %v3695_v26 = vrot.slane %v10167_v9, 4  ;;  %v13444_v63 = vrot.slane %v13388_v0, 6  ;;  %v13447_v39 = vld [vmem:[#allocation479_spill] sm:$0xff]  ;;  %v13449_v0 = vld [vmem:[#allocation305_spill] sm:$0xff] }
 0x6f6   :  { %4829 = vmax.xlane.f32.xlu1 %v4828_v6  ;;  %v3539_v6 = vsel %vm3245_vm11, %v3538_v33, %v9565_v48  ;;  %v2540_v41 = vrot.slane %v13445_v49, 4  ;;  %v2660_v18 = vrot.slane %v13446_v56, 7  ;;  %v13448_v33 = vld [vmem:[#allocation107_spill] sm:$0xff]  ;;  %v4849_v27 = vsel %vm4757_vm12, %v3543_v51, -inf }
 0x6f7   :  { %v2469_v31 = vsel %vm2100_vm6, %v2468_v40, %v2467_v43  ;;  %v2537_v62 = vsel %vm2097_vm5, %v13444_v63, %v2535_v3  ;;  %v10211_v43 = vpop.permute.xlu0 %2057  ;;  %v10214_v40 = vperm.slane %v3648_v52, %v8750_v24  ;;  %v2472_v58 = vrot.slane %v13448_v33, 3  ;;  %v13450_v33 = vld [vmem:[#allocation294_spill] sm:$0xff] }
 0x6f8   :  { %4826 = vmax.xlane.f32.xlu0 %v4825_v57  ;;  %v2471_v23 = vsel %vm2103_vm7, %v2470_v59, %v2469_v31  ;;  %v3602_v57 = vrot.slane %v13447_v39, 4  ;;  %v2538_v35 = vrot.slane %v13449_v0, 5  ;;  %v4837_v3 = vsel %vm4757_vm12, %v3539_v6, -inf }
 0x6f9   :  { %v3582_v63 = vrot.slane %v10197_v38, 4  ;;  %v2473_v31 = vsel %vm2106_vm8, %v2472_v58, %v2471_v23  ;;  %v2476_v52 = vrot.slane %v9467_v55, 1  ;;  %v3579_v49 = vsel %vm3245_vm11, 0.0, %v3578_v19  ;;  %v13451_v23 = vld [vmem:[#allocation311_spill] sm:$0xff] }
 0x6fa   :  { %v3696_v56 = vsel %vm3245_vm11, %v3695_v26, %v10214_v40  ;;  %v2539_v51 = vsel %vm2100_vm6, %v2538_v35, %v2537_v62  ;;  %v2474_v39 = vrot.slane %v9490_v4, 2  ;;  %v2662_v0 = vrot.slane %v13450_v33, 6  ;;  %v13452_v19 = vld [vmem:[#allocation343_spill] sm:$0xff]  ;;  %v13453_v62 = vld [vmem:[#allocation297_spill] sm:$0xff] }
 0x6fb   :  { %v2541_v58 = vsel %vm2103_vm7, %v2540_v41, %v2539_v51  ;;  %v2661_v55 = vsel %vm2094_vm4, %v2660_v18, %v13451_v23  ;;  %v3603_v59 = vsel %vm3245_vm11, %v3602_v57, %v13452_v19  ;;  %v4834_v35 = vsel %vm4761_vm13, %v3579_v49, -inf  ;;  %v13454_v33 = vld [vmem:[#allocation413_spill] sm:$0xff]  ;;  %v10249_v18 = vpop.permute.xlu1 %2065  ;;  %v13458_v23 = vld [vmem:[#allocation308_spill] sm:$0xff] }
 0x6fc   :  { %v2475_v26 = vsel %vm2109_vm9, %v2474_v39, %v2473_v31  ;;  %v3583_v4 = vsel %vm3245_vm11, 0.0, %v3582_v63  ;;  %v3596_v6 = vrot.slane %v13454_v33, 4  ;;  %13455 = vst [vmem:[#allocation76_spill] sm:$0xff] %v10249_v18  ;;  %v4427_v57 = vrot.slane %v9662_v53, 4  ;;  %v13457_v63 = vld [vmem:[#allocation307_spill] sm:$0xff]  ;;  %v10261_v33 = vpop.permute.xlu2 %2079  ;;  %v13461_v53 = vld [vmem:[#allocation314_spill] sm:$0xff] }
 0x6fd   :  { %4850 = vmax.xlane.f32.xlu2 %v4849_v27  ;;  %v3580_v27 = vrot.slane %v10131_v1, 4  ;;  %v10242_v1 = vperm.slane %v3696_v56, %v9255_v28  ;;  %v10247_v41 = vsel %vm2112_vm10, %v2476_v52, %v2475_v26  ;;  %v13456_v31 = vrot.slane %v13389_v13, 3  ;;  %v13459_v26 = vld [vmem:[#allocation313_spill] sm:$0xff]  ;;  %13460 = vst [vmem:[#allocation8_spill] sm:$0xff] %v10261_v33  ;;  %v13465_v33 = vld [vmem:[#allocation106_spill] sm:$0xff] }
 0x6fe   :  { %4838 = vmax.xlane.f32.xlu1 %v4837_v3  ;;  %v2668_v3 = vrot.slane %v13453_v62, 3  ;;  %v2546_v51 = vrot.slane %v13457_v63, 1  ;;  %v3607_v56 = vperm.slane %v3603_v59, %v8750_v24  ;;  %v2544_v19 = vrot.slane %v13458_v23, 2 }
 0x6ff   :  { %v2543_v49 = vsel %vm2106_vm8, %v13456_v31, %v2541_v58  ;;  %v3581_v39 = vsel %vm3245_vm11, 0.0, %v3580_v27  ;;  %v2663_v52 = vsel %vm2097_vm5, %v2662_v0, %v2661_v55  ;;  %v2666_v62 = vrot.slane %v13459_v26, 4  ;;  %v10266_v31 = vpop.permute.xlu0 %2063  ;;  %v13463_v55 = vld [vmem:[#allocation273_spill] sm:$0xff] }
 0x700   :  { %4835 = vmax.xlane.f32.xlu0 %v4834_v35  ;;  %v4858_v35 = vsel %vm4761_vm13, %v3583_v4, -inf  ;;  %v2664_v58 = vrot.slane %v13461_v53, 5  ;;  %13462 = vst [vmem:[#allocation137_spill] sm:$0xff] %v10266_v31  ;;  %v3719_v59 = vrot.slane %v10242_v1, 4  ;;  %v10271_v27 = vperm.slane %v10247_v41, %v8750_v24  ;;  %v13548_v31 = vld [vmem:[#allocation433_spill] sm:$0xff] }
 0x701   :  { %v2545_v0 = vsel %vm2109_vm9, %v2544_v19, %v2543_v49  ;;  %v3597_v63 = vsel %vm3245_vm11, %v3596_v6, %v13463_v55  ;;  %v13464_v4 = vrot.slane %v9565_v48, 4  ;;  %v4846_v53 = vsel %vm4761_vm13, %v3581_v39, -inf  ;;  %v13466_v6 = vld [vmem:[#allocation319_spill] sm:$0xff]  ;;  %v13467_v48 = vld [vmem:[#allocation370_spill] sm:$0xff] }
 0x702   :  { %v10282_v26 = vsel %vm2112_vm10, %v2546_v51, %v2545_v0  ;;  %v3614_v13 = vrot.slane %v3607_v56, 4  ;;  %v4428_v49 = vsel %vm3245_vm11, %v4427_v57, %v13465_v33  ;;  %v2786_v55 = vrot.slane %v13466_v6, 7  ;;  %v13469_v57 = vld [vmem:[#allocation303_spill] sm:$0xff]  ;;  %v13470_v0 = vld [vmem:[#allocation306_spill] sm:$0xff] }
 0x703   :  { %v3541_v23 = vsel %vm3245_vm11, %v10148_v11, %v13464_v4  ;;  %v2548_v32 = vrot.slane %v13467_v48, 7  ;;  %v2576_v11 = vrot.slane %v13468_v20, 7  ;;  %v3601_v39 = vperm.slane %v3597_v63, %v8750_v24  ;;  %v13474_v48 = vld [vmem:[#allocation317_spill] sm:$0xff]  ;;  %v10317_v33 = vpop.permute.xlu1 %2071 }
 0x704   :  { %v4843_v51 = vsel %vm4757_vm12, %v3541_v23, -inf  ;;  %v10297_v56 = vperm.slane %v10271_v27, %v9255_v28  ;;  %v10303_v20 = vperm.slane %v4428_v49, %v9255_v28  ;;  %v13472_v23 = vld [vmem:[#allocation316_spill] sm:$0xff]  ;;  %13477 = vst [vmem:[#allocation136_spill] sm:$0xff] %v10317_v33  ;;  %v13547_v33 = vld [vmem:[#allocation450_spill] sm:$0xff] }
 0x705   :  { %4859 = vmax.xlane.f32.xlu2 %v4858_v35  ;;  %v2665_v35 = vsel %vm2100_vm6, %v2664_v58, %v2663_v52  ;;  %v3720_v52 = vsel %vm3245_vm11, %v3719_v59, %v9629_v5  ;;  %v2788_v58 = vrot.slane %v13469_v57, 6  ;;  %v13473_v59 = vrot.slane %v9498_v15, 4 }
 0x706   :  { %4847 = vmax.xlane.f32.xlu1 %v4846_v53  ;;  %v2667_v19 = vsel %vm2103_vm7, %v2666_v62, %v2665_v35  ;;  %13471 = vst [vmem:[#allocation140_spill] sm:$0xff] %v10303_v20  ;;  %v2672_v53 = vrot.slane %v13472_v23, 1  ;;  %v3615_v6 = vsel %vm3245_vm11, %v3614_v13, %v3601_v39  ;;  %v2670_v57 = vrot.slane %v13474_v48, 2  ;;  %v13475_v62 = vld [vmem:[#allocation320_spill] sm:$0xff]  ;;  %v10327_v48 = vpop.permute.xlu2 %2085 }
 0x707   :  { %v2669_v63 = vsel %vm2106_vm8, %v2668_v3, %v2667_v19  ;;  %v3545_v35 = vsel %vm3245_vm11, %v10143_v54, %v13473_v59  ;;  %v2787_v4 = vsel %vm2094_vm4, %v2786_v55, %v13475_v62  ;;  %v4867_v3 = vsel %vm4757_vm12, %v3720_v52, -inf  ;;  %v13478_v19 = vld [vmem:[#allocation371_spill] sm:$0xff]  ;;  %v13479_v23 = vld [vmem:[#allocation440_spill] sm:$0xff]  ;;  %v13481_v55 = vld [vmem:[#allocation354_spill] sm:$0xff]  ;;  %13482 = vst [vmem:[#allocation134_spill] sm:$0xff] %v10327_v48 }
 0x708   :  { %4844 = vmax.xlane.f32.xlu0 %v4843_v51  ;;  %v13476_v51 = vld [vmem:[#allocation508_spill] sm:$0xff]  ;;  %v2549_v15 = vsel %vm2094_vm4, %v2548_v32, %v13478_v19  ;;  %v2562_v20 = vrot.slane %v13479_v23, 7  ;;  %v13480_v54 = vld [vmem:[#allocation491_spill] sm:$0xff]  ;;  %v3765_v13 = vrot.slane %v10297_v56, 4  ;;  %v2671_v39 = vsel %vm2109_vm9, %v2670_v57, %v2669_v63  ;;  %v13486_v48 = vld [vmem:[#allocation374_spill] sm:$0xff] }
 0x709   :  { %v2577_v49 = vsel %vm2094_vm4, %v2576_v11, %v13476_v51  ;;  %v2578_v59 = vrot.slane %v13480_v54, 6  ;;  %v2550_v62 = vrot.slane %v13481_v55, 6  ;;  %v4855_v11 = vsel %vm4757_vm12, %v3545_v35, -inf  ;;  %v10337_v54 = vpop.permute.xlu0 %2069  ;;  %v13485_v55 = vld [vmem:[#allocation511_spill] sm:$0xff] }
 0x70a   :  { %v3619_v52 = vperm.slane %v3615_v6, %v9255_v28  ;;  %v10332_v51 = vsel %vm2112_vm10, %v2672_v53, %v2671_v39  ;;  %v2789_v32 = vsel %vm2097_vm5, %v2788_v58, %v2787_v4  ;;  %13484 = vst [vmem:[#allocation156_spill] sm:$0xff] %v10337_v54  ;;  %v3661_v63 = vrot.slane %v10124_v42, 4  ;;  %v13487_v39 = vld [vmem:[#allocation441_spill] sm:$0xff] }
 0x70b   :  { %v2579_v19 = vsel %vm2097_vm5, %v2578_v59, %v2577_v49  ;;  %v2551_v57 = vsel %vm2097_vm5, %v2550_v62, %v2549_v15  ;;  %v2580_v35 = vrot.slane %v13485_v55, 5  ;;  %v3697_v6 = vrot.slane %v10214_v40, 4  ;;  %v13488_v59 = vld [vmem:[#allocation424_spill] sm:$0xff] }
 0x70c   :  { %v2552_v53 = vrot.slane %v13486_v48, 5  ;;  %v2563_v58 = vsel %vm2094_vm4, %v2562_v20, %v13487_v39  ;;  %v4852_v4 = vsel %vm4761_vm13, %v10197_v38, -inf  ;;  %v3766_v49 = vsel %vm3245_vm11, 0.0, %v3765_v13  ;;  %v13489_v48 = vld [vmem:[#allocation373_spill] sm:$0xff]  ;;  %v13491_v39 = vld [vmem:[#allocation494_spill] sm:$0xff] }
 0x70d   :  { %4868 = vmax.xlane.f32.xlu2 %v4867_v3  ;;  %v13483_v3 = vld [vmem:[#allocation510_spill] sm:$0xff]  ;;  %v2581_v42 = vsel %vm2100_vm6, %v2580_v35, %v2579_v19  ;;  %v3620_v15 = vrot.slane %v3619_v52, 4  ;;  %v3698_v62 = vsel %vm3245_vm11, %v10167_v9, %v3697_v6  ;;  %v13490_v20 = vrot.slane %v10183_v36, 4  ;;  %v13492_v35 = vld [vmem:[#allocation444_spill] sm:$0xff]  ;;  %v13493_v6 = vld [vmem:[#allocation443_spill] sm:$0xff] }
 0x70e   :  { %v2582_v23 = vrot.slane %v13483_v3, 4  ;;  %4856 = vmax.xlane.f32.xlu1 %v4855_v11  ;;  %v2564_v11 = vrot.slane %v13488_v59, 6  ;;  %v2553_v40 = vsel %vm2100_vm6, %v2552_v53, %v2551_v57  ;;  %v2554_v3 = vrot.slane %v13489_v48, 4  ;;  %v10373_v59 = vpop.permute.xlu1 %2077  ;;  %v13499_v48 = vld [vmem:[#allocation322_spill] sm:$0xff] }
 0x70f   :  { %v3650_v38 = vsel %vm3245_vm11, %v10134_v2, %v13490_v20  ;;  %v2584_v19 = vrot.slane %v13491_v39, 3  ;;  %v3662_v52 = vsel %vm3245_vm11, %v10098_v10, %v3661_v63  ;;  %v4876_v9 = vsel %vm4761_vm13, %v3766_v49, -inf  ;;  %13495 = vst [vmem:[#allocation163_spill] sm:$0xff] %v10373_v59  ;;  %v13498_v49 = vld [vmem:[#allocation112_spill] sm:$0xff]  ;;  %v13500_v39 = vld [vmem:[#allocation514_spill] sm:$0xff] }
 0x710   :  { %4853 = vmax.xlane.f32.xlu0 %v4852_v4  ;;  %v2583_v13 = vsel %vm2103_vm7, %v2582_v23, %v2581_v42  ;;  %v2565_v55 = vsel %vm2097_vm5, %v2564_v11, %v2563_v58  ;;  %v2566_v57 = vrot.slane %v13492_v35, 5  ;;  %v2568_v53 = vrot.slane %v13493_v6, 4  ;;  %v13494_v58 = vld [vmem:[#allocation513_spill] sm:$0xff]  ;;  %v13496_v11 = vld [vmem:[#allocation116_spill] sm:$0xff] }
 0x711   :  { %v3735_v36 = vrot.slane %v10247_v41, 4  ;;  %v10369_v2 = vperm.slane %v3698_v62, %v9255_v28  ;;  %v2585_v23 = vsel %vm2106_vm8, %v2584_v19, %v2583_v13  ;;  %v2588_v4 = vrot.slane %v13494_v58, 1  ;;  %v13501_v19 = vld [vmem:[#allocation323_spill] sm:$0xff]  ;;  %v13502_v35 = vld [vmem:[#allocation357_spill] sm:$0xff] }
 0x712   :  { %v13497_v10 = vperm.slane %v13496_v11, %v9255_v28  ;;  %v4864_v42 = vsel %vm4761_vm13, %v13498_v49, -inf  ;;  %v2792_v41 = vrot.slane %v13499_v48, 4  ;;  %v2555_v20 = vsel %vm2103_vm7, %v2554_v3, %v2553_v40  ;;  %v10389_v11 = vpop.permute.xlu2 %2091  ;;  %v10392_v49 = vpop.permute.xlu0 %2075 }
 0x713   :  { %v3670_v62 = vperm.slane %v3662_v52, %v8750_v24  ;;  %v2586_v13 = vrot.slane %v13500_v39, 2  ;;  %v2556_v6 = vrot.slane %v13502_v35, 3  ;;  %v3658_v58 = vperm.slane %v3650_v38, %v8750_v24  ;;  %13503 = vst [vmem:[#allocation147_spill] sm:$0xff] %v10389_v11  ;;  %v13508_v35 = vld [vmem:[#allocation376_spill] sm:$0xff] }
 0x714   :  { %v3621_v63 = vsel %vm3245_vm11, %v3620_v15, %v13497_v10  ;;  %v2567_v15 = vsel %vm2100_vm6, %v2566_v57, %v2565_v55  ;;  %13504 = vst [vmem:[#allocation151_spill] sm:$0xff] %v10392_v49  ;;  %v13505_v3 = vrot.slane %v9620_v61, 4  ;;  %v2594_v11 = vrot.slane %v9665_v21, 5  ;;  %v13525_v21 = vld [vmem:[#allocation119_spill] sm:$0xff] }
 0x715   :  { %4877 = vmax.xlane.f32.xlu2 %v4876_v9  ;;  %v2790_v9 = vrot.slane %v13501_v19, 5  ;;  %v2587_v10 = vsel %vm2109_vm9, %v2586_v13, %v2585_v23  ;;  %v4861_v40 = vsel %vm4757_vm12, %v3621_v63, -inf  ;;  %v2557_v38 = vsel %vm2106_vm8, %v2556_v6, %v2555_v20  ;;  %v13506_v23 = vld [vmem:[#allocation427_spill] sm:$0xff] }
 0x716   :  { %4865 = vmax.xlane.f32.xlu1 %v4864_v42  ;;  %v3726_v52 = vsel %vm3245_vm11, %v10369_v2, %v13505_v3  ;;  %v3736_v42 = vsel %vm3245_vm11, 0.0, %v3735_v36  ;;  %v2569_v55 = vsel %vm2103_vm7, %v2568_v53, %v2567_v15  ;;  %v10404_v57 = vsel %vm2112_vm10, %v2588_v4, %v2587_v10  ;;  %v13509_v4 = vld [vmem:[#allocation377_spill] sm:$0xff]  ;;  %v13510_v10 = vld [vmem:[#allocation446_spill] sm:$0xff]  ;;  %v13511_v3 = vld [vmem:[#allocation447_spill] sm:$0xff] }
 0x717   :  { %v2791_v48 = vsel %vm2100_vm6, %v2790_v9, %v2789_v32  ;;  %v2570_v39 = vrot.slane %v13506_v23, 3  ;;  %v3707_v63 = vrot.slane %v3670_v62, 4  ;;  %v13507_v13 = vrot.slane %v9629_v5, 4 }
 0x718   :  { %4862 = vmax.xlane.f32.xlu0 %v4861_v40  ;;  %v3745_v36 = vrot.slane %v10271_v27, 4  ;;  %v2560_v32 = vrot.slane %v13508_v35, 1  ;;  %v3709_v9 = vrot.slane %v3658_v58, 4  ;;  %v4885_v20 = vsel %vm4757_vm12, %v3726_v52, -inf  ;;  %v13512_v52 = vld [vmem:[#allocation328_spill] sm:$0xff] }
 0x719   :  { %v3722_v19 = vsel %vm3245_vm11, %v10242_v1, %v13507_v13  ;;  %v3744_v53 = vperm.slane %v3736_v42, %v8750_v24  ;;  %v2558_v6 = vrot.slane %v13509_v4, 2  ;;  %v2571_v15 = vsel %vm2106_vm8, %v2570_v39, %v2569_v55 }
 0x71a   :  { %v2574_v40 = vrot.slane %v13510_v10, 1  ;;  %v3848_v5 = vrot.slane %v10404_v57, 4  ;;  %v2793_v1 = vsel %vm2103_vm7, %v2792_v41, %v2791_v48  ;;  %v2572_v27 = vrot.slane %v13511_v3, 2 }
 0x71b   :  { %v4873_v23 = vsel %vm4757_vm12, %v3722_v19, -inf  ;;  %v3710_v13 = vsel %vm3245_vm11, %v3670_v62, %v3709_v9  ;;  %v2912_v35 = vrot.slane %v13512_v52, 7  ;;  %v2559_v42 = vsel %vm2109_vm9, %v2558_v6, %v2557_v38  ;;  %v13519_v52 = vld [vmem:[#allocation329_spill] sm:$0xff] }
 0x71c   :  { %v3746_v55 = vsel %vm3245_vm11, 0.0, %v3745_v36  ;;  %v3708_v39 = vsel %vm3245_vm11, %v3707_v63, %v3658_v58  ;;  %v10428_v4 = vsel %vm2112_vm10, %v2560_v32, %v2559_v42  ;;  %v2573_v41 = vsel %vm2109_vm9, %v2572_v27, %v2571_v15  ;;  %v13514_v15 = vld [vmem:[#allocation312_spill] sm:$0xff] }
 0x71d   :  { %4886 = vmax.xlane.f32.xlu2 %v4885_v20  ;;  %v2590_v48 = vrot.slane %v9539_v50, 7  ;;  %v10432_v20 = vpop.permute.xlu1 %2083  ;;  %v10437_v62 = vperm.slane %v3744_v53, %v9255_v28  ;;  %v10440_v38 = vsel %vm2112_vm10, %v2574_v40, %v2573_v41  ;;  %v3849_v58 = vsel %vm3245_vm11, %v3848_v5, %v10428_v4  ;;  %v13515_v5 = vld [vmem:[#allocation315_spill] sm:$0xff] }
 0x71e   :  { %4874 = vmax.xlane.f32.xlu1 %v4873_v23  ;;  %13513 = vst [vmem:[#allocation157_spill] sm:$0xff] %v10432_v20  ;;  %v4870_v63 = vsel %vm4761_vm13, %v10297_v56, -inf  ;;  %v10447_v36 = vperm.slane %v3710_v13, %v9255_v28  ;;  %v3723_v50 = vrot.slane %v10369_v2, 4  ;;  %v3754_v32 = vperm.slane %v3746_v55, %v9255_v28  ;;  %v10460_v23 = vpop.permute.xlu0 %2081  ;;  %v13518_v13 = vld [vmem:[#allocation326_spill] sm:$0xff] }
 0x71f   :  { %v10452_v9 = vperm.slane %v3708_v39, %v9255_v28  ;;  %v3755_v6 = vrot.slane %v3744_v53, 4  ;;  %v2914_v10 = vrot.slane %v13514_v15, 6  ;;  %v2920_v3 = vrot.slane %v13515_v5, 3  ;;  %13517 = vst [vmem:[#allocation135_spill] sm:$0xff] %v10460_v23 }
 0x720   :  { %v10434_v19 = vpop.xlane.xlu2 %4766  ;;  %4871 = vmax.xlane.f32.xlu0 %v4870_v63  ;;  %v13516_v56 = vrot.slane %v13470_v0, 3  ;;  %v2796_v2 = vrot.slane %v13518_v13, 2  ;;  %v2913_v42 = vsel %vm2094_vm4, %v2912_v35, %v13519_v52  ;;  %v2591_v53 = vsel %vm2094_vm4, %v2590_v48, %v9562_v22  ;;  %v13520_v0 = vld [vmem:[#allocation105_spill] sm:$0xff] }
 0x721   :  { %v4894_v55 = vsel %vm4761_vm13, %v10437_v62, -inf  ;;  %v3836_v39 = vrot.slane %v10440_v38, 4  ;;  %v10471_v41 = vperm.slane %v3849_v58, %v8750_v24  ;;  %v3731_v63 = vrot.slane %v10447_v36, 4 }
 0x722   :  { %v2795_v27 = vsel %vm2106_vm8, %v13516_v56, %v2793_v1  ;;  %v2592_v1 = vrot.slane %v13520_v0, 6  ;;  %v3724_v15 = vsel %vm3245_vm11, %v3723_v50, %v9620_v61  ;;  %v4882_v35 = vsel %vm4761_vm13, %v3754_v32, -inf  ;;  %v13521_v56 = vld [vmem:[#allocation325_spill] sm:$0xff]  ;;  %v13522_v0 = vld [vmem:[#allocation332_spill] sm:$0xff]  ;;  %v13523_v61 = vld [vmem:[#allocation331_spill] sm:$0xff] }
 0x723   :  { %v3727_v22 = vrot.slane %v10452_v9, 4  ;;  %v3756_v48 = vsel %vm3245_vm11, 0.0, %v3755_v6  ;;  %v2797_v5 = vsel %vm2109_vm9, %v2796_v2, %v2795_v27  ;;  %v2798_v13 = vrot.slane %v13521_v56, 1 }
 0x724   :  { %v2593_v58 = vsel %vm2097_vm5, %v2592_v1, %v2591_v53  ;;  %v2596_v52 = vrot.slane %v9634_v34, 4  ;;  %v2916_v40 = vrot.slane %v13522_v0, 5  ;;  %v2918_v50 = vrot.slane %v13523_v61, 4 }
 0x725   :  { %4895 = vmax.xlane.f32.xlu2 %v4894_v55  ;;  %v2915_v55 = vsel %vm2097_vm5, %v2914_v10, %v2913_v42  ;;  %v3837_v6 = vsel %vm3245_vm11, %v3836_v39, %v10282_v26  ;;  %v4879_v27 = vsel %vm4757_vm12, %v3724_v15, -inf  ;;  %v3732_v2 = vsel %vm3245_vm11, %v3731_v63, %v9598_v30  ;;  %v10499_v42 = vpop.permute.xlu1 %2089  ;;  %v13526_v63 = vld [vmem:[#allocation379_spill] sm:$0xff] }
 0x726   :  { %4883 = vmax.xlane.f32.xlu1 %v4882_v35  ;;  %v10496_v34 = vperm.slane %v3756_v48, %v9255_v28  ;;  %v2595_v10 = vsel %vm2100_vm6, %v2594_v11, %v2593_v58  ;;  %13524 = vst [vmem:[#allocation9_spill] sm:$0xff] %v10499_v42  ;;  %v3767_v53 = vrot.slane %v3754_v32, 4  ;;  %v3728_v1 = vsel %vm3245_vm11, %v3727_v22, %v13525_v21  ;;  %v13527_v58 = vld [vmem:[#allocation488_spill] sm:$0xff]  ;;  %v13528_v32 = vld [vmem:[#allocation138_spill] sm:$0xff] }
 0x727   :  { %v3884_v35 = vrot.slane %v10471_v41, 4  ;;  %v10505_v39 = vsel %vm2112_vm10, %v2798_v13, %v2797_v5  ;;  %v2917_v15 = vsel %vm2100_vm6, %v2916_v40, %v2915_v55  ;;  %v2674_v56 = vrot.slane %v13526_v63, 7  ;;  %v10518_v13 = vpop.permute.xlu0 %2087 }
 0x728   :  { %v10488_v23 = vpop.xlane.xlu2 %4769  ;;  %4880 = vmax.xlane.f32.xlu0 %v4879_v27  ;;  %v2597_v48 = vsel %vm2103_vm7, %v2596_v52, %v2595_v10  ;;  %v10511_v11 = vperm.slane %v3837_v6, %v8750_v24  ;;  %v3791_v0 = vrot.slane %v13527_v58, 4  ;;  %v2598_v61 = vrot.slane %v13528_v32, 3  ;;  %v13529_v27 = vld [vmem:[#allocation321_spill] sm:$0xff]  ;;  %13530 = vst [vmem:[#allocation152_spill] sm:$0xff] %v10518_v13  ;;  %v13531_v6 = vld [vmem:[#allocation123_spill] sm:$0xff]  ;;  %v13532_v32 = vld [vmem:[#allocation380_spill] sm:$0xff] }
 0x729   :  { %v4903_v22 = vsel %vm4757_vm12, %v3732_v2, -inf  ;;  %v2919_v5 = vsel %vm2103_vm7, %v2918_v50, %v2917_v15  ;;  %v4891_v40 = vsel %vm4757_vm12, %v3728_v1, -inf  ;;  %v3771_v52 = vrot.slane %v10496_v34, 4  ;;  %v13533_v15 = vld [vmem:[#allocation108_spill] sm:$0xff] }
 0x72a   :  { %v2599_v55 = vsel %vm2106_vm8, %v2598_v61, %v2597_v48  ;;  %v2602_v10 = vrot.slane %v13531_v6, 1  ;;  %v3768_v63 = vsel %vm3245_vm11, 0.0, %v3767_v53  ;;  %v3885_v2 = vsel %vm3245_vm11, %v3884_v35, %v10511_v11  ;;  %v13534_v48 = vld [vmem:[#allocation363_spill] sm:$0xff]  ;;  %v13535_v6 = vld [vmem:[#allocation421_spill] sm:$0xff] }
 0x72b   :  { %v2675_v50 = vsel %vm2094_vm4, %v2674_v56, %v13532_v32  ;;  %v2600_v42 = vrot.slane %v13533_v15, 2  ;;  %v3769_v1 = vrot.slane %v10437_v62, 4  ;;  %v2676_v61 = vrot.slane %v13534_v48, 6  ;;  %v13536_v53 = vld [vmem:[#allocation61_spill] sm:$0xff]  ;;  %v13537_v62 = vld [vmem:[#allocation335_spill] sm:$0xff] }
 0x72c   :  { %v3785_v13 = vrot.slane %v13535_v6, 4  ;;  %v3792_v20 = vsel %vm3245_vm11, %v3791_v0, %v13536_v53  ;;  %v4888_v56 = vsel %vm4761_vm13, %v3768_v63, -inf  ;;  %v3772_v32 = vsel %vm3245_vm11, 0.0, %v3771_v52  ;;  %v13540_v63 = vld [vmem:[#allocation449_spill] sm:$0xff]  ;;  %v13541_v15 = vld [vmem:[#allocation383_spill] sm:$0xff] }
 0x72d   :  { %4904 = vmax.xlane.f32.xlu2 %v4903_v22  ;;  %v2921_v22 = vsel %vm2106_vm8, %v2920_v3, %v2919_v5  ;;  %v2601_v58 = vsel %vm2109_vm9, %v2600_v42, %v2599_v55  ;;  %v2922_v3 = vrot.slane %v13537_v62, 2  ;;  %v13538_v5 = vld [vmem:[#allocation334_spill] sm:$0xff]  ;;  %v2677_v48 = vsel %vm2097_vm5, %v2676_v61, %v2675_v50 }
 0x72e   :  { %4892 = vmax.xlane.f32.xlu1 %v4891_v40  ;;  %v10543_v40 = vperm.slane %v3885_v2, %v9255_v28  ;;  %v10549_v6 = vsel %vm2112_vm10, %v2602_v10, %v2601_v58  ;;  %v10551_v0 = vpop.xlane.xlu1 %4763  ;;  %v13539_v42 = vld [vmem:[#allocation382_spill] sm:$0xff]  ;;  %v2688_v53 = vrot.slane %v13540_v63, 7  ;;  %v3796_v52 = vperm.slane %v3792_v20, %v8750_v24 }
 0x72f   :  { %v2680_v55 = vrot.slane %v13539_v42, 4  ;;  %v3770_v2 = vsel %vm3245_vm11, 0.0, %v3769_v1  ;;  %v10558_v62 = vsel %vm2109_vm9, %v2922_v3, %v2921_v22  ;;  %v2678_v49 = vrot.slane %v13541_v15, 5  ;;  %v13542_v58 = vld [vmem:[#allocation282_spill] sm:$0xff]  ;;  %v13544_v22 = vld [vmem:[#allocation337_spill] sm:$0xff] }
 0x730   :  { %v10537_v35 = vpop.xlane.xlu2 %4778  ;;  %4889 = vmax.xlane.f32.xlu0 %v4888_v56  ;;  %v5335_v50 = vlaneseq  ;;  %v4912_v10 = vsel %vm4761_vm13, %v3772_v32, -inf  ;;  %v3786_v61 = vsel %vm3245_vm11, %v3785_v13, %v13542_v58  ;;  %v13543_v56 = vld [vmem:[#allocation516_spill] sm:$0xff]  ;;  %v3908_v20 = vrot.slane %v10543_v40, 4  ;;  %v13546_v58 = vld [vmem:[#allocation366_spill] sm:$0xff] }
 0x731   :  { %v2702_v59 = vrot.slane %v13543_v56, 7  ;;  %v10570_v1 = vperm.slane %v10549_v6, %v8750_v24  ;;  %v2679_v15 = vsel %vm2100_vm6, %v2678_v49, %v2677_v48  ;;  %v13545_v32 = vrot.slane %v13525_v21, 4 }
 0x732   :  { %v4900_v63 = vsel %vm4761_vm13, %v3770_v2, -inf  ;;  %v2682_v56 = vrot.slane %v13546_v58, 3  ;;  %v2689_v54 = vsel %vm2094_vm4, %v2688_v53, %v13547_v33  ;;  %v3803_v12 = vrot.slane %v3796_v52, 4 }
 0x733   :  { %v10565_v42 = vpop.xlane.xlu0 %4759  ;;  %v3730_v13 = vsel %vm3245_vm11, %v10452_v9, %v13545_v32  ;;  %v3790_v3 = vperm.slane %v3786_v61, %v8750_v24  ;;  %v2690_v49 = vrot.slane %v13548_v31, 6  ;;  %v13549_v21 = vrot.slane %v10282_v26, 4  ;;  %v13550_v32 = vld [vmem:[#allocation517_spill] sm:$0xff] }
 0x734   :  { %v10589_v48 = vand.u32 127, %v5335_v50  ;;  %v3909_v33 = vsel %vm3245_vm11, %v3908_v20, %v9897_v14  ;;  %v10598_v53 = vperm.slane %v10570_v1, %v9255_v28  ;;  %v3850_v31 = vrot.slane %v10428_v4, 4 }
 0x735   :  { %4913 = vmax.xlane.f32.xlu2 %v4912_v10  ;;  %v2681_v10 = vsel %vm2103_vm7, %v2680_v55, %v2679_v15  ;;  %v3839_v9 = vsel %vm3245_vm11, %v10440_v38, %v13549_v21  ;;  %v2703_v55 = vsel %vm2094_vm4, %v2702_v59, %v13550_v32  ;;  %v4897_v15 = vsel %vm4757_vm12, %v3730_v13, -inf  ;;  %v13551_v38 = vld [vmem:[#allocation500_spill] sm:$0xff]  ;;  %v13552_v13 = vld [vmem:[#allocation453_spill] sm:$0xff]  ;;  %v13554_v21 = vld [vmem:[#allocation15_spill] sm:$0xff] }
 0x736   :  { %4901 = vmax.xlane.f32.xlu1 %v4900_v63  ;;  %v2691_v26 = vsel %vm2097_vm5, %v2690_v49, %v2689_v54  ;;  %v2704_v52 = vrot.slane %v13551_v38, 6  ;;  %v10604_v50 = vadd.s32 4294967288, %v10589_v48  ;;  %v4776_v59 = vpop.xlane.xlu1 %4775  ;;  %v10607_v61 = vsel %vm2106_vm8, %v2682_v56, %v2681_v10  ;;  %v13555_v10 = vld [vmem:[#allocation452_spill] sm:$0xff] }
 0x737   :  { %v2692_v20 = vrot.slane %v13552_v13, 5  ;;  %v13553_v63 = vrot.slane %v9598_v30, 4  ;;  %v3804_v4 = vsel %vm3245_vm11, %v3803_v12, %v3790_v3  ;;  %v10616_v54 = vperm.slane %v3839_v9, %v8750_v24  ;;  %v13556_v13 = vld [vmem:[#allocation11_spill] sm:$0xff] }
 0x738   :  { %v4788_v2 = vpop.xlane.xlu2 %4787  ;;  %4898 = vmax.xlane.f32.xlu0 %v4897_v15  ;;  %v2705_v49 = vsel %vm2097_vm5, %v2704_v52, %v2703_v55  ;;  %v2708_v32 = vrot.slane %v13554_v21, 4  ;;  %v4921_v15 = vsel %vm4757_vm12, %v3909_v33, -inf  ;;  %v2694_v38 = vrot.slane %v13555_v10, 4 }
 0x739   :  { %v3734_v58 = vsel %vm3245_vm11, %v10447_v36, %v13553_v63  ;;  %v2693_v56 = vsel %vm2100_vm6, %v2692_v20, %v2691_v26  ;;  %v2706_v30 = vrot.slane %v13556_v13, 5  ;;  %v3954_v36 = vrot.slane %v10598_v53, 4  ;;  %v13557_v20 = vld [vmem:[#allocation503_spill] sm:$0xff] }
 0x73a   :  { %v5343_v12 = vperm.slane %v10488_v23, %v10604_v50  ;;  %v5339_v3 = vperm.slane %v10551_v0, %v10604_v50  ;;  %v4909_v9 = vsel %vm4757_vm12, %v3734_v58, -inf  ;;  %v3808_v55 = vperm.slane %v3804_v4, %v9255_v28 }
 0x73b   :  { %v4773_v18 = vpop.xlane.xlu0 %4772  ;;  %v2707_v33 = vsel %vm2100_vm6, %v2706_v30, %v2705_v49  ;;  %v5346_v26 = vperm.slane %v4776_v59, %v10604_v50  ;;  %v3886_v52 = vrot.slane %v10511_v11, 4  ;;  %v2710_v63 = vrot.slane %v13557_v20, 3  ;;  %v13558_v30 = vld [vmem:[#allocation45_spill] sm:$0xff] }
 0x73c   :  { %v2709_v21 = vsel %vm2103_vm7, %v2708_v32, %v2707_v33  ;;  %v5342_v23 = vperm.slane %v10434_v19, %v10589_v48  ;;  %v5337_v0 = vperm.slane %v10565_v42, %v10589_v48  ;;  %v5345_v4 = vperm.slane %v4773_v18, %v10589_v48 }
 0x73d   :  { %4922 = vmax.xlane.f32.xlu2 %v4921_v15  ;;  %v4906_v59 = vsel %vm4761_vm13, %v10496_v34, -inf  ;;  %v5352_v49 = vperm.slane %v4788_v2, %v10604_v50  ;;  %v3955_v11 = vsel %vm3245_vm11, 0.0, %v3954_v36  ;;  %v3809_v19 = vrot.slane %v3808_v55, 4 }
 0x73e   :  { %4910 = vmax.xlane.f32.xlu1 %v4909_v9  ;;  %v5344_v15 = vsel %vm5340_vm14, %v5343_v12, %v5342_v23  ;;  %v5341_v32 = vsel %vm5340_vm14, %v5339_v3, %v5337_v0  ;;  %v4785_v10 = vpop.xlane.xlu1 %4784  ;;  %v3887_v42 = vsel %vm3245_vm11, %v10471_v41, %v3886_v52  ;;  %v3851_v18 = vsel %vm3245_vm11, %v10404_v57, %v3850_v31  ;;  %v13559_v12 = vld [vmem:[#allocation63_spill] sm:$0xff]  ;;  %v13563_v0 = vld [vmem:[#allocation385_spill] sm:$0xff] }
 0x73f   :  { %v2711_v13 = vsel %vm2106_vm8, %v2710_v63, %v2709_v21  ;;  %v5347_v34 = vsel %vm5340_vm14, %v5346_v26, %v5345_v4  ;;  %v5351_v2 = vperm.slane %v4785_v10, %v10589_v48  ;;  %v2712_v36 = vrot.slane %v13558_v30, 2  ;;  %v13560_v63 = vld [vmem:[#allocation24_spill] sm:$0xff]  ;;  %v13562_v23 = vld [vmem:[#allocation99_spill] sm:$0xff] }
 0x740   :  { %v10640_v58 = vpop.xlane.xlu2 %4796  ;;  %4907 = vmax.xlane.f32.xlu0 %v4906_v59  ;;  %v2714_v9 = vrot.slane %v13559_v12, 1  ;;  %v5348_v3 = vperm.slane %v10537_v35, %v10589_v48  ;;  %v4930_v55 = vsel %vm4761_vm13, %v3955_v11, -inf  ;;  %v3924_v41 = vrot.slane %v10549_v6, 4  ;;  %v13565_v10 = vld [vmem:[#allocation436_spill] sm:$0xff] }
 0x741   :  { %v5555_v33 = vsel %vm2094_vm4, %v5344_v15, %v5341_v32  ;;  %v5353_v31 = vsel %vm5340_vm14, %v5352_v49, %v5351_v2  ;;  %v10665_v26 = vperm.slane %v3887_v42, %v9255_v28  ;;  %v13561_v35 = vperm.slane %v13560_v63, %v9255_v28  ;;  %v13564_v15 = vld [vmem:[#allocation386_spill] sm:$0xff] }
 0x742   :  { %v5556_v52 = vsel %vm2097_vm5, %v5347_v34, %v5555_v33  ;;  %v4918_v6 = vsel %vm4761_vm13, %v13562_v23, -inf  ;;  %v2686_v4 = vrot.slane %v13563_v0, 1  ;;  %v2695_v59 = vsel %vm2103_vm7, %v2694_v38, %v2693_v56 }
 0x743   :  { %v4782_v57 = vpop.xlane.xlu0 %4781  ;;  %v3810_v21 = vsel %vm3245_vm11, %v3809_v19, %v13561_v35  ;;  %v3859_v49 = vperm.slane %v3851_v18, %v8750_v24  ;;  %v2713_v11 = vsel %vm2109_vm9, %v2712_v36, %v2711_v13  ;;  %v2684_v32 = vrot.slane %v13564_v15, 2  ;;  %v13569_v35 = vld [vmem:[#allocation456_spill] sm:$0xff] }
 0x744   :  { %v5349_v20 = vperm.slane %v4782_v57, %v10604_v50  ;;  %v2696_v42 = vrot.slane %v13565_v10, 3  ;;  %v10682_v34 = vsel %vm2112_vm10, %v2714_v9, %v2713_v11  ;;  %v4915_v12 = vsel %vm4757_vm12, %v3810_v21, -inf  ;;  %v13567_v9 = vld [vmem:[#allocation455_spill] sm:$0xff] }
 0x745   :  { %4931 = vmax.xlane.f32.xlu2 %v4930_v55  ;;  %v13566_v56 = vrot.slane %v9874_v45, 4  ;;  %v3925_v18 = vsel %vm3245_vm11, 0.0, %v3924_v41  ;;  %v3898_v13 = vrot.slane %v10616_v54, 4  ;;  %v2700_v55 = vrot.slane %v13567_v9, 1 }
 0x746   :  { %4919 = vmax.xlane.f32.xlu1 %v4918_v6  ;;  %v5350_v19 = vsel %vm5340_vm14, %v5349_v20, %v5348_v3  ;;  %v2697_v36 = vsel %vm2106_vm8, %v2696_v42, %v2695_v59  ;;  %v3896_v57 = vrot.slane %v3859_v49, 4  ;;  %v13568_v20 = vrot.slane %v9897_v14, 4  ;;  %v13571_v14 = vld [vmem:[#allocation33_spill] sm:$0xff] }
 0x747   :  { %v5557_v30 = vsel %vm2100_vm6, %v5350_v19, %v5556_v52  ;;  %v3915_v38 = vsel %vm3245_vm11, %v10665_v26, %v13566_v56  ;;  %v4037_v52 = vrot.slane %v10682_v34, 4  ;;  %v3934_v41 = vrot.slane %v10570_v1, 4 }
 0x748   :  { %v4806_v2 = vpop.xlane.xlu2 %4805  ;;  %4916 = vmax.xlane.f32.xlu0 %v4915_v12  ;;  %v5558_v3 = vsel %vm2103_vm7, %v5353_v31, %v5557_v30  ;;  %v3911_v63 = vsel %vm3245_vm11, %v10543_v40, %v13568_v20  ;;  %v2698_v21 = vrot.slane %v13569_v35, 2  ;;  %v4939_v6 = vsel %vm4757_vm12, %v3915_v38, -inf }
 0x749   :  { %v4794_v33 = vpop.xlane.xlu1 %4793  ;;  %v3933_v0 = vperm.slane %v3925_v18, %v8750_v24  ;;  %v13570_v31 = vrot.slane %v13538_v5, 1  ;;  %v13572_v11 = vrot.slane %v13544_v22, 7  ;;  %v2685_v1 = vsel %vm2109_vm9, %v2684_v32, %v10607_v61 }
 0x74a   :  { %v5355_v23 = vperm.slane %v4794_v33, %v10604_v50  ;;  %v3899_v10 = vsel %vm3245_vm11, %v3859_v49, %v3898_v13  ;;  %v10720_v42 = vsel %vm2112_vm10, %v2686_v4, %v2685_v1  ;;  %v2699_v5 = vsel %vm2109_vm9, %v2698_v21, %v2697_v36 }
 0x74b   :  { %v10710_v59 = vsel %vm2112_vm10, %v13570_v31, %v10558_v62  ;;  %v3039_v40 = vsel %vm2094_vm4, %v13572_v11, %v13571_v14  ;;  %v4791_v15 = vpop.xlane.xlu0 %4790  ;;  %v4927_v19 = vsel %vm4757_vm12, %v3911_v63, -inf  ;;  %v10726_v22 = vsel %vm2112_vm10, %v2700_v55, %v2699_v5  ;;  %v13578_v5 = vld [vmem:[#allocation389_spill] sm:$0xff] }
 0x74c   :  { %v5354_v62 = vperm.slane %v4791_v15, %v10589_v48  ;;  %v4038_v30 = vsel %vm3245_vm11, %v4037_v52, %v10720_v42  ;;  %v3935_v61 = vsel %vm3245_vm11, 0.0, %v3934_v41  ;;  %v3897_v49 = vsel %vm3245_vm11, %v3896_v57, %v10616_v54  ;;  %v13577_v15 = vld [vmem:[#allocation372_spill] sm:$0xff] }
 0x74d   :  { %4940 = vmax.xlane.f32.xlu2 %v4939_v6  ;;  %v2716_v4 = vrot.slane %v9761_v7, 7  ;;  %v10738_v56 = vperm.slane %v3933_v0, %v9255_v28  ;;  %v10741_v38 = vperm.slane %v3899_v10, %v9255_v28  ;;  %v4924_v18 = vsel %vm4761_vm13, %v10598_v53, -inf  ;;  %v13574_v53 = vld [vmem:[#allocation338_spill] sm:$0xff] }
 0x74e   :  { %4928 = vmax.xlane.f32.xlu1 %v4927_v19  ;;  %v5356_v32 = vsel %vm5340_vm14, %v5355_v23, %v5354_v62  ;;  %v3912_v36 = vrot.slane %v10665_v26, 4  ;;  %v5361_v54 = vperm.slane %v4806_v2, %v10604_v50  ;;  %v13573_v7 = vrot.slane %v13529_v27, 6  ;;  %v13576_v23 = vld [vmem:[#allocation130_spill] sm:$0xff] }
 0x74f   :  { %v5559_v13 = vsel %vm2106_vm8, %v5356_v32, %v5558_v3  ;;  %v3943_v33 = vperm.slane %v3935_v61, %v9255_v28  ;;  %v10755_v57 = vperm.slane %v3897_v49, %v9255_v28  ;;  %v3944_v52 = vrot.slane %v3933_v0, 4  ;;  %v13575_v3 = vld [vmem:[#allocation388_spill] sm:$0xff]  ;;  %v13579_v61 = vld [vmem:[#allocation141_spill] sm:$0xff] }
 0x750   :  { %v10735_v12 = vpop.xlane.xlu2 %4814  ;;  %v10751_v9 = vsel %vm2097_vm5, %v13573_v7, %v3039_v40  ;;  %4925 = vmax.xlane.f32.xlu0 %v4924_v18  ;;  %v2800_v63 = vrot.slane %v13575_v3, 7  ;;  %v4025_v26 = vrot.slane %v10726_v22, 4  ;;  %v10762_v27 = vperm.slane %v4038_v30, %v8750_v24 }
 0x751   :  { %v4803_v55 = vpop.xlane.xlu1 %4802  ;;  %v2717_v41 = vsel %vm2094_vm4, %v2716_v4, %v9779_v29  ;;  %v5357_v35 = vperm.slane %v10640_v58, %v10589_v48  ;;  %v4948_v21 = vsel %vm4761_vm13, %v10738_v56, -inf  ;;  %v2718_v6 = vrot.slane %v13576_v23, 6 }
 0x752   :  { %v5360_v2 = vperm.slane %v4803_v55, %v10589_v48  ;;  %v3913_v31 = vsel %vm3245_vm11, %v3912_v36, %v9874_v45  ;;  %v3920_v11 = vrot.slane %v10741_v38, 4  ;;  %v4936_v29 = vsel %vm4761_vm13, %v3943_v33, -inf }
 0x753   :  { %v4800_v0 = vpop.xlane.xlu0 %4799  ;;  %v3916_v58 = vrot.slane %v10755_v57, 4  ;;  %v3945_v1 = vsel %vm3245_vm11, 0.0, %v3944_v52  ;;  %v2802_v10 = vrot.slane %v13577_v15, 6  ;;  %v2801_v62 = vsel %vm2094_vm4, %v2800_v63, %v13578_v5 }
 0x754   :  { %v5362_v14 = vsel %vm5340_vm14, %v5361_v54, %v5360_v2  ;;  %v5358_v40 = vperm.slane %v4800_v0, %v10604_v50  ;;  %v2719_v45 = vsel %vm2097_vm5, %v2718_v6, %v2717_v41  ;;  %v2722_v19 = vrot.slane %v9831_v46, 4  ;;  %v13580_v54 = vld [vmem:[#allocation117_spill] sm:$0xff]  ;;  %v13581_v2 = vld [vmem:[#allocation127_spill] sm:$0xff] }
 0x755   :  { %4949 = vmax.xlane.f32.xlu2 %v4948_v21  ;;  %v4026_v30 = vsel %vm3245_vm11, %v4025_v26, %v10332_v51  ;;  %v2720_v49 = vrot.slane %v13579_v61, 5  ;;  %v4933_v32 = vsel %vm4757_vm12, %v3913_v31, -inf  ;;  %v3921_v7 = vsel %vm3245_vm11, %v3920_v11, %v13580_v54  ;;  %v13583_v0 = vld [vmem:[#allocation497_spill] sm:$0xff] }
 0x756   :  { %4937 = vmax.xlane.f32.xlu1 %v4936_v29  ;;  %v5359_v4 = vsel %vm5340_vm14, %v5358_v40, %v5357_v35  ;;  %v10793_v55 = vperm.slane %v3945_v1, %v9255_v28  ;;  %v4073_v46 = vrot.slane %v10762_v27, 4  ;;  %v3956_v63 = vrot.slane %v3943_v33, 4  ;;  %v13584_v11 = vld [vmem:[#allocation145_spill] sm:$0xff]  ;;  %v13585_v29 = vld [vmem:[#allocation391_spill] sm:$0xff] }
 0x757   :  { %v5560_v36 = vsel %vm2109_vm9, %v5359_v4, %v5559_v13  ;;  %v2721_v52 = vsel %vm2100_vm6, %v2720_v49, %v2719_v45  ;;  %v3917_v41 = vsel %vm3245_vm11, %v3916_v58, %v13581_v2  ;;  %v13582_v13 = vld [vmem:[#allocation339_spill] sm:$0xff]  ;;  %v2803_v21 = vsel %vm2097_vm5, %v2802_v10, %v2801_v62  ;;  %v13586_v45 = vld [vmem:[#allocation52_spill] sm:$0xff] }
 0x758   :  { %v4824_v18 = vpop.xlane.xlu2 %4823  ;;  %4934 = vmax.xlane.f32.xlu0 %v4933_v32  ;;  %v10798_v3 = vsel %vm2112_vm10, %v5362_v14, %v5560_v36  ;;  %v3042_v35 = vrot.slane %v13582_v13, 5  ;;  %v10805_v23 = vperm.slane %v4026_v30, %v8750_v24  ;;  %v2723_v6 = vsel %vm2103_vm7, %v2722_v19, %v2721_v52  ;;  %v13587_v49 = vld [vmem:[#allocation12_spill] sm:$0xff] }
 0x759   :  { %v4812_v26 = vpop.xlane.xlu1 %4811  ;;  %v3980_v31 = vrot.slane %v13583_v0, 4  ;;  %v2724_v40 = vrot.slane %v13584_v11, 3  ;;  %v4957_v33 = vsel %vm4757_vm12, %v3921_v7, -inf  ;;  %v2806_v1 = vrot.slane %v13585_v29, 4  ;;  %v13588_v32 = vld [vmem:[#allocation396_spill] sm:$0xff]  ;;  %v13589_v7 = vld [vmem:[#allocation146_spill] sm:$0xff] }
 0x75a   :  { %v5364_v14 = vperm.slane %v4812_v26, %v10604_v50  ;;  %v4945_v15 = vsel %vm4757_vm12, %v3917_v41, -inf  ;;  %v3960_v10 = vrot.slane %v10793_v55, 4  ;;  %v4074_v5 = vsel %vm3245_vm11, %v4073_v46, %v10805_v23  ;;  %v13590_v41 = vld [vmem:[#allocation430_spill] sm:$0xff]  ;;  %v13591_v46 = vld [vmem:[#allocation360_spill] sm:$0xff] }
 0x75b   :  { %v4809_v58 = vpop.xlane.xlu0 %4808  ;;  %v2725_v62 = vsel %vm2106_vm8, %v2724_v40, %v2723_v6  ;;  %v2728_v19 = vrot.slane %v13586_v45, 1  ;;  %v3957_v61 = vsel %vm3245_vm11, 0.0, %v3956_v63  ;;  %v2804_v4 = vrot.slane %v13587_v49, 5 }
 0x75c   :  { %v5363_v30 = vperm.slane %v4809_v58, %v10589_v48  ;;  %v2926_v36 = vrot.slane %v13588_v32, 7  ;;  %v2726_v52 = vrot.slane %v13589_v7, 2  ;;  %v3958_v26 = vrot.slane %v10738_v56, 4  ;;  %v13595_v7 = vld [vmem:[#allocation291_spill] sm:$0xff] }
 0x75d   :  { %4958 = vmax.xlane.f32.xlu2 %v4957_v33  ;;  %v3974_v13 = vrot.slane %v13590_v41, 4  ;;  %v3981_v6 = vsel %vm3245_vm11, %v3980_v31, %v13591_v46  ;;  %v10834_v63 = vperm.slane %v4074_v5, %v9255_v28  ;;  %v4942_v33 = vsel %vm4761_vm13, %v3957_v61, -inf  ;;  %v13592_v31 = vld [vmem:[#allocation375_spill] sm:$0xff] }
 0x75e   :  { %4946 = vmax.xlane.f32.xlu1 %v4945_v15  ;;  %v10829_v0 = vsel %vm5340_vm14, %v5364_v14, %v5363_v30  ;;  %v2727_v40 = vsel %vm2109_vm9, %v2726_v52, %v2725_v62  ;;  %v5370_v29 = vperm.slane %v4824_v18, %v10604_v50  ;;  %v3961_v56 = vsel %vm3245_vm11, 0.0, %v3960_v10  ;;  %v13593_v15 = vld [vmem:[#allocation381_spill] sm:$0xff] }
 0x75f   :  { %v10842_v58 = vsel %vm2100_vm6, %v3042_v35, %v10751_v9  ;;  %v2808_v14 = vrot.slane %v13592_v31, 3  ;;  %v2928_v45 = vrot.slane %v13593_v15, 6  ;;  %v10847_v30 = vsel %vm2112_vm10, %v2728_v19, %v2727_v40  ;;  %v13594_v35 = vld [vmem:[#allocation397_spill] sm:$0xff] }
 0x760   :  { %v10831_v11 = vpop.xlane.xlu2 %4832  ;;  %4943 = vmax.xlane.f32.xlu0 %v4942_v33  ;;  %v2805_v62 = vsel %vm2100_vm6, %v2804_v4, %v2803_v21  ;;  %v3985_v61 = vperm.slane %v3981_v6, %v8750_v24  ;;  %v3959_v10 = vsel %vm3245_vm11, 0.0, %v3958_v26  ;;  %v2927_v49 = vsel %vm2094_vm4, %v2926_v36, %v13594_v35  ;;  %v13596_v26 = vld [vmem:[#allocation384_spill] sm:$0xff]  ;;  %v13598_v33 = vld [vmem:[#allocation394_spill] sm:$0xff] }
 0x761   :  { %v4821_v5 = vpop.xlane.xlu1 %4820  ;;  %v2807_v9 = vsel %vm2103_vm7, %v2806_v1, %v2805_v62  ;;  %v5366_v32 = vperm.slane %v10735_v12, %v10589_v48  ;;  %v4966_v19 = vsel %vm4761_vm13, %v3961_v56, -inf  ;;  %v3975_v52 = vsel %vm3245_vm11, %v3974_v13, %v13595_v7 }
 0x762   :  { %v5369_v18 = vperm.slane %v4821_v5, %v10589_v48  ;;  %v4097_v41 = vrot.slane %v10834_v63, 4  ;;  %v10865_v1 = vperm.slane %v10847_v30, %v8750_v24  ;;  %v2934_v36 = vrot.slane %v13596_v26, 3  ;;  %v13599_v5 = vld [vmem:[#allocation458_spill] sm:$0xff]  ;;  %v13630_v26 = vld [vmem:[#allocation405_spill] sm:$0xff] }
 0x763   :  { %v4818_v21 = vpop.xlane.xlu0 %4817  ;;  %v13597_v12 = vrot.slane %v13581_v2, 4  ;;  %v4954_v13 = vsel %vm4761_vm13, %v3959_v10, -inf  ;;  %v2809_v40 = vsel %vm2106_vm8, %v2808_v14, %v2807_v9  ;;  %v2929_v56 = vsel %vm2097_vm5, %v2928_v45, %v2927_v49  ;;  %v13601_v14 = vld [vmem:[#allocation132_spill] sm:$0xff]  ;;  %v13602_v49 = vld [vmem:[#allocation390_spill] sm:$0xff] }
 0x764   :  { %v5371_v4 = vsel %vm5340_vm14, %v5370_v29, %v5369_v18  ;;  %v5367_v46 = vperm.slane %v4818_v21, %v10604_v50  ;;  %v2810_v29 = vrot.slane %v13598_v33, 2  ;;  %v3992_v31 = vrot.slane %v3985_v61, 4  ;;  %v13600_v18 = vld [vmem:[#allocation73_spill] sm:$0xff] }
 0x765   :  { %4967 = vmax.xlane.f32.xlu2 %v4966_v19  ;;  %v3919_v6 = vsel %vm3245_vm11, %v10755_v57, %v13597_v12  ;;  %v3979_v15 = vperm.slane %v3975_v52, %v8750_v24  ;;  %v2814_v62 = vrot.slane %v13599_v5, 7  ;;  %v2828_v35 = vrot.slane %v13600_v18, 7  ;;  %v13603_v52 = vld [vmem:[#allocation393_spill] sm:$0xff]  ;;  %v13604_v12 = vld [vmem:[#allocation400_spill] sm:$0xff]  ;;  %v13607_v18 = vld [vmem:[#allocation459_spill] sm:$0xff] }
 0x766   :  { %4955 = vmax.xlane.f32.xlu1 %v4954_v13  ;;  %v5368_v2 = vsel %vm5340_vm14, %v5367_v46, %v5366_v32  ;;  %v4951_v57 = vsel %vm4757_vm12, %v3919_v6, -inf  ;;  %v4098_v9 = vsel %vm3245_vm11, %v4097_v41, %v13601_v14  ;;  %v10887_v45 = vperm.slane %v10865_v1, %v9255_v28 }
 0x767   :  { %v5562_v10 = vsel %vm2094_vm4, %v5371_v4, %v5368_v2  ;;  %v4039_v61 = vrot.slane %v10720_v42, 4  ;;  %v3054_v7 = vrot.slane %v13602_v49, 6  ;;  %v2812_v21 = vrot.slane %v13603_v52, 1  ;;  %v13605_v4 = vld [vmem:[#allocation399_spill] sm:$0xff] }
 0x768   :  { %v4842_v19 = vpop.xlane.xlu2 %4841  ;;  %v2930_v32 = vrot.slane %v13604_v12, 5  ;;  %4952 = vmax.xlane.f32.xlu0 %v4951_v57  ;;  %v2811_v6 = vsel %vm2109_vm9, %v2810_v29, %v2809_v40  ;;  %v2932_v13 = vrot.slane %v13605_v4, 4  ;;  %v13606_v41 = vrot.slane %v13580_v54, 4  ;;  %v13608_v12 = vld [vmem:[#allocation442_spill] sm:$0xff]  ;;  %v13610_v4 = vld [vmem:[#allocation13_spill] sm:$0xff] }
 0x769   :  { %v4830_v46 = vpop.xlane.xlu1 %4829  ;;  %v3993_v5 = vsel %vm3245_vm11, %v3992_v31, %v3979_v15  ;;  %v2815_v2 = vsel %vm2094_vm4, %v2814_v62, %v13607_v18  ;;  %v4975_v57 = vsel %vm4757_vm12, %v4098_v9, -inf  ;;  %v2816_v40 = vrot.slane %v13608_v12, 6  ;;  %v13611_v15 = vld [vmem:[#allocation509_spill] sm:$0xff] }
 0x76a   :  { %v3923_v33 = vsel %vm3245_vm11, %v10741_v38, %v13606_v41  ;;  %v2931_v42 = vsel %vm2100_vm6, %v2930_v32, %v2929_v56  ;;  %v5373_v52 = vperm.slane %v4830_v46, %v10604_v50  ;;  %v13609_v29 = vrot.slane %v10332_v51, 4  ;;  %v13612_v41 = vld [vmem:[#allocation462_spill] sm:$0xff] }
 0x76b   :  { %v2829_v38 = vsel %vm2094_vm4, %v2828_v35, %v13610_v4  ;;  %v4827_v31 = vpop.xlane.xlu0 %4826  ;;  %v4143_v56 = vrot.slane %v10887_v45, 4  ;;  %v2830_v62 = vrot.slane %v13611_v15, 6  ;;  %v4963_v9 = vsel %vm4757_vm12, %v3923_v33, -inf  ;;  %v13615_v15 = vld [vmem:[#allocation19_spill] sm:$0xff] }
 0x76c   :  { %v4028_v54 = vsel %vm3245_vm11, %v10726_v22, %v13609_v29  ;;  %v5372_v32 = vperm.slane %v4827_v31, %v10589_v48  ;;  %v3997_v46 = vperm.slane %v3993_v5, %v9255_v28  ;;  %v2817_v51 = vsel %vm2097_vm5, %v2816_v40, %v2815_v2  ;;  %v13613_v22 = vld [vmem:[#allocation461_spill] sm:$0xff]  ;;  %v13614_v29 = vld [vmem:[#allocation20_spill] sm:$0xff] }
 0x76d   :  { %4976 = vmax.xlane.f32.xlu2 %v4975_v57  ;;  %v2818_v18 = vrot.slane %v13612_v41, 5  ;;  %v2820_v12 = vrot.slane %v13613_v22, 4  ;;  %v4075_v35 = vrot.slane %v10805_v23, 4  ;;  %v2831_v57 = vsel %vm2097_vm5, %v2830_v62, %v2829_v38  ;;  %v13616_v23 = vld [vmem:[#allocation445_spill] sm:$0xff] }
 0x76e   :  { %4964 = vmax.xlane.f32.xlu1 %v4963_v9  ;;  %v2832_v4 = vrot.slane %v13614_v29, 5  ;;  %v2834_v20 = vrot.slane %v13615_v15, 4  ;;  %v5374_v31 = vsel %vm5340_vm14, %v5373_v52, %v5372_v32  ;;  %v4960_v5 = vsel %vm4761_vm13, %v10793_v55, -inf  ;;  %v13617_v15 = vld [vmem:[#allocation512_spill] sm:$0xff] }
 0x76f   :  { %v5563_v2 = vsel %vm2097_vm5, %v5374_v31, %v5562_v10  ;;  %v5379_v40 = vperm.slane %v4842_v19, %v10604_v50  ;;  %v4144_v9 = vsel %vm3245_vm11, 0.0, %v4143_v56  ;;  %v2822_v41 = vrot.slane %v13616_v23, 3 }
 0x770   :  { %v10925_v33 = vpop.xlane.xlu2 %4850  ;;  %v4036_v38 = vperm.slane %v4028_v54, %v8750_v24  ;;  %4961 = vmax.xlane.f32.xlu0 %v4960_v5  ;;  %v3998_v62 = vrot.slane %v3997_v46, 4  ;;  %v4076_v52 = vsel %vm3245_vm11, %v10762_v27, %v4075_v35  ;;  %v2819_v32 = vsel %vm2100_vm6, %v2818_v18, %v2817_v51  ;;  %v13618_v35 = vld [vmem:[#allocation14_spill] sm:$0xff] }
 0x771   :  { %v4839_v22 = vpop.xlane.xlu1 %4838  ;;  %v4040_v55 = vsel %vm3245_vm11, %v10682_v34, %v4039_v61  ;;  %v2833_v10 = vsel %vm2100_vm6, %v2832_v4, %v2831_v57  ;;  %v2821_v56 = vsel %vm2103_vm7, %v2820_v12, %v2819_v32  ;;  %v5375_v54 = vperm.slane %v10831_v11, %v10589_v48  ;;  %v13620_v4 = vld [vmem:[#allocation118_spill] sm:$0xff] }
 0x772   :  { %v5378_v19 = vperm.slane %v4839_v22, %v10589_v48  ;;  %v2835_v29 = vsel %vm2103_vm7, %v2834_v20, %v2833_v10  ;;  %v4984_v46 = vsel %vm4761_vm13, %v4144_v9, -inf  ;;  %v2836_v27 = vrot.slane %v13617_v15, 3  ;;  %v13621_v9 = vld [vmem:[#allocation16_spill] sm:$0xff]  ;;  %v13622_v32 = vld [vmem:[#allocation70_spill] sm:$0xff] }
 0x773   :  { %v4113_v51 = vrot.slane %v10847_v30, 4  ;;  %v4836_v18 = vpop.xlane.xlu0 %4835  ;;  %v10950_v61 = vperm.slane %v4076_v52, %v9255_v28  ;;  %v4048_v12 = vperm.slane %v4040_v55, %v8750_v24  ;;  %v13619_v11 = vperm.slane %v13618_v35, %v9255_v28 }
 0x774   :  { %v5380_v34 = vsel %vm5340_vm14, %v5379_v40, %v5378_v19  ;;  %v5376_v20 = vperm.slane %v4836_v18, %v10604_v50  ;;  %v4972_v31 = vsel %vm4761_vm13, %v13620_v4, -inf  ;;  %v10961_v30 = vsel %vm2112_vm10, %v2812_v21, %v2811_v6  ;;  %v13623_v6 = vld [vmem:[#allocation29_spill] sm:$0xff]  ;;  %v13626_v18 = vld [vmem:[#allocation464_spill] sm:$0xff] }
 0x775   :  { %4985 = vmax.xlane.f32.xlu2 %v4984_v46  ;;  %v3999_v57 = vsel %vm3245_vm11, %v3998_v62, %v13619_v11  ;;  %v2933_v5 = vsel %vm2103_vm7, %v2932_v13, %v2931_v42  ;;  %v2837_v40 = vsel %vm2106_vm8, %v2836_v27, %v2835_v29  ;;  %v2840_v23 = vrot.slane %v13621_v9, 1  ;;  %v13625_v29 = vld [vmem:[#allocation463_spill] sm:$0xff] }
 0x776   :  { %4973 = vmax.xlane.f32.xlu1 %v4972_v31  ;;  %v4087_v22 = vrot.slane %v4036_v38, 4  ;;  %v2823_v52 = vsel %vm2106_vm8, %v2822_v41, %v2821_v56  ;;  %v2838_v55 = vrot.slane %v13622_v32, 2  ;;  %v5377_v62 = vsel %vm5340_vm14, %v5376_v20, %v5375_v54 }
 0x777   :  { %v5564_v19 = vsel %vm2100_vm6, %v5377_v62, %v5563_v2  ;;  %v4969_v21 = vsel %vm4757_vm12, %v3999_v57, -inf  ;;  %v13624_v46 = vrot.slane %v13623_v6, 4  ;;  %v4114_v42 = vsel %vm3245_vm11, 0.0, %v4113_v51  ;;  %v13628_v57 = vld [vmem:[#allocation392_spill] sm:$0xff] }
 0x778   :  { %v4860_v10 = vpop.xlane.xlu2 %4859  ;;  %v2826_v15 = vrot.slane %v13625_v29, 1  ;;  %v4085_v27 = vrot.slane %v4048_v12, 4  ;;  %v2839_v41 = vsel %vm2109_vm9, %v2838_v55, %v2837_v40  ;;  %4970 = vmax.xlane.f32.xlu0 %v4969_v21  ;;  %v5565_v56 = vsel %vm2103_vm7, %v5380_v34, %v5564_v19  ;;  %v13629_v21 = vld [vmem:[#allocation402_spill] sm:$0xff] }
 0x779   :  { %v4104_v13 = vsel %vm3245_vm11, %v10950_v61, %v13624_v46  ;;  %v4848_v54 = vpop.xlane.xlu1 %4847  ;;  %v2824_v2 = vrot.slane %v13626_v18, 2  ;;  %v10981_v20 = vsel %vm2112_vm10, %v2840_v23, %v2839_v41  ;;  %v13627_v35 = vrot.slane %v13601_v14, 4 }
 0x77a   :  { %v4123_v51 = vrot.slane %v10865_v1, 4  ;;  %v3060_v4 = vrot.slane %v13628_v57, 3  ;;  %v5382_v31 = vperm.slane %v4848_v54, %v10604_v50  ;;  %v4993_v40 = vsel %vm4757_vm12, %v4104_v13, -inf }
 0x77b   :  { %v4100_v11 = vsel %vm3245_vm11, %v10834_v63, %v13627_v35  ;;  %v4122_v34 = vperm.slane %v4114_v42, %v8750_v24  ;;  %v4228_v9 = vrot.slane %v10961_v30, 4  ;;  %v10996_v23 = vsel %vm2106_vm8, %v2934_v36, %v2933_v5  ;;  %v4845_v63 = vpop.xlane.xlu0 %4844 }
 0x77c   :  { %v2825_v14 = vsel %vm2109_vm9, %v2824_v2, %v2823_v52  ;;  %v4088_v1 = vsel %vm3245_vm11, %v4048_v12, %v4087_v22  ;;  %v4226_v32 = vrot.slane %v10981_v20, 4  ;;  %v5381_v55 = vperm.slane %v4845_v63, %v10589_v48  ;;  %v13631_v52 = vld [vmem:[#allocation154_spill] sm:$0xff]  ;;  %v13634_v63 = vld [vmem:[#allocation149_spill] sm:$0xff] }
 0x77d   :  { %4994 = vmax.xlane.f32.xlu2 %v4993_v40  ;;  %v4981_v62 = vsel %vm4757_vm12, %v4100_v11, -inf  ;;  %v4086_v19 = vsel %vm3245_vm11, %v4085_v27, %v4036_v38  ;;  %v2938_v46 = vrot.slane %v13629_v21, 1  ;;  %v3052_v13 = vrot.slane %v13630_v26, 7 }
 0x77e   :  { %v11007_v36 = vsel %vm2112_vm10, %v2826_v15, %v2825_v14  ;;  %4982 = vmax.xlane.f32.xlu1 %v4981_v62  ;;  %v4124_v5 = vsel %vm3245_vm11, 0.0, %v4123_v51  ;;  %v2842_v12 = vrot.slane %v13631_v52, 7  ;;  %v5383_v22 = vsel %vm5340_vm14, %v5382_v31, %v5381_v55  ;;  %v13632_v31 = vld [vmem:[#allocation403_spill] sm:$0xff] }
 0x77f   :  { %v11015_v29 = vperm.slane %v4122_v34, %v9255_v28  ;;  %v11018_v38 = vperm.slane %v4088_v1, %v9255_v28  ;;  %v4978_v27 = vsel %vm4761_vm13, %v10887_v45, -inf  ;;  %v5566_v15 = vsel %vm2106_vm8, %v5383_v22, %v5565_v56  ;;  %v13633_v45 = vld [vmem:[#allocation406_spill] sm:$0xff]  ;;  %v13635_v62 = vld [vmem:[#allocation131_spill] sm:$0xff] }
 0x780   :  { %v11012_v42 = vpop.xlane.xlu2 %4868  ;;  %v5388_v41 = vperm.slane %v4860_v10, %v10604_v50  ;;  %v11025_v54 = vperm.slane %v4086_v19, %v9255_v28  ;;  %v4227_v18 = vsel %vm3245_vm11, %v4226_v32, %v10961_v30  ;;  %4979 = vmax.xlane.f32.xlu0 %v4978_v27  ;;  %v4101_v2 = vrot.slane %v10950_v61, 4 }
 0x781   :  { %v4857_v35 = vpop.xlane.xlu1 %4856  ;;  %v4132_v11 = vperm.slane %v4124_v5, %v9255_v28  ;;  %v4133_v51 = vrot.slane %v4122_v34, 4  ;;  %v2936_v40 = vrot.slane %v13632_v31, 2  ;;  %v3053_v56 = vsel %vm2094_vm4, %v3052_v13, %v13633_v45  ;;  %v13648_v31 = vld [vmem:[#allocation469_spill] sm:$0xff] }
 0x782   :  { %v4214_v10 = vrot.slane %v11007_v36, 4  ;;  %v5387_v14 = vperm.slane %v4857_v35, %v10589_v48  ;;  %v2843_v1 = vsel %vm2094_vm4, %v2842_v12, %v13634_v63  ;;  %v5384_v32 = vperm.slane %v10925_v33, %v10589_v48 }
 0x783   :  { %v5002_v61 = vsel %vm4761_vm13, %v11015_v29, -inf  ;;  %v4109_v34 = vrot.slane %v11018_v38, 4  ;;  %v11044_v55 = vperm.slane %v4227_v18, %v8750_v24  ;;  %v2844_v19 = vrot.slane %v13635_v62, 6  ;;  %v4854_v26 = vpop.xlane.xlu0 %4853  ;;  %v13636_v18 = vld [vmem:[#allocation408_spill] sm:$0xff]  ;;  %v13638_v62 = vld [vmem:[#allocation37_spill] sm:$0xff] }
 0x784   :  { %v5389_v13 = vsel %vm5340_vm14, %v5388_v41, %v5387_v14  ;;  %v4105_v5 = vrot.slane %v11025_v54, 4  ;;  %v5385_v52 = vperm.slane %v4854_v26, %v10604_v50  ;;  %v4102_v33 = vsel %vm3245_vm11, %v4101_v2, %v13623_v6 }
 0x785   :  { %5003 = vmax.xlane.f32.xlu2 %v5002_v61  ;;  %v4990_v12 = vsel %vm4761_vm13, %v4132_v11, -inf  ;;  %v4134_v22 = vsel %vm3245_vm11, 0.0, %v4133_v51  ;;  %v3055_v27 = vsel %vm2097_vm5, %v3054_v7, %v3053_v56  ;;  %v3058_v35 = vrot.slane %v13636_v18, 4  ;;  %v13637_v51 = vld [vmem:[#allocation133_spill] sm:$0xff] }
 0x786   :  { %v2845_v41 = vsel %vm2097_vm5, %v2844_v19, %v2843_v1  ;;  %v2848_v45 = vrot.slane %v10056_v25, 4  ;;  %4991 = vmax.xlane.f32.xlu1 %v4990_v12  ;;  %v4215_v14 = vsel %vm3245_vm11, %v4214_v10, %v10505_v39  ;;  %v2846_v6 = vrot.slane %v10081_v47, 5  ;;  %v13639_v19 = vld [vmem:[#allocation409_spill] sm:$0xff] }
 0x787   :  { %v5386_v2 = vsel %vm5340_vm14, %v5385_v52, %v5384_v32  ;;  %v4110_v49 = vsel %vm3245_vm11, %v4109_v34, %v13637_v51  ;;  %v4987_v56 = vsel %vm4757_vm12, %v4102_v33, -inf  ;;  %v11069_v1 = vperm.slane %v4134_v22, %v9255_v28  ;;  %v13640_v52 = vld [vmem:[#allocation466_spill] sm:$0xff] }
 0x788   :  { %v4878_v63 = vpop.xlane.xlu2 %4877  ;;  %v5567_v7 = vsel %vm2109_vm9, %v5386_v2, %v5566_v15  ;;  %v4262_v25 = vrot.slane %v11044_v55, 4  ;;  %v2847_v61 = vsel %vm2100_vm6, %v2846_v6, %v2845_v41  ;;  %4988 = vmax.xlane.f32.xlu0 %v4987_v56  ;;  %v4145_v10 = vrot.slane %v4132_v11, 4  ;;  %v13641_v22 = vld [vmem:[#allocation506_spill] sm:$0xff] }
 0x789   :  { %v11074_v47 = vsel %vm2112_vm10, %v5389_v13, %v5567_v7  ;;  %v4866_v32 = vpop.xlane.xlu1 %4865  ;;  %v4106_v34 = vsel %vm3245_vm11, %v4105_v5, %v13638_v62  ;;  %v3056_v15 = vrot.slane %v13639_v19, 5  ;;  %v11080_v26 = vperm.slane %v4215_v14, %v8750_v24  ;;  %v13642_v41 = vld [vmem:[#allocation126_spill] sm:$0xff] }
 0x78a   :  { %v2940_v33 = vrot.slane %v13640_v52, 7  ;;  %v2849_v12 = vsel %vm2103_vm7, %v2848_v45, %v2847_v61  ;;  %v4169_v18 = vrot.slane %v13641_v22, 4  ;;  %v2850_v6 = vrot.slane %v13642_v41, 3  ;;  %v13645_v41 = vld [vmem:[#allocation451_spill] sm:$0xff] }
 0x78b   :  { %v5391_v13 = vperm.slane %v4866_v32, %v10604_v50  ;;  %v5011_v11 = vsel %vm4757_vm12, %v4110_v49, -inf  ;;  %v3057_v2 = vsel %vm2100_vm6, %v3056_v15, %v3055_v27  ;;  %v4863_v5 = vpop.xlane.xlu0 %4862  ;;  %v4999_v7 = vsel %vm4757_vm12, %v4106_v34, -inf  ;;  %v13643_v49 = vld [vmem:[#allocation439_spill] sm:$0xff]  ;;  %v13644_v27 = vld [vmem:[#allocation25_spill] sm:$0xff] }
 0x78c   :  { %v4149_v14 = vrot.slane %v11069_v1, 4  ;;  %v4263_v56 = vsel %vm3245_vm11, %v4262_v25, %v11080_v26  ;;  %v2851_v45 = vsel %vm2106_vm8, %v2850_v6, %v2849_v12  ;;  %v2854_v61 = vrot.slane %v10115_v17, 1 }
 0x78d   :  { %5012 = vmax.xlane.f32.xlu2 %v5011_v11  ;;  %v5390_v19 = vperm.slane %v4863_v5, %v10589_v48  ;;  %v4146_v32 = vsel %vm3245_vm11, 0.0, %v4145_v10  ;;  %v4163_v52 = vrot.slane %v13643_v49, 4  ;;  %v2941_v15 = vsel %vm2094_vm4, %v2940_v33, %v13644_v27  ;;  %v13646_v11 = vld [vmem:[#allocation369_spill] sm:$0xff] }
 0x78e   :  { %v2852_v34 = vrot.slane %v10138_v16, 2  ;;  %5000 = vmax.xlane.f32.xlu1 %v4999_v7  ;;  %v4147_v22 = vrot.slane %v11015_v29, 4  ;;  %v2942_v25 = vrot.slane %v13645_v41, 6  ;;  %v4170_v12 = vsel %vm3245_vm11, %v4169_v18, %v13646_v11 }
 0x78f   :  { %v11106_v17 = vsel %vm5340_vm14, %v5391_v13, %v5390_v19  ;;  %v11111_v10 = vperm.slane %v4263_v56, %v9255_v28  ;;  %v4996_v16 = vsel %vm4761_vm13, %v4146_v32, -inf  ;;  %v5397_v5 = vperm.slane %v4878_v63, %v10604_v50  ;;  %v13647_v19 = vld [vmem:[#allocation468_spill] sm:$0xff] }
 0x790   :  { %v11108_v6 = vpop.xlane.xlu2 %4886  ;;  %v2853_v33 = vsel %vm2109_vm9, %v2852_v34, %v2851_v45  ;;  %v4150_v29 = vsel %vm3245_vm11, 0.0, %v4149_v14  ;;  %v2937_v18 = vsel %vm2109_vm9, %v2936_v40, %v10996_v23  ;;  %v3059_v13 = vsel %vm2103_vm7, %v3058_v35, %v3057_v2  ;;  %4997 = vmax.xlane.f32.xlu0 %v4996_v16  ;;  %v13649_v23 = vld [vmem:[#allocation17_spill] sm:$0xff] }
 0x791   :  { %v2943_v7 = vsel %vm2097_vm5, %v2942_v25, %v2941_v15  ;;  %v11124_v56 = vsel %vm2112_vm10, %v2854_v61, %v2853_v33  ;;  %v4875_v45 = vpop.xlane.xlu1 %4874  ;;  %v2946_v32 = vrot.slane %v13647_v19, 4  ;;  %v4174_v63 = vperm.slane %v4170_v12, %v8750_v24  ;;  %v13650_v61 = vld [vmem:[#allocation300_spill] sm:$0xff] }
 0x792   :  { %v5396_v14 = vperm.slane %v4875_v45, %v10589_v48  ;;  %v4148_v49 = vsel %vm3245_vm11, 0.0, %v4147_v22  ;;  %v2944_v27 = vrot.slane %v13648_v31, 5  ;;  %v2954_v40 = vrot.slane %v13649_v23, 7  ;;  %v13652_v45 = vld [vmem:[#allocation454_spill] sm:$0xff] }
 0x793   :  { %v5393_v35 = vperm.slane %v11012_v42, %v10589_v48  ;;  %v5020_v2 = vsel %vm4761_vm13, %v4150_v29, -inf  ;;  %v4164_v15 = vsel %vm3245_vm11, %v4163_v52, %v13650_v61  ;;  %v4872_v34 = vpop.xlane.xlu0 %4871  ;;  %v4286_v25 = vrot.slane %v11111_v10, 4  ;;  %v13656_v23 = vld [vmem:[#allocation518_spill] sm:$0xff] }
 0x794   :  { %v5398_v41 = vsel %vm5340_vm14, %v5397_v5, %v5396_v14  ;;  %v11141_v22 = vperm.slane %v11124_v56, %v8750_v24  ;;  %v2945_v11 = vsel %vm2100_vm6, %v2944_v27, %v2943_v7  ;;  %v5394_v12 = vperm.slane %v4872_v34, %v10604_v50 }
 0x795   :  { %5021 = vmax.xlane.f32.xlu2 %v5020_v2  ;;  %v13651_v42 = vrot.slane %v13638_v62, 4  ;;  %v5008_v52 = vsel %vm4761_vm13, %v4148_v49, -inf  ;;  %v11153_v16 = vsel %vm2112_vm10, %v2938_v46, %v2937_v18  ;;  %v3061_v5 = vsel %vm2106_vm8, %v3060_v4, %v3059_v13  ;;  %v13654_v13 = vld [vmem:[#allocation412_spill] sm:$0xff]  ;;  %v13657_v2 = vld [vmem:[#allocation471_spill] sm:$0xff] }
 0x796   :  { %v2947_v29 = vsel %vm2103_vm7, %v2946_v32, %v2945_v11  ;;  %v4181_v7 = vrot.slane %v4174_v63, 4  ;;  %5009 = vmax.xlane.f32.xlu1 %v5008_v52  ;;  %v4168_v62 = vperm.slane %v4164_v15, %v8750_v24  ;;  %v2948_v19 = vrot.slane %v13652_v45, 3  ;;  %v13655_v63 = vld [vmem:[#allocation411_spill] sm:$0xff]  ;;  %v13658_v15 = vld [vmem:[#allocation470_spill] sm:$0xff] }
 0x797   :  { %v4108_v33 = vsel %vm3245_vm11, %v11025_v54, %v13651_v42  ;;  %v13653_v54 = vld [vmem:[#allocation47_spill] sm:$0xff]  ;;  %v5395_v21 = vsel %vm5340_vm14, %v5394_v12, %v5393_v35  ;;  %v4287_v4 = vsel %vm3245_vm11, %v4286_v25, %v10180_v60  ;;  %v11170_v18 = vperm.slane %v11141_v22, %v9255_v28  ;;  %v13660_v42 = vld [vmem:[#allocation48_spill] sm:$0xff] }
 0x798   :  { %v2955_v14 = vsel %vm2094_vm4, %v2954_v40, %v13653_v54  ;;  %v4896_v49 = vpop.xlane.xlu2 %4895  ;;  %v5005_v46 = vsel %vm4757_vm12, %v4108_v33, -inf  ;;  %v5569_v57 = vsel %vm2094_vm4, %v5398_v41, %v5395_v21  ;;  %v3062_v32 = vrot.slane %v13654_v13, 2  ;;  %v13662_v21 = vld [vmem:[#allocation84_spill] sm:$0xff] }
 0x799   :  { %v3064_v31 = vrot.slane %v13655_v63, 1  ;;  %v2949_v27 = vsel %vm2106_vm8, %v2948_v19, %v2947_v29  ;;  %v2956_v40 = vrot.slane %v13656_v23, 6  ;;  %5006 = vmax.xlane.f32.xlu0 %v5005_v46  ;;  %v4884_v35 = vpop.xlane.xlu1 %4883  ;;  %v2950_v61 = vrot.slane %v13657_v2, 2  ;;  %v13661_v19 = vld [vmem:[#allocation448_spill] sm:$0xff] }
 0x79a   :  { %v2952_v34 = vrot.slane %v13658_v15, 1  ;;  %v13659_v41 = vrot.slane %v13637_v51, 4  ;;  %v4182_v11 = vsel %vm3245_vm11, %v4181_v7, %v4168_v62  ;;  %v2960_v33 = vrot.slane %v13660_v42, 4 }
 0x79b   :  { %v2957_v12 = vsel %vm2097_vm5, %v2956_v40, %v2955_v14  ;;  %v5400_v52 = vperm.slane %v4884_v35, %v10604_v50  ;;  %v5029_v29 = vsel %vm4757_vm12, %v4287_v4, -inf  ;;  %v11188_v45 = vsel %vm2109_vm9, %v3062_v32, %v3061_v5  ;;  %v4881_v46 = vpop.xlane.xlu0 %4880  ;;  %v13663_v4 = vld [vmem:[#allocation460_spill] sm:$0xff] }
 0x79c   :  { %v4112_v25 = vsel %vm3245_vm11, %v11018_v38, %v13659_v41  ;;  %v4352_v54 = vrot.slane %v13661_v19, 4  ;;  %v2958_v51 = vrot.slane %v13662_v21, 5  ;;  %v4332_v38 = vrot.slane %v11170_v18, 4 }
 0x79d   :  { %5030 = vmax.xlane.f32.xlu2 %v5029_v29  ;;  %v2951_v7 = vsel %vm2109_vm9, %v2950_v61, %v2949_v27  ;;  %v5399_v62 = vperm.slane %v4881_v46, %v10589_v48  ;;  %v5017_v14 = vsel %vm4757_vm12, %v4112_v25, -inf  ;;  %v4186_v13 = vperm.slane %v4182_v11, %v9255_v28  ;;  %v13667_v29 = vld [vmem:[#allocation54_spill] sm:$0xff] }
 0x79e   :  { %v3068_v23 = vrot.slane %v13663_v4, 6  ;;  %v13664_v5 = vrot.slane %v10505_v39, 4  ;;  %v11203_v40 = vsel %vm2112_vm10, %v2952_v34, %v2951_v7  ;;  %v2959_v35 = vsel %vm2100_vm6, %v2958_v51, %v2957_v12  ;;  %5018 = vmax.xlane.f32.xlu1 %v5017_v14  ;;  %v13669_v4 = vld [vmem:[#allocation18_spill] sm:$0xff] }
 0x79f   :  { %v4229_v27 = vsel %vm3245_vm11, %v10981_v20, %v4228_v9  ;;  %v2961_v2 = vsel %vm2103_vm7, %v2960_v33, %v2959_v35  ;;  %v5401_v61 = vsel %vm5340_vm14, %v5400_v52, %v5399_v62  ;;  %v4264_v39 = vrot.slane %v11080_v26, 4  ;;  %v13665_v20 = vld [vmem:[#allocation22_spill] sm:$0xff]  ;;  %v13666_v33 = vld [vmem:[#allocation472_spill] sm:$0xff]  ;;  %v13670_v35 = vld [vmem:[#allocation125_spill] sm:$0xff] }
 0x7a0   :  { %v4217_v32 = vsel %vm3245_vm11, %v11007_v36, %v13664_v5  ;;  %v11212_v15 = vpop.xlane.xlu2 %4904  ;;  %v5014_v36 = vsel %vm4761_vm13, %v11069_v1, -inf  ;;  %v5570_v34 = vsel %vm2097_vm5, %v5401_v61, %v5569_v57  ;;  %v5406_v41 = vperm.slane %v4896_v49, %v10604_v50 }
 0x7a1   :  { %v4333_v30 = vsel %vm3245_vm11, 0.0, %v4332_v38  ;;  %v4225_v25 = vperm.slane %v4217_v32, %v8750_v24  ;;  %v2962_v9 = vrot.slane %v13665_v20, 3  ;;  %5015 = vmax.xlane.f32.xlu0 %v5014_v36  ;;  %v4187_v11 = vrot.slane %v4186_v13, 4  ;;  %v4893_v12 = vpop.xlane.xlu1 %4892  ;;  %v13668_v38 = vld [vmem:[#allocation69_spill] sm:$0xff] }
 0x7a2   :  { %v4265_v42 = vsel %vm3245_vm11, %v11044_v55, %v4264_v39  ;;  %v4403_v26 = vrot.slane %v11203_v40, 4  ;;  %v3066_v1 = vrot.slane %v13666_v33, 7  ;;  %v4237_v57 = vperm.slane %v4229_v27, %v8750_v24  ;;  %v13673_v36 = vld [vmem:[#allocation473_spill] sm:$0xff] }
 0x7a3   :  { %v5405_v49 = vperm.slane %v4893_v12, %v10589_v48  ;;  %v2963_v52 = vsel %vm2106_vm8, %v2962_v9, %v2961_v2  ;;  %v2966_v21 = vrot.slane %v13667_v29, 1  ;;  %v5402_v51 = vperm.slane %v11108_v6, %v10589_v48  ;;  %v4890_v62 = vpop.xlane.xlu0 %4889  ;;  %v13672_v2 = vld [vmem:[#allocation114_spill] sm:$0xff] }
 0x7a4   :  { %v5038_v46 = vsel %vm4761_vm13, %v4333_v30, -inf  ;;  %v2964_v7 = vrot.slane %v13668_v38, 2  ;;  %v4302_v55 = vrot.slane %v11124_v56, 4  ;;  %v11237_v13 = vperm.slane %v4265_v42, %v9255_v28  ;;  %v13674_v12 = vld [vmem:[#allocation10_spill] sm:$0xff]  ;;  %v13676_v38 = vld [vmem:[#allocation476_spill] sm:$0xff] }
 0x7a5   :  { %v5407_v14 = vsel %vm5340_vm14, %v5406_v41, %v5405_v49  ;;  %5039 = vmax.xlane.f32.xlu2 %v5038_v46  ;;  %v3074_v5 = vrot.slane %v13669_v4, 3  ;;  %v5403_v32 = vperm.slane %v4890_v62, %v10604_v50  ;;  %v13671_v6 = vperm.slane %v13670_v35, %v9255_v28  ;;  %v13677_v62 = vld [vmem:[#allocation515_spill] sm:$0xff] }
 0x7a6   :  { %v5026_v61 = vsel %vm4761_vm13, %v13672_v2, -inf  ;;  %v4276_v56 = vrot.slane %v4225_v25, 4  ;;  %v4404_v39 = vsel %vm3245_vm11, %v4403_v26, %v10710_v59  ;;  %v3067_v41 = vsel %vm2094_vm4, %v3066_v1, %v13673_v36  ;;  %v13679_v36 = vld [vmem:[#allocation475_spill] sm:$0xff] }
 0x7a7   :  { %v4188_v27 = vsel %vm3245_vm11, %v4187_v11, %v13671_v6  ;;  %v2965_v30 = vsel %vm2109_vm9, %v2964_v7, %v2963_v52  ;;  %5027 = vmax.xlane.f32.xlu1 %v5026_v61  ;;  %v4274_v20 = vrot.slane %v4237_v57, 4  ;;  %v3080_v42 = vrot.slane %v13674_v12, 7 }
 0x7a8   :  { %v11253_v9 = vsel %vm2112_vm10, %v2966_v21, %v2965_v30  ;;  %v5404_v11 = vsel %vm5340_vm14, %v5403_v32, %v5402_v51  ;;  %v11257_v33 = vpop.xlane.xlu2 %4913  ;;  %v5023_v26 = vsel %vm4757_vm12, %v4188_v27, -inf  ;;  %v13675_v29 = vrot.slane %v10024_v44, 4  ;;  %v13680_v30 = vld [vmem:[#allocation60_spill] sm:$0xff] }
 0x7a9   :  { %v5571_v49 = vsel %vm2100_vm6, %v5404_v11, %v5570_v34  ;;  %v4303_v52 = vsel %vm3245_vm11, 0.0, %v4302_v55  ;;  %v11267_v21 = vperm.slane %v4404_v39, %v8750_v24  ;;  %v3069_v46 = vsel %vm2097_vm5, %v3068_v23, %v3067_v41  ;;  %5024 = vmax.xlane.f32.xlu0 %v5023_v26  ;;  %v4902_v34 = vpop.xlane.xlu1 %4901 }
 0x7aa   :  { %v4293_v1 = vsel %vm3245_vm11, %v11237_v13, %v13675_v29  ;;  %v3070_v51 = vrot.slane %v13676_v38, 5  ;;  %v5572_v7 = vsel %vm2103_vm7, %v5407_v14, %v5571_v49  ;;  %v4358_v32 = vrot.slane %v13677_v62, 4 }
 0x7ab   :  { %v4415_v35 = vrot.slane %v11253_v9, 4  ;;  %v13678_v6 = vrot.slane %v10180_v60, 4  ;;  %v4312_v27 = vrot.slane %v11141_v22, 4  ;;  %v5409_v2 = vperm.slane %v4902_v34, %v10604_v50  ;;  %v4899_v12 = vpop.xlane.xlu0 %4898  ;;  %v13681_v22 = vld [vmem:[#allocation42_spill] sm:$0xff] }
 0x7ac   :  { %v5047_v23 = vsel %vm4757_vm12, %v4293_v1, -inf  ;;  %v4311_v61 = vperm.slane %v4303_v52, %v8750_v24  ;;  %v4277_v14 = vsel %vm3245_vm11, %v4237_v57, %v4276_v56  ;;  %v11284_v39 = vsel %vm2100_vm6, %v3070_v51, %v3069_v46  ;;  %v13682_v56 = vld [vmem:[#allocation378_spill] sm:$0xff] }
 0x7ad   :  { %v4289_v55 = vsel %vm3245_vm11, %v11111_v10, %v13678_v6  ;;  %v3072_v41 = vrot.slane %v13679_v36, 4  ;;  %v3081_v60 = vsel %vm2094_vm4, %v3080_v42, %v13680_v30  ;;  %5048 = vmax.xlane.f32.xlu2 %v5047_v23  ;;  %v4275_v10 = vsel %vm3245_vm11, %v4274_v20, %v4225_v25 }
 0x7ae   :  { %v3082_v11 = vrot.slane %v13681_v22, 6  ;;  %v2968_v49 = vrot.slane %v10188_v8, 7  ;;  %v5408_v26 = vperm.slane %v4899_v12, %v10589_v48  ;;  %v5035_v57 = vsel %vm4757_vm12, %v4289_v55, -inf }
 0x7af   :  { %v11296_v29 = vsel %vm3245_vm11, %v4358_v32, %v13682_v56  ;;  %v4416_v1 = vsel %vm3245_vm11, %v4415_v35, %v11153_v16  ;;  %5036 = vmax.xlane.f32.xlu1 %v5035_v57  ;;  %v4313_v42 = vsel %vm3245_vm11, 0.0, %v4312_v27  ;;  %v11302_v25 = vperm.slane %v4277_v14, %v9255_v28  ;;  %v13683_v35 = vld [vmem:[#allocation58_spill] sm:$0xff] }
 0x7b0   :  { %v3083_v20 = vsel %vm2097_vm5, %v3082_v11, %v3081_v60  ;;  %v5410_v8 = vsel %vm5340_vm14, %v5409_v2, %v5408_v26  ;;  %v11306_v52 = vpop.xlane.xlu2 %4922  ;;  %v11309_v46 = vperm.slane %v4311_v61, %v9255_v28  ;;  %v11312_v38 = vperm.slane %v4275_v10, %v9255_v28  ;;  %v13684_v14 = vld [vmem:[#allocation78_spill] sm:$0xff] }
 0x7b1   :  { %v5032_v51 = vsel %vm4761_vm13, %v11170_v18, -inf  ;;  %v5573_v34 = vsel %vm2106_vm8, %v5410_v8, %v5572_v7  ;;  %v4290_v62 = vrot.slane %v11237_v13, 4  ;;  %v5415_v32 = vperm.slane %v11257_v33, %v10604_v50  ;;  %v4911_v27 = vpop.xlane.xlu1 %4910  ;;  %v13687_v8 = vld [vmem:[#allocation137_spill] sm:$0xff] }
 0x7b2   :  { %v3086_v6 = vrot.slane %v13683_v35, 4  ;;  %v2969_v55 = vsel %vm2094_vm4, %v2968_v49, %v10211_v43  ;;  %5033 = vmax.xlane.f32.xlu0 %v5032_v51  ;;  %v4321_v2 = vperm.slane %v4313_v42, %v9255_v28  ;;  %v4322_v23 = vrot.slane %v4311_v61, 4  ;;  %v13685_v49 = vld [vmem:[#allocation76_spill] sm:$0xff]  ;;  %v13688_v35 = vld [vmem:[#allocation129_spill] sm:$0xff] }
 0x7b3   :  { %v3084_v30 = vrot.slane %v13684_v14, 5  ;;  %v2970_v18 = vrot.slane %v10067_v37, 6  ;;  %v5414_v7 = vperm.slane %v4911_v27, %v10589_v48  ;;  %v4298_v13 = vrot.slane %v11302_v25, 4  ;;  %v4908_v37 = vpop.xlane.xlu0 %4907 }
 0x7b4   :  { %v11329_v33 = vperm.slane %v4416_v1, %v8750_v24  ;;  %v5411_v60 = vperm.slane %v11212_v15, %v10589_v48  ;;  %v5056_v43 = vsel %vm4761_vm13, %v11309_v46, -inf  ;;  %v4294_v12 = vrot.slane %v11312_v38, 4  ;;  %v13686_v1 = vld [vmem:[#allocation51_spill] sm:$0xff] }
 0x7b5   :  { %v3085_v61 = vsel %vm2100_vm6, %v3084_v30, %v3083_v20  ;;  %v2971_v10 = vsel %vm2097_vm5, %v2970_v18, %v2969_v55  ;;  %v4291_v22 = vsel %vm3245_vm11, %v4290_v62, %v10024_v44  ;;  %v5416_v11 = vsel %vm5340_vm14, %v5415_v32, %v5414_v7  ;;  %5057 = vmax.xlane.f32.xlu2 %v5056_v43  ;;  %v13689_v55 = vld [vmem:[#allocation142_spill] sm:$0xff] }
 0x7b6   :  { %v2974_v26 = vrot.slane %v13685_v49, 4  ;;  %v5412_v15 = vperm.slane %v4908_v37, %v10604_v50  ;;  %v5044_v57 = vsel %vm4761_vm13, %v4321_v2, -inf  ;;  %v4323_v56 = vsel %vm3245_vm11, 0.0, %v4322_v23  ;;  %v13690_v37 = vld [vmem:[#allocation90_spill] sm:$0xff] }
 0x7b7   :  { %v3088_v42 = vrot.slane %v13686_v1, 3  ;;  %v3087_v20 = vsel %vm2103_vm7, %v3086_v6, %v3085_v61  ;;  %v2972_v51 = vrot.slane %v13687_v8, 5  ;;  %5045 = vmax.xlane.f32.xlu1 %v5044_v57  ;;  %v4299_v44 = vsel %vm3245_vm11, %v4298_v13, %v13688_v35  ;;  %v13691_v49 = vld [vmem:[#allocation162_spill] sm:$0xff] }
 0x7b8   :  { %v5413_v62 = vsel %vm5340_vm14, %v5412_v15, %v5411_v60  ;;  %v5041_v32 = vsel %vm4757_vm12, %v4291_v22, -inf  ;;  %v4295_v27 = vsel %vm3245_vm11, %v4294_v12, %v13689_v55  ;;  %v4932_v14 = vpop.xlane.xlu2 %4931  ;;  %v4451_v23 = vrot.slane %v11329_v33, 4 }
 0x7b9   :  { %v2973_v30 = vsel %vm2100_vm6, %v2972_v51, %v2971_v10  ;;  %v5629_v6 = vrot.slane %v10798_v3, 4  ;;  %v5574_v18 = vsel %vm2109_vm9, %v5413_v62, %v5573_v34  ;;  %v11359_v7 = vperm.slane %v4323_v56, %v9255_v28  ;;  %v4920_v61 = vpop.xlane.xlu1 %4919  ;;  %v13692_v34 = vld [vmem:[#allocation68_spill] sm:$0xff] }
 0x7ba   :  { %v3089_v13 = vsel %vm2106_vm8, %v3088_v42, %v3087_v20  ;;  %v2975_v60 = vsel %vm2103_vm7, %v2974_v26, %v2973_v30  ;;  %5042 = vmax.xlane.f32.xlu0 %v5041_v32  ;;  %v5575_v43 = vsel %vm2112_vm10, %v5416_v11, %v5574_v18  ;;  %v4334_v12 = vrot.slane %v4321_v2, 4  ;;  %v13693_v62 = vld [vmem:[#allocation156_spill] sm:$0xff] }
 0x7bb   :  { %v3092_v22 = vrot.slane %v13690_v37, 1  ;;  %v2976_v10 = vrot.slane %v13691_v49, 3  ;;  %v5627_v15 = vrot.slane %v5575_v43, 4  ;;  %v11367_v57 = vsel %vm3245_vm11, %v5575_v43, %v5629_v6  ;;  %v4917_v20 = vpop.xlane.xlu0 %4916  ;;  %v13694_v30 = vld [vmem:[#allocation136_spill] sm:$0xff] }
 0x7bc   :  { %v3090_v56 = vrot.slane %v13692_v34, 2  ;;  %v5418_v1 = vperm.slane %v4920_v61, %v10604_v50  ;;  %v5053_v42 = vsel %vm4757_vm12, %v4295_v27, -inf  ;;  %v5065_v26 = vsel %vm4757_vm12, %v4299_v44, -inf }
 0x7bd   :  { %v2977_v11 = vsel %vm2106_vm8, %v2976_v10, %v2975_v60  ;;  %v11376_v2 = vsel %vm3245_vm11, %v5627_v15, %v10798_v3  ;;  %5066 = vmax.xlane.f32.xlu2 %v5065_v26  ;;  %v4338_v8 = vrot.slane %v11359_v7, 4  ;;  %v4452_v51 = vsel %vm3245_vm11, %v4451_v23, %v11267_v21  ;;  %v13696_v10 = vld [vmem:[#allocation477_spill] sm:$0xff] }
 0x7be   :  { %v2978_v32 = vrot.slane %v13693_v62, 2  ;;  %v2980_v6 = vrot.slane %v13694_v30, 1  ;;  %v5417_v27 = vperm.slane %v4917_v20, %v10589_v48  ;;  %v4335_v44 = vsel %vm3245_vm11, 0.0, %v4334_v12 }
 0x7bf   :  { %v3073_v3 = vsel %vm2103_vm7, %v3072_v41, %v11284_v39  ;;  %v4363_v18 = vperm.slane %v11296_v29, %v8750_v24  ;;  %v3091_v60 = vsel %vm2109_vm9, %v3090_v56, %v3089_v13  ;;  %5054 = vmax.xlane.f32.xlu1 %v5053_v42  ;;  %v4336_v23 = vrot.slane %v11309_v46, 4  ;;  %v13695_v46 = vld [vmem:[#allocation309_spill] sm:$0xff] }
 0x7c0   :  { %v11394_v43 = vsel %vm2112_vm10, %v3092_v22, %v3091_v60  ;;  %v2979_v61 = vsel %vm2109_vm9, %v2978_v32, %v2977_v11  ;;  %v5419_v12 = vsel %vm5340_vm14, %v5418_v1, %v5417_v27  ;;  %v11398_v37 = vpop.xlane.xlu2 %4940  ;;  %v11401_v36 = vperm.slane %v4452_v51, %v9255_v28  ;;  %v13697_v1 = vld [vmem:[#allocation478_spill] sm:$0xff] }
 0x7c1   :  { %v5050_v39 = vsel %vm4761_vm13, %v4335_v44, -inf  ;;  %v5739_v41 = vrot.slane %v5419_v12, 4  ;;  %v5424_v29 = vperm.slane %v4932_v14, %v10604_v50  ;;  %v4339_v13 = vsel %vm3245_vm11, 0.0, %v4338_v8  ;;  %v4929_v56 = vpop.xlane.xlu1 %4928  ;;  %v13699_v44 = vld [vmem:[#allocation324_spill] sm:$0xff] }
 0x7c2   :  { %v4353_v22 = vsel %vm3245_vm11, %v4352_v54, %v13695_v46  ;;  %v3075_v49 = vsel %vm2106_vm8, %v3074_v5, %v3073_v3  ;;  %v3078_v15 = vrot.slane %v13696_v10, 1  ;;  %v11415_v34 = vsel %vm2112_vm10, %v2980_v6, %v2979_v61  ;;  %5051 = vmax.xlane.f32.xlu0 %v5050_v39  ;;  %v13701_v61 = vld [vmem:[#allocation163_spill] sm:$0xff]  ;;  %v13706_v10 = vld [vmem:[#allocation128_spill] sm:$0xff] }
 0x7c3   :  { %v3076_v14 = vrot.slane %v13697_v1, 2  ;;  %v11420_v42 = vsel %vm3245_vm11, %v5739_v41, %v10829_v0  ;;  %v5423_v19 = vperm.slane %v4929_v56, %v10589_v48  ;;  %v4337_v54 = vsel %vm3245_vm11, 0.0, %v4336_v23  ;;  %v4926_v8 = vpop.xlane.xlu0 %4925  ;;  %v13707_v1 = vld [vmem:[#allocation341_spill] sm:$0xff] }
 0x7c4   :  { %v4370_v4 = vrot.slane %v4363_v18, 4  ;;  %v4604_v5 = vrot.slane %v11394_v43, 4  ;;  %v5420_v26 = vperm.slane %v11306_v52, %v10589_v48  ;;  %v5074_v11 = vsel %vm4761_vm13, %v4339_v13, -inf  ;;  %v13703_v13 = vld [vmem:[#allocation85_spill] sm:$0xff] }
 0x7c5   :  { %v4357_v20 = vperm.slane %v4353_v22, %v8750_v24  ;;  %v5425_v51 = vsel %vm5340_vm14, %v5424_v29, %v5423_v19  ;;  %5075 = vmax.xlane.f32.xlu2 %v5074_v11  ;;  %v4475_v0 = vrot.slane %v11401_v36, 4  ;;  %v11433_v62 = vperm.slane %v11415_v34, %v8750_v24  ;;  %v13705_v22 = vld [vmem:[#allocation124_spill] sm:$0xff] }
 0x7c6   :  { %v3077_v32 = vsel %vm2109_vm9, %v3076_v14, %v3075_v49  ;;  %v5421_v30 = vperm.slane %v4926_v8, %v10604_v50  ;;  %v13698_v52 = vrot.slane %v13689_v55, 4  ;;  %v5062_v27 = vsel %vm4761_vm13, %v4337_v54, -inf  ;;  %v13708_v54 = vld [vmem:[#allocation342_spill] sm:$0xff]  ;;  %v13710_v8 = vld [vmem:[#allocation151_spill] sm:$0xff] }
 0x7c7   :  { %v3046_v3 = vrot.slane %v13699_v44, 3  ;;  %v13700_v18 = vrot.slane %v13574_v53, 4  ;;  %v11451_v23 = vsel %vm2112_vm10, %v3064_v31, %v11188_v45  ;;  %v11454_v55 = vsel %vm2112_vm10, %v3078_v15, %v3077_v32  ;;  %5063 = vmax.xlane.f32.xlu1 %v5062_v27  ;;  %v13702_v31 = vld [vmem:[#allocation140_spill] sm:$0xff] }
 0x7c8   :  { %v4297_v6 = vsel %vm3245_vm11, %v11312_v38, %v13698_v52  ;;  %v4605_v38 = vsel %vm3245_vm11, %v4604_v5, %v11451_v23  ;;  %v3094_v12 = vrot.slane %v13701_v61, 7  ;;  %v5422_v39 = vsel %vm5340_vm14, %v5421_v30, %v5420_v26 }
 0x7c9   :  { %v3045_v60 = vsel %vm2103_vm7, %v13700_v18, %v10842_v58  ;;  %v4371_v53 = vsel %vm3245_vm11, %v4370_v4, %v4357_v20  ;;  %v4950_v58 = vpop.xlane.xlu2 %4949  ;;  %v5059_v41 = vsel %vm4757_vm12, %v4297_v6, -inf  ;;  %v5576_v63 = vsel %vm2094_vm4, %v5425_v51, %v5422_v39  ;;  %v4938_v19 = vpop.xlane.xlu1 %4937  ;;  %v13711_v6 = vld [vmem:[#allocation8_spill] sm:$0xff]  ;;  %v13715_v39 = vld [vmem:[#allocation106_spill] sm:$0xff] }
 0x7ca   :  { %v4476_v45 = vsel %vm3245_vm11, %v4475_v0, %v13702_v31  ;;  %v11467_v29 = vperm.slane %v11433_v62, %v9255_v28  ;;  %v13704_v46 = vrot.slane %v13703_v13, 4  ;;  %v11477_v15 = vperm.slane %v13706_v10, %v8750_v24  ;;  %5060 = vmax.xlane.f32.xlu0 %v5059_v41  ;;  %v13714_v18 = vld [vmem:[#allocation100_spill] sm:$0xff]  ;;  %v13717_v41 = vld [vmem:[#allocation139_spill] sm:$0xff] }
 0x7cb   :  { %v3047_v56 = vsel %vm2106_vm8, %v3046_v3, %v3045_v60  ;;  %v3050_v14 = vrot.slane %v13707_v1, 1  ;;  %v3048_v4 = vrot.slane %v13708_v54, 2  ;;  %v4592_v5 = vrot.slane %v11454_v55, 4  ;;  %v4935_v44 = vpop.xlane.xlu0 %4934  ;;  %v13712_v3 = vld [vmem:[#allocation43_spill] sm:$0xff] }
 0x7cc   :  { %v11473_v49 = vsel %vm3245_vm11, %v13705_v22, %v13704_v46  ;;  %v11484_v26 = vperm.slane %v4605_v38, %v8750_v24  ;;  %v13709_v11 = vrot.slane %v13688_v35, 4  ;;  %v3095_v51 = vsel %vm2094_vm4, %v3094_v12, %v13710_v8  ;;  %v13718_v22 = vld [vmem:[#allocation157_spill] sm:$0xff]  ;;  %v13719_v1 = vld [vmem:[#allocation135_spill] sm:$0xff] }
 0x7cd   :  { %v5427_v0 = vperm.slane %v4938_v19, %v10604_v50  ;;  %v4375_v32 = vperm.slane %v4371_v53, %v9255_v28  ;;  %v5083_v30 = vsel %vm4757_vm12, %v4476_v45, -inf  ;;  %v3049_v52 = vsel %vm2109_vm9, %v3048_v4, %v3047_v56 }
 0x7ce   :  { %v4301_v20 = vsel %vm3245_vm11, %v11302_v25, %v13709_v11  ;;  %v3096_v27 = vrot.slane %v13711_v6, 6  ;;  %v13713_v35 = vperm.slane %v13712_v3, %v8750_v24  ;;  %5084 = vmax.xlane.f32.xlu2 %v5083_v30  ;;  %v4521_v60 = vrot.slane %v11467_v29, 4 }
 0x7cf   :  { %v11504_v38 = vsel %vm2112_vm10, %v3050_v14, %v3049_v52  ;;  %v5426_v61 = vperm.slane %v4935_v44, %v10589_v48  ;;  %v5071_v12 = vsel %vm4757_vm12, %v4301_v20, -inf  ;;  %v13716_v53 = vrot.slane %v13715_v39, 4 }
 0x7d0   :  { %v4365_v25 = vsel %vm3245_vm11, %v13714_v18, %v13713_v35  ;;  %v4593_v13 = vsel %vm3245_vm11, %v4592_v5, %v11504_v38  ;;  %v3097_v46 = vsel %vm2097_vm5, %v3096_v27, %v3095_v51  ;;  %v3100_v10 = vrot.slane %v13718_v22, 4  ;;  %5072 = vmax.xlane.f32.xlu1 %v5071_v12  ;;  %v13720_v27 = vld [vmem:[#allocation134_spill] sm:$0xff]  ;;  %v13721_v12 = vld [vmem:[#allocation9_spill] sm:$0xff] }
 0x7d1   :  { %v4430_v45 = vsel %vm3245_vm11, %v13717_v41, %v13716_v53  ;;  %v4453_v56 = vrot.slane %v11267_v21, 4  ;;  %v3098_v14 = vrot.slane %v13719_v1, 5  ;;  %v5428_v19 = vsel %vm5340_vm14, %v5427_v0, %v5426_v61  ;;  %v11519_v4 = vpop.xlane.xlu2 %4958  ;;  %v13722_v53 = vld [vmem:[#allocation148_spill] sm:$0xff] }
 0x7d2   :  { %v4376_v54 = vrot.slane %v4375_v32, 4  ;;  %v4640_v11 = vrot.slane %v11484_v26, 4  ;;  %v5068_v20 = vsel %vm4761_vm13, %v11359_v7, -inf  ;;  %v5577_v5 = vsel %vm2097_vm5, %v5428_v19, %v5576_v63  ;;  %v4947_v32 = vpop.xlane.xlu1 %4946 }
 0x7d3   :  { %v5433_v8 = vperm.slane %v4950_v58, %v10604_v50  ;;  %v4522_v51 = vsel %vm3245_vm11, 0.0, %v4521_v60  ;;  %v4417_v21 = vrot.slane %v11153_v16, 4  ;;  %v3099_v30 = vsel %vm2100_vm6, %v3098_v14, %v3097_v46  ;;  %5069 = vmax.xlane.f32.xlu0 %v5068_v20  ;;  %v4944_v35 = vpop.xlane.xlu0 %4943 }
 0x7d4   :  { %v4369_v0 = vperm.slane %v4365_v25, %v9255_v28  ;;  %v4454_v52 = vsel %vm3245_vm11, %v11329_v33, %v4453_v56  ;;  %v11533_v6 = vperm.slane %v4593_v13, %v8750_v24  ;;  %v3101_v7 = vsel %vm2103_vm7, %v3100_v10, %v3099_v30 }
 0x7d5   :  { %v5432_v58 = vperm.slane %v4947_v32, %v10589_v48  ;;  %v11538_v63 = vperm.slane %v4430_v45, %v9255_v28  ;;  %v4418_v16 = vsel %vm3245_vm11, %v11253_v9, %v4417_v21  ;;  %v3102_v44 = vrot.slane %v13720_v27, 3  ;;  %v13723_v45 = vld [vmem:[#allocation152_spill] sm:$0xff] }
 0x7d6   :  { %v5429_v3 = vperm.slane %v11398_v37, %v10589_v48  ;;  %v5092_v33 = vsel %vm4761_vm13, %v4522_v51, -inf  ;;  %v4377_v18 = vsel %vm3245_vm11, %v4376_v54, %v4369_v0  ;;  %v11549_v60 = vperm.slane %v4454_v52, %v9255_v28  ;;  %v13724_v52 = vld [vmem:[#allocation75_spill] sm:$0xff] }
 0x7d7   :  { %v5434_v25 = vsel %vm5340_vm14, %v5433_v8, %v5432_v58  ;;  %5093 = vmax.xlane.f32.xlu2 %v5092_v33  ;;  %v4641_v61 = vsel %vm3245_vm11, %v4640_v11, %v11533_v6  ;;  %v3103_v9 = vsel %vm2106_vm8, %v3102_v44, %v3101_v7  ;;  %v3106_v39 = vrot.slane %v13721_v12, 1  ;;  %v13725_v44 = vld [vmem:[#allocation21_spill] sm:$0xff] }
 0x7d8   :  { %v5430_v37 = vperm.slane %v4944_v35, %v10604_v50  ;;  %v5080_v41 = vsel %vm4761_vm13, %v13722_v53, -inf  ;;  %v3104_v13 = vrot.slane %v13723_v45, 2  ;;  %v4477_v46 = vrot.slane %v13702_v31, 4 }
 0x7d9   :  { %5081 = vmax.xlane.f32.xlu1 %v5080_v41  ;;  %v4481_v22 = vrot.slane %v11538_v63, 4  ;;  %v4616_v10 = vrot.slane %v11477_v15, 4  ;;  %v4405_v56 = vrot.slane %v10710_v59, 4  ;;  %v11564_v1 = vperm.slane %v4418_v16, %v8750_v24  ;;  %v4968_v19 = vpop.xlane.xlu2 %4967 }
 0x7da   :  { %v5431_v14 = vsel %vm5340_vm14, %v5430_v37, %v5429_v3  ;;  %v11568_v54 = vperm.slane %v4641_v61, %v9255_v28  ;;  %v3105_v11 = vsel %vm2109_vm9, %v3104_v13, %v3103_v9  ;;  %v5077_v31 = vsel %vm4757_vm12, %v4377_v18, -inf  ;;  %v4956_v30 = vpop.xlane.xlu1 %4955 }
 0x7db   :  { %v5578_v20 = vsel %vm2100_vm6, %v5431_v14, %v5577_v5  ;;  %v4482_v8 = vsel %vm3245_vm11, %v11549_v60, %v4481_v22  ;;  %v11577_v59 = vperm.slane %v11473_v49, %v8750_v24  ;;  %v11580_v51 = vsel %vm2112_vm10, %v3106_v39, %v3105_v11  ;;  %5078 = vmax.xlane.f32.xlu0 %v5077_v31  ;;  %v4953_v33 = vpop.xlane.xlu0 %4952 }
 0x7dc   :  { %v5579_v21 = vsel %vm2103_vm7, %v5434_v25, %v5578_v20  ;;  %v4406_v0 = vsel %vm3245_vm11, %v11203_v40, %v4405_v56  ;;  %v4478_v5 = vsel %vm3245_vm11, %v11401_v36, %v4477_v46  ;;  %v4501_v32 = vrot.slane %v11433_v62, 4  ;;  %v13726_v25 = vld [vmem:[#allocation94_spill] sm:$0xff] }
 0x7dd   :  { %v4617_v7 = vsel %vm3245_vm11, %v4616_v10, %v13724_v52  ;;  %v4463_v49 = vrot.slane %v11564_v1, 4  ;;  %v5436_v58 = vperm.slane %v4956_v30, %v10604_v50  ;;  %v5101_v16 = vsel %vm4757_vm12, %v4482_v8, -inf }
 0x7de   :  { %v4664_v27 = vrot.slane %v11568_v54, 4  ;;  %v4381_v3 = vrot.slane %v13725_v44, 4  ;;  %v11597_v40 = vperm.slane %v11580_v51, %v8750_v24  ;;  %v11600_v36 = vperm.slane %v4406_v0, %v8750_v24 }
 0x7df   :  { %5102 = vmax.xlane.f32.xlu2 %v5101_v16  ;;  %v5435_v62 = vperm.slane %v4953_v33, %v10589_v48  ;;  %v5089_v35 = vsel %vm4757_vm12, %v4478_v5, -inf  ;;  %v11605_v18 = vperm.slane %v4617_v7, %v9255_v28  ;;  %v4439_v9 = vrot.slane %v11577_v59, 4 }
 0x7e0   :  { %v4382_v61 = vsel %vm3245_vm11, %v13726_v25, %v4381_v3  ;;  %v4502_v12 = vsel %vm3245_vm11, 0.0, %v4501_v32  ;;  %v4479_v37 = vrot.slane %v11549_v60, 4  ;;  %v4464_v45 = vsel %vm3245_vm11, %v4463_v49, %v11600_v36 }
 0x7e1   :  { %5090 = vmax.xlane.f32.xlu1 %v5089_v35  ;;  %v5437_v39 = vsel %vm5340_vm14, %v5436_v58, %v5435_v62  ;;  %v11613_v53 = vpop.xlane.xlu2 %4976  ;;  %v4665_v41 = vsel %vm3245_vm11, %v4664_v27, %v11605_v18  ;;  %v5086_v13 = vsel %vm4761_vm13, %v11467_v29, -inf  ;;  %v5442_v22 = vperm.slane %v4968_v19, %v10604_v50 }
 0x7e2   :  { %v5580_v46 = vsel %vm2106_vm8, %v5437_v39, %v5579_v21  ;;  %v11625_v10 = vperm.slane %v11597_v40, %v9255_v28  ;;  %v11628_v60 = vperm.slane %v4382_v61, %v8750_v24  ;;  %v4965_v56 = vpop.xlane.xlu1 %4964  ;;  %v4510_v14 = vperm.slane %v4502_v12, %v9255_v28 }
 0x7e3   :  { %5087 = vmax.xlane.f32.xlu0 %v5086_v13  ;;  %v5441_v11 = vperm.slane %v4965_v56, %v10589_v48  ;;  %v11633_v20 = vperm.slane %v4464_v45, %v9255_v28  ;;  %v5438_v29 = vperm.slane %v11519_v4, %v10589_v48  ;;  %v5137_v19 = vsel %vm4757_vm12, %v4665_v41, -inf  ;;  %v4962_v21 = vpop.xlane.xlu0 %4961 }
 0x7e4   :  { %v4440_v31 = vsel %vm3245_vm11, %v4439_v9, %v11628_v60  ;;  %v4491_v8 = vrot.slane %v11415_v34, 4  ;;  %v4480_v30 = vsel %vm3245_vm11, %v4479_v37, %v11538_v63  ;;  %v4710_v5 = vrot.slane %v11625_v10, 4 }
 0x7e5   :  { %v5443_v0 = vsel %vm5340_vm14, %v5442_v22, %v5441_v11  ;;  %v5439_v32 = vperm.slane %v4962_v21, %v10604_v50  ;;  %v5098_v4 = vsel %vm4761_vm13, %v4510_v14, -inf  ;;  %v4483_v7 = vrot.slane %v11633_v20, 4  ;;  %v13727_v21 = vld [vmem:[#allocation59_spill] sm:$0xff] }
 0x7e6   :  { %v5095_v34 = vsel %vm4757_vm12, %v4480_v30, -inf  ;;  %v11651_v58 = vperm.slane %v4440_v31, %v9255_v28  ;;  %v5641_v16 = vrot.slane %v11074_v47, 4  ;;  %v4711_v44 = vsel %vm3245_vm11, 0.0, %v4710_v5 }
 0x7e7   :  { %5138 = vmax.xlane.f32.xlu2 %v5137_v19  ;;  %v5440_v49 = vsel %vm5340_vm14, %v5439_v32, %v5438_v29  ;;  %v4492_v3 = vsel %vm3245_vm11, 0.0, %v4491_v8  ;;  %v4523_v62 = vrot.slane %v4510_v14, 4  ;;  %v5146_v39 = vsel %vm4761_vm13, %v4711_v44, -inf }
 0x7e8   :  { %v5581_v27 = vsel %vm2109_vm9, %v5440_v49, %v5580_v46  ;;  %v4484_v9 = vsel %vm3245_vm11, %v4483_v7, %v11651_v58  ;;  %v11666_v37 = vperm.slane %v4492_v3, %v8750_v24  ;;  %v4642_v14 = vrot.slane %v11533_v6, 4  ;;  %v13728_v49 = vld [vmem:[#allocation27_spill] sm:$0xff]  ;;  %v13729_v3 = vld [vmem:[#allocation74_spill] sm:$0xff] }
 0x7e9   :  { %5099 = vmax.xlane.f32.xlu1 %v5098_v4  ;;  %v4986_v63 = vpop.xlane.xlu2 %4985  ;;  %v5582_v33 = vsel %vm2112_vm10, %v5443_v0, %v5581_v27  ;;  %v4524_v46 = vsel %vm3245_vm11, 0.0, %v4523_v62  ;;  %v5107_v22 = vsel %vm4757_vm12, %v4484_v9, -inf  ;;  %v4666_v8 = vrot.slane %v11605_v18, 4 }
 0x7ea   :  { %v4974_v35 = vpop.xlane.xlu1 %4973  ;;  %v5639_v25 = vrot.slane %v5582_v33, 4  ;;  %v11659_v61 = vsel %vm3245_vm11, %v5582_v33, %v5641_v16  ;;  %v11681_v29 = vperm.slane %v11666_v37, %v9255_v28  ;;  %v5451_v31 = vperm.slane %v4986_v63, %v10604_v50 }
 0x7eb   :  { %5096 = vmax.xlane.f32.xlu0 %v5095_v34  ;;  %v5445_v12 = vperm.slane %v4974_v35, %v10604_v50  ;;  %v4971_v45 = vpop.xlane.xlu0 %4970  ;;  %v4582_v30 = vrot.slane %v13727_v21, 4  ;;  %v4606_v0 = vrot.slane %v11451_v23, 4  ;;  %v4643_v6 = vsel %vm3245_vm11, %v11484_v26, %v4642_v14 }
 0x7ec   :  { %v11670_v41 = vsel %vm3245_vm11, %v5639_v25, %v11074_v47  ;;  %v5444_v13 = vperm.slane %v4971_v45, %v10589_v48  ;;  %v5104_v47 = vsel %vm4761_vm13, %v4524_v46, -inf  ;;  %v4667_v7 = vsel %vm3245_vm11, %v11568_v54, %v4666_v8 }
 0x7ed   :  { %v4690_v18 = vrot.slane %v11597_v40, 4  ;;  %v4583_v34 = vsel %vm3245_vm11, %v13728_v49, %v4582_v30  ;;  %v5447_v23 = vperm.slane %v11613_v53, %v10589_v48  ;;  %v5110_v26 = vsel %vm4761_vm13, %v11681_v29, -inf }
 0x7ee   :  { %v5446_v56 = vsel %vm5340_vm14, %v5445_v12, %v5444_v13  ;;  %v4680_v63 = vrot.slane %v11580_v51, 4  ;;  %v5143_v40 = vsel %vm4757_vm12, %v4667_v7, -inf  ;;  %v4618_v44 = vrot.slane %v13724_v52, 4 }
 0x7ef   :  { %5147 = vmax.xlane.f32.xlu2 %v5146_v39  ;;  %v5745_v19 = vrot.slane %v5446_v56, 4  ;;  %v4651_v53 = vperm.slane %v4643_v6, %v9255_v28  ;;  %v4570_v33 = vrot.slane %v13729_v3, 4  ;;  %v11714_v62 = vperm.slane %v4583_v34, %v8750_v24 }
 0x7f0   :  { %v4485_v51 = vrot.slane %v11651_v58, 4  ;;  %v4594_v35 = vrot.slane %v11504_v38, 4  ;;  %v4619_v52 = vsel %vm3245_vm11, %v11477_v15, %v4618_v44  ;;  %v5140_v39 = vsel %vm4761_vm13, %v11625_v10, -inf  ;;  %v13730_v38 = vld [vmem:[#allocation103_spill] sm:$0xff] }
 0x7f1   :  { %5108 = vmax.xlane.f32.xlu1 %v5107_v22  ;;  %v11677_v11 = vpop.xlane.xlu2 %4994  ;;  %v11692_v32 = vsel %vm3245_vm11, %v5745_v19, %v11106_v17  ;;  %v4607_v17 = vsel %vm3245_vm11, %v11394_v43, %v4606_v0  ;;  %v4691_v43 = vsel %vm3245_vm11, 0.0, %v4690_v18  ;;  %v4681_v58 = vsel %vm3245_vm11, 0.0, %v4680_v63 }
 0x7f2   :  { %v4983_v5 = vpop.xlane.xlu1 %4982  ;;  %v11720_v25 = vperm.slane %v4607_v17, %v8750_v24  ;;  %v4486_v13 = vsel %vm3245_vm11, %v11633_v20, %v4485_v51  ;;  %v4571_v46 = vsel %vm3245_vm11, %v13730_v38, %v4570_v33  ;;  %v4668_v22 = vrot.slane %v4651_v53, 4 }
 0x7f3   :  { %5105 = vmax.xlane.f32.xlu0 %v5104_v47  ;;  %v5450_v4 = vperm.slane %v4983_v5, %v10589_v48  ;;  %v4980_v16 = vpop.xlane.xlu0 %4979  ;;  %v4699_v14 = vperm.slane %v4691_v43, %v9255_v28  ;;  %v4628_v15 = vrot.slane %v11714_v62, 4  ;;  %v4595_v10 = vsel %vm3245_vm11, %v11454_v55, %v4594_v35 }
 0x7f4   :  { %v5448_v54 = vperm.slane %v4980_v16, %v10604_v50  ;;  %v4627_v47 = vperm.slane %v4619_v52, %v9255_v28  ;;  %v4652_v19 = vrot.slane %v11720_v25, 4  ;;  %v11742_v8 = vperm.slane %v4681_v58, %v8750_v24 }
 0x7f5   :  { %v5452_v27 = vsel %vm5340_vm14, %v5451_v31, %v5450_v4  ;;  %v5113_v31 = vsel %vm4757_vm12, %v4486_v13, -inf  ;;  %v11745_v21 = vperm.slane %v4571_v46, %v8750_v24  ;;  %v11748_v0 = vperm.slane %v4595_v10, %v8750_v24 }
 0x7f6   :  { %v5449_v9 = vsel %vm5340_vm14, %v5448_v54, %v5447_v23  ;;  %v4669_v5 = vsel %vm3245_vm11, %v4668_v22, %v4627_v47  ;;  %v5152_v6 = vsel %vm4761_vm13, %v4699_v14, -inf  ;;  %v4712_v4 = vrot.slane %v4699_v14, 4 }
 0x7f7   :  { %5111 = vmax.xlane.f32.xlu2 %v5110_v26  ;;  %v5583_v45 = vsel %vm2094_vm4, %v5452_v27, %v5449_v9  ;;  %v11758_v49 = vperm.slane %v11742_v8, %v9255_v28  ;;  %v4629_v34 = vsel %vm3245_vm11, %v4628_v15, %v11745_v21  ;;  %v4653_v23 = vsel %vm3245_vm11, %v4652_v19, %v11748_v0 }
 0x7f8   :  { %v5149_v26 = vsel %vm4757_vm12, %v4669_v5, -inf  ;;  %v4511_v27 = vrot.slane %v11666_v37, 4  ;;  %v4635_v44 = vperm.slane %v4629_v34, %v9255_v28  ;;  %v4659_v3 = vperm.slane %v4653_v23, %v9255_v28 }
 0x7f9   :  { %5144 = vmax.xlane.f32.xlu1 %v5143_v40  ;;  %v5004_v12 = vpop.xlane.xlu2 %5003  ;;  %v4713_v40 = vsel %vm3245_vm11, 0.0, %v4712_v4  ;;  %v5456_v33 = vperm.slane %v11677_v11, %v10589_v48  ;;  %v4670_v43 = vrot.slane %v4627_v47, 4  ;;  %v5164_v51 = vsel %vm4761_vm13, %v11758_v49, -inf }
 0x7fa   :  { %v4992_v56 = vpop.xlane.xlu1 %4991  ;;  %v5460_v63 = vperm.slane %v5004_v12, %v10604_v50  ;;  %v5158_v12 = vsel %vm4761_vm13, %v4713_v40, -inf  ;;  %v4674_v13 = vrot.slane %v4635_v44, 4  ;;  %v4465_v11 = vrot.slane %v11600_v36, 4 }
 0x7fb   :  { %5141 = vmax.xlane.f32.xlu0 %v5140_v39  ;;  %v5454_v20 = vperm.slane %v4992_v56, %v10604_v50  ;;  %v4989_v30 = vpop.xlane.xlu0 %4988  ;;  %v4671_v52 = vsel %vm3245_vm11, %v4651_v53, %v4670_v43  ;;  %v4512_v39 = vsel %vm3245_vm11, 0.0, %v4511_v27  ;;  %v4525_v15 = vrot.slane %v11681_v29, 4 }
 0x7fc   :  { %v5453_v55 = vperm.slane %v4989_v30, %v10589_v48  ;;  %v5155_v22 = vsel %vm4757_vm12, %v4671_v52, -inf  ;;  %v4675_v56 = vsel %vm3245_vm11, %v4659_v3, %v4674_v13  ;;  %v4520_v53 = vperm.slane %v4512_v39, %v9255_v28  ;;  %v13733_v52 = vld [vmem:[#allocation256_spill] sm:$0xff]  ;;  %v13734_v13 = vld [vmem:[#allocation465_spill] sm:$0xff] }
 0x7fd   :  { %v4466_v36 = vsel %vm3245_vm11, %v11564_v1, %v4465_v11  ;;  %v4630_v30 = vrot.slane %v11745_v21, 4  ;;  %v4526_v29 = vsel %vm3245_vm11, 0.0, %v4525_v15  ;;  %v4654_v34 = vrot.slane %v11748_v0, 4 }
 0x7fe   :  { %v5455_v7 = vsel %vm5340_vm14, %v5454_v20, %v5453_v55  ;;  %v5167_v20 = vsel %vm4757_vm12, %v4675_v56, -inf  ;;  %v4527_v5 = vrot.slane %v4520_v53, 4  ;;  %v4474_v4 = vperm.slane %v4466_v36, %v9255_v28  ;;  %v13735_v36 = vld [vmem:[#allocation120_spill] sm:$0xff] }
 0x7ff   :  { %5114 = vmax.xlane.f32.xlu2 %v5113_v31  ;;  %v5584_v17 = vsel %vm2097_vm5, %v5455_v7, %v5583_v45  ;;  %v4672_v45 = vrot.slane %v4659_v3, 4  ;;  %v4441_v31 = vrot.slane %v11628_v60, 4  ;;  %v13731_v60 = vld [vmem:[#allocation80_spill] sm:$0xff]  ;;  %v4655_v40 = vsel %vm3245_vm11, %v11720_v25, %v4654_v34 }
 0x800   :  { %v4736_v23 = vrot.slane %v13731_v60, 4  ;;  %v11827_v25 = vperm.slane %v4655_v40, %v9255_v28  ;;  %v4730_v11 = vrot.slane %v13734_v13, 4 }
 0x801   :  { %5153 = vmax.xlane.f32.xlu1 %v5152_v6  ;;  %v11754_v18 = vpop.xlane.xlu2 %5012  ;;  %v4673_v47 = vsel %vm3245_vm11, %v4672_v45, %v4635_v44  ;;  %v4442_v7 = vsel %vm3245_vm11, %v11577_v59, %v4441_v31  ;;  %v4528_v59 = vsel %vm3245_vm11, 0.0, %v4527_v5  ;;  %v5122_v45 = vsel %vm4761_vm13, %v4520_v53, -inf  ;;  %v13736_v31 = vld [vmem:[#allocation188_spill] sm:$0xff] }
 0x802   :  { %v5001_v16 = vpop.xlane.xlu1 %5000  ;;  %v5161_v1 = vsel %vm4757_vm12, %v4673_v47, -inf  ;;  %v5128_v43 = vsel %vm4761_vm13, %v4528_v59, -inf }
 0x803   :  { %5150 = vmax.xlane.f32.xlu0 %v5149_v26  ;;  %v5459_v54 = vperm.slane %v5001_v16, %v10589_v48  ;;  %v4998_v35 = vpop.xlane.xlu0 %4997 }
 0x804   :  { %v5457_v37 = vperm.slane %v4998_v35, %v10604_v50 }
 0x805   :  { %v5461_v9 = vsel %vm5340_vm14, %v5460_v63, %v5459_v54  ;;  %v5116_v63 = vsel %vm4761_vm13, %v4526_v29, -inf  ;;  %v4487_v54 = vrot.slane %v4474_v4, 4  ;;  %v4700_v29 = vrot.slane %v11742_v8, 4 }
 0x806   :  { %v5458_v58 = vsel %vm5340_vm14, %v5457_v37, %v5456_v33  ;;  %v4450_v33 = vperm.slane %v4442_v7, %v9255_v28 }
 0x807   :  { %5165 = vmax.xlane.f32.xlu2 %v5164_v51  ;;  %v5585_v46 = vsel %vm2100_vm6, %v5458_v58, %v5584_v17  ;;  %v4631_v17 = vsel %vm3245_vm11, %v11714_v62, %v4630_v30  ;;  %v5465_v62 = vperm.slane %v11754_v18, %v10589_v48  ;;  %v13732_v51 = vld [vmem:[#allocation395_spill] sm:$0xff]  ;;  %v4718_v30 = vrot.slane %v13736_v31, 4 }
 0x808   :  { %v5586_v14 = vsel %vm2103_vm7, %v5461_v9, %v5585_v46  ;;  %v11817_v3 = vperm.slane %v4631_v17, %v9255_v28  ;;  %v4737_v35 = vsel %vm3245_vm11, %v4736_v23, %v13732_v51  ;;  %v4488_v18 = vsel %vm3245_vm11, %v4487_v54, %v4450_v33  ;;  %v13740_v54 = vld [vmem:[#allocation387_spill] sm:$0xff] }
 0x809   :  { %5159 = vmax.xlane.f32.xlu1 %v5158_v12  ;;  %v5022_v38 = vpop.xlane.xlu2 %5021  ;;  %v4724_v12 = vrot.slane %v13733_v52, 4  ;;  %v4489_v15 = vrot.slane %v4450_v33, 4  ;;  %v4701_v8 = vsel %vm3245_vm11, 0.0, %v4700_v29  ;;  %v13741_v33 = vld [vmem:[#allocation247_spill] sm:$0xff] }
 0x80a   :  { %v5010_v10 = vpop.xlane.xlu1 %5009  ;;  %v5469_v27 = vperm.slane %v5022_v38, %v10604_v50  ;;  %v4678_v58 = vrot.slane %v11817_v3, 4  ;;  %v4741_v38 = vperm.slane %v4737_v35, %v8750_v24 }
 0x80b   :  { %5156 = vmax.xlane.f32.xlu0 %v5155_v22  ;;  %v5463_v19 = vperm.slane %v5010_v10, %v10604_v50  ;;  %v4725_v53 = vsel %vm3245_vm11, %v4724_v12, %v13735_v36  ;;  %v4676_v12 = vrot.slane %v11827_v25, 4  ;;  %v13745_v36 = vld [vmem:[#allocation318_spill] sm:$0xff] }
 0x80c   :  { %v5007_v55 = vpop.xlane.xlu0 %5006  ;;  %v4679_v10 = vsel %vm3245_vm11, %v11827_v25, %v4678_v58  ;;  %v4748_v34 = vrot.slane %v4741_v38, 4 }
 0x80d   :  { %v5462_v6 = vperm.slane %v5007_v55, %v10589_v48  ;;  %v13737_v55 = vld [vmem:[#allocation327_spill] sm:$0xff]  ;;  %v5179_v23 = vsel %vm4757_vm12, %v4679_v10, -inf }
 0x80e   :  { %v4731_v5 = vsel %vm3245_vm11, %v4730_v11, %v13737_v55  ;;  %v13746_v55 = vld [vmem:[#allocation179_spill] sm:$0xff] }
 0x80f   :  { %5168 = vmax.xlane.f32.xlu2 %v5167_v20  ;;  %v5464_v21 = vsel %vm5340_vm14, %v5463_v19, %v5462_v6  ;;  %v4714_v19 = vrot.slane %v11758_v49, 4  ;;  %v4490_v6 = vsel %vm3245_vm11, %v4474_v4, %v4489_v15  ;;  %v4735_v17 = vperm.slane %v4731_v5, %v8750_v24 }
 0x810   :  { %v5587_v16 = vsel %vm2106_vm8, %v5464_v21, %v5586_v14  ;;  %v5119_v14 = vsel %vm4757_vm12, %v4488_v18, -inf  ;;  %v4729_v21 = vperm.slane %v4725_v53, %v8750_v24  ;;  %v5125_v4 = vsel %vm4757_vm12, %v4490_v6, -inf }
 0x811   :  { %5162 = vmax.xlane.f32.xlu1 %v5161_v1  ;;  %v11805_v26 = vpop.xlane.xlu2 %5030  ;;  %v13738_v1 = vld [vmem:[#allocation38_spill] sm:$0xff]  ;;  %v4709_v18 = vperm.slane %v4701_v8, %v9255_v28  ;;  %v4529_v5 = vrot.slane %v13746_v55, 4 }
 0x812   :  { %v5019_v0 = vpop.xlane.xlu1 %5018  ;;  %v4547_v7 = vrot.slane %v13738_v1, 4  ;;  %v4742_v51 = vrot.slane %v4729_v21, 4  ;;  %v5474_v38 = vperm.slane %v11805_v26, %v10589_v48  ;;  %v4677_v26 = vsel %vm3245_vm11, %v4676_v12, %v11817_v3 }
 0x813   :  { %5117 = vmax.xlane.f32.xlu0 %v5116_v63  ;;  %v5468_v44 = vperm.slane %v5019_v0, %v10589_v48 }
 0x814   :  { %v5016_v9 = vpop.xlane.xlu0 %5015  ;;  %v4548_v0 = vsel %vm3245_vm11, %v4547_v7, %v13740_v54 }
 0x815   :  { %v5470_v37 = vsel %vm5340_vm14, %v5469_v27, %v5468_v44  ;;  %v5466_v39 = vperm.slane %v5016_v9, %v10604_v50  ;;  %v13739_v27 = vld [vmem:[#allocation79_spill] sm:$0xff]  ;;  %v4552_v13 = vperm.slane %v4548_v0, %v8750_v24 }
 0x816   :  { %v4719_v59 = vsel %vm3245_vm11, %v4718_v30, %v13739_v27 }
 0x817   :  { %5129 = vmax.xlane.f32.xlu2 %v5128_v43  ;;  %v5467_v46 = vsel %vm5340_vm14, %v5466_v39, %v5465_v62  ;;  %v4749_v62 = vsel %vm3245_vm11, %v4748_v34, %v4735_v17  ;;  %v4535_v43 = vrot.slane %v13741_v33, 4  ;;  %v4559_v31 = vrot.slane %v4552_v13, 4 }
 0x818   :  { %v5588_v56 = vsel %vm2109_vm9, %v5467_v46, %v5587_v16  ;;  %v4715_v16 = vsel %vm3245_vm11, 0.0, %v4714_v19  ;;  %v4753_v58 = vperm.slane %v4749_v62, %v9255_v28  ;;  %v13743_v46 = vld [vmem:[#allocation147_spill] sm:$0xff]  ;;  %v5173_v34 = vsel %vm4757_vm12, %v4677_v26, -inf }
 0x819   :  { %5123 = vmax.xlane.f32.xlu1 %v5122_v45  ;;  %v5040_v22 = vpop.xlane.xlu2 %5039  ;;  %v11844_v47 = vsel %vm2112_vm10, %v5470_v37, %v5588_v56  ;;  %v5170_v35 = vsel %vm4761_vm13, %v4715_v16, -inf  ;;  %v13742_v37 = vld [vmem:[#allocation457_spill] sm:$0xff]  ;;  %v4723_v45 = vperm.slane %v4719_v59, %v8750_v24  ;;  %v13744_v56 = vld [vmem:[#allocation111_spill] sm:$0xff] }
 0x81a   :  { %v5028_v20 = vpop.xlane.xlu1 %5027  ;;  %v5478_v9 = vperm.slane %v5040_v22, %v10604_v50  ;;  %v4541_v52 = vrot.slane %v13742_v37, 4  ;;  %v5188_v22 = vsel %vm4761_vm13, %v13743_v46, -inf  ;;  %v4536_v25 = vsel %vm3245_vm11, %v4535_v43, %v13744_v56 }
 0x81b   :  { %5120 = vmax.xlane.f32.xlu0 %v5119_v14  ;;  %v5472_v60 = vperm.slane %v5028_v20, %v10604_v50  ;;  %v4743_v10 = vsel %vm3245_vm11, %v4742_v51, %v4723_v45  ;;  %v5176_v20 = vsel %vm4761_vm13, %v4709_v18, -inf  ;;  %v4754_v30 = vrot.slane %v4753_v58, 4 }
 0x81c   :  { %v5025_v49 = vpop.xlane.xlu0 %5024  ;;  %v4542_v53 = vsel %vm3245_vm11, %v4541_v52, %v13745_v36  ;;  %v4540_v6 = vperm.slane %v4536_v25, %v8750_v24  ;;  %v4747_v3 = vperm.slane %v4743_v10, %v9255_v28 }
 0x81d   :  { %v5471_v63 = vperm.slane %v5025_v49, %v10589_v48  ;;  %v4546_v7 = vperm.slane %v4542_v53, %v8750_v24 }
 0x81e   :  { %v4755_v49 = vsel %vm3245_vm11, %v4754_v30, %v4747_v3  ;;  %v4553_v8 = vrot.slane %v4540_v6, 4  ;;  %v5650_v6 = vperm.slane %v11659_v61, %v8750_v24 }
 0x81f   :  { %5180 = vmax.xlane.f32.xlu2 %v5179_v23  ;;  %v11866_v40 = vsel %vm5340_vm14, %v5472_v60, %v5471_v63  ;;  %v4716_v23 = vrot.slane %v4709_v18, 4  ;;  %v4560_v17 = vsel %vm3245_vm11, %v4559_v31, %v4546_v7  ;;  %v13747_v63 = vld [vmem:[#allocation64_spill] sm:$0xff]  ;;  %v5185_v0 = vsel %vm4757_vm12, %v4755_v49, -inf }
 0x820   :  { %v4530_v16 = vsel %vm3245_vm11, %v4529_v5, %v13747_v63  ;;  %v4564_v62 = vperm.slane %v4560_v17, %v9255_v28  ;;  %v5638_v5 = vperm.slane %v11367_v57, %v8750_v24  ;;  %v5634_v7 = vperm.slane %v11376_v2, %v8750_v24 }
 0x821   :  { %5126 = vmax.xlane.f32.xlu1 %v5125_v4  ;;  %v11868_v44 = vpop.xlane.xlu2 %5048  ;;  %v4717_v54 = vsel %vm3245_vm11, 0.0, %v4716_v23  ;;  %v4534_v33 = vperm.slane %v4530_v16, %v8750_v24  ;;  %v5687_v49 = vrot.slane %v5650_v6, 4 }
 0x822   :  { %v5037_v39 = vpop.xlane.xlu1 %5036  ;;  %v4565_v12 = vrot.slane %v4564_v62, 4  ;;  %v5483_v45 = vperm.slane %v11868_v44, %v10589_v48  ;;  %v5689_v23 = vrot.slane %v5638_v5, 4  ;;  %v5677_v63 = vrot.slane %v5634_v7, 4 }
 0x823   :  { %5171 = vmax.xlane.f32.xlu0 %v5170_v35  ;;  %v5477_v11 = vperm.slane %v5037_v39, %v10589_v48  ;;  %v5182_v35 = vsel %vm4761_vm13, %v4717_v54, -inf  ;;  %v4554_v37 = vsel %vm3245_vm11, %v4553_v8, %v4534_v33  ;;  %v5750_v54 = vperm.slane %v11692_v32, %v8750_v24 }
 0x824   :  { %v4558_v13 = vperm.slane %v4554_v37, %v9255_v28  ;;  %v11949_v16 = vsel %vm3245_vm11, %v5650_v6, %v5689_v23  ;;  %v5744_v37 = vperm.slane %v11420_v42, %v8750_v24 }
 0x825   :  { %v5034_v14 = vpop.xlane.xlu0 %5033  ;;  %v5479_v15 = vsel %vm5340_vm14, %v5478_v9, %v5477_v11 }
 0x826   :  { %v5475_v19 = vperm.slane %v5034_v14, %v10604_v50  ;;  %v4566_v46 = vsel %vm3245_vm11, %v4565_v12, %v4558_v13 }
 0x827   :  { %5189 = vmax.xlane.f32.xlu2 %v5188_v22  ;;  %v13748_v22 = vld [vmem:[#allocation143_spill] sm:$0xff]  ;;  %v5131_v44 = vsel %vm4757_vm12, %v4566_v46, -inf }
 0x828   :  { %v5476_v29 = vsel %vm5340_vm14, %v5475_v19, %v5474_v38  ;;  %v5134_v56 = vsel %vm4761_vm13, %v13748_v22, -inf }
 0x829   :  { %5177 = vmax.xlane.f32.xlu1 %v5176_v20  ;;  %v5058_v1 = vpop.xlane.xlu2 %5057  ;;  %v5590_v60 = vsel %vm2094_vm4, %v5479_v15, %v5476_v29 }
 0x82a   :  { %v5046_v21 = vpop.xlane.xlu1 %5045  ;;  %v5487_v52 = vperm.slane %v5058_v1, %v10604_v50 }
 0x82b   :  { %5174 = vmax.xlane.f32.xlu0 %v5173_v34  ;;  %v5481_v4 = vperm.slane %v5046_v21, %v10604_v50  ;;  %v5646_v21 = vperm.slane %v11670_v41, %v8750_v24 }
 0x82d   :  { %v5043_v27 = vpop.xlane.xlu0 %5042  ;;  %v5675_v41 = vrot.slane %v5646_v21, 4 }
 0x82e   :  { %v5480_v59 = vperm.slane %v5043_v27, %v10589_v48  ;;  %v11956_v27 = vsel %vm3245_vm11, %v5646_v21, %v5677_v63 }
 0x82f   :  { %v11965_v62 = vsel %vm3245_vm11, %v5675_v41, %v5634_v7 }
 0x830   :  { %v5482_v43 = vsel %vm5340_vm14, %v5481_v4, %v5480_v59  ;;  %v11959_v59 = vsel %vm3245_vm11, %v5687_v49, %v5638_v5 }
 0x831   :  { %5186 = vmax.xlane.f32.xlu1 %v5185_v0  ;;  %v5067_v51 = vpop.xlane.xlu2 %5066  ;;  %v5591_v9 = vsel %vm2097_vm5, %v5482_v43, %v5590_v60 }
 0x832   :  { %v5055_v39 = vpop.xlane.xlu1 %5054  ;;  %v5492_v34 = vperm.slane %v5067_v51, %v10589_v48  ;;  %v5763_v51 = vrot.slane %v5750_v54, 4 }
 0x833   :  { %5183 = vmax.xlane.f32.xlu0 %v5182_v35  ;;  %v5486_v18 = vperm.slane %v5055_v39, %v10589_v48 }
 0x834   :  { %v11976_v39 = vsel %vm3245_vm11, %v5763_v51, %v5744_v37 }
 0x835   :  { %v5052_v11 = vpop.xlane.xlu0 %5051  ;;  %v5488_v58 = vsel %vm5340_vm14, %v5487_v52, %v5486_v18 }
 0x836   :  { %v5484_v38 = vperm.slane %v5052_v11, %v10604_v50 }
 0x838   :  { %v5485_v25 = vsel %vm5340_vm14, %v5484_v38, %v5483_v45 }
 0x839   :  { %5135 = vmax.xlane.f32.xlu1 %v5134_v56  ;;  %v5076_v14 = vpop.xlane.xlu2 %5075  ;;  %v5592_v15 = vsel %vm2100_vm6, %v5485_v25, %v5591_v9 }
 0x83a   :  { %v5593_v10 = vsel %vm2103_vm7, %v5488_v58, %v5592_v15  ;;  %v5064_v36 = vpop.xlane.xlu1 %5063  ;;  %v5496_v55 = vperm.slane %v5076_v14, %v10604_v50 }
 0x83b   :  { %5132 = vmax.xlane.f32.xlu0 %v5131_v44  ;;  %v5490_v53 = vperm.slane %v5064_v36, %v10604_v50 }
 0x83d   :  { %v5061_v19 = vpop.xlane.xlu0 %5060 }
 0x83e   :  { %v5489_v26 = vperm.slane %v5061_v19, %v10589_v48 }
 0x840   :  { %v5491_v20 = vsel %vm5340_vm14, %v5490_v53, %v5489_v26 }
 0x841   :  { %v5085_v31 = vpop.xlane.xlu2 %5084  ;;  %v5594_v30 = vsel %vm2106_vm8, %v5491_v20, %v5593_v10 }
 0x842   :  { %v5501_v18 = vperm.slane %v5085_v31, %v10589_v48 }
 0x843   :  { %v5073_v29 = vpop.xlane.xlu1 %5072 }
 0x844   :  { %v5495_v1 = vperm.slane %v5073_v29, %v10589_v48 }
 0x846   :  { %v5070_v60 = vpop.xlane.xlu0 %5069  ;;  %v5497_v3 = vsel %vm5340_vm14, %v5496_v55, %v5495_v1 }
 0x847   :  { %v5493_v57 = vperm.slane %v5070_v60, %v10604_v50 }
 0x849   :  { %v5494_v61 = vsel %vm5340_vm14, %v5493_v57, %v5492_v34 }
 0x84a   :  { %v5094_v17 = vpop.xlane.xlu2 %5093  ;;  %v5595_v2 = vsel %vm2109_vm9, %v5494_v61, %v5594_v30 }
 0x84b   :  { %v11953_v4 = vsel %vm2112_vm10, %v5497_v3, %v5595_v2  ;;  %v5505_v52 = vperm.slane %v5094_v17, %v10604_v50 }
 0x84c   :  { %v5082_v8 = vpop.xlane.xlu1 %5081 }
 0x84d   :  { %v5499_v0 = vperm.slane %v5082_v8, %v10604_v50 }
 0x84e   :  { %v5079_v33 = vpop.xlane.xlu0 %5078 }
 0x84f   :  { %v5498_v43 = vperm.slane %v5079_v33, %v10589_v48 }
 0x851   :  { %v11969_v35 = vsel %vm5340_vm14, %v5499_v0, %v5498_v43 }
 0x852   :  { %v5103_v9 = vpop.xlane.xlu2 %5102 }
 0x853   :  { %v5510_v3 = vperm.slane %v5103_v9, %v10589_v48 }
 0x854   :  { %v5091_v12 = vpop.xlane.xlu1 %5090 }
 0x855   :  { %v5504_v32 = vperm.slane %v5091_v12, %v10589_v48 }
 0x856   :  { %v5088_v45 = vpop.xlane.xlu0 %5087 }
 0x857   :  { %v5506_v13 = vsel %vm5340_vm14, %v5505_v52, %v5504_v32  ;;  %v5502_v11 = vperm.slane %v5088_v45, %v10604_v50  ;;  %v5653_v32 = vrot.slane %v11844_v47, 4 }
 0x859   :  { %v5503_v58 = vsel %vm5340_vm14, %v5502_v11, %v5501_v18 }
 0x85a   :  { %v11982_v38 = vpop.xlane.xlu2 %5138  ;;  %v5597_v42 = vsel %vm2094_vm4, %v5506_v13, %v5503_v58 }
 0x85c   :  { %v5100_v46 = vpop.xlane.xlu1 %5099 }
 0x85d   :  { %v5508_v22 = vperm.slane %v5100_v46, %v10604_v50 }
 0x85e   :  { %v5097_v56 = vpop.xlane.xlu0 %5096 }
 0x85f   :  { %v5507_v25 = vperm.slane %v5097_v56, %v10589_v48 }
 0x861   :  { %v5509_v14 = vsel %vm5340_vm14, %v5508_v22, %v5507_v25 }
 0x862   :  { %v5148_v15 = vpop.xlane.xlu2 %5147  ;;  %v5598_v44 = vsel %vm2097_vm5, %v5509_v14, %v5597_v42 }
 0x863   :  { %v5532_v22 = vperm.slane %v5148_v15, %v10604_v50 }
 0x864   :  { %v5109_v10 = vpop.xlane.xlu1 %5108 }
 0x865   :  { %v5513_v17 = vperm.slane %v5109_v10, %v10589_v48 }
 0x866   :  { %v5106_v36 = vpop.xlane.xlu0 %5105 }
 0x867   :  { %v5511_v23 = vperm.slane %v5106_v36, %v10604_v50 }
 0x869   :  { %v5512_v2 = vsel %vm5340_vm14, %v5511_v23, %v5510_v3 }
 0x86a   :  { %v5112_v53 = vpop.xlane.xlu2 %5111  ;;  %v5599_v33 = vsel %vm2100_vm6, %v5512_v2, %v5598_v44  ;;  %v5528_v44 = vperm.slane %v11982_v38, %v10589_v48 }
 0x86b   :  { %v5514_v21 = vperm.slane %v5112_v53, %v10604_v50 }
 0x86c   :  { %v5145_v19 = vpop.xlane.xlu1 %5144 }
 0x86d   :  { %v5515_v8 = vsel %vm5340_vm14, %v5514_v21, %v5513_v17  ;;  %v5531_v56 = vperm.slane %v5145_v19, %v10589_v48 }
 0x86e   :  { %v5142_v26 = vpop.xlane.xlu0 %5141  ;;  %v5600_v9 = vsel %vm2103_vm7, %v5515_v8, %v5599_v33 }
 0x86f   :  { %v5529_v10 = vperm.slane %v5142_v26, %v10604_v50  ;;  %v5533_v15 = vsel %vm5340_vm14, %v5532_v22, %v5531_v56 }
 0x872   :  { %v5115_v20 = vpop.xlane.xlu2 %5114 }
 0x873   :  { %v5516_v49 = vperm.slane %v5115_v20, %v10589_v48 }
 0x874   :  { %v5154_v31 = vpop.xlane.xlu1 %5153 }
 0x875   :  { %v5535_v14 = vperm.slane %v5154_v31, %v10604_v50 }
 0x876   :  { %v5151_v30 = vpop.xlane.xlu0 %5150 }
 0x877   :  { %v5534_v53 = vperm.slane %v5151_v30, %v10589_v48  ;;  %v5530_v30 = vsel %vm5340_vm14, %v5529_v10, %v5528_v44 }
 0x879   :  { %v5536_v26 = vsel %vm5340_vm14, %v5535_v14, %v5534_v53 }
 0x87a   :  { %v5166_v55 = vpop.xlane.xlu2 %5165 }
 0x87b   :  { %v5541_v20 = vperm.slane %v5166_v55, %v10604_v50 }
 0x87c   :  { %v5160_v5 = vpop.xlane.xlu1 %5159 }
 0x87d   :  { %v5538_v36 = vperm.slane %v5160_v5, %v10604_v50 }
 0x87e   :  { %v5157_v6 = vpop.xlane.xlu0 %5156 }
 0x87f   :  { %v5537_v19 = vperm.slane %v5157_v6, %v10589_v48 }
 0x881   :  { %v5539_v55 = vsel %vm5340_vm14, %v5538_v36, %v5537_v19 }
 0x882   :  { %v5169_v29 = vpop.xlane.xlu2 %5168 }
 0x883   :  { %v5543_v31 = vperm.slane %v5169_v29, %v10589_v48 }
 0x884   :  { %v5163_v1 = vpop.xlane.xlu1 %5162 }
 0x886   :  { %v5118_v7 = vpop.xlane.xlu0 %5117 }
 0x887   :  { %v5517_v57 = vperm.slane %v5118_v7, %v10604_v50 }
 0x889   :  { %v5518_v54 = vsel %vm5340_vm14, %v5517_v57, %v5516_v49 }
 0x88a   :  { %v5130_v60 = vpop.xlane.xlu2 %5129  ;;  %v5601_v52 = vsel %vm2106_vm8, %v5518_v54, %v5600_v9 }
 0x88b   :  { %v5523_v0 = vperm.slane %v5130_v60, %v10604_v50 }
 0x88c   :  { %v5124_v34 = vpop.xlane.xlu1 %5123 }
 0x88d   :  { %v5520_v63 = vperm.slane %v5124_v34, %v10604_v50 }
 0x88e   :  { %v5121_v61 = vpop.xlane.xlu0 %5120 }
 0x88f   :  { %v5519_v41 = vperm.slane %v5121_v61, %v10589_v48 }
 0x891   :  { %v5521_v43 = vsel %vm5340_vm14, %v5520_v63, %v5519_v41 }
 0x892   :  { %v5181_v12 = vpop.xlane.xlu2 %5180  ;;  %v5602_v18 = vsel %vm2109_vm9, %v5521_v43, %v5601_v52  ;;  %v5698_v43 = vperm.slane %v11949_v16, %v9255_v28 }
 0x893   :  { %v5549_v63 = vperm.slane %v5181_v12, %v10589_v48 }
 0x894   :  { %v5127_v51 = vpop.xlane.xlu1 %5126 }
 0x895   :  { %v5522_v37 = vperm.slane %v5127_v51, %v10589_v48  ;;  %v5665_v51 = vrot.slane %v11953_v4, 4 }
 0x896   :  { %v5172_v45 = vpop.xlane.xlu0 %5171 }
 0x897   :  { %v5524_v13 = vsel %vm5340_vm14, %v5523_v0, %v5522_v37  ;;  %v5544_v34 = vperm.slane %v5172_v45, %v10604_v50  ;;  %v5686_v45 = vperm.slane %v11956_v27, %v9255_v28 }
 0x898   :  { %v5603_v11 = vsel %vm2112_vm10, %v5524_v13, %v5602_v18 }
 0x899   :  { %v5651_v58 = vrot.slane %v5603_v11, 4  ;;  %v5654_v42 = vsel %vm3245_vm11, %v5603_v11, %v5653_v32  ;;  %v5545_v23 = vsel %vm5340_vm14, %v5544_v34, %v5543_v31  ;;  %v5694_v11 = vperm.slane %v11959_v59, %v9255_v28 }
 0x89a   :  { %v5190_v38 = vpop.xlane.xlu2 %5189  ;;  %v5662_v33 = vperm.slane %v5654_v42, %v8750_v24  ;;  %v5737_v42 = vrot.slane %v5698_v43, 4  ;;  %v5729_v53 = vrot.slane %v5686_v45, 4 }
 0x89b   :  { %v5652_v46 = vsel %vm3245_vm11, %v5651_v58, %v11844_v47  ;;  %v5540_v47 = vperm.slane %v5163_v1, %v10589_v48  ;;  %v5604_v1 = vsel %vm2094_vm4, %v5533_v15, %v5530_v30  ;;  %v5553_v6 = vperm.slane %v5190_v38, %v10604_v50 }
 0x89c   :  { %v5178_v25 = vpop.xlane.xlu1 %5177  ;;  %v5605_v29 = vsel %vm2097_vm5, %v5536_v26, %v5604_v1  ;;  %v5658_v52 = vperm.slane %v5652_v46, %v8750_v24  ;;  %v5713_v16 = vrot.slane %v5662_v33, 4  ;;  %vm5819_vm4 = vcmask 441344  }
 0x89d   :  { %v5547_v5 = vperm.slane %v5178_v25, %v10604_v50  ;;  %v5542_v60 = vsel %vm5340_vm14, %v5541_v20, %v5540_v47  ;;  %v5606_v49 = vsel %vm2100_vm6, %v5539_v55, %v5605_v29  ;;  %v5682_v25 = vperm.slane %v11965_v62, %v9255_v28 }
 0x89e   :  { %v5175_v7 = vpop.xlane.xlu0 %5174  ;;  %v5607_v17 = vsel %vm2103_vm7, %v5542_v60, %v5606_v49  ;;  %v5701_v59 = vrot.slane %v5658_v52, 4  ;;  %v5733_v20 = vrot.slane %v5694_v11, 4  ;;  %vm5821_vm5 = vcmask 515072  }
 0x89f   :  { %v5546_v3 = vperm.slane %v5175_v7, %v10589_v48  ;;  %v5608_v2 = vsel %vm2106_vm8, %v5545_v23, %v5607_v17  ;;  %v5725_v38 = vrot.slane %v5682_v25, 4  ;;  %v5768_v17 = vperm.slane %v11976_v39, %v9255_v28 }
 0x8a0   :  { %vm5823_vm6 = vcmask 588800   ;;  %vm5825_vm7 = vcmask 662528  }
 0x8a1   :  { %v5548_v57 = vsel %vm5340_vm14, %v5547_v5, %v5546_v3 }
 0x8a2   :  { %v5609_v54 = vsel %vm2109_vm9, %v5548_v57, %v5608_v2 }
 0x8a4   :  { %v5187_v21 = vpop.xlane.xlu1 %5186 }
 0x8a5   :  { %v5552_v61 = vperm.slane %v5187_v21, %v10589_v48 }
 0x8a6   :  { %v5184_v8 = vpop.xlane.xlu0 %5183 }
 0x8a7   :  { %v5554_v41 = vsel %vm5340_vm14, %v5553_v6, %v5552_v61  ;;  %v5550_v0 = vperm.slane %v5184_v8, %v10604_v50 }
 0x8a8   :  { %v5757_v37 = vrot.slane %v5554_v41, 4 }
 0x8a9   :  { %v5551_v9 = vsel %vm5340_vm14, %v5550_v0, %v5549_v63 }
 0x8aa   :  { %v5610_v12 = vsel %vm2112_vm10, %v5551_v9, %v5609_v54  ;;  %v5758_v46 = vsel %vm3245_vm11, %v5757_v37, %v11969_v35 }
 0x8ab   :  { %v5663_v32 = vrot.slane %v5610_v12, 4  ;;  %v5666_v18 = vsel %vm3245_vm11, %v5610_v12, %v5665_v51  ;;  %v5762_v35 = vperm.slane %v5758_v46, %v8750_v24 }
 0x8ac   :  { %v5136_v13 = vpop.xlane.xlu1 %5135  ;;  %v5674_v58 = vperm.slane %v5666_v18, %v8750_v24 }
 0x8ad   :  { %v5664_v22 = vsel %vm3245_vm11, %v5663_v32, %v11953_v4  ;;  %v5526_v56 = vperm.slane %v5136_v13, %v10604_v50  ;;  %v5769_v29 = vrot.slane %v5762_v35, 4 }
 0x8ae   :  { %v5711_v27 = vrot.slane %v5674_v58, 4  ;;  %v5133_v14 = vpop.xlane.xlu0 %5132  ;;  %v5670_v44 = vperm.slane %v5664_v22, %v8750_v24  ;;  %v5714_v10 = vsel %vm3245_vm11, %v5674_v58, %v5713_v16 }
 0x8af   :  { %v5525_v36 = vperm.slane %v5133_v14, %v10589_v48  ;;  %v5722_v4 = vperm.slane %v5714_v10, %v9255_v28 }
 0x8b0   :  { %v5702_v50 = vsel %vm3245_vm11, %v5670_v44, %v5701_v59  ;;  %v5699_v47 = vrot.slane %v5670_v44, 4  ;;  %v5712_v62 = vsel %vm3245_vm11, %v5711_v27, %v5662_v33 }
 0x8b1   :  { %v5710_v7 = vperm.slane %v5702_v50, %v9255_v28  ;;  %v5527_v15 = vsel %vm5340_vm14, %v5526_v56, %v5525_v36  ;;  %v5735_v19 = vrot.slane %v5722_v4, 4  ;;  %v5718_v31 = vperm.slane %v5712_v62, %v9255_v28 }
 0x8b2   :  { %v5751_v34 = vrot.slane %v5527_v15, 4  ;;  %v5700_v48 = vsel %vm3245_vm11, %v5699_v47, %v5658_v52  ;;  %v5738_v26 = vsel %vm3245_vm11, %v5722_v4, %v5737_v42 }
 0x8b3   :  { %v5730_v5 = vsel %vm3245_vm11, %v5710_v7, %v5729_v53  ;;  %v5727_v30 = vrot.slane %v5710_v7, 4  ;;  %v5706_v55 = vperm.slane %v5700_v48, %v9255_v28  ;;  %v5736_v1 = vsel %vm3245_vm11, %v5735_v19, %v5698_v43 }
 0x8b4   :  { %5786 = vrot.lane.b32.xlu1 %v5730_v5, %s5933_s21  ;;  %v5752_v60 = vsel %vm3245_vm11, %v5751_v34, %v11866_v40  ;;  %v5731_v3 = vrot.slane %v5718_v31, 4  ;;  %v5734_v6 = vsel %vm3245_vm11, %v5718_v31, %v5733_v20 }
 0x8b5   :  { %v5756_v23 = vperm.slane %v5752_v60, %v8750_v24  ;;  %v5728_v21 = vsel %vm3245_vm11, %v5727_v30, %v5686_v45  ;;  %v5726_v49 = vsel %vm3245_vm11, %v5706_v55, %v5725_v38  ;;  %v5723_v8 = vrot.slane %v5706_v55, 4 }
 0x8b6   :  { %5782 = vrot.lane.b32.xlu0 %v5728_v21, %s5934_s22  ;;  %5778 = vrot.lane.b32.xlu2 %v5726_v49, %s5935_s23  ;;  %v5732_v57 = vsel %vm3245_vm11, %v5731_v3, %v5694_v11 }
 0x8b7   :  { %v5770_v61 = vsel %vm3245_vm11, %v5769_v29, %v5756_v23 }
 0x8b8   :  { %v5774_v40 = vperm.slane %v5770_v61, %v9255_v28  ;;  %v5724_v28 = vsel %vm3245_vm11, %v5723_v8, %v5682_v25 }
 0x8ba   :  { %v5775_v63 = vrot.slane %v5774_v40, 4 }
 0x8bc   :  { %5798 = vrot.lane.b32.xlu1 %v5736_v1, %s5936_s24  ;;  %v5776_v24 = vsel %vm3245_vm11, %v5775_v63, %v5768_v17 }
 0x8be   :  { %5790 = vrot.lane.b32.xlu0 %v5732_v57, %s5937_s25  ;;  %5794 = vrot.lane.b32.xlu2 %v5734_v6, %s5938_s26 }
 0x8c6   :  { %5802 = vrot.lane.b32.xlu0 %v5738_v26, %s5939_s27  ;;  %5806 = vrot.lane.b32.xlu2 %v5776_v24, %s5940_s28 }
 0x910   :  { %v5779_v2 = vpop.permute.xlu2 %5778 }
 0x911   :  { %v5810_v39 = vsel %vm5809_vm15, %v5724_v28, %v5779_v2 }
 0x918   :  { %v5795_v33 = vpop.permute.xlu2 %5794 }
 0x920   :  { %v5807_v18 = vpop.permute.xlu2 %5806 }
 0x926   :  { %v5787_v54 = vpop.permute.xlu1 %5786 }
 0x928   :  { %v5783_v41 = vpop.permute.xlu0 %5782 }
 0x929   :  { %v5812_v0 = vsel %vm5811_vm0, %v5810_v39, %v5783_v41 }
 0x92a   :  { %v5814_v51 = vsel %vm5813_vm1, %v5812_v0, %v5787_v54 }
 0x92e   :  { %v5799_v52 = vpop.permute.xlu1 %5798 }
 0x930   :  { %v5791_v43 = vpop.permute.xlu0 %5790 }
 0x931   :  { %v5816_v9 = vsel %vm5815_vm2, %v5814_v51, %v5791_v43 }
 0x932   :  { %v5818_v37 = vsel %vm5817_vm3, %v5816_v9, %v5795_v33 }
 0x933   :  { %v5820_v12 = vsel %vm5819_vm4, %v5818_v37, %v5799_v52 }
 0x938   :  { %v5803_v32 = vpop.permute.xlu0 %5802 }
 0x939   :  { %v5822_v45 = vsel %vm5821_vm5, %v5820_v12, %v5803_v32 }
 0x93a   :  { %v5824_v13 = vsel %vm5823_vm6, %v5822_v45, %v5807_v18 }
 0x93b   :  { %5826 = vst.msk [vmem:[#allocation5] sm:$0xff] %vm5825_vm7, %v5824_v13 }
 0x93c   :  { %5837 = dma.vmem_to_hbm [thread:$0]  %s5833_s30, 128, %s5835_s4, [#allocation4]  }
 0x93d   :  { %5917 = dma.done.wait [#allocation4], 128  }
 0x93e   :  { %5918 = vsyncadd [#allocation4], 4294967168 }
 0x93f   :  { %5842 = vsyncpa [#allocation3], 1 }
 0x940   :  { %5843 = vsyncpa [#allocation4], 1 }

</bundles_post_ra>
